<compile_context>
chip_gen: v7x
topology: tpu7x:2x2x1
jax: 0.10.0
libtpu: 0.0.40
codegen_flags: <defaults>
</compile_context>

<pallas_src>
import math
import numpy as np
import jax
import jax.numpy as jnp
from jax.experimental import pallas as pl
from jax.experimental.pallas import tpu as pltpu


def _round_up(x, m):
    return ((x + m - 1) // m) * m


# ----------------------------------------------------------------------------
# Generic fused "matmul chain (+BN, +ReLU) -> max over points" kernel
# ----------------------------------------------------------------------------
def _make_chain_max_kernel(n_valid, nt, dout, stage_cfg):
    """stage_cfg: tuple of (per_batch: bool, relu: bool) per (W, scale, shift) stage."""
    nstages = len(stage_cfg)
    needs_mask = (n_valid % nt) != 0   # all padded rows live in the last N-tile

    def kernel(*refs):
        x_ref = refs[0]
        o_ref = refs[1 + 3 * nstages]
        acc_ref = refs[2 + 3 * nstages]
        nk = pl.program_id(1)
        last = pl.num_programs(1) - 1

        @pl.when(nk == 0)
        def _():
            acc_ref[...] = jnp.full(acc_ref.shape, -jnp.inf, acc_ref.dtype)

        h = x_ref[0]                                    # (nt, Cin) bf16
        for si, (per_batch, relu) in enumerate(stage_cfg):
            w = refs[1 + 3 * si]
            s = refs[2 + 3 * si]
            b = refs[3 + 3 * si]
            wmat = w[0] if per_batch else w[...]
            h = jnp.dot(h.astype(jnp.bfloat16), wmat,
                        preferred_element_type=jnp.float32)
            h = h * s[...] + b[...]
            if relu:
                h = jnp.maximum(h, 0.0)
        # h: (nt, dout) f32

        def accumulate(hval):
            # leading-dim split -> elementwise maxima (VPU); no per-step sublane reduce
            hm = jnp.max(hval.reshape(nt // 8, 8, dout), axis=0)
            acc_ref[...] = jnp.maximum(acc_ref[...], hm)

        if needs_mask:
            @pl.when(nk == last)
            def _():
                row = nk * nt + jax.lax.broadcasted_iota(jnp.int32, (nt, 1), 0)
                accumulate(jnp.where(row < n_valid, h, -jnp.inf))

            @pl.when(nk != last)
            def _():
                accumulate(h)
        else:
            accumulate(h)

        @pl.when(nk == last)
        def _():
            o_ref[0] = jnp.max(acc_ref[...], axis=0, keepdims=True)

    return kernel


def chain_max(x_bnc, stages, n_valid, nt):
    """x_bnc: (B, Np, Cin) bf16 -> (B, dout) f32 = max over points of the fused chain."""
    B, Np, Cin = x_bnc.shape
    dout = stages[-1]["W"].shape[-1]
    stage_cfg = tuple((st["per_batch"], st["relu"]) for st in stages)
    kernel = _make_chain_max_kernel(n_valid, nt, dout, stage_cfg)

    in_specs = [pl.BlockSpec((1, nt, Cin), lambda b, n: (b, n, 0))]
    operands = [x_bnc]
    for st in stages:
        W = st["W"]
        if st["per_batch"]:
            _, K, M = W.shape
            in_specs.append(pl.BlockSpec((1, K, M), lambda b, n: (b, 0, 0)))
        else:
            K, M = W.shape
            in_specs.append(pl.BlockSpec((K, M), lambda b, n: (0, 0)))
        in_specs.append(pl.BlockSpec((1, M), lambda b, n: (0, 0)))
        in_specs.append(pl.BlockSpec((1, M), lambda b, n: (0, 0)))
        operands += [W, st["scale"], st["shift"]]

    out = pl.pallas_call(
        kernel,
        out_shape=jax.ShapeDtypeStruct((B, 1, dout), jnp.float32),
        grid=(B, Np // nt),
        in_specs=in_specs,
        out_specs=pl.BlockSpec((1, 1, dout), lambda b, n: (b, 0, 0)),
        scratch_shapes=[pltpu.VMEM((8, dout), jnp.float32)],
        compiler_params=pltpu.CompilerParams(
            dimension_semantics=("parallel", "arbitrary")),
    )(*operands)
    return out.reshape(B, dout)


def _stage(p, per_batch=False, relu=True, W=None):
    return {"W": p["W"] if W is None else W,
            "scale": p["scale"], "shift": p["shift"],
            "per_batch": per_batch, "relu": relu}


# ----------------------------------------------------------------------------
# Fused 3-layer fc chain (whole padded batch in one grid step)
# ----------------------------------------------------------------------------
def _fc_chain_kernel(x_ref, w1, s1, b1, w2, s2, b2, w3, s3, b3, o_ref):
    """fc1 (BN,ReLU) -> fc2 (BN,ReLU) -> fc3 (affine, no ReLU). x is bf16."""
    h = jnp.dot(x_ref[...], w1[...], preferred_element_type=jnp.float32)
    h = jnp.maximum(h * s1[...] + b1[...], 0.0)
    h = jnp.dot(h.astype(jnp.bfloat16), w2[...], preferred_element_type=jnp.float32)
    h = jnp.maximum(h * s2[...] + b2[...], 0.0)
    h = jnp.dot(h.astype(jnp.bfloat16), w3[...], preferred_element_type=jnp.float32)
    o_ref[...] = h * s3[...] + b3[...]


def fc_chain(g, p1, p2, p3, out_dim):
    """(B, K) global feature -> fused 3-layer fc chain -> (B, out_dim) f32."""
    B, K = g.shape
    TB = min(256, _round_up(B, 8))       # whole batch per grid step for typical B
    Bp = _round_up(B, TB)
    g = g.astype(jnp.bfloat16)
    if Bp != B:
        g = jnp.pad(g, ((0, Bp - B), (0, 0)))
    d1 = p1["W"].shape[1]
    d2 = p2["W"].shape[1]
    d3 = p3["W"].shape[1]                 # lane-padded to a multiple of 128
    out = pl.pallas_call(
        _fc_chain_kernel,
        out_shape=jax.ShapeDtypeStruct((Bp, d3), jnp.float32),
        grid=(Bp // TB,),
        in_specs=[
            pl.BlockSpec((TB, K), lambda i: (i, 0)),
            pl.BlockSpec((K, d1), lambda i: (0, 0)),
            pl.BlockSpec((1, d1), lambda i: (0, 0)),
            pl.BlockSpec((1, d1), lambda i: (0, 0)),
            pl.BlockSpec((d1, d2), lambda i: (0, 0)),
            pl.BlockSpec((1, d2), lambda i: (0, 0)),
            pl.BlockSpec((1, d2), lambda i: (0, 0)),
            pl.BlockSpec((d2, d3), lambda i: (0, 0)),
            pl.BlockSpec((1, d3), lambda i: (0, 0)),
            pl.BlockSpec((1, d3), lambda i: (0, 0)),
        ],
        out_specs=pl.BlockSpec((TB, d3), lambda i: (i, 0)),
        compiler_params=pltpu.CompilerParams(dimension_semantics=("parallel",)),
    )(g, p1["W"], p1["scale"], p1["shift"],
      p2["W"], p2["scale"], p2["shift"],
      p3["W"], p3["scale"], p3["shift"])
    return out[:B, :out_dim]


# ----------------------------------------------------------------------------
# Butterfly parameterization (dense-equivalent materialization, init-time glue)
# ----------------------------------------------------------------------------
def _butterfly_factor(t, n, stride):
    j = np.arange(n // 2)
    c = j // stride
    p = j % stride
    r0 = c * 2 * stride + p
    r1 = r0 + stride
    F = jnp.zeros((n, n), jnp.float32)
    F = F.at[r0, r0].set(t[:, 0, 0])
    F = F.at[r0, r1].set(t[:, 0, 1])
    F = F.at[r1, r0].set(t[:, 1, 0])
    F = F.at[r1, r1].set(t[:, 1, 1])
    return F


def butterfly_dense(key, in_size, out_size):
    """Dense equivalent of Butterfly(in_size, out_size, tied_weight=False)."""
    m = int(math.log2(in_size))
    assert (1 << m) == in_size, "butterfly input sizes here are powers of two"
    n = in_size
    nstack = -(-out_size // n)
    twiddle = jax.random.normal(key, (nstack, m, n // 2, 2, 2), jnp.float32) / np.sqrt(2.0)
    blocks = []
    for s in range(nstack):
        Bmat = jnp.eye(n, dtype=jnp.float32)
        for i in range(m):  # increasing stride: 1, 2, 4, ...
            F = _butterfly_factor(twiddle[s, i], n, 1 << i)
            Bmat = F @ Bmat
        blocks.append(Bmat)
    return jnp.concatenate(blocks, axis=0)[:out_size]  # (out, in)


# ----------------------------------------------------------------------------
# Parameter construction (deterministic; BN folded, weights bf16)
# ----------------------------------------------------------------------------
def make_layer(key, cin, cout, kind, bn, pad_out=False, pad_in=None, iden_k=None):
    k1, k2 = jax.random.split(key)
    if kind == "dense":
        W = jax.random.normal(k1, (cin, cout), jnp.float32) / np.sqrt(cin)
    else:  # butterfly
        W = butterfly_dense(k1, cin, cout).T  # (cin, cout)
    kb, kbn = jax.random.split(k2)
    b = 0.05 * jax.random.normal(kb, (cout,), jnp.float32)
    if bn:
        kg, kbe, km, kv = jax.random.split(kbn, 4)
        gamma = 1.0 + 0.1 * jax.random.normal(kg, (cout,), jnp.float32)
        beta = 0.1 * jax.random.normal(kbe, (cout,), jnp.float32)
        mean = 0.1 * jax.random.normal(km, (cout,), jnp.float32)
        var = 1.0 + 0.1 * jax.random.uniform(kv, (cout,), jnp.float32)
        scale = gamma / jnp.sqrt(var + 1e-5)
        shift = (b - mean) * scale + beta
    else:
        scale = jnp.ones((cout,), jnp.float32)
        shift = b
    if iden_k is not None:  # fold the "+ identity" of the STN heads into the shift
        shift = shift + jnp.eye(iden_k, dtype=jnp.float32).reshape(-1)
    co = _round_up(cout, 128) if pad_out else cout
    if co != cout:  # lane-pad narrow outputs so stores stay unmasked; wrapper slices
        W = jnp.pad(W, ((0, 0), (0, co - cout)))
        scale = jnp.pad(scale, (0, co - cout))
        shift = jnp.pad(shift, (0, co - cout))
    if pad_in is not None and pad_in != cin:  # zero-pad input rows (padded x lanes are zero)
        W = jnp.pad(W, ((0, pad_in - cin), (0, 0)))
    return {"W": W.astype(jnp.bfloat16),
            "scale": scale.reshape(1, co),
            "shift": shift.reshape(1, co)}


def make_stn3d(key, channel=3):
    ks = jax.random.split(key, 6)
    cpad = _round_up(channel, 8)
    return {
        "conv1": make_layer(ks[0], channel, 64, "dense", True, pad_in=cpad),
        "conv2": make_layer(ks[1], 64, 128, "butterfly", True),
        "conv3": make_layer(ks[2], 128, 1024, "butterfly", True),
        "fc1": make_layer(ks[3], 1024, 512, "butterfly", True),
        "fc2": make_layer(ks[4], 512, 256, "butterfly", True),
        "fc3": make_layer(ks[5], 256, channel * channel, "dense", False,
                          pad_out=True, iden_k=channel),
    }


def make_stnkd(key, channel=64):
    ks = jax.random.split(key, 6)
    return {
        "conv1": make_layer(ks[0], channel, 64, "butterfly", True),
        "conv2": make_layer(ks[1], 64, 128, "butterfly", True),
        "conv3": make_layer(ks[2], 128, 1024, "butterfly", True),
        "fc1": make_layer(ks[3], 1024, 512, "butterfly", True),
        "fc2": make_layer(ks[4], 512, 256, "butterfly", True),
        "fc3": make_layer(ks[5], 256, channel * channel, "butterfly", False,
                          pad_out=True, iden_k=channel),
    }


def make_params(key, classes=40, channel=3):
    k = jax.random.split(key, 8)
    return {
        "stn": make_stn3d(k[0], channel),
        "block0": make_layer(k[1], channel, 64, "dense", True),
        "fstn": make_stnkd(k[2], 64),
        "block1_1": make_layer(k[3], 64, 128, "butterfly", True),
        "block1_2": make_layer(k[4], 128, 1024, "butterfly", True),
        "block2_1": make_layer(k[5], 1024, 512, "butterfly", True),
        "block2_2": make_layer(k[6], 512, 256, "butterfly", True),
        "classifier": make_layer(k[7], 256, classes, "butterfly", False, pad_out=True),
    }


# ----------------------------------------------------------------------------
# Forward pass
# ----------------------------------------------------------------------------
def pointnet_forward(params, x_bdn, classes=40):
    """x_bdn: (B, D=3, N) like the PyTorch module.  Returns (logits, trans_feat)."""
    B, D, N = x_bdn.shape
    nt = min(512, _round_up(N, 8))        # large point-row tile (step-overhead amortized)
    Np = _round_up(N, nt)
    Cp = _round_up(D, 8)                  # channel-pad the raw xyz once

    x = jnp.transpose(x_bdn, (0, 2, 1))   # (B, N, D) channels-last
    x = jnp.pad(x, ((0, 0), (0, Np - N), (0, Cp - D)))
    x_bf = x.astype(jnp.bfloat16)         # (B, Np, Cp)

    stn = params["stn"]
    fstn = params["fstn"]
    b0 = params["block0"]

    # --- STN3d: fused conv chain + max, then whole-batch fc chain (identity folded in) ---
    g_stn = chain_max(
        x_bf,
        [_stage(stn["conv1"]), _stage(stn["conv2"]), _stage(stn["conv3"])],
        N, nt)
    trans = fc_chain(g_stn, stn["fc1"], stn["fc2"], stn["fc3"], D * D).reshape(B, D, D)

    # --- fold the input transform into block0's per-batch weight: x@trans@W0 == x@(trans@W0) ---
    w0 = b0["W"].astype(jnp.float32)                                  # (D, 64)
    wc = jnp.einsum("bij,jk->bik", trans, w0)                          # (B, D, 64)
    wc = jnp.pad(wc, ((0, 0), (0, Cp - D), (0, 0))).astype(jnp.bfloat16)  # (B, Cp, 64)

    # --- block0 + feature STN conv chain + max, fully fused (h64 never hits HBM) ---
    g_f = chain_max(
        x_bf,
        [_stage(b0, per_batch=True, W=wc),
         _stage(fstn["conv1"]), _stage(fstn["conv2"]), _stage(fstn["conv3"])],
        N, nt)
    trans_feat = fc_chain(g_f, fstn["fc1"], fstn["fc2"], fstn["fc3"], 64 * 64)
    trans_feat = trans_feat.reshape(B, 64, 64)

    # --- fold the feature transform into block1_1: h@trans_feat@W1 == h@(trans_feat@W1) ---
    w1 = params["block1_1"]["W"].astype(jnp.float32)                   # (64, 128)
    tw1 = jnp.einsum("bij,jk->bik", trans_feat, w1).astype(jnp.bfloat16)  # (B, 64, 128)

    # --- block0 -> block1_1 -> block1_2 -> max, fully fused ---
    g = chain_max(
        x_bf,
        [_stage(b0, per_batch=True, W=wc),
         _stage(params["block1_1"], per_batch=True, W=tw1),
         _stage(params["block1_2"], relu=False)],
        N, nt)                                                         # (B, 1024)

    # --- block2 (Dropout = identity) + classifier, fused whole-batch fc chain ---
    logits = fc_chain(g, params["block2_1"], params["block2_2"],
                      params["classifier"], classes)
    return logits, trans_feat


# ----------------------------------------------------------------------------
if __name__ == "__main__":
    key = jax.random.PRNGKey(0)
    kp, kx = jax.random.split(key)

    params = make_params(kp, classes=40, channel=3)
    # small example input, PyTorch convention (B, D, N): batch=2, 3 coords, 16 points
    x = jax.random.normal(kx, (2, 3, 16), jnp.float32)

    fwd = jax.jit(pointnet_forward)
    logits, trans_feat = fwd(params, x)
    jax.block_until_ready((logits, trans_feat))

    assert logits.shape == (2, 40), logits.shape
    assert trans_feat.shape == (2, 64, 64), trans_feat.shape
    assert bool(jnp.all(jnp.isfinite(logits))) and bool(jnp.all(jnp.isfinite(trans_feat)))
    print("KERNEL_OK")
</pallas_src>

<mosaic_0001>
module attributes {stable_mosaic.version = 11 : i64} {
  func.func @kernel(%arg0: i32, %arg1: i32, %arg2: memref<1x16x8xbf16, #tpu.memory_space<vmem>>, %arg3: memref<8x64xbf16, #tpu.memory_space<vmem>>, %arg4: memref<1x64xf32, #tpu.memory_space<vmem>>, %arg5: memref<1x64xf32, #tpu.memory_space<vmem>>, %arg6: memref<64x128xbf16, #tpu.memory_space<vmem>>, %arg7: memref<1x128xf32, #tpu.memory_space<vmem>>, %arg8: memref<1x128xf32, #tpu.memory_space<vmem>>, %arg9: memref<128x1024xbf16, #tpu.memory_space<vmem>>, %arg10: memref<1x1024xf32, #tpu.memory_space<vmem>>, %arg11: memref<1x1024xf32, #tpu.memory_space<vmem>>, %arg12: memref<1x1x1024xf32, #tpu.memory_space<vmem>>, %arg13: memref<8x1024xf32, #tpu.memory_space<vmem>>) attributes {dimension_semantics = [#tpu.dimension_semantics<parallel>, #tpu.dimension_semantics<arbitrary>], iteration_bounds = array<i64: 2, 1>, scalar_prefetch = 0 : i64, scratch_operands = 1 : i64, tpu.core_type = #tpu.core_type<tc>, window_params = [{transform_indices = @transform_0, window_bounds = array<i64: 1, 16, 8>}, {pipeline_mode = #tpu.pipeline_mode<synchronous>, transform_indices = @transform_1, window_bounds = array<i64: 8, 64>}, {pipeline_mode = #tpu.pipeline_mode<synchronous>, transform_indices = @transform_2, window_bounds = array<i64: 1, 64>}, {pipeline_mode = #tpu.pipeline_mode<synchronous>, transform_indices = @transform_3, window_bounds = array<i64: 1, 64>}, {pipeline_mode = #tpu.pipeline_mode<synchronous>, transform_indices = @transform_4, window_bounds = array<i64: 64, 128>}, {pipeline_mode = #tpu.pipeline_mode<synchronous>, transform_indices = @transform_5, window_bounds = array<i64: 1, 128>}, {pipeline_mode = #tpu.pipeline_mode<synchronous>, transform_indices = @transform_6, window_bounds = array<i64: 1, 128>}, {pipeline_mode = #tpu.pipeline_mode<synchronous>, transform_indices = @transform_7, window_bounds = array<i64: 128, 1024>}, {pipeline_mode = #tpu.pipeline_mode<synchronous>, transform_indices = @transform_8, window_bounds = array<i64: 1, 1024>}, {pipeline_mode = #tpu.pipeline_mode<synchronous>, transform_indices = @transform_9, window_bounds = array<i64: 1, 1024>}, {transform_indices = @transform_10, window_bounds = array<i64: 1, 1, 1024>}]} {
    %c0_i32 = arith.constant 0 : i32
    %0 = arith.cmpi eq, %arg1, %c0_i32 : i32
    %1 = arith.extui %0 : i1 to i32
    %c0_i32_0 = arith.constant 0 : i32
    %2 = arith.cmpi ne, %1, %c0_i32_0 : i32
    scf.if %2 {
      %cst_33 = arith.constant 0xFF800000 : f32
      %45 = vector.broadcast %cst_33 : f32 to vector<8x1024xf32>
      %c0_34 = arith.constant 0 : index
      %c0_35 = arith.constant 0 : index
      %46 = vector.load %arg13[%c0_34, %c0_35] : memref<8x1024xf32, #tpu.memory_space<vmem>>, vector<8x1024xf32>
      tpu.vector_store %arg13[%c0_34, %c0_35], %45 {strides = array<i32>} : memref<8x1024xf32, #tpu.memory_space<vmem>>, vector<8x1024xf32>,
    } else {
    }
    %c0 = arith.constant 0 : index
    %c0_1 = arith.constant 0 : index
    %c0_2 = arith.constant 0 : index
    %3 = vector.load %arg2[%c0, %c0_1, %c0_2] : memref<1x16x8xbf16, #tpu.memory_space<vmem>>, vector<1x16x8xbf16>
    %4 = vector.shape_cast %3 : vector<1x16x8xbf16> to vector<16x8xbf16>
    %c0_3 = arith.constant 0 : index
    %c0_4 = arith.constant 0 : index
    %5 = vector.load %arg3[%c0_3, %c0_4] : memref<8x64xbf16, #tpu.memory_space<vmem>>, vector<8x64xbf16>
    %cst = arith.constant dense<0.000000e+00> : vector<16x64xf32>
    %6 = tpu.matmul %4, %5, %cst {dimension_numbers = #tpu.dot_dimension_numbers<[1], [0], [0], [1], [0, 0, 1, 1], [], []>} : vector<16x8xbf16>, vector<8x64xbf16>, vector<16x64xf32> -> vector<16x64xf32>
    %c0_5 = arith.constant 0 : index
    %c0_6 = arith.constant 0 : index
    %7 = vector.load %arg4[%c0_5, %c0_6] : memref<1x64xf32, #tpu.memory_space<vmem>>, vector<1x64xf32>
    %8 = vector.broadcast %7 : vector<1x64xf32> to vector<16x64xf32>
    %9 = arith.mulf %6, %8 : vector<16x64xf32>
    %c0_7 = arith.constant 0 : index
    %c0_8 = arith.constant 0 : index
    %10 = vector.load %arg5[%c0_7, %c0_8] : memref<1x64xf32, #tpu.memory_space<vmem>>, vector<1x64xf32>
    %11 = vector.broadcast %10 : vector<1x64xf32> to vector<16x64xf32>
    %12 = arith.addf %9, %11 : vector<16x64xf32>
    %cst_9 = arith.constant 0.000000e+00 : f32
    %13 = vector.broadcast %cst_9 : f32 to vector<16x64xf32>
    %14 = arith.maximumf %12, %13 : vector<16x64xf32>
    %c0_10 = arith.constant 0 : index
    %c0_11 = arith.constant 0 : index
    %15 = vector.load %arg6[%c0_10, %c0_11] : memref<64x128xbf16, #tpu.memory_space<vmem>>, vector<64x128xbf16>
    %16 = arith.truncf %14 : vector<16x64xf32> to vector<16x64xbf16>
    %cst_12 = arith.constant dense<0.000000e+00> : vector<16x128xf32>
    %17 = tpu.matmul %16, %15, %cst_12 {dimension_numbers = #tpu.dot_dimension_numbers<[1], [0], [0], [1], [0, 0, 1, 1], [], []>} : vector<16x64xbf16>, vector<64x128xbf16>, vector<16x128xf32> -> vector<16x128xf32>
    %c0_13 = arith.constant 0 : index
    %c0_14 = arith.constant 0 : index
    %18 = vector.load %arg7[%c0_13, %c0_14] : memref<1x128xf32, #tpu.memory_space<vmem>>, vector<1x128xf32>
    %19 = vector.broadcast %18 : vector<1x128xf32> to vector<16x128xf32>
    %20 = arith.mulf %17, %19 : vector<16x128xf32>
    %c0_15 = arith.constant 0 : index
    %c0_16 = arith.constant 0 : index
    %21 = vector.load %arg8[%c0_15, %c0_16] : memref<1x128xf32, #tpu.memory_space<vmem>>, vector<1x128xf32>
    %22 = vector.broadcast %21 : vector<1x128xf32> to vector<16x128xf32>
    %23 = arith.addf %20, %22 : vector<16x128xf32>
    %cst_17 = arith.constant 0.000000e+00 : f32
    %24 = vector.broadcast %cst_17 : f32 to vector<16x128xf32>
    %25 = arith.maximumf %23, %24 : vector<16x128xf32>
    %c0_18 = arith.constant 0 : index
    %c0_19 = arith.constant 0 : index
    %26 = vector.load %arg9[%c0_18, %c0_19] : memref<128x1024xbf16, #tpu.memory_space<vmem>>, vector<128x1024xbf16>
    %27 = arith.truncf %25 : vector<16x128xf32> to vector<16x128xbf16>
    %cst_20 = arith.constant dense<0.000000e+00> : vector<16x1024xf32>
    %28 = tpu.matmul %27, %26, %cst_20 {dimension_numbers = #tpu.dot_dimension_numbers<[1], [0], [0], [1], [0, 0, 1, 1], [], []>} : vector<16x128xbf16>, vector<128x1024xbf16>, vector<16x1024xf32> -> vector<16x1024xf32>
    %c0_21 = arith.constant 0 : index
    %c0_22 = arith.constant 0 : index
    %29 = vector.load %arg10[%c0_21, %c0_22] : memref<1x1024xf32, #tpu.memory_space<vmem>>, vector<1x1024xf32>
    %30 = vector.broadcast %29 : vector<1x1024xf32> to vector<16x1024xf32>
    %31 = arith.mulf %28, %30 : vector<16x1024xf32>
    %c0_23 = arith.constant 0 : index
    %c0_24 = arith.constant 0 : index
    %32 = vector.load %arg11[%c0_23, %c0_24] : memref<1x1024xf32, #tpu.memory_space<vmem>>, vector<1x1024xf32>
    %33 = vector.broadcast %32 : vector<1x1024xf32> to vector<16x1024xf32>
    %34 = arith.addf %31, %33 : vector<16x1024xf32>
    %cst_25 = arith.constant 0.000000e+00 : f32
    %35 = vector.broadcast %cst_25 : f32 to vector<16x1024xf32>
    %36 = arith.maximumf %34, %35 : vector<16x1024xf32>
    %37 = vector.shape_cast %36 : vector<16x1024xf32> to vector<2x8x1024xf32>
    %cst_26 = arith.constant dense<0xFF800000> : vector<8x1024xf32>
    %38 = vector.multi_reduction <maximumf>, %37, %cst_26 [0] : vector<2x8x1024xf32> to vector<8x1024xf32>
    %c0_27 = arith.constant 0 : index
    %c0_28 = arith.constant 0 : index
    %39 = vector.load %arg13[%c0_27, %c0_28] : memref<8x1024xf32, #tpu.memory_space<vmem>>, vector<8x1024xf32>
    %40 = arith.maximumf %39, %38 : vector<8x1024xf32>
    %c0_29 = arith.constant 0 : index
    %c0_30 = arith.constant 0 : index
    %41 = vector.load %arg13[%c0_29, %c0_30] : memref<8x1024xf32, #tpu.memory_space<vmem>>, vector<8x1024xf32>
    tpu.vector_store %arg13[%c0_29, %c0_30], %40 {strides = array<i32>} : memref<8x1024xf32, #tpu.memory_space<vmem>>, vector<8x1024xf32>,
    %c0_i32_31 = arith.constant 0 : i32
    %42 = arith.cmpi eq, %arg1, %c0_i32_31 : i32
    %43 = arith.extui %42 : i1 to i32
    %c0_i32_32 = arith.constant 0 : i32
    %44 = arith.cmpi ne, %43, %c0_i32_32 : i32
    scf.if %44 {
      %c0_33 = arith.constant 0 : index
      %c0_34 = arith.constant 0 : index
      %45 = vector.load %arg13[%c0_33, %c0_34] : memref<8x1024xf32, #tpu.memory_space<vmem>>, vector<8x1024xf32>
      %cst_35 = arith.constant dense<0xFF800000> : vector<1024xf32>
      %46 = vector.multi_reduction <maximumf>, %45, %cst_35 [0] : vector<8x1024xf32> to vector<1024xf32>
      %47 = vector.shape_cast %46 : vector<1024xf32> to vector<1x1024xf32>
      %c0_36 = arith.constant 0 : index
      %c0_37 = arith.constant 0 : index
      %c0_38 = arith.constant 0 : index
      %48 = vector.load %arg12[%c0_36, %c0_37, %c0_38] : memref<1x1x1024xf32, #tpu.memory_space<vmem>>, vector<1x1x1024xf32>
      %49 = vector.shape_cast %48 : vector<1x1x1024xf32> to vector<1x1024xf32>
      %50 = vector.shape_cast %47 : vector<1x1024xf32> to vector<1x1x1024xf32>
      tpu.vector_store %arg12[%c0_36, %c0_37, %c0_38], %50 {strides = array<i32>} : memref<1x1x1024xf32, #tpu.memory_space<vmem>>, vector<1x1x1024xf32>,
    } else {
    }
    return
  }
  func.func @transform_0(%arg0: i32, %arg1: i32) -> (i32, i32, i32) {
    %c0_i32 = arith.constant 0 : i32
    %c0_i32_0 = arith.constant 0 : i32
    return %arg0, %arg1, %c0_i32 : i32, i32, i32
  }
  func.func @transform_1(%arg0: i32, %arg1: i32) -> (i32, i32) {
    %c0_i32 = arith.constant 0 : i32
    %c0_i32_0 = arith.constant 0 : i32
    %c0_i32_1 = arith.constant 0 : i32
    return %c0_i32, %c0_i32_0 : i32, i32
  }
  func.func @transform_2(%arg0: i32, %arg1: i32) -> (i32, i32) {
    %c0_i32 = arith.constant 0 : i32
    %c0_i32_0 = arith.constant 0 : i32
    %c0_i32_1 = arith.constant 0 : i32
    return %c0_i32, %c0_i32_0 : i32, i32
  }
  func.func @transform_3(%arg0: i32, %arg1: i32) -> (i32, i32) {
    %c0_i32 = arith.constant 0 : i32
    %c0_i32_0 = arith.constant 0 : i32
    %c0_i32_1 = arith.constant 0 : i32
    return %c0_i32, %c0_i32_0 : i32, i32
  }
  func.func @transform_4(%arg0: i32, %arg1: i32) -> (i32, i32) {
    %c0_i32 = arith.constant 0 : i32
    %c0_i32_0 = arith.constant 0 : i32
    %c0_i32_1 = arith.constant 0 : i32
    return %c0_i32, %c0_i32_0 : i32, i32
  }
  func.func @transform_5(%arg0: i32, %arg1: i32) -> (i32, i32) {
    %c0_i32 = arith.constant 0 : i32
    %c0_i32_0 = arith.constant 0 : i32
    %c0_i32_1 = arith.constant 0 : i32
    return %c0_i32, %c0_i32_0 : i32, i32
  }
  func.func @transform_6(%arg0: i32, %arg1: i32) -> (i32, i32) {
    %c0_i32 = arith.constant 0 : i32
    %c0_i32_0 = arith.constant 0 : i32
    %c0_i32_1 = arith.constant 0 : i32
    return %c0_i32, %c0_i32_0 : i32, i32
  }
  func.func @transform_7(%arg0: i32, %arg1: i32) -> (i32, i32) {
    %c0_i32 = arith.constant 0 : i32
    %c0_i32_0 = arith.constant 0 : i32
    %c0_i32_1 = arith.constant 0 : i32
    return %c0_i32, %c0_i32_0 : i32, i32
  }
  func.func @transform_8(%arg0: i32, %arg1: i32) -> (i32, i32) {
    %c0_i32 = arith.constant 0 : i32
    %c0_i32_0 = arith.constant 0 : i32
    %c0_i32_1 = arith.constant 0 : i32
    return %c0_i32, %c0_i32_0 : i32, i32
  }
  func.func @transform_9(%arg0: i32, %arg1: i32) -> (i32, i32) {
    %c0_i32 = arith.constant 0 : i32
    %c0_i32_0 = arith.constant 0 : i32
    %c0_i32_1 = arith.constant 0 : i32
    return %c0_i32, %c0_i32_0 : i32, i32
  }
  func.func @transform_10(%arg0: i32, %arg1: i32) -> (i32, i32, i32) {
    %c0_i32 = arith.constant 0 : i32
    %c0_i32_0 = arith.constant 0 : i32
    %c0_i32_1 = arith.constant 0 : i32
    return %arg0, %c0_i32, %c0_i32_0 : i32, i32, i32
  }
}

module attributes {stable_mosaic.version = 11 : i64} {
  func.func @_fc_chain_kernel(%arg0: i32, %arg1: memref<8x1024xbf16, #tpu.memory_space<vmem>>, %arg2: memref<1024x512xbf16, #tpu.memory_space<vmem>>, %arg3: memref<1x512xf32, #tpu.memory_space<vmem>>, %arg4: memref<1x512xf32, #tpu.memory_space<vmem>>, %arg5: memref<512x256xbf16, #tpu.memory_space<vmem>>, %arg6: memref<1x256xf32, #tpu.memory_space<vmem>>, %arg7: memref<1x256xf32, #tpu.memory_space<vmem>>, %arg8: memref<256x128xbf16, #tpu.memory_space<vmem>>, %arg9: memref<1x128xf32, #tpu.memory_space<vmem>>, %arg10: memref<1x128xf32, #tpu.memory_space<vmem>>, %arg11: memref<8x128xf32, #tpu.memory_space<vmem>>) attributes {dimension_semantics = [#tpu.dimension_semantics<parallel>], iteration_bounds = array<i64: 1>, scalar_prefetch = 0 : i64, scratch_operands = 0 : i64, tpu.core_type = #tpu.core_type<tc>, window_params = [{transform_indices = @transform_0, window_bounds = array<i64: 8, 1024>}, {pipeline_mode = #tpu.pipeline_mode<synchronous>, transform_indices = @transform_1, window_bounds = array<i64: 1024, 512>}, {pipeline_mode = #tpu.pipeline_mode<synchronous>, transform_indices = @transform_2, window_bounds = array<i64: 1, 512>}, {pipeline_mode = #tpu.pipeline_mode<synchronous>, transform_indices = @transform_3, window_bounds = array<i64: 1, 512>}, {pipeline_mode = #tpu.pipeline_mode<synchronous>, transform_indices = @transform_4, window_bounds = array<i64: 512, 256>}, {pipeline_mode = #tpu.pipeline_mode<synchronous>, transform_indices = @transform_5, window_bounds = array<i64: 1, 256>}, {pipeline_mode = #tpu.pipeline_mode<synchronous>, transform_indices = @transform_6, window_bounds = array<i64: 1, 256>}, {pipeline_mode = #tpu.pipeline_mode<synchronous>, transform_indices = @transform_7, window_bounds = array<i64: 256, 128>}, {pipeline_mode = #tpu.pipeline_mode<synchronous>, transform_indices = @transform_8, window_bounds = array<i64: 1, 128>}, {pipeline_mode = #tpu.pipeline_mode<synchronous>, transform_indices = @transform_9, window_bounds = array<i64: 1, 128>}, {transform_indices = @transform_10, window_bounds = array<i64: 8, 128>}]} {
    %c0 = arith.constant 0 : index
    %c0_0 = arith.constant 0 : index
    %0 = vector.load %arg1[%c0, %c0_0] : memref<8x1024xbf16, #tpu.memory_space<vmem>>, vector<8x1024xbf16>
    %c0_1 = arith.constant 0 : index
    %c0_2 = arith.constant 0 : index
    %1 = vector.load %arg2[%c0_1, %c0_2] : memref<1024x512xbf16, #tpu.memory_space<vmem>>, vector<1024x512xbf16>
    %cst = arith.constant dense<0.000000e+00> : vector<8x512xf32>
    %2 = tpu.matmul %0, %1, %cst {dimension_numbers = #tpu.dot_dimension_numbers<[1], [0], [0], [1], [0, 0, 1, 1], [], []>} : vector<8x1024xbf16>, vector<1024x512xbf16>, vector<8x512xf32> -> vector<8x512xf32>
    %c0_3 = arith.constant 0 : index
    %c0_4 = arith.constant 0 : index
    %3 = vector.load %arg3[%c0_3, %c0_4] : memref<1x512xf32, #tpu.memory_space<vmem>>, vector<1x512xf32>
    %4 = vector.broadcast %3 : vector<1x512xf32> to vector<8x512xf32>
    %5 = arith.mulf %2, %4 : vector<8x512xf32>
    %c0_5 = arith.constant 0 : index
    %c0_6 = arith.constant 0 : index
    %6 = vector.load %arg4[%c0_5, %c0_6] : memref<1x512xf32, #tpu.memory_space<vmem>>, vector<1x512xf32>
    %7 = vector.broadcast %6 : vector<1x512xf32> to vector<8x512xf32>
    %8 = arith.addf %5, %7 : vector<8x512xf32>
    %cst_7 = arith.constant 0.000000e+00 : f32
    %9 = vector.broadcast %cst_7 : f32 to vector<8x512xf32>
    %10 = arith.maximumf %8, %9 : vector<8x512xf32>
    %11 = arith.truncf %10 : vector<8x512xf32> to vector<8x512xbf16>
    %c0_8 = arith.constant 0 : index
    %c0_9 = arith.constant 0 : index
    %12 = vector.load %arg5[%c0_8, %c0_9] : memref<512x256xbf16, #tpu.memory_space<vmem>>, vector<512x256xbf16>
    %cst_10 = arith.constant dense<0.000000e+00> : vector<8x256xf32>
    %13 = tpu.matmul %11, %12, %cst_10 {dimension_numbers = #tpu.dot_dimension_numbers<[1], [0], [0], [1], [0, 0, 1, 1], [], []>} : vector<8x512xbf16>, vector<512x256xbf16>, vector<8x256xf32> -> vector<8x256xf32>
    %c0_11 = arith.constant 0 : index
    %c0_12 = arith.constant 0 : index
    %14 = vector.load %arg6[%c0_11, %c0_12] : memref<1x256xf32, #tpu.memory_space<vmem>>, vector<1x256xf32>
    %15 = vector.broadcast %14 : vector<1x256xf32> to vector<8x256xf32>
    %16 = arith.mulf %13, %15 : vector<8x256xf32>
    %c0_13 = arith.constant 0 : index
    %c0_14 = arith.constant 0 : index
    %17 = vector.load %arg7[%c0_13, %c0_14] : memref<1x256xf32, #tpu.memory_space<vmem>>, vector<1x256xf32>
    %18 = vector.broadcast %17 : vector<1x256xf32> to vector<8x256xf32>
    %19 = arith.addf %16, %18 : vector<8x256xf32>
    %cst_15 = arith.constant 0.000000e+00 : f32
    %20 = vector.broadcast %cst_15 : f32 to vector<8x256xf32>
    %21 = arith.maximumf %19, %20 : vector<8x256xf32>
    %22 = arith.truncf %21 : vector<8x256xf32> to vector<8x256xbf16>
    %c0_16 = arith.constant 0 : index
    %c0_17 = arith.constant 0 : index
    %23 = vector.load %arg8[%c0_16, %c0_17] : memref<256x128xbf16, #tpu.memory_space<vmem>>, vector<256x128xbf16>
    %cst_18 = arith.constant dense<0.000000e+00> : vector<8x128xf32>
    %24 = tpu.matmul %22, %23, %cst_18 {dimension_numbers = #tpu.dot_dimension_numbers<[1], [0], [0], [1], [0, 0, 1, 1], [], []>} : vector<8x256xbf16>, vector<256x128xbf16>, vector<8x128xf32> -> vector<8x128xf32>
    %c0_19 = arith.constant 0 : index
    %c0_20 = arith.constant 0 : index
    %25 = vector.load %arg9[%c0_19, %c0_20] : memref<1x128xf32, #tpu.memory_space<vmem>>, vector<1x128xf32>
    %26 = vector.broadcast %25 : vector<1x128xf32> to vector<8x128xf32>
    %27 = arith.mulf %24, %26 : vector<8x128xf32>
    %c0_21 = arith.constant 0 : index
    %c0_22 = arith.constant 0 : index
    %28 = vector.load %arg10[%c0_21, %c0_22] : memref<1x128xf32, #tpu.memory_space<vmem>>, vector<1x128xf32>
    %29 = vector.broadcast %28 : vector<1x128xf32> to vector<8x128xf32>
    %30 = arith.addf %27, %29 : vector<8x128xf32>
    %c0_23 = arith.constant 0 : index
    %c0_24 = arith.constant 0 : index
    %31 = vector.load %arg11[%c0_23, %c0_24] : memref<8x128xf32, #tpu.memory_space<vmem>>, vector<8x128xf32>
    tpu.vector_store %arg11[%c0_23, %c0_24], %30 {strides = array<i32>} : memref<8x128xf32, #tpu.memory_space<vmem>>, vector<8x128xf32>,
    return
  }
  func.func @transform_0(%arg0: i32) -> (i32, i32) {
    %c0_i32 = arith.constant 0 : i32
    %c0_i32_0 = arith.constant 0 : i32
    return %arg0, %c0_i32 : i32, i32
  }
  func.func @transform_1(%arg0: i32) -> (i32, i32) {
    %c0_i32 = arith.constant 0 : i32
    %c0_i32_0 = arith.constant 0 : i32
    %c0_i32_1 = arith.constant 0 : i32
    return %c0_i32, %c0_i32_0 : i32, i32
  }
  func.func @transform_2(%arg0: i32) -> (i32, i32) {
    %c0_i32 = arith.constant 0 : i32
    %c0_i32_0 = arith.constant 0 : i32
    %c0_i32_1 = arith.constant 0 : i32
    return %c0_i32, %c0_i32_0 : i32, i32
  }
  func.func @transform_3(%arg0: i32) -> (i32, i32) {
    %c0_i32 = arith.constant 0 : i32
    %c0_i32_0 = arith.constant 0 : i32
    %c0_i32_1 = arith.constant 0 : i32
    return %c0_i32, %c0_i32_0 : i32, i32
  }
  func.func @transform_4(%arg0: i32) -> (i32, i32) {
    %c0_i32 = arith.constant 0 : i32
    %c0_i32_0 = arith.constant 0 : i32
    %c0_i32_1 = arith.constant 0 : i32
    return %c0_i32, %c0_i32_0 : i32, i32
  }
  func.func @transform_5(%arg0: i32) -> (i32, i32) {
    %c0_i32 = arith.constant 0 : i32
    %c0_i32_0 = arith.constant 0 : i32
    %c0_i32_1 = arith.constant 0 : i32
    return %c0_i32, %c0_i32_0 : i32, i32
  }
  func.func @transform_6(%arg0: i32) -> (i32, i32) {
    %c0_i32 = arith.constant 0 : i32
    %c0_i32_0 = arith.constant 0 : i32
    %c0_i32_1 = arith.constant 0 : i32
    return %c0_i32, %c0_i32_0 : i32, i32
  }
  func.func @transform_7(%arg0: i32) -> (i32, i32) {
    %c0_i32 = arith.constant 0 : i32
    %c0_i32_0 = arith.constant 0 : i32
    %c0_i32_1 = arith.constant 0 : i32
    return %c0_i32, %c0_i32_0 : i32, i32
  }
  func.func @transform_8(%arg0: i32) -> (i32, i32) {
    %c0_i32 = arith.constant 0 : i32
    %c0_i32_0 = arith.constant 0 : i32
    %c0_i32_1 = arith.constant 0 : i32
    return %c0_i32, %c0_i32_0 : i32, i32
  }
  func.func @transform_9(%arg0: i32) -> (i32, i32) {
    %c0_i32 = arith.constant 0 : i32
    %c0_i32_0 = arith.constant 0 : i32
    %c0_i32_1 = arith.constant 0 : i32
    return %c0_i32, %c0_i32_0 : i32, i32
  }
  func.func @transform_10(%arg0: i32) -> (i32, i32) {
    %c0_i32 = arith.constant 0 : i32
    %c0_i32_0 = arith.constant 0 : i32
    return %arg0, %c0_i32 : i32, i32
  }
}

module attributes {stable_mosaic.version = 11 : i64} {
  func.func @kernel(%arg0: i32, %arg1: i32, %arg2: memref<1x16x8xbf16, #tpu.memory_space<vmem>>, %arg3: memref<1x8x64xbf16, #tpu.memory_space<vmem>>, %arg4: memref<1x64xf32, #tpu.memory_space<vmem>>, %arg5: memref<1x64xf32, #tpu.memory_space<vmem>>, %arg6: memref<64x64xbf16, #tpu.memory_space<vmem>>, %arg7: memref<1x64xf32, #tpu.memory_space<vmem>>, %arg8: memref<1x64xf32, #tpu.memory_space<vmem>>, %arg9: memref<64x128xbf16, #tpu.memory_space<vmem>>, %arg10: memref<1x128xf32, #tpu.memory_space<vmem>>, %arg11: memref<1x128xf32, #tpu.memory_space<vmem>>, %arg12: memref<128x1024xbf16, #tpu.memory_space<vmem>>, %arg13: memref<1x1024xf32, #tpu.memory_space<vmem>>, %arg14: memref<1x1024xf32, #tpu.memory_space<vmem>>, %arg15: memref<1x1x1024xf32, #tpu.memory_space<vmem>>, %arg16: memref<8x1024xf32, #tpu.memory_space<vmem>>) attributes {dimension_semantics = [#tpu.dimension_semantics<parallel>, #tpu.dimension_semantics<arbitrary>], iteration_bounds = array<i64: 2, 1>, scalar_prefetch = 0 : i64, scratch_operands = 1 : i64, tpu.core_type = #tpu.core_type<tc>, window_params = [{transform_indices = @transform_0, window_bounds = array<i64: 1, 16, 8>}, {transform_indices = @transform_1, window_bounds = array<i64: 1, 8, 64>}, {pipeline_mode = #tpu.pipeline_mode<synchronous>, transform_indices = @transform_2, window_bounds = array<i64: 1, 64>}, {pipeline_mode = #tpu.pipeline_mode<synchronous>, transform_indices = @transform_3, window_bounds = array<i64: 1, 64>}, {pipeline_mode = #tpu.pipeline_mode<synchronous>, transform_indices = @transform_4, window_bounds = array<i64: 64, 64>}, {pipeline_mode = #tpu.pipeline_mode<synchronous>, transform_indices = @transform_5, window_bounds = array<i64: 1, 64>}, {pipeline_mode = #tpu.pipeline_mode<synchronous>, transform_indices = @transform_6, window_bounds = array<i64: 1, 64>}, {pipeline_mode = #tpu.pipeline_mode<synchronous>, transform_indices = @transform_7, window_bounds = array<i64: 64, 128>}, {pipeline_mode = #tpu.pipeline_mode<synchronous>, transform_indices = @transform_8, window_bounds = array<i64: 1, 128>}, {pipeline_mode = #tpu.pipeline_mode<synchronous>, transform_indices = @transform_9, window_bounds = array<i64: 1, 128>}, {pipeline_mode = #tpu.pipeline_mode<synchronous>, transform_indices = @transform_10, window_bounds = array<i64: 128, 1024>}, {pipeline_mode = #tpu.pipeline_mode<synchronous>, transform_indices = @transform_11, window_bounds = array<i64: 1, 1024>}, {pipeline_mode = #tpu.pipeline_mode<synchronous>, transform_indices = @transform_12, window_bounds = array<i64: 1, 1024>}, {transform_indices = @transform_13, window_bounds = array<i64: 1, 1, 1024>}]} {
    %c0_i32 = arith.constant 0 : i32
    %0 = arith.cmpi eq, %arg1, %c0_i32 : i32
    %1 = arith.extui %0 : i1 to i32
    %c0_i32_0 = arith.constant 0 : i32
    %2 = arith.cmpi ne, %1, %c0_i32_0 : i32
    scf.if %2 {
      %cst_42 = arith.constant 0xFF800000 : f32
      %57 = vector.broadcast %cst_42 : f32 to vector<8x1024xf32>
      %c0_43 = arith.constant 0 : index
      %c0_44 = arith.constant 0 : index
      %58 = vector.load %arg16[%c0_43, %c0_44] : memref<8x1024xf32, #tpu.memory_space<vmem>>, vector<8x1024xf32>
      tpu.vector_store %arg16[%c0_43, %c0_44], %57 {strides = array<i32>} : memref<8x1024xf32, #tpu.memory_space<vmem>>, vector<8x1024xf32>,
    } else {
    }
    %c0 = arith.constant 0 : index
    %c0_1 = arith.constant 0 : index
    %c0_2 = arith.constant 0 : index
    %3 = vector.load %arg2[%c0, %c0_1, %c0_2] : memref<1x16x8xbf16, #tpu.memory_space<vmem>>, vector<1x16x8xbf16>
    %4 = vector.shape_cast %3 : vector<1x16x8xbf16> to vector<16x8xbf16>
    %c0_3 = arith.constant 0 : index
    %c0_4 = arith.constant 0 : index
    %c0_5 = arith.constant 0 : index
    %5 = vector.load %arg3[%c0_3, %c0_4, %c0_5] : memref<1x8x64xbf16, #tpu.memory_space<vmem>>, vector<1x8x64xbf16>
    %6 = vector.shape_cast %5 : vector<1x8x64xbf16> to vector<8x64xbf16>
    %cst = arith.constant dense<0.000000e+00> : vector<16x64xf32>
    %7 = tpu.matmul %4, %6, %cst {dimension_numbers = #tpu.dot_dimension_numbers<[1], [0], [0], [1], [0, 0, 1, 1], [], []>} : vector<16x8xbf16>, vector<8x64xbf16>, vector<16x64xf32> -> vector<16x64xf32>
    %c0_6 = arith.constant 0 : index
    %c0_7 = arith.constant 0 : index
    %8 = vector.load %arg4[%c0_6, %c0_7] : memref<1x64xf32, #tpu.memory_space<vmem>>, vector<1x64xf32>
    %9 = vector.broadcast %8 : vector<1x64xf32> to vector<16x64xf32>
    %10 = arith.mulf %7, %9 : vector<16x64xf32>
    %c0_8 = arith.constant 0 : index
    %c0_9 = arith.constant 0 : index
    %11 = vector.load %arg5[%c0_8, %c0_9] : memref<1x64xf32, #tpu.memory_space<vmem>>, vector<1x64xf32>
    %12 = vector.broadcast %11 : vector<1x64xf32> to vector<16x64xf32>
    %13 = arith.addf %10, %12 : vector<16x64xf32>
    %cst_10 = arith.constant 0.000000e+00 : f32
    %14 = vector.broadcast %cst_10 : f32 to vector<16x64xf32>
    %15 = arith.maximumf %13, %14 : vector<16x64xf32>
    %c0_11 = arith.constant 0 : index
    %c0_12 = arith.constant 0 : index
    %16 = vector.load %arg6[%c0_11, %c0_12] : memref<64x64xbf16, #tpu.memory_space<vmem>>, vector<64x64xbf16>
    %17 = arith.truncf %15 : vector<16x64xf32> to vector<16x64xbf16>
    %cst_13 = arith.constant dense<0.000000e+00> : vector<16x64xf32>
    %18 = tpu.matmul %17, %16, %cst_13 {dimension_numbers = #tpu.dot_dimension_numbers<[1], [0], [0], [1], [0, 0, 1, 1], [], []>} : vector<16x64xbf16>, vector<64x64xbf16>, vector<16x64xf32> -> vector<16x64xf32>
    %c0_14 = arith.constant 0 : index
    %c0_15 = arith.constant 0 : index
    %19 = vector.load %arg7[%c0_14, %c0_15] : memref<1x64xf32, #tpu.memory_space<vmem>>, vector<1x64xf32>
    %20 = vector.broadcast %19 : vector<1x64xf32> to vector<16x64xf32>
    %21 = arith.mulf %18, %20 : vector<16x64xf32>
    %c0_16 = arith.constant 0 : index
    %c0_17 = arith.constant 0 : index
    %22 = vector.load %arg8[%c0_16, %c0_17] : memref<1x64xf32, #tpu.memory_space<vmem>>, vector<1x64xf32>
    %23 = vector.broadcast %22 : vector<1x64xf32> to vector<16x64xf32>
    %24 = arith.addf %21, %23 : vector<16x64xf32>
    %cst_18 = arith.constant 0.000000e+00 : f32
    %25 = vector.broadcast %cst_18 : f32 to vector<16x64xf32>
    %26 = arith.maximumf %24, %25 : vector<16x64xf32>
    %c0_19 = arith.constant 0 : index
    %c0_20 = arith.constant 0 : index
    %27 = vector.load %arg9[%c0_19, %c0_20] : memref<64x128xbf16, #tpu.memory_space<vmem>>, vector<64x128xbf16>
    %28 = arith.truncf %26 : vector<16x64xf32> to vector<16x64xbf16>
    %cst_21 = arith.constant dense<0.000000e+00> : vector<16x128xf32>
    %29 = tpu.matmul %28, %27, %cst_21 {dimension_numbers = #tpu.dot_dimension_numbers<[1], [0], [0], [1], [0, 0, 1, 1], [], []>} : vector<16x64xbf16>, vector<64x128xbf16>, vector<16x128xf32> -> vector<16x128xf32>
    %c0_22 = arith.constant 0 : index
    %c0_23 = arith.constant 0 : index
    %30 = vector.load %arg10[%c0_22, %c0_23] : memref<1x128xf32, #tpu.memory_space<vmem>>, vector<1x128xf32>
    %31 = vector.broadcast %30 : vector<1x128xf32> to vector<16x128xf32>
    %32 = arith.mulf %29, %31 : vector<16x128xf32>
    %c0_24 = arith.constant 0 : index
    %c0_25 = arith.constant 0 : index
    %33 = vector.load %arg11[%c0_24, %c0_25] : memref<1x128xf32, #tpu.memory_space<vmem>>, vector<1x128xf32>
    %34 = vector.broadcast %33 : vector<1x128xf32> to vector<16x128xf32>
    %35 = arith.addf %32, %34 : vector<16x128xf32>
    %cst_26 = arith.constant 0.000000e+00 : f32
    %36 = vector.broadcast %cst_26 : f32 to vector<16x128xf32>
    %37 = arith.maximumf %35, %36 : vector<16x128xf32>
    %c0_27 = arith.constant 0 : index
    %c0_28 = arith.constant 0 : index
    %38 = vector.load %arg12[%c0_27, %c0_28] : memref<128x1024xbf16, #tpu.memory_space<vmem>>, vector<128x1024xbf16>
    %39 = arith.truncf %37 : vector<16x128xf32> to vector<16x128xbf16>
    %cst_29 = arith.constant dense<0.000000e+00> : vector<16x1024xf32>
    %40 = tpu.matmul %39, %38, %cst_29 {dimension_numbers = #tpu.dot_dimension_numbers<[1], [0], [0], [1], [0, 0, 1, 1], [], []>} : vector<16x128xbf16>, vector<128x1024xbf16>, vector<16x1024xf32> -> vector<16x1024xf32>
    %c0_30 = arith.constant 0 : index
    %c0_31 = arith.constant 0 : index
    %41 = vector.load %arg13[%c0_30, %c0_31] : memref<1x1024xf32, #tpu.memory_space<vmem>>, vector<1x1024xf32>
    %42 = vector.broadcast %41 : vector<1x1024xf32> to vector<16x1024xf32>
    %43 = arith.mulf %40, %42 : vector<16x1024xf32>
    %c0_32 = arith.constant 0 : index
    %c0_33 = arith.constant 0 : index
    %44 = vector.load %arg14[%c0_32, %c0_33] : memref<1x1024xf32, #tpu.memory_space<vmem>>, vector<1x1024xf32>
    %45 = vector.broadcast %44 : vector<1x1024xf32> to vector<16x1024xf32>
    %46 = arith.addf %43, %45 : vector<16x1024xf32>
    %cst_34 = arith.constant 0.000000e+00 : f32
    %47 = vector.broadcast %cst_34 : f32 to vector<16x1024xf32>
    %48 = arith.maximumf %46, %47 : vector<16x1024xf32>
    %49 = vector.shape_cast %48 : vector<16x1024xf32> to vector<2x8x1024xf32>
    %cst_35 = arith.constant dense<0xFF800000> : vector<8x1024xf32>
    %50 = vector.multi_reduction <maximumf>, %49, %cst_35 [0] : vector<2x8x1024xf32> to vector<8x1024xf32>
    %c0_36 = arith.constant 0 : index
    %c0_37 = arith.constant 0 : index
    %51 = vector.load %arg16[%c0_36, %c0_37] : memref<8x1024xf32, #tpu.memory_space<vmem>>, vector<8x1024xf32>
    %52 = arith.maximumf %51, %50 : vector<8x1024xf32>
    %c0_38 = arith.constant 0 : index
    %c0_39 = arith.constant 0 : index
    %53 = vector.load %arg16[%c0_38, %c0_39] : memref<8x1024xf32, #tpu.memory_space<vmem>>, vector<8x1024xf32>
    tpu.vector_store %arg16[%c0_38, %c0_39], %52 {strides = array<i32>} : memref<8x1024xf32, #tpu.memory_space<vmem>>, vector<8x1024xf32>,
    %c0_i32_40 = arith.constant 0 : i32
    %54 = arith.cmpi eq, %arg1, %c0_i32_40 : i32
    %55 = arith.extui %54 : i1 to i32
    %c0_i32_41 = arith.constant 0 : i32
    %56 = arith.cmpi ne, %55, %c0_i32_41 : i32
    scf.if %56 {
      %c0_42 = arith.constant 0 : index
      %c0_43 = arith.constant 0 : index
      %57 = vector.load %arg16[%c0_42, %c0_43] : memref<8x1024xf32, #tpu.memory_space<vmem>>, vector<8x1024xf32>
      %cst_44 = arith.constant dense<0xFF800000> : vector<1024xf32>
      %58 = vector.multi_reduction <maximumf>, %57, %cst_44 [0] : vector<8x1024xf32> to vector<1024xf32>
      %59 = vector.shape_cast %58 : vector<1024xf32> to vector<1x1024xf32>
      %c0_45 = arith.constant 0 : index
      %c0_46 = arith.constant 0 : index
      %c0_47 = arith.constant 0 : index
      %60 = vector.load %arg15[%c0_45, %c0_46, %c0_47] : memref<1x1x1024xf32, #tpu.memory_space<vmem>>, vector<1x1x1024xf32>
      %61 = vector.shape_cast %60 : vector<1x1x1024xf32> to vector<1x1024xf32>
      %62 = vector.shape_cast %59 : vector<1x1024xf32> to vector<1x1x1024xf32>
      tpu.vector_store %arg15[%c0_45, %c0_46, %c0_47], %62 {strides = array<i32>} : memref<1x1x1024xf32, #tpu.memory_space<vmem>>, vector<1x1x1024xf32>,
    } else {
    }
    return
  }
  func.func @transform_0(%arg0: i32, %arg1: i32) -> (i32, i32, i32) {
    %c0_i32 = arith.constant 0 : i32
    %c0_i32_0 = arith.constant 0 : i32
    return %arg0, %arg1, %c0_i32 : i32, i32, i32
  }
  func.func @transform_1(%arg0: i32, %arg1: i32) -> (i32, i32, i32) {
    %c0_i32 = arith.constant 0 : i32
    %c0_i32_0 = arith.constant 0 : i32
    %c0_i32_1 = arith.constant 0 : i32
    return %arg0, %c0_i32, %c0_i32_0 : i32, i32, i32
  }
  func.func @transform_2(%arg0: i32, %arg1: i32) -> (i32, i32) {
    %c0_i32 = arith.constant 0 : i32
    %c0_i32_0 = arith.constant 0 : i32
    %c0_i32_1 = arith.constant 0 : i32
    return %c0_i32, %c0_i32_0 : i32, i32
  }
  func.func @transform_3(%arg0: i32, %arg1: i32) -> (i32, i32) {
    %c0_i32 = arith.constant 0 : i32
    %c0_i32_0 = arith.constant 0 : i32
    %c0_i32_1 = arith.constant 0 : i32
    return %c0_i32, %c0_i32_0 : i32, i32
  }
  func.func @transform_4(%arg0: i32, %arg1: i32) -> (i32, i32) {
    %c0_i32 = arith.constant 0 : i32
    %c0_i32_0 = arith.constant 0 : i32
    %c0_i32_1 = arith.constant 0 : i32
    return %c0_i32, %c0_i32_0 : i32, i32
  }
  func.func @transform_5(%arg0: i32, %arg1: i32) -> (i32, i32) {
    %c0_i32 = arith.constant 0 : i32
    %c0_i32_0 = arith.constant 0 : i32
    %c0_i32_1 = arith.constant 0 : i32
    return %c0_i32, %c0_i32_0 : i32, i32
  }
  func.func @transform_6(%arg0: i32, %arg1: i32) -> (i32, i32) {
    %c0_i32 = arith.constant 0 : i32
    %c0_i32_0 = arith.constant 0 : i32
    %c0_i32_1 = arith.constant 0 : i32
    return %c0_i32, %c0_i32_0 : i32, i32
  }
  func.func @transform_7(%arg0: i32, %arg1: i32) -> (i32, i32) {
    %c0_i32 = arith.constant 0 : i32
    %c0_i32_0 = arith.constant 0 : i32
    %c0_i32_1 = arith.constant 0 : i32
    return %c0_i32, %c0_i32_0 : i32, i32
  }
  func.func @transform_8(%arg0: i32, %arg1: i32) -> (i32, i32) {
    %c0_i32 = arith.constant 0 : i32
    %c0_i32_0 = arith.constant 0 : i32
    %c0_i32_1 = arith.constant 0 : i32
    return %c0_i32, %c0_i32_0 : i32, i32
  }
  func.func @transform_9(%arg0: i32, %arg1: i32) -> (i32, i32) {
    %c0_i32 = arith.constant 0 : i32
    %c0_i32_0 = arith.constant 0 : i32
    %c0_i32_1 = arith.constant 0 : i32
    return %c0_i32, %c0_i32_0 : i32, i32
  }
  func.func @transform_10(%arg0: i32, %arg1: i32) -> (i32, i32) {
    %c0_i32 = arith.constant 0 : i32
    %c0_i32_0 = arith.constant 0 : i32
    %c0_i32_1 = arith.constant 0 : i32
    return %c0_i32, %c0_i32_0 : i32, i32
  }
  func.func @transform_11(%arg0: i32, %arg1: i32) -> (i32, i32) {
    %c0_i32 = arith.constant 0 : i32
    %c0_i32_0 = arith.constant 0 : i32
    %c0_i32_1 = arith.constant 0 : i32
    return %c0_i32, %c0_i32_0 : i32, i32
  }
  func.func @transform_12(%arg0: i32, %arg1: i32) -> (i32, i32) {
    %c0_i32 = arith.constant 0 : i32
    %c0_i32_0 = arith.constant 0 : i32
    %c0_i32_1 = arith.constant 0 : i32
    return %c0_i32, %c0_i32_0 : i32, i32
  }
  func.func @transform_13(%arg0: i32, %arg1: i32) -> (i32, i32, i32) {
    %c0_i32 = arith.constant 0 : i32
    %c0_i32_0 = arith.constant 0 : i32
    %c0_i32_1 = arith.constant 0 : i32
    return %arg0, %c0_i32, %c0_i32_0 : i32, i32, i32
  }
}

module attributes {stable_mosaic.version = 11 : i64} {
  func.func @_fc_chain_kernel(%arg0: i32, %arg1: memref<8x1024xbf16, #tpu.memory_space<vmem>>, %arg2: memref<1024x512xbf16, #tpu.memory_space<vmem>>, %arg3: memref<1x512xf32, #tpu.memory_space<vmem>>, %arg4: memref<1x512xf32, #tpu.memory_space<vmem>>, %arg5: memref<512x256xbf16, #tpu.memory_space<vmem>>, %arg6: memref<1x256xf32, #tpu.memory_space<vmem>>, %arg7: memref<1x256xf32, #tpu.memory_space<vmem>>, %arg8: memref<256x4096xbf16, #tpu.memory_space<vmem>>, %arg9: memref<1x4096xf32, #tpu.memory_space<vmem>>, %arg10: memref<1x4096xf32, #tpu.memory_space<vmem>>, %arg11: memref<8x4096xf32, #tpu.memory_space<vmem>>) attributes {dimension_semantics = [#tpu.dimension_semantics<parallel>], iteration_bounds = array<i64: 1>, scalar_prefetch = 0 : i64, scratch_operands = 0 : i64, tpu.core_type = #tpu.core_type<tc>, window_params = [{transform_indices = @transform_0, window_bounds = array<i64: 8, 1024>}, {pipeline_mode = #tpu.pipeline_mode<synchronous>, transform_indices = @transform_1, window_bounds = array<i64: 1024, 512>}, {pipeline_mode = #tpu.pipeline_mode<synchronous>, transform_indices = @transform_2, window_bounds = array<i64: 1, 512>}, {pipeline_mode = #tpu.pipeline_mode<synchronous>, transform_indices = @transform_3, window_bounds = array<i64: 1, 512>}, {pipeline_mode = #tpu.pipeline_mode<synchronous>, transform_indices = @transform_4, window_bounds = array<i64: 512, 256>}, {pipeline_mode = #tpu.pipeline_mode<synchronous>, transform_indices = @transform_5, window_bounds = array<i64: 1, 256>}, {pipeline_mode = #tpu.pipeline_mode<synchronous>, transform_indices = @transform_6, window_bounds = array<i64: 1, 256>}, {pipeline_mode = #tpu.pipeline_mode<synchronous>, transform_indices = @transform_7, window_bounds = array<i64: 256, 4096>}, {pipeline_mode = #tpu.pipeline_mode<synchronous>, transform_indices = @transform_8, window_bounds = array<i64: 1, 4096>}, {pipeline_mode = #tpu.pipeline_mode<synchronous>, transform_indices = @transform_9, window_bounds = array<i64: 1, 4096>}, {transform_indices = @transform_10, window_bounds = array<i64: 8, 4096>}]} {
    %c0 = arith.constant 0 : index
    %c0_0 = arith.constant 0 : index
    %0 = vector.load %arg1[%c0, %c0_0] : memref<8x1024xbf16, #tpu.memory_space<vmem>>, vector<8x1024xbf16>
    %c0_1 = arith.constant 0 : index
    %c0_2 = arith.constant 0 : index
    %1 = vector.load %arg2[%c0_1, %c0_2] : memref<1024x512xbf16, #tpu.memory_space<vmem>>, vector<1024x512xbf16>
    %cst = arith.constant dense<0.000000e+00> : vector<8x512xf32>
    %2 = tpu.matmul %0, %1, %cst {dimension_numbers = #tpu.dot_dimension_numbers<[1], [0], [0], [1], [0, 0, 1, 1], [], []>} : vector<8x1024xbf16>, vector<1024x512xbf16>, vector<8x512xf32> -> vector<8x512xf32>
    %c0_3 = arith.constant 0 : index
    %c0_4 = arith.constant 0 : index
    %3 = vector.load %arg3[%c0_3, %c0_4] : memref<1x512xf32, #tpu.memory_space<vmem>>, vector<1x512xf32>
    %4 = vector.broadcast %3 : vector<1x512xf32> to vector<8x512xf32>
    %5 = arith.mulf %2, %4 : vector<8x512xf32>
    %c0_5 = arith.constant 0 : index
    %c0_6 = arith.constant 0 : index
    %6 = vector.load %arg4[%c0_5, %c0_6] : memref<1x512xf32, #tpu.memory_space<vmem>>, vector<1x512xf32>
    %7 = vector.broadcast %6 : vector<1x512xf32> to vector<8x512xf32>
    %8 = arith.addf %5, %7 : vector<8x512xf32>
    %cst_7 = arith.constant 0.000000e+00 : f32
    %9 = vector.broadcast %cst_7 : f32 to vector<8x512xf32>
    %10 = arith.maximumf %8, %9 : vector<8x512xf32>
    %11 = arith.truncf %10 : vector<8x512xf32> to vector<8x512xbf16>
    %c0_8 = arith.constant 0 : index
    %c0_9 = arith.constant 0 : index
    %12 = vector.load %arg5[%c0_8, %c0_9] : memref<512x256xbf16, #tpu.memory_space<vmem>>, vector<512x256xbf16>
    %cst_10 = arith.constant dense<0.000000e+00> : vector<8x256xf32>
    %13 = tpu.matmul %11, %12, %cst_10 {dimension_numbers = #tpu.dot_dimension_numbers<[1], [0], [0], [1], [0, 0, 1, 1], [], []>} : vector<8x512xbf16>, vector<512x256xbf16>, vector<8x256xf32> -> vector<8x256xf32>
    %c0_11 = arith.constant 0 : index
    %c0_12 = arith.constant 0 : index
    %14 = vector.load %arg6[%c0_11, %c0_12] : memref<1x256xf32, #tpu.memory_space<vmem>>, vector<1x256xf32>
    %15 = vector.broadcast %14 : vector<1x256xf32> to vector<8x256xf32>
    %16 = arith.mulf %13, %15 : vector<8x256xf32>
    %c0_13 = arith.constant 0 : index
    %c0_14 = arith.constant 0 : index
    %17 = vector.load %arg7[%c0_13, %c0_14] : memref<1x256xf32, #tpu.memory_space<vmem>>, vector<1x256xf32>
    %18 = vector.broadcast %17 : vector<1x256xf32> to vector<8x256xf32>
    %19 = arith.addf %16, %18 : vector<8x256xf32>
    %cst_15 = arith.constant 0.000000e+00 : f32
    %20 = vector.broadcast %cst_15 : f32 to vector<8x256xf32>
    %21 = arith.maximumf %19, %20 : vector<8x256xf32>
    %22 = arith.truncf %21 : vector<8x256xf32> to vector<8x256xbf16>
    %c0_16 = arith.constant 0 : index
    %c0_17 = arith.constant 0 : index
    %23 = vector.load %arg8[%c0_16, %c0_17] : memref<256x4096xbf16, #tpu.memory_space<vmem>>, vector<256x4096xbf16>
    %cst_18 = arith.constant dense<0.000000e+00> : vector<8x4096xf32>
    %24 = tpu.matmul %22, %23, %cst_18 {dimension_numbers = #tpu.dot_dimension_numbers<[1], [0], [0], [1], [0, 0, 1, 1], [], []>} : vector<8x256xbf16>, vector<256x4096xbf16>, vector<8x4096xf32> -> vector<8x4096xf32>
    %c0_19 = arith.constant 0 : index
    %c0_20 = arith.constant 0 : index
    %25 = vector.load %arg9[%c0_19, %c0_20] : memref<1x4096xf32, #tpu.memory_space<vmem>>, vector<1x4096xf32>
    %26 = vector.broadcast %25 : vector<1x4096xf32> to vector<8x4096xf32>
    %27 = arith.mulf %24, %26 : vector<8x4096xf32>
    %c0_21 = arith.constant 0 : index
    %c0_22 = arith.constant 0 : index
    %28 = vector.load %arg10[%c0_21, %c0_22] : memref<1x4096xf32, #tpu.memory_space<vmem>>, vector<1x4096xf32>
    %29 = vector.broadcast %28 : vector<1x4096xf32> to vector<8x4096xf32>
    %30 = arith.addf %27, %29 : vector<8x4096xf32>
    %c0_23 = arith.constant 0 : index
    %c0_24 = arith.constant 0 : index
    %31 = vector.load %arg11[%c0_23, %c0_24] : memref<8x4096xf32, #tpu.memory_space<vmem>>, vector<8x4096xf32>
    tpu.vector_store %arg11[%c0_23, %c0_24], %30 {strides = array<i32>} : memref<8x4096xf32, #tpu.memory_space<vmem>>, vector<8x4096xf32>,
    return
  }
  func.func @transform_0(%arg0: i32) -> (i32, i32) {
    %c0_i32 = arith.constant 0 : i32
    %c0_i32_0 = arith.constant 0 : i32
    return %arg0, %c0_i32 : i32, i32
  }
  func.func @transform_1(%arg0: i32) -> (i32, i32) {
    %c0_i32 = arith.constant 0 : i32
    %c0_i32_0 = arith.constant 0 : i32
    %c0_i32_1 = arith.constant 0 : i32
    return %c0_i32, %c0_i32_0 : i32, i32
  }
  func.func @transform_2(%arg0: i32) -> (i32, i32) {
    %c0_i32 = arith.constant 0 : i32
    %c0_i32_0 = arith.constant 0 : i32
    %c0_i32_1 = arith.constant 0 : i32
    return %c0_i32, %c0_i32_0 : i32, i32
  }
  func.func @transform_3(%arg0: i32) -> (i32, i32) {
    %c0_i32 = arith.constant 0 : i32
    %c0_i32_0 = arith.constant 0 : i32
    %c0_i32_1 = arith.constant 0 : i32
    return %c0_i32, %c0_i32_0 : i32, i32
  }
  func.func @transform_4(%arg0: i32) -> (i32, i32) {
    %c0_i32 = arith.constant 0 : i32
    %c0_i32_0 = arith.constant 0 : i32
    %c0_i32_1 = arith.constant 0 : i32
    return %c0_i32, %c0_i32_0 : i32, i32
  }
  func.func @transform_5(%arg0: i32) -> (i32, i32) {
    %c0_i32 = arith.constant 0 : i32
    %c0_i32_0 = arith.constant 0 : i32
    %c0_i32_1 = arith.constant 0 : i32
    return %c0_i32, %c0_i32_0 : i32, i32
  }
  func.func @transform_6(%arg0: i32) -> (i32, i32) {
    %c0_i32 = arith.constant 0 : i32
    %c0_i32_0 = arith.constant 0 : i32
    %c0_i32_1 = arith.constant 0 : i32
    return %c0_i32, %c0_i32_0 : i32, i32
  }
  func.func @transform_7(%arg0: i32) -> (i32, i32) {
    %c0_i32 = arith.constant 0 : i32
    %c0_i32_0 = arith.constant 0 : i32
    %c0_i32_1 = arith.constant 0 : i32
    return %c0_i32, %c0_i32_0 : i32, i32
  }
  func.func @transform_8(%arg0: i32) -> (i32, i32) {
    %c0_i32 = arith.constant 0 : i32
    %c0_i32_0 = arith.constant 0 : i32
    %c0_i32_1 = arith.constant 0 : i32
    return %c0_i32, %c0_i32_0 : i32, i32
  }
  func.func @transform_9(%arg0: i32) -> (i32, i32) {
    %c0_i32 = arith.constant 0 : i32
    %c0_i32_0 = arith.constant 0 : i32
    %c0_i32_1 = arith.constant 0 : i32
    return %c0_i32, %c0_i32_0 : i32, i32
  }
  func.func @transform_10(%arg0: i32) -> (i32, i32) {
    %c0_i32 = arith.constant 0 : i32
    %c0_i32_0 = arith.constant 0 : i32
    return %arg0, %c0_i32 : i32, i32
  }
}

module attributes {stable_mosaic.version = 11 : i64} {
  func.func @kernel(%arg0: i32, %arg1: i32, %arg2: memref<1x16x8xbf16, #tpu.memory_space<vmem>>, %arg3: memref<1x8x64xbf16, #tpu.memory_space<vmem>>, %arg4: memref<1x64xf32, #tpu.memory_space<vmem>>, %arg5: memref<1x64xf32, #tpu.memory_space<vmem>>, %arg6: memref<1x64x128xbf16, #tpu.memory_space<vmem>>, %arg7: memref<1x128xf32, #tpu.memory_space<vmem>>, %arg8: memref<1x128xf32, #tpu.memory_space<vmem>>, %arg9: memref<128x1024xbf16, #tpu.memory_space<vmem>>, %arg10: memref<1x1024xf32, #tpu.memory_space<vmem>>, %arg11: memref<1x1024xf32, #tpu.memory_space<vmem>>, %arg12: memref<1x1x1024xf32, #tpu.memory_space<vmem>>, %arg13: memref<8x1024xf32, #tpu.memory_space<vmem>>) attributes {dimension_semantics = [#tpu.dimension_semantics<parallel>, #tpu.dimension_semantics<arbitrary>], iteration_bounds = array<i64: 2, 1>, scalar_prefetch = 0 : i64, scratch_operands = 1 : i64, tpu.core_type = #tpu.core_type<tc>, window_params = [{transform_indices = @transform_0, window_bounds = array<i64: 1, 16, 8>}, {transform_indices = @transform_1, window_bounds = array<i64: 1, 8, 64>}, {pipeline_mode = #tpu.pipeline_mode<synchronous>, transform_indices = @transform_2, window_bounds = array<i64: 1, 64>}, {pipeline_mode = #tpu.pipeline_mode<synchronous>, transform_indices = @transform_3, window_bounds = array<i64: 1, 64>}, {transform_indices = @transform_4, window_bounds = array<i64: 1, 64, 128>}, {pipeline_mode = #tpu.pipeline_mode<synchronous>, transform_indices = @transform_5, window_bounds = array<i64: 1, 128>}, {pipeline_mode = #tpu.pipeline_mode<synchronous>, transform_indices = @transform_6, window_bounds = array<i64: 1, 128>}, {pipeline_mode = #tpu.pipeline_mode<synchronous>, transform_indices = @transform_7, window_bounds = array<i64: 128, 1024>}, {pipeline_mode = #tpu.pipeline_mode<synchronous>, transform_indices = @transform_8, window_bounds = array<i64: 1, 1024>}, {pipeline_mode = #tpu.pipeline_mode<synchronous>, transform_indices = @transform_9, window_bounds = array<i64: 1, 1024>}, {transform_indices = @transform_10, window_bounds = array<i64: 1, 1, 1024>}]} {
    %c0_i32 = arith.constant 0 : i32
    %0 = arith.cmpi eq, %arg1, %c0_i32 : i32
    %1 = arith.extui %0 : i1 to i32
    %c0_i32_0 = arith.constant 0 : i32
    %2 = arith.cmpi ne, %1, %c0_i32_0 : i32
    scf.if %2 {
      %cst_34 = arith.constant 0xFF800000 : f32
      %45 = vector.broadcast %cst_34 : f32 to vector<8x1024xf32>
      %c0_35 = arith.constant 0 : index
      %c0_36 = arith.constant 0 : index
      %46 = vector.load %arg13[%c0_35, %c0_36] : memref<8x1024xf32, #tpu.memory_space<vmem>>, vector<8x1024xf32>
      tpu.vector_store %arg13[%c0_35, %c0_36], %45 {strides = array<i32>} : memref<8x1024xf32, #tpu.memory_space<vmem>>, vector<8x1024xf32>,
    } else {
    }
    %c0 = arith.constant 0 : index
    %c0_1 = arith.constant 0 : index
    %c0_2 = arith.constant 0 : index
    %3 = vector.load %arg2[%c0, %c0_1, %c0_2] : memref<1x16x8xbf16, #tpu.memory_space<vmem>>, vector<1x16x8xbf16>
    %4 = vector.shape_cast %3 : vector<1x16x8xbf16> to vector<16x8xbf16>
    %c0_3 = arith.constant 0 : index
    %c0_4 = arith.constant 0 : index
    %c0_5 = arith.constant 0 : index
    %5 = vector.load %arg3[%c0_3, %c0_4, %c0_5] : memref<1x8x64xbf16, #tpu.memory_space<vmem>>, vector<1x8x64xbf16>
    %6 = vector.shape_cast %5 : vector<1x8x64xbf16> to vector<8x64xbf16>
    %cst = arith.constant dense<0.000000e+00> : vector<16x64xf32>
    %7 = tpu.matmul %4, %6, %cst {dimension_numbers = #tpu.dot_dimension_numbers<[1], [0], [0], [1], [0, 0, 1, 1], [], []>} : vector<16x8xbf16>, vector<8x64xbf16>, vector<16x64xf32> -> vector<16x64xf32>
    %c0_6 = arith.constant 0 : index
    %c0_7 = arith.constant 0 : index
    %8 = vector.load %arg4[%c0_6, %c0_7] : memref<1x64xf32, #tpu.memory_space<vmem>>, vector<1x64xf32>
    %9 = vector.broadcast %8 : vector<1x64xf32> to vector<16x64xf32>
    %10 = arith.mulf %7, %9 : vector<16x64xf32>
    %c0_8 = arith.constant 0 : index
    %c0_9 = arith.constant 0 : index
    %11 = vector.load %arg5[%c0_8, %c0_9] : memref<1x64xf32, #tpu.memory_space<vmem>>, vector<1x64xf32>
    %12 = vector.broadcast %11 : vector<1x64xf32> to vector<16x64xf32>
    %13 = arith.addf %10, %12 : vector<16x64xf32>
    %cst_10 = arith.constant 0.000000e+00 : f32
    %14 = vector.broadcast %cst_10 : f32 to vector<16x64xf32>
    %15 = arith.maximumf %13, %14 : vector<16x64xf32>
    %c0_11 = arith.constant 0 : index
    %c0_12 = arith.constant 0 : index
    %c0_13 = arith.constant 0 : index
    %16 = vector.load %arg6[%c0_11, %c0_12, %c0_13] : memref<1x64x128xbf16, #tpu.memory_space<vmem>>, vector<1x64x128xbf16>
    %17 = vector.shape_cast %16 : vector<1x64x128xbf16> to vector<64x128xbf16>
    %18 = arith.truncf %15 : vector<16x64xf32> to vector<16x64xbf16>
    %cst_14 = arith.constant dense<0.000000e+00> : vector<16x128xf32>
    %19 = tpu.matmul %18, %17, %cst_14 {dimension_numbers = #tpu.dot_dimension_numbers<[1], [0], [0], [1], [0, 0, 1, 1], [], []>} : vector<16x64xbf16>, vector<64x128xbf16>, vector<16x128xf32> -> vector<16x128xf32>
    %c0_15 = arith.constant 0 : index
    %c0_16 = arith.constant 0 : index
    %20 = vector.load %arg7[%c0_15, %c0_16] : memref<1x128xf32, #tpu.memory_space<vmem>>, vector<1x128xf32>
    %21 = vector.broadcast %20 : vector<1x128xf32> to vector<16x128xf32>
    %22 = arith.mulf %19, %21 : vector<16x128xf32>
    %c0_17 = arith.constant 0 : index
    %c0_18 = arith.constant 0 : index
    %23 = vector.load %arg8[%c0_17, %c0_18] : memref<1x128xf32, #tpu.memory_space<vmem>>, vector<1x128xf32>
    %24 = vector.broadcast %23 : vector<1x128xf32> to vector<16x128xf32>
    %25 = arith.addf %22, %24 : vector<16x128xf32>
    %cst_19 = arith.constant 0.000000e+00 : f32
    %26 = vector.broadcast %cst_19 : f32 to vector<16x128xf32>
    %27 = arith.maximumf %25, %26 : vector<16x128xf32>
    %c0_20 = arith.constant 0 : index
    %c0_21 = arith.constant 0 : index
    %28 = vector.load %arg9[%c0_20, %c0_21] : memref<128x1024xbf16, #tpu.memory_space<vmem>>, vector<128x1024xbf16>
    %29 = arith.truncf %27 : vector<16x128xf32> to vector<16x128xbf16>
    %cst_22 = arith.constant dense<0.000000e+00> : vector<16x1024xf32>
    %30 = tpu.matmul %29, %28, %cst_22 {dimension_numbers = #tpu.dot_dimension_numbers<[1], [0], [0], [1], [0, 0, 1, 1], [], []>} : vector<16x128xbf16>, vector<128x1024xbf16>, vector<16x1024xf32> -> vector<16x1024xf32>
    %c0_23 = arith.constant 0 : index
    %c0_24 = arith.constant 0 : index
    %31 = vector.load %arg10[%c0_23, %c0_24] : memref<1x1024xf32, #tpu.memory_space<vmem>>, vector<1x1024xf32>
    %32 = vector.broadcast %31 : vector<1x1024xf32> to vector<16x1024xf32>
    %33 = arith.mulf %30, %32 : vector<16x1024xf32>
    %c0_25 = arith.constant 0 : index
    %c0_26 = arith.constant 0 : index
    %34 = vector.load %arg11[%c0_25, %c0_26] : memref<1x1024xf32, #tpu.memory_space<vmem>>, vector<1x1024xf32>
    %35 = vector.broadcast %34 : vector<1x1024xf32> to vector<16x1024xf32>
    %36 = arith.addf %33, %35 : vector<16x1024xf32>
    %37 = vector.shape_cast %36 : vector<16x1024xf32> to vector<2x8x1024xf32>
    %cst_27 = arith.constant dense<0xFF800000> : vector<8x1024xf32>
    %38 = vector.multi_reduction <maximumf>, %37, %cst_27 [0] : vector<2x8x1024xf32> to vector<8x1024xf32>
    %c0_28 = arith.constant 0 : index
    %c0_29 = arith.constant 0 : index
    %39 = vector.load %arg13[%c0_28, %c0_29] : memref<8x1024xf32, #tpu.memory_space<vmem>>, vector<8x1024xf32>
    %40 = arith.maximumf %39, %38 : vector<8x1024xf32>
    %c0_30 = arith.constant 0 : index
    %c0_31 = arith.constant 0 : index
    %41 = vector.load %arg13[%c0_30, %c0_31] : memref<8x1024xf32, #tpu.memory_space<vmem>>, vector<8x1024xf32>
    tpu.vector_store %arg13[%c0_30, %c0_31], %40 {strides = array<i32>} : memref<8x1024xf32, #tpu.memory_space<vmem>>, vector<8x1024xf32>,
    %c0_i32_32 = arith.constant 0 : i32
    %42 = arith.cmpi eq, %arg1, %c0_i32_32 : i32
    %43 = arith.extui %42 : i1 to i32
    %c0_i32_33 = arith.constant 0 : i32
    %44 = arith.cmpi ne, %43, %c0_i32_33 : i32
    scf.if %44 {
      %c0_34 = arith.constant 0 : index
      %c0_35 = arith.constant 0 : index
      %45 = vector.load %arg13[%c0_34, %c0_35] : memref<8x1024xf32, #tpu.memory_space<vmem>>, vector<8x1024xf32>
      %cst_36 = arith.constant dense<0xFF800000> : vector<1024xf32>
      %46 = vector.multi_reduction <maximumf>, %45, %cst_36 [0] : vector<8x1024xf32> to vector<1024xf32>
      %47 = vector.shape_cast %46 : vector<1024xf32> to vector<1x1024xf32>
      %c0_37 = arith.constant 0 : index
      %c0_38 = arith.constant 0 : index
      %c0_39 = arith.constant 0 : index
      %48 = vector.load %arg12[%c0_37, %c0_38, %c0_39] : memref<1x1x1024xf32, #tpu.memory_space<vmem>>, vector<1x1x1024xf32>
      %49 = vector.shape_cast %48 : vector<1x1x1024xf32> to vector<1x1024xf32>
      %50 = vector.shape_cast %47 : vector<1x1024xf32> to vector<1x1x1024xf32>
      tpu.vector_store %arg12[%c0_37, %c0_38, %c0_39], %50 {strides = array<i32>} : memref<1x1x1024xf32, #tpu.memory_space<vmem>>, vector<1x1x1024xf32>,
    } else {
    }
    return
  }
  func.func @transform_0(%arg0: i32, %arg1: i32) -> (i32, i32, i32) {
    %c0_i32 = arith.constant 0 : i32
    %c0_i32_0 = arith.constant 0 : i32
    return %arg0, %arg1, %c0_i32 : i32, i32, i32
  }
  func.func @transform_1(%arg0: i32, %arg1: i32) -> (i32, i32, i32) {
    %c0_i32 = arith.constant 0 : i32
    %c0_i32_0 = arith.constant 0 : i32
    %c0_i32_1 = arith.constant 0 : i32
    return %arg0, %c0_i32, %c0_i32_0 : i32, i32, i32
  }
  func.func @transform_2(%arg0: i32, %arg1: i32) -> (i32, i32) {
    %c0_i32 = arith.constant 0 : i32
    %c0_i32_0 = arith.constant 0 : i32
    %c0_i32_1 = arith.constant 0 : i32
    return %c0_i32, %c0_i32_0 : i32, i32
  }
  func.func @transform_3(%arg0: i32, %arg1: i32) -> (i32, i32) {
    %c0_i32 = arith.constant 0 : i32
    %c0_i32_0 = arith.constant 0 : i32
    %c0_i32_1 = arith.constant 0 : i32
    return %c0_i32, %c0_i32_0 : i32, i32
  }
  func.func @transform_4(%arg0: i32, %arg1: i32) -> (i32, i32, i32) {
    %c0_i32 = arith.constant 0 : i32
    %c0_i32_0 = arith.constant 0 : i32
    %c0_i32_1 = arith.constant 0 : i32
    return %arg0, %c0_i32, %c0_i32_0 : i32, i32, i32
  }
  func.func @transform_5(%arg0: i32, %arg1: i32) -> (i32, i32) {
    %c0_i32 = arith.constant 0 : i32
    %c0_i32_0 = arith.constant 0 : i32
    %c0_i32_1 = arith.constant 0 : i32
    return %c0_i32, %c0_i32_0 : i32, i32
  }
  func.func @transform_6(%arg0: i32, %arg1: i32) -> (i32, i32) {
    %c0_i32 = arith.constant 0 : i32
    %c0_i32_0 = arith.constant 0 : i32
    %c0_i32_1 = arith.constant 0 : i32
    return %c0_i32, %c0_i32_0 : i32, i32
  }
  func.func @transform_7(%arg0: i32, %arg1: i32) -> (i32, i32) {
    %c0_i32 = arith.constant 0 : i32
    %c0_i32_0 = arith.constant 0 : i32
    %c0_i32_1 = arith.constant 0 : i32
    return %c0_i32, %c0_i32_0 : i32, i32
  }
  func.func @transform_8(%arg0: i32, %arg1: i32) -> (i32, i32) {
    %c0_i32 = arith.constant 0 : i32
    %c0_i32_0 = arith.constant 0 : i32
    %c0_i32_1 = arith.constant 0 : i32
    return %c0_i32, %c0_i32_0 : i32, i32
  }
  func.func @transform_9(%arg0: i32, %arg1: i32) -> (i32, i32) {
    %c0_i32 = arith.constant 0 : i32
    %c0_i32_0 = arith.constant 0 : i32
    %c0_i32_1 = arith.constant 0 : i32
    return %c0_i32, %c0_i32_0 : i32, i32
  }
  func.func @transform_10(%arg0: i32, %arg1: i32) -> (i32, i32, i32) {
    %c0_i32 = arith.constant 0 : i32
    %c0_i32_0 = arith.constant 0 : i32
    %c0_i32_1 = arith.constant 0 : i32
    return %arg0, %c0_i32, %c0_i32_0 : i32, i32, i32
  }
}

module attributes {stable_mosaic.version = 11 : i64} {
  func.func @_fc_chain_kernel(%arg0: i32, %arg1: memref<8x1024xbf16, #tpu.memory_space<vmem>>, %arg2: memref<1024x512xbf16, #tpu.memory_space<vmem>>, %arg3: memref<1x512xf32, #tpu.memory_space<vmem>>, %arg4: memref<1x512xf32, #tpu.memory_space<vmem>>, %arg5: memref<512x256xbf16, #tpu.memory_space<vmem>>, %arg6: memref<1x256xf32, #tpu.memory_space<vmem>>, %arg7: memref<1x256xf32, #tpu.memory_space<vmem>>, %arg8: memref<256x128xbf16, #tpu.memory_space<vmem>>, %arg9: memref<1x128xf32, #tpu.memory_space<vmem>>, %arg10: memref<1x128xf32, #tpu.memory_space<vmem>>, %arg11: memref<8x128xf32, #tpu.memory_space<vmem>>) attributes {dimension_semantics = [#tpu.dimension_semantics<parallel>], iteration_bounds = array<i64: 1>, scalar_prefetch = 0 : i64, scratch_operands = 0 : i64, tpu.core_type = #tpu.core_type<tc>, window_params = [{transform_indices = @transform_0, window_bounds = array<i64: 8, 1024>}, {pipeline_mode = #tpu.pipeline_mode<synchronous>, transform_indices = @transform_1, window_bounds = array<i64: 1024, 512>}, {pipeline_mode = #tpu.pipeline_mode<synchronous>, transform_indices = @transform_2, window_bounds = array<i64: 1, 512>}, {pipeline_mode = #tpu.pipeline_mode<synchronous>, transform_indices = @transform_3, window_bounds = array<i64: 1, 512>}, {pipeline_mode = #tpu.pipeline_mode<synchronous>, transform_indices = @transform_4, window_bounds = array<i64: 512, 256>}, {pipeline_mode = #tpu.pipeline_mode<synchronous>, transform_indices = @transform_5, window_bounds = array<i64: 1, 256>}, {pipeline_mode = #tpu.pipeline_mode<synchronous>, transform_indices = @transform_6, window_bounds = array<i64: 1, 256>}, {pipeline_mode = #tpu.pipeline_mode<synchronous>, transform_indices = @transform_7, window_bounds = array<i64: 256, 128>}, {pipeline_mode = #tpu.pipeline_mode<synchronous>, transform_indices = @transform_8, window_bounds = array<i64: 1, 128>}, {pipeline_mode = #tpu.pipeline_mode<synchronous>, transform_indices = @transform_9, window_bounds = array<i64: 1, 128>}, {transform_indices = @transform_10, window_bounds = array<i64: 8, 128>}]} {
    %c0 = arith.constant 0 : index
    %c0_0 = arith.constant 0 : index
    %0 = vector.load %arg1[%c0, %c0_0] : memref<8x1024xbf16, #tpu.memory_space<vmem>>, vector<8x1024xbf16>
    %c0_1 = arith.constant 0 : index
    %c0_2 = arith.constant 0 : index
    %1 = vector.load %arg2[%c0_1, %c0_2] : memref<1024x512xbf16, #tpu.memory_space<vmem>>, vector<1024x512xbf16>
    %cst = arith.constant dense<0.000000e+00> : vector<8x512xf32>
    %2 = tpu.matmul %0, %1, %cst {dimension_numbers = #tpu.dot_dimension_numbers<[1], [0], [0], [1], [0, 0, 1, 1], [], []>} : vector<8x1024xbf16>, vector<1024x512xbf16>, vector<8x512xf32> -> vector<8x512xf32>
    %c0_3 = arith.constant 0 : index
    %c0_4 = arith.constant 0 : index
    %3 = vector.load %arg3[%c0_3, %c0_4] : memref<1x512xf32, #tpu.memory_space<vmem>>, vector<1x512xf32>
    %4 = vector.broadcast %3 : vector<1x512xf32> to vector<8x512xf32>
    %5 = arith.mulf %2, %4 : vector<8x512xf32>
    %c0_5 = arith.constant 0 : index
    %c0_6 = arith.constant 0 : index
    %6 = vector.load %arg4[%c0_5, %c0_6] : memref<1x512xf32, #tpu.memory_space<vmem>>, vector<1x512xf32>
    %7 = vector.broadcast %6 : vector<1x512xf32> to vector<8x512xf32>
    %8 = arith.addf %5, %7 : vector<8x512xf32>
    %cst_7 = arith.constant 0.000000e+00 : f32
    %9 = vector.broadcast %cst_7 : f32 to vector<8x512xf32>
    %10 = arith.maximumf %8, %9 : vector<8x512xf32>
    %11 = arith.truncf %10 : vector<8x512xf32> to vector<8x512xbf16>
    %c0_8 = arith.constant 0 : index
    %c0_9 = arith.constant 0 : index
    %12 = vector.load %arg5[%c0_8, %c0_9] : memref<512x256xbf16, #tpu.memory_space<vmem>>, vector<512x256xbf16>
    %cst_10 = arith.constant dense<0.000000e+00> : vector<8x256xf32>
    %13 = tpu.matmul %11, %12, %cst_10 {dimension_numbers = #tpu.dot_dimension_numbers<[1], [0], [0], [1], [0, 0, 1, 1], [], []>} : vector<8x512xbf16>, vector<512x256xbf16>, vector<8x256xf32> -> vector<8x256xf32>
    %c0_11 = arith.constant 0 : index
    %c0_12 = arith.constant 0 : index
    %14 = vector.load %arg6[%c0_11, %c0_12] : memref<1x256xf32, #tpu.memory_space<vmem>>, vector<1x256xf32>
    %15 = vector.broadcast %14 : vector<1x256xf32> to vector<8x256xf32>
    %16 = arith.mulf %13, %15 : vector<8x256xf32>
    %c0_13 = arith.constant 0 : index
    %c0_14 = arith.constant 0 : index
    %17 = vector.load %arg7[%c0_13, %c0_14] : memref<1x256xf32, #tpu.memory_space<vmem>>, vector<1x256xf32>
    %18 = vector.broadcast %17 : vector<1x256xf32> to vector<8x256xf32>
    %19 = arith.addf %16, %18 : vector<8x256xf32>
    %cst_15 = arith.constant 0.000000e+00 : f32
    %20 = vector.broadcast %cst_15 : f32 to vector<8x256xf32>
    %21 = arith.maximumf %19, %20 : vector<8x256xf32>
    %22 = arith.truncf %21 : vector<8x256xf32> to vector<8x256xbf16>
    %c0_16 = arith.constant 0 : index
    %c0_17 = arith.constant 0 : index
    %23 = vector.load %arg8[%c0_16, %c0_17] : memref<256x128xbf16, #tpu.memory_space<vmem>>, vector<256x128xbf16>
    %cst_18 = arith.constant dense<0.000000e+00> : vector<8x128xf32>
    %24 = tpu.matmul %22, %23, %cst_18 {dimension_numbers = #tpu.dot_dimension_numbers<[1], [0], [0], [1], [0, 0, 1, 1], [], []>} : vector<8x256xbf16>, vector<256x128xbf16>, vector<8x128xf32> -> vector<8x128xf32>
    %c0_19 = arith.constant 0 : index
    %c0_20 = arith.constant 0 : index
    %25 = vector.load %arg9[%c0_19, %c0_20] : memref<1x128xf32, #tpu.memory_space<vmem>>, vector<1x128xf32>
    %26 = vector.broadcast %25 : vector<1x128xf32> to vector<8x128xf32>
    %27 = arith.mulf %24, %26 : vector<8x128xf32>
    %c0_21 = arith.constant 0 : index
    %c0_22 = arith.constant 0 : index
    %28 = vector.load %arg10[%c0_21, %c0_22] : memref<1x128xf32, #tpu.memory_space<vmem>>, vector<1x128xf32>
    %29 = vector.broadcast %28 : vector<1x128xf32> to vector<8x128xf32>
    %30 = arith.addf %27, %29 : vector<8x128xf32>
    %c0_23 = arith.constant 0 : index
    %c0_24 = arith.constant 0 : index
    %31 = vector.load %arg11[%c0_23, %c0_24] : memref<8x128xf32, #tpu.memory_space<vmem>>, vector<8x128xf32>
    tpu.vector_store %arg11[%c0_23, %c0_24], %30 {strides = array<i32>} : memref<8x128xf32, #tpu.memory_space<vmem>>, vector<8x128xf32>,
    return
  }
  func.func @transform_0(%arg0: i32) -> (i32, i32) {
    %c0_i32 = arith.constant 0 : i32
    %c0_i32_0 = arith.constant 0 : i32
    return %arg0, %c0_i32 : i32, i32
  }
  func.func @transform_1(%arg0: i32) -> (i32, i32) {
    %c0_i32 = arith.constant 0 : i32
    %c0_i32_0 = arith.constant 0 : i32
    %c0_i32_1 = arith.constant 0 : i32
    return %c0_i32, %c0_i32_0 : i32, i32
  }
  func.func @transform_2(%arg0: i32) -> (i32, i32) {
    %c0_i32 = arith.constant 0 : i32
    %c0_i32_0 = arith.constant 0 : i32
    %c0_i32_1 = arith.constant 0 : i32
    return %c0_i32, %c0_i32_0 : i32, i32
  }
  func.func @transform_3(%arg0: i32) -> (i32, i32) {
    %c0_i32 = arith.constant 0 : i32
    %c0_i32_0 = arith.constant 0 : i32
    %c0_i32_1 = arith.constant 0 : i32
    return %c0_i32, %c0_i32_0 : i32, i32
  }
  func.func @transform_4(%arg0: i32) -> (i32, i32) {
    %c0_i32 = arith.constant 0 : i32
    %c0_i32_0 = arith.constant 0 : i32
    %c0_i32_1 = arith.constant 0 : i32
    return %c0_i32, %c0_i32_0 : i32, i32
  }
  func.func @transform_5(%arg0: i32) -> (i32, i32) {
    %c0_i32 = arith.constant 0 : i32
    %c0_i32_0 = arith.constant 0 : i32
    %c0_i32_1 = arith.constant 0 : i32
    return %c0_i32, %c0_i32_0 : i32, i32
  }
  func.func @transform_6(%arg0: i32) -> (i32, i32) {
    %c0_i32 = arith.constant 0 : i32
    %c0_i32_0 = arith.constant 0 : i32
    %c0_i32_1 = arith.constant 0 : i32
    return %c0_i32, %c0_i32_0 : i32, i32
  }
  func.func @transform_7(%arg0: i32) -> (i32, i32) {
    %c0_i32 = arith.constant 0 : i32
    %c0_i32_0 = arith.constant 0 : i32
    %c0_i32_1 = arith.constant 0 : i32
    return %c0_i32, %c0_i32_0 : i32, i32
  }
  func.func @transform_8(%arg0: i32) -> (i32, i32) {
    %c0_i32 = arith.constant 0 : i32
    %c0_i32_0 = arith.constant 0 : i32
    %c0_i32_1 = arith.constant 0 : i32
    return %c0_i32, %c0_i32_0 : i32, i32
  }
  func.func @transform_9(%arg0: i32) -> (i32, i32) {
    %c0_i32 = arith.constant 0 : i32
    %c0_i32_0 = arith.constant 0 : i32
    %c0_i32_1 = arith.constant 0 : i32
    return %c0_i32, %c0_i32_0 : i32, i32
  }
  func.func @transform_10(%arg0: i32) -> (i32, i32) {
    %c0_i32 = arith.constant 0 : i32
    %c0_i32_0 = arith.constant 0 : i32
    return %arg0, %c0_i32 : i32, i32
  }
}

</mosaic_0001>

<bundles_post_ra>
// kernel: pointnet_forward.6
= control target key start
LH: loop header
LB: loop body
LE: loop exit
PB: predicated region body
PF: predicated region fallthrough
CT: control target
= control target key end

     0   :  { %s2656_s0 = inlined_call_operand.vmem [shape: bf16[2,16,8], index: 0, kind: input, shape index: {}]   ;;  %s2657_s1 = inlined_call_operand.hbm [shape: bf16[8,64], index: 1, kind: input, shape index: {}]   ;;  %s2658_s2 = inlined_call_operand.hbm [shape: f32[1,64], index: 2, kind: input, shape index: {}]   ;;  %s2659_s3 = inlined_call_operand.hbm [shape: f32[1,64], index: 3, kind: input, shape index: {}]   ;;  %s2660_s4 = inlined_call_operand.hbm [shape: bf16[64,128], index: 4, kind: input, shape index: {}]   ;;  %s2661_s5 = inlined_call_operand.hbm [shape: f32[1,128], index: 5, kind: input, shape index: {}]   ;;  %s2662_s6 = inlined_call_operand.hbm [shape: f32[1,128], index: 6, kind: input, shape index: {}]   ;;  %s2663_s7 = inlined_call_operand.hbm [shape: bf16[128,1024], index: 7, kind: input, shape index: {}]   ;;  %s2664_s8 = inlined_call_operand.hbm [shape: f32[1,1024], index: 8, kind: input, shape index: {}]   ;;  %s2665_s9 = inlined_call_operand.hbm [shape: f32[1,1024], index: 9, kind: input, shape index: {}]   ;;  %s2666_s10 = inlined_call_operand.vmem [shape: f32[2,1,1024], index: 10, kind: output, shape index: {}]  }
   0x1   :  { %2670 = sst [smem:[#allocation22_spill]] %s2657_s1 }
   0x2   :  { %2671 = sst [smem:[#allocation23_spill]] %s2658_s2 }
   0x3   :  { %15 = vsyncpa [#allocation4], 0 }
   0x4   :  { %16 = vsyncpa [#allocation6], 0 }
   0x5   :  { %17 = vsyncpa [#allocation9], 0 }
   0x6   :  { %18 = vsyncpa [#allocation12], 0 }
   0x7   :  { %19 = vsyncpa [#allocation15], 0  ;;  %s2311_s13 = smov 0   ;;  %s2313_s14 = smov 0  }
   0x8   :  { %s2315_s15 = smov 0  }
   0x9 LB: > { %s2239_s16 = smov [#allocation5]   ;;  %s1686_s18 = sadd.s32 4294967295, %s2237_s15   ;;  %s2237_s15 = sphi %s2315_s15, %s25_s15   ;;  %s2233_s14 = sphi %s2313_s14, %s2683_s14   ;;  %s2229_s13 = sphi %s2311_s13, %s2682_s13  }
   0xa   : > { %s309_s17 = sshll.u32 %s2239_s16, 4  ;;  %p1688_p0 = scmp.ge.s32.totalorder %s2237_s15, 1  ;;  %s2333_s17 = int_to_ptr.vmem [resolvable:$true] %s309_s17 }
   0xb   : > { %p285_p1 = scmp.lt.s32.totalorder %s2237_s15, 3  ;;  %p2329_p2 = scmp.eq.s32.totalorder %s1686_s18, 0 }
   0xc   : > { %s2240_s21 = smov [#allocation8]   ;;  %s2241_s24 = smov [#allocation11]  }
   0xd   : > { %s2672_s19 = scalar_select %p2329_p2, 1, 0 }
   0xe   : > { %p2335_p3 = pnand %p1688_p0, %p285_p1  ;;  %s330_s22 = sshll.u32 %s2240_s21, 4  ;;  %s2341_s22 = int_to_ptr.vmem [resolvable:$true] %s330_s22 }
   0xf   : > { %s355_s25 = sshll.u32 %s2241_s24, 4  ;;  %s2242_s26 = smov [#allocation14]   ;;  %s2349_s25 = int_to_ptr.vmem [resolvable:$true] %s355_s25 }
  0x10   : > { %s2673_s20 = scalar_select %p2335_p3, 1, 0 }
  0x11   : > { %p1851_p4 = pneg %p2335_p3  ;;  %s2351_s27 = sshll.u32 %s2242_s26, 4  ;;  %s380_s27 = int_to_ptr.vmem [resolvable:$true] %s2351_s27 }
  0x12   : > { %s2675_s2 = sld [smem:[#allocation23_spill]] }
  0x13   : > { %p2345_p5 = pnand %p2329_p2, %p1851_p4 }
  0x15   : > { %p2361_p7 = pneg %p2345_p5 }
  0x18   : > { %s1943_s30 = scalar_lea.hbm %s2675_s2, 16 }
  0x19   : > { %p1944_p6 = scmp.ne.s32.totalorder %s2675_s2, %s1943_s30  ;;  %p1950_p10 = scmp.lt.u32.totalorder %s1943_s30, %s2675_s2 }
  0x1b   : > { %p1946_p8 = pnand %p2361_p7, %p1944_p6 }
  0x1d   : > { %p1947_p9 = pneg %p1946_p8 }
  0x1f   : > { %p1952_p11 = pnand %p1950_p10, %p1947_p9 }
  0x21   : > { %1955 = shalt.err (!%p1952_p11)
}
  0x22   : > { %s1956_s24 = scalar_lea.vmem %s2333_s17, 16  ;;  %s1963_s26 = scalar_lea.vmem %s2333_s17, 32 }
  0x23   : > { %p1957_p12 = scmp.ne.s32.totalorder %s2333_s17, %s1956_s24  ;;  %p1964_p1 = scmp.lt.s32.totalorder %s2333_s17, %s2333_s17 }
  0x24   : > { %p1965_p4 = scmp.lt.s32.totalorder %s1963_s26, %s1956_s24 }
  0x25   : > { %p1959_p13 = pnand %p1957_p12, %p2361_p7 }
  0x26   : > { %p1966_p6 = por %p1965_p4, %p1964_p1 }
  0x27   : > { %p1960_p0 = pneg %p1959_p13 }
  0x29   : > { %p1967_p8 = pnand %p1966_p6, %p1960_p0 }
  0x2b   : > { %1970 = shalt.err (!%p1967_p8)
}
  0x2c   : > { %1857 = dma.hbm_to_vmem [thread:$0]  (!%p2345_p5), %s2675_s2, 16, %s2333_s17, [#allocation6]  }
  0x2d   : > { %s1971_s12 = scalar_lea.hbm %s2660_s4, 512 }
  0x2e   : > { %p1972_p9 = scmp.ne.s32.totalorder %s2660_s4, %s1971_s12  ;;  %p1978_p12 = scmp.lt.u32.totalorder %s1971_s12, %s2660_s4 }
  0x30   : > { %p1974_p10 = pnand %p1972_p9, %p2361_p7 }
  0x32   : > { %p1975_p11 = pneg %p1974_p10 }
  0x34   : > { %p1980_p13 = pnand %p1978_p12, %p1975_p11 }
  0x36   : > { %1983 = shalt.err (!%p1980_p13)
}
  0x37   : > { %s1984_s17 = scalar_lea.vmem %s2341_s22, 512  ;;  %p1992_p6 = scmp.lt.s32.totalorder %s2341_s22, %s2341_s22 }
  0x38   : > { %p1985_p0 = scmp.ne.s32.totalorder %s2341_s22, %s1984_s17  ;;  %p1993_p8 = scmp.lt.s32.totalorder %s1984_s17, %s1984_s17 }
  0x3a   : > { %p1987_p1 = pnand %p1985_p0, %p2361_p7  ;;  %p1994_p9 = por %p1993_p8, %p1992_p6 }
  0x3c   : > { %p1988_p4 = pneg %p1987_p1 }
  0x3e   : > { %p1995_p10 = pnand %p1994_p9, %p1988_p4 }
  0x40   : > { %1998 = shalt.err (!%p1995_p10)
}
  0x41   : > { %s2243_s28 = smov 64   ;;  %s2244_s29 = smov 4  }
  0x42   : > { %1863 = dma.hbm_to_vmem [thread:$0]  (!%p2345_p5), %s2660_s4, 512, %s2341_s22, [#allocation9], %s2243_s28, %s2243_s28, %s2244_s29  }
  0x43   : > { %s1999_s21 = scalar_lea.hbm %s2662_s6, 16 }
  0x44   : > { %p2000_p11 = scmp.ne.s32.totalorder %s2662_s6, %s1999_s21  ;;  %p2006_p0 = scmp.lt.u32.totalorder %s1999_s21, %s2662_s6 }
  0x46   : > { %p2002_p12 = pnand %p2000_p11, %p2361_p7 }
  0x48   : > { %p2003_p13 = pneg %p2002_p12 }
  0x4a   : > { %p2008_p1 = pnand %p2006_p0, %p2003_p13 }
  0x4c   : > { %2011 = shalt.err (!%p2008_p1)
}
  0x4d   : > { %s2012_s22 = scalar_lea.vmem %s2349_s25, 16  ;;  %s2019_s28 = scalar_lea.vmem %s2349_s25, 32 }
  0x4e   : > { %p2013_p4 = scmp.ne.s32.totalorder %s2349_s25, %s2012_s22  ;;  %p2020_p9 = scmp.lt.s32.totalorder %s2349_s25, %s2349_s25 }
  0x4f   : > { %p2021_p10 = scmp.lt.s32.totalorder %s2019_s28, %s2012_s22 }
  0x50   : > { %p2015_p6 = pnand %p2013_p4, %p2361_p7 }
  0x51   : > { %p2022_p11 = por %p2021_p10, %p2020_p9 }
  0x52   : > { %p2016_p8 = pneg %p2015_p6 }
  0x54   : > { %p2023_p12 = pnand %p2022_p11, %p2016_p8 }
  0x56   : > { %2026 = shalt.err (!%p2023_p12)
}
  0x57   : > { %1869 = dma.hbm_to_vmem [thread:$0]  (!%p2345_p5), %s2662_s6, 16, %s2349_s25, [#allocation12]  }
  0x58   : > { %s2027_s12 = scalar_lea.hbm %s2664_s8, 128 }
  0x59   : > { %p2028_p13 = scmp.ne.s32.totalorder %s2664_s8, %s2027_s12  ;;  %p2034_p4 = scmp.lt.u32.totalorder %s2027_s12, %s2664_s8 }
  0x5b   : > { %p2030_p0 = pnand %p2028_p13, %p2361_p7 }
  0x5d   : > { %p2031_p1 = pneg %p2030_p0 }
  0x5f   : > { %p2036_p6 = pnand %p2034_p4, %p2031_p1 }
  0x61   : > { %2039 = shalt.err (!%p2036_p6)
}
  0x62   : > { %s2040_s17 = scalar_lea.vmem %s380_s27, 128  ;;  %p2048_p11 = scmp.lt.s32.totalorder %s380_s27, %s380_s27 }
  0x63   : > { %p2041_p8 = scmp.ne.s32.totalorder %s380_s27, %s2040_s17  ;;  %p2049_p12 = scmp.lt.s32.totalorder %s2040_s17, %s2040_s17 }
  0x65   : > { %p2043_p9 = pnand %p2041_p8, %p2361_p7  ;;  %p2050_p2 = por %p2049_p12, %p2048_p11 }
  0x67   : > { %p2044_p10 = pneg %p2043_p9 }
  0x69   : > { %p2051_p3 = pnand %p2050_p2, %p2044_p10 }
  0x6b   : > { %2054 = shalt.err (!%p2051_p3)
}
  0x6c   : > { %1875 = dma.hbm_to_vmem [thread:$0]  (!%p2345_p5), %s2664_s8, 128, %s380_s27, [#allocation15]  }
  0x6d   : > { %s37_s28 = sadd.s32 1, %s2233_s14  ;;  %s2245_s2 = smov [#allocation3]  }
  0x6e   : > { %s298_s29 = sshll.u32 %s2245_s2, 4  ;;  %p2450_p13 = scmp.ge.s32.totalorder %s37_s28, 2  ;;  %s299_s29 = int_to_ptr.vmem [resolvable:$true] %s298_s29 }
  0x6f   : > { %s2678_s1 = sld [smem:[#allocation22_spill]] }
  0x70   : > { %s2677_s30 = scalar_select %p2450_p13, 1, 0 }
  0x75   : > { %s2055_s18 = scalar_lea.hbm %s2678_s1, 64 }
  0x76   : > { %p2056_p2 = scmp.ne.s32.totalorder %s2678_s1, %s2055_s18  ;;  %p2062_p1 = scmp.lt.u32.totalorder %s2055_s18, %s2678_s1 }
  0x78   : > { %p2058_p3 = pnand %p2056_p2, %p2361_p7 }
  0x7a   : > { %p2059_p0 = pneg %p2058_p3 }
  0x7c   : > { %p2064_p4 = pnand %p2062_p1, %p2059_p0 }
  0x7e   : > { %2067 = shalt.err (!%p2064_p4)
}
  0x7f   : > { %s2068_s17 = scalar_lea.vmem %s299_s29, 64  ;;  %p2076_p10 = scmp.lt.s32.totalorder %s299_s29, %s299_s29 }
  0x80   : > { %p2069_p6 = scmp.ne.s32.totalorder %s299_s29, %s2068_s17  ;;  %p2077_p11 = scmp.lt.s32.totalorder %s2068_s17, %s2068_s17 }
  0x82   : > { %p2071_p8 = pnand %p2069_p6, %p2361_p7  ;;  %p2078_p12 = por %p2077_p11, %p2076_p10 }
  0x84   : > { %p2072_p9 = pneg %p2071_p8 }
  0x86   : > { %p2079_p13 = pnand %p2078_p12, %p2072_p9 }
  0x88   : > { %2082 = shalt.err (!%p2079_p13)
}
  0x89   : > { %1854 = dma.hbm_to_vmem [thread:$0]  (!%p2345_p5), %s2678_s1, 64, %s299_s29, [#allocation4]  }
  0x8a   : > { %p2679_p2 = scmp.ne.s32.totalorder %s2677_s30, 0  ;;  %s2246_s2 = smov [#allocation7]  }
  0x8b   : > { %s320_s11 = sshll.u32 %s2246_s2, 4  ;;  %s2247_s12 = smov [#allocation10]   ;;  %s321_s11 = int_to_ptr.vmem [resolvable:$true] %s320_s11 }
  0x8c   : > { %s2685_s28 = smov (%p2679_p2, %s37_s28), 0  ;;  %s344_s18 = sshll.u32 %s2247_s12, 4  ;;  %s2476_s18 = int_to_ptr.vmem [resolvable:$true] %s344_s18 }
  0x8d   : > { %s2083_s27 = scalar_lea.hbm %s2659_s3, 16 }
  0x8e   : > { %p2084_p13 = scmp.ne.s32.totalorder %s2659_s3, %s2083_s27  ;;  %p2090_p1 = scmp.lt.u32.totalorder %s2083_s27, %s2659_s3 }
  0x90   : > { %p2086_p3 = pnand %p2084_p13, %p2361_p7 }
  0x92   : > { %p2087_p0 = pneg %p2086_p3 }
  0x94   : > { %p2092_p4 = pnand %p2090_p1, %p2087_p0 }
  0x96   : > { %2095 = shalt.err (!%p2092_p4)
}
  0x97   : > { %s2096_s25 = scalar_lea.vmem %s321_s11, 16  ;;  %s2103_s22 = scalar_lea.vmem %s321_s11, 32 }
  0x98   : > { %p2097_p6 = scmp.ne.s32.totalorder %s321_s11, %s2096_s25  ;;  %p2104_p10 = scmp.lt.s32.totalorder %s321_s11, %s321_s11 }
  0x99   : > { %p2105_p11 = scmp.lt.s32.totalorder %s2103_s22, %s2096_s25 }
  0x9a   : > { %p2099_p8 = pnand %p2097_p6, %p2361_p7 }
  0x9b   : > { %p2106_p12 = por %p2105_p11, %p2104_p10 }
  0x9c   : > { %p2100_p9 = pneg %p2099_p8 }
  0x9e   : > { %p2107_p2 = pnand %p2106_p12, %p2100_p9 }
  0xa0   : > { %2110 = shalt.err (!%p2107_p2)
}
  0xa1   : > { %1860 = dma.hbm_to_vmem [thread:$0]  (!%p2345_p5), %s2659_s3, 16, %s321_s11, [#allocation6]  }
  0xa2   : > { %s2111_s27 = scalar_lea.hbm %s2661_s5, 16 }
  0xa3   : > { %p2112_p13 = scmp.ne.s32.totalorder %s2661_s5, %s2111_s27  ;;  %p2118_p1 = scmp.lt.u32.totalorder %s2111_s27, %s2661_s5 }
  0xa5   : > { %p2114_p3 = pnand %p2112_p13, %p2361_p7 }
  0xa7   : > { %p2115_p0 = pneg %p2114_p3 }
  0xa9   : > { %p2120_p4 = pnand %p2118_p1, %p2115_p0 }
  0xab   : > { %2123 = shalt.err (!%p2120_p4)
}
  0xac   : > { %s2124_s11 = scalar_lea.vmem %s2476_s18, 16  ;;  %s2131_s25 = scalar_lea.vmem %s2476_s18, 32 }
  0xad   : > { %p2125_p6 = scmp.ne.s32.totalorder %s2476_s18, %s2124_s11  ;;  %p2132_p10 = scmp.lt.s32.totalorder %s2476_s18, %s2476_s18 }
  0xae   : > { %p2133_p11 = scmp.lt.s32.totalorder %s2131_s25, %s2124_s11 }
  0xaf   : > { %p2127_p8 = pnand %p2125_p6, %p2361_p7 }
  0xb0   : > { %p2134_p12 = por %p2133_p11, %p2132_p10 }
  0xb1   : > { %p2128_p9 = pneg %p2127_p8 }
  0xb3   : > { %p2135_p2 = pnand %p2134_p12, %p2128_p9 }
  0xb5   : > { %2138 = shalt.err (!%p2135_p2)
}
  0xb6   : > { %1866 = dma.hbm_to_vmem [thread:$0]  (!%p2345_p5), %s2661_s5, 16, %s2476_s18, [#allocation9]  }
  0xb7   : > { %s2248_s12 = smov [#allocation13]   ;;  %s2139_s26 = scalar_lea.hbm %s2663_s7, 8192 }
  0xb8   : > { %s365_s21 = sshll.u32 %s2248_s12, 4  ;;  %p2140_p13 = scmp.ne.s32.totalorder %s2663_s7, %s2139_s26  ;;  %s366_s21 = int_to_ptr.vmem [resolvable:$true] %s365_s21 }
  0xb9   : > { %p2146_p1 = scmp.lt.u32.totalorder %s2139_s26, %s2663_s7 }
  0xba   : > { %p2142_p3 = pnand %p2140_p13, %p2361_p7 }
  0xbc   : > { %p2143_p0 = pneg %p2142_p3 }
  0xbe   : > { %p2148_p4 = pnand %p2146_p1, %p2143_p0 }
  0xc0   : > { %2151 = shalt.err (!%p2148_p4)
}
  0xc1   : > { %s2152_s18 = scalar_lea.vmem %s366_s21, 8192  ;;  %p2160_p10 = scmp.lt.s32.totalorder %s366_s21, %s366_s21 }
  0xc2   : > { %p2153_p6 = scmp.ne.s32.totalorder %s366_s21, %s2152_s18  ;;  %p2161_p11 = scmp.lt.s32.totalorder %s2152_s18, %s2152_s18 }
  0xc4   : > { %p2155_p8 = pnand %p2153_p6, %p2361_p7  ;;  %p2162_p12 = por %p2161_p11, %p2160_p10 }
  0xc6   : > { %p2156_p9 = pneg %p2155_p8 }
  0xc8   : > { %p2163_p2 = pnand %p2162_p12, %p2156_p9 }
  0xca   : > { %2166 = shalt.err (!%p2163_p2)
}
  0xcb   : > { %s2249_s25 = smov 512   ;;  %s2250_s22 = smov 32  }
  0xcc   : > { %1872 = dma.hbm_to_vmem [thread:$0]  (!%p2345_p5), %s2663_s7, 8192, %s366_s21, [#allocation12], %s2249_s25, %s2249_s25, %s2250_s22  }
  0xcd   : > { %s2251_s24 = smov [#allocation16]   ;;  %s2167_s29 = scalar_lea.hbm %s2665_s9, 128 }
  0xce   : > { %s390_s27 = sshll.u32 %s2251_s24, 4  ;;  %p2168_p13 = scmp.ne.s32.totalorder %s2665_s9, %s2167_s29  ;;  %s391_s27 = int_to_ptr.vmem [resolvable:$true] %s390_s27 }
  0xcf   : > { %p2174_p1 = scmp.lt.u32.totalorder %s2167_s29, %s2665_s9 }
  0xd0   : > { %p2170_p3 = pnand %p2168_p13, %p2361_p7 }
  0xd2   : > { %p2171_p0 = pneg %p2170_p3 }
  0xd4   : > { %p2176_p4 = pnand %p2174_p1, %p2171_p0 }
  0xd6   : > { %2179 = shalt.err (!%p2176_p4)
}
  0xd7   : > { %s2180_s21 = scalar_lea.vmem %s391_s27, 128  ;;  %p2188_p10 = scmp.lt.s32.totalorder %s391_s27, %s391_s27 }
  0xd8   : > { %p2181_p6 = scmp.ne.s32.totalorder %s391_s27, %s2180_s21  ;;  %p2189_p11 = scmp.lt.s32.totalorder %s2180_s21, %s2180_s21 }
  0xda   : > { %p2183_p8 = pnand %p2181_p6, %p2361_p7  ;;  %p2190_p12 = por %p2189_p11, %p2188_p10 }
  0xdc   : > { %p2184_p9 = pneg %p2183_p8 }
  0xde   : > { %p2191_p2 = pnand %p2190_p12, %p2184_p9 }
  0xe0   : > { %2194 = shalt.err (!%p2191_p2)
}
  0xe1   : > { %1878 = dma.hbm_to_vmem [thread:$0]  (!%p2345_p5), %s2665_s9, 128, %s391_s27, [#allocation15]  }
  0xe2   : > { %p2680_p13 = scmp.ne.s32.totalorder %s2673_s20, 0 }
  0xe3   : > { %p2681_p3 = scmp.ne.s32.totalorder (!%p2680_p13), %s2672_s19, 0 }
  0xe4   : > { %416 = sbr.rel (%p2680_p13) target bundleno = 972 (0x3cc), region = 60 }
  0xeb   : > { %2208 = dma.done.wait (%p2681_p3), [#allocation4], 64  }
  0xec   : > { %2210 = vsyncadd (%p2681_p3), [#allocation4], 4294967232 }
  0xed   : > { %2212 = dma.done.wait (%p2681_p3), [#allocation6], 32  }
  0xee   : > { %2214 = vsyncadd (%p2681_p3), [#allocation6], 4294967264 }
  0xef   : > { %2216 = dma.done.wait (%p2681_p3), [#allocation9], 528  }
  0xf0   : > { %2218 = vsyncadd (%p2681_p3), [#allocation9], 4294966768 }
  0xf1   : > { %2220 = dma.done.wait (%p2681_p3), [#allocation12], 8208  }
  0xf2   : > { %2222 = vsyncadd (%p2681_p3), [#allocation12], 4294959088 }
  0xf3   : > { %2224 = dma.done.wait (%p2681_p3), [#allocation15], 256  }
  0xf4   : > { %2226 = vsyncadd (%p2681_p3), [#allocation15], 4294967040  ;;  %p490_p5 = scmp.lt.s32.totalorder %s2229_s13, 1  ;;  %v2252_v0 = vmov 0.0   ;;  %vm2253_vm0 = vmmov 0   ;;  %vm528_vm1 = vcmask 1043456  }
  0xf5   : > { %1797 = vmatprep.subr.bf16.mxu0 %v2252_v0  ;;  %1799 = vmatprep.mubr.msk.bf16.mxu0 %vm2253_vm0, %v2252_v0  ;;  %v518_v1 = vld [vmem:[#allocation3] sm:$0xf]  ;;  %vm524_vm2 = vcmask 64512   ;;  %v1939_v4 = vld [vmem:[#allocation8] sm:$0xff]   ;;  %v1940_v5 = vld [vmem:[#allocation8 + $0x8] sm:$0xff]   ;;  %vm626_vm3 = vcmask 523264  }
  0xf6   : > { %s2687_s13 = smov (!%p490_p5, %s2229_s13), 1  ;;  %1803 = vmatprep.subr.bf16.mxu1 %v2252_v0  ;;  %1811 = vmatprep.mubr.msk.bf16.mxu1 %vm2253_vm0, %v2252_v0  ;;  %v530_v2 = vsel %vm528_vm1, %v518_v1, 0  ;;  %v1941_v6 = vld [vmem:[#allocation8 + $0x10] sm:$0xff]   ;;  %v1942_v7 = vld [vmem:[#allocation8 + $0x18] sm:$0xff]   ;;  %v691_v8 = vld [vmem:[#allocation13] sm:$0xff] }
  0xf7   : > { %s1789_s1 = sshll.u32 %s2687_s13, 3  ;;  %1798 = vmatpush3.bf16.msra.mxu0 %v530_v2  ;;  %1804 = vmatpush3.bf16.msra.mxu1 %v1939_v4  ;;  %v695_v9 = vld [vmem:[#allocation13 + $0x20] sm:$0xff]  ;;  %v692_v10 = vld [vmem:[#allocation13 + $0x8] sm:$0xff]  ;;  %v1714_v36 = vld [vmem:[#allocation5] ss:$0 sm:$0xff] }
  0xf8   : > { %s497_s19 = scalar_lea.vmem %s2656_s0, %s1789_s1  ;;  %1805 = vmatprep.subr.bf16.mxu1 %v2252_v0  ;;  %v1723_v11 = vcombine.low %v691_v8, %v695_v9  ;;  %v1724_v12 = vcombine.high %v691_v8, %v695_v9  ;;  %v696_v13 = vld [vmem:[#allocation13 + $0x28] sm:$0xff]  ;;  %v699_v14 = vld [vmem:[#allocation13 + $0x40] sm:$0xff]  ;;  %v1715_v38 = vld [vmem:[#allocation7] ss:$0 sm:$0xff]  ;;  %s502_s12 = scalar_lea.vmem %s2666_s10, %s1789_s1 }
  0xf9   : > { %v1938_v3 = vld [vmem:[%s497_s19] sm:$0xff]   ;;  %v703_v15 = vld [vmem:[#allocation13 + $0x60] sm:$0xff]  ;;  %v1725_v16 = vcombine.low %v692_v10, %v696_v13  ;;  %v1726_v17 = vcombine.high %v692_v10, %v696_v13  ;;  %v700_v46 = vld [vmem:[#allocation13 + $0x48] sm:$0xff] }
  0xfa   : > { %1800 = vmatmul.mubr.msk.bf16.vlgmr.msra.gmra.mrb[0].mxu0 %vm524_vm2, %v1938_v3  ;;  %v1732_v18 = vcombine.high %v699_v14, %v703_v15  ;;  %1076 = vmatprep.subr.bf16.mxu0 %v1724_v12  ;;  %v1731_v19 = vcombine.low %v699_v14, %v703_v15  ;;  %v707_v20 = vld [vmem:[#allocation13 + $0x80] sm:$0xff]  ;;  %v704_v47 = vld [vmem:[#allocation13 + $0x68] sm:$0xff] }
  0xfb   : > { %1806 = vmatpush3.bf16.msra.mxu1 %v1940_v5  ;;  %1077 = vmatpush1.bf16.msra.mxu0 %v1723_v11  ;;  %v711_v21 = vld [vmem:[#allocation13 + $0xa0] sm:$0xff]  ;;  %v1734_v51 = vcombine.high %v700_v46, %v704_v47  ;;  %v708_v52 = vld [vmem:[#allocation13 + $0x88] sm:$0xff]  ;;  %v1733_v54 = vcombine.low %v700_v46, %v704_v47 }
  0xfc   : > { %1807 = vmatprep.subr.bf16.mxu1 %v2252_v0  ;;  %1078 = vmatprep.subr.bf16.mxu0 %v1732_v18  ;;  %v1740_v22 = vcombine.high %v707_v20, %v711_v21  ;;  %v1739_v23 = vcombine.low %v707_v20, %v711_v21  ;;  %v715_v24 = vld [vmem:[#allocation13 + $0xc0] sm:$0xff]  ;;  %v712_v53 = vld [vmem:[#allocation13 + $0xa8] sm:$0xff]  ;;  %v693_v21 = vld [vmem:[#allocation13 + $0x10] sm:$0xff] }
  0xfd   : > { %v719_v25 = vld [vmem:[#allocation13 + $0xe0] sm:$0xff]  ;;  %v1742_v55 = vcombine.high %v708_v52, %v712_v53  ;;  %v716_v56 = vld [vmem:[#allocation13 + $0xc8] sm:$0xff]  ;;  %v1741_v58 = vcombine.low %v708_v52, %v712_v53  ;;  %v714_v52 = vld [vmem:[#allocation13 + $0xb8] sm:$0xff] }
  0xfe   : > { %v1748_v26 = vcombine.high %v715_v24, %v719_v25  ;;  %v1747_v27 = vcombine.low %v715_v24, %v719_v25  ;;  %v723_v28 = vld [vmem:[#allocation13 + $0x100] sm:$0xff]  ;;  %v720_v57 = vld [vmem:[#allocation13 + $0xe8] sm:$0xff]  ;;  %v698_v25 = vld [vmem:[#allocation13 + $0x38] sm:$0xff] }
  0xff   : > { %1808 = vmatpush3.bf16.msra.mxu1 %v1941_v6  ;;  %1079 = vmatpush1.bf16.msra.mxu0 %v1731_v19  ;;  %v727_v29 = vld [vmem:[#allocation13 + $0x120] sm:$0xff]  ;;  %v1750_v59 = vcombine.high %v716_v56, %v720_v57  ;;  %v724_v60 = vld [vmem:[#allocation13 + $0x108] sm:$0xff]  ;;  %v1749_v62 = vcombine.low %v716_v56, %v720_v57  ;;  %v717_v57 = vld [vmem:[#allocation13 + $0xd0] sm:$0xff] }
 0x100   : > { %1809 = vmatprep.subr.bf16.mxu1 %v2252_v0  ;;  %1080 = vmatprep.subr.bf16.mxu0 %v1740_v22  ;;  %v1756_v30 = vcombine.high %v723_v28, %v727_v29  ;;  %v1755_v31 = vcombine.low %v723_v28, %v727_v29  ;;  %v731_v32 = vld [vmem:[#allocation13 + $0x140] sm:$0xff]  ;;  %v728_v61 = vld [vmem:[#allocation13 + $0x128] sm:$0xff]  ;;  %v697_v22 = vld [vmem:[#allocation13 + $0x30] sm:$0xff]  ;;  %v2254_v29 = vmov 0  }
 0x101   : > { %v735_v33 = vld [vmem:[#allocation13 + $0x160] sm:$0xff]  ;;  %v1758_v63 = vcombine.high %v724_v60, %v728_v61  ;;  %v732_v0 = vld [vmem:[#allocation13 + $0x148] sm:$0xff]  ;;  %v1757_v2 = vcombine.low %v724_v60, %v728_v61  ;;  %v1728_v24 = vcombine.high %v693_v21, %v697_v22  ;;  %1108 = vmatprep.mubr.bf16.mxu0 %v2254_v29  ;;  %v722_v60 = vld [vmem:[#allocation13 + $0xf8] sm:$0xff] }
 0x102   : > { %v1764_v34 = vcombine.high %v731_v32, %v735_v33  ;;  %v1763_v35 = vcombine.low %v731_v32, %v735_v33  ;;  %v736_v1 = vld [vmem:[#allocation13 + $0x168] sm:$0xff]  ;;  %v739_v5 = vld [vmem:[#allocation13 + $0x180] sm:$0xff]  ;;  %v1722_v32 = vld [vmem:[#allocation11] ss:$0 sm:$0xff] }
 0x103   : > { %1810 = vmatpush3.bf16.msra.mxu1 %v1942_v7  ;;  %1081 = vmatpush1.bf16.msra.mxu0 %v1739_v23  ;;  %v1766_v3 = vcombine.high %v732_v0, %v736_v1  ;;  %v1765_v4 = vcombine.low %v732_v0, %v736_v1  ;;  %v743_v6 = vld [vmem:[#allocation13 + $0x1a0] sm:$0xff]  ;;  %v740_v7 = vld [vmem:[#allocation13 + $0x188] sm:$0xff]  ;;  %v694_v23 = vld [vmem:[#allocation13 + $0x18] sm:$0xff] }
 0x104   : > { %1119 = vmatprep.subr.bf16.mxu1 %v1726_v17  ;;  %1082 = vmatprep.subr.bf16.mxu0 %v1748_v26  ;;  %v1772_v8 = vcombine.high %v739_v5, %v743_v6  ;;  %v744_v9 = vld [vmem:[#allocation13 + $0x1a8] sm:$0xff]  ;;  %v1771_v10 = vcombine.low %v739_v5, %v743_v6  ;;  %v747_v13 = vld [vmem:[#allocation13 + $0x1c0] sm:$0xff]  ;;  %v1727_v26 = vcombine.low %v693_v21, %v697_v22  ;;  %v725_v1 = vld [vmem:[#allocation13 + $0x110] sm:$0xff] }
 0x105   : > { %v1773_v11 = vcombine.low %v740_v7, %v744_v9  ;;  %v1774_v12 = vcombine.high %v740_v7, %v744_v9  ;;  %v751_v14 = vld [vmem:[#allocation13 + $0x1e0] sm:$0xff]  ;;  %v748_v15 = vld [vmem:[#allocation13 + $0x1c8] sm:$0xff]  ;;  %v1730_v28 = vcombine.high %v694_v23, %v698_v25  ;;  %v733_v9 = vld [vmem:[#allocation13 + $0x150] sm:$0xff] }
 0x106   : > { %v752_v17 = vld [vmem:[#allocation13 + $0x1e8] sm:$0xff]  ;;  %v1779_v18 = vcombine.low %v747_v13, %v751_v14 }
 0x107   : > { %1083 = vmatpush1.bf16.msra.mxu0 %v1747_v27  ;;  %v1781_v19 = vcombine.low %v748_v15, %v752_v17  ;;  %v1782_v20 = vcombine.high %v748_v15, %v752_v17  ;;  %v1729_v27 = vcombine.low %v694_v23, %v698_v25  ;;  %v741_v17 = vld [vmem:[#allocation13 + $0x190] sm:$0xff] }
 0x108   : > { %1084 = vmatprep.subr.bf16.mxu0 %v1756_v30  ;;  %v1721_v30 = vld [vmem:[#allocation10] ss:$0 sm:$0xff]  ;;  %v749_v25 = vld [vmem:[#allocation13 + $0x1d0] sm:$0xff] }
 0x10b   : > { %1085 = vmatpush1.bf16.msra.mxu0 %v1755_v31 }
 0x10c   : > { %1086 = vmatprep.subr.bf16.mxu0 %v1764_v34 }
 0x10f   : > { %1087 = vmatpush1.bf16.msra.mxu0 %v1763_v35 }
 0x110   : > { %1088 = vmatprep.subr.bf16.mxu0 %v1772_v8 }
 0x113   : > { %1089 = vmatpush1.bf16.msra.mxu0 %v1771_v10  ;;  %v737_v10 = vld [vmem:[#allocation13 + $0x170] sm:$0xff] }
 0x114   : > { %v1768_v15 = vcombine.high %v733_v9, %v737_v10  ;;  %v1767_v21 = vcombine.low %v733_v9, %v737_v10 }
 0x1cd   : > { %v566_v37 = vpop.f32.mrb[0].mxu0 }
 0x1ce   : > { %v580_v39 = vmul.f32 %v1714_v36, %v566_v37  ;;  %v1801_v40 = vpop.f32.mrb[1].mxu0 }
 0x1cf   : > { %v569_v41 = vpop.f32.mrb[2].mxu0  ;;  %v701_v40 = vld [vmem:[#allocation13 + $0x50] sm:$0xff] }
 0x1d0   : > { %v589_v42 = vadd.f32 %v1715_v38, %v580_v39  ;;  %v581_v43 = vmul.f32 %v1714_v36, %v569_v41  ;;  %v1802_v44 = vpop.f32.mrb[3].mxu0  ;;  %v705_v41 = vld [vmem:[#allocation13 + $0x70] sm:$0xff] }
 0x1d1   : > { %v1736_v47 = vcombine.high %v701_v40, %v705_v41  ;;  %v1735_v53 = vcombine.low %v701_v40, %v705_v41 }
 0x1d2   : > { %v590_v45 = vadd.f32 %v1715_v38, %v581_v43  ;;  %v591_v48 = vmax.f32 %v589_v42, 0.0  ;;  %v702_v42 = vld [vmem:[#allocation13 + $0x58] sm:$0xff] }
 0x1d3   : > { %v706_v43 = vld [vmem:[#allocation13 + $0x78] sm:$0xff] }
 0x1d4   : > { %v592_v49 = vmax.f32 %v590_v45, 0.0 }
 0x1d6   : > { %v601_v50 = vpack.c.bf16 %v592_v49, %v591_v48  ;;  %v1738_v48 = vcombine.high %v702_v42, %v706_v43  ;;  %v709_v49 = vld [vmem:[#allocation13 + $0x90] sm:$0xff] }
 0x1d8   : > { %1812 = vmatmul.mubr.msk.bf16.vlgmr.msra.gmra.mrb[0].mxu1 %vm626_vm3, %v601_v50  ;;  %v713_v50 = vld [vmem:[#allocation13 + $0xb0] sm:$0xff] }
 0x1d9   : > { %1120 = vmatpush1.bf16.msra.mxu1 %v1725_v16  ;;  %v1780_v16 = vcombine.high %v747_v13, %v751_v14  ;;  %1151 = vmatprep.mubr.bf16.mxu1 %v2254_v29  ;;  %v1743_v61 = vcombine.low %v709_v49, %v713_v50 }
 0x1da   : > { %1121 = vmatprep.subr.bf16.mxu1 %v1734_v51  ;;  %v710_v51 = vld [vmem:[#allocation13 + $0x98] sm:$0xff] }
 0x1db   : > { %1090 = vmatprep.subr.bf16.mxu0 %v1780_v16  ;;  %v1746_v56 = vcombine.high %v710_v51, %v714_v52 }
 0x1dc   : > { %1091 = vmatpush1.bf16.msra.mxu0 %v1779_v18  ;;  %v745_v18 = vld [vmem:[#allocation13 + $0x1b0] sm:$0xff] }
 0x1dd   : > { %1122 = vmatpush1.bf16.msra.mxu1 %v1733_v54  ;;  %1162 = vmatprep.subr.bf16.mxu0 %v1728_v24  ;;  %v1737_v54 = vcombine.low %v702_v42, %v706_v43  ;;  %v1776_v23 = vcombine.high %v741_v17, %v745_v18  ;;  %v2602_v42 = vld [vmem:[#allocation16] sm:$0xff] }
 0x1de   : > { %1123 = vmatprep.subr.bf16.mxu1 %v1742_v55  ;;  %v1744_v55 = vcombine.high %v709_v49, %v713_v50 }
 0x1e1   : > { %1124 = vmatpush1.bf16.msra.mxu1 %v1741_v58  ;;  %v721_v58 = vld [vmem:[#allocation13 + $0xf0] sm:$0xff] }
 0x1e2   : > { %1125 = vmatprep.subr.bf16.mxu1 %v1750_v59  ;;  %v718_v59 = vld [vmem:[#allocation13 + $0xd8] sm:$0xff]  ;;  %v1751_v5 = vcombine.low %v717_v57, %v721_v58 }
 0x1e3   : > { %v1754_v0 = vcombine.high %v718_v59, %v722_v60  ;;  %v1753_v6 = vcombine.low %v718_v59, %v722_v60 }
 0x1e5   : > { %1126 = vmatpush1.bf16.msra.mxu1 %v1749_v62  ;;  %v1745_v62 = vcombine.low %v710_v51, %v714_v52 }
 0x1e6   : > { %1127 = vmatprep.subr.bf16.mxu1 %v1758_v63  ;;  %v1752_v63 = vcombine.high %v717_v57, %v721_v58 }
 0x1e9   : > { %1128 = vmatpush1.bf16.msra.mxu1 %v1757_v2  ;;  %v729_v2 = vld [vmem:[#allocation13 + $0x130] sm:$0xff] }
 0x1ea   : > { %1129 = vmatprep.subr.bf16.mxu1 %v1766_v3  ;;  %v726_v3 = vld [vmem:[#allocation13 + $0x118] sm:$0xff]  ;;  %v1760_v7 = vcombine.high %v725_v1, %v729_v2  ;;  %v1759_v13 = vcombine.low %v725_v1, %v729_v2 }
 0x1ed   : > { %1130 = vmatpush1.bf16.msra.mxu1 %v1765_v4  ;;  %v730_v4 = vld [vmem:[#allocation13 + $0x138] sm:$0xff] }
 0x1ee   : > { %1131 = vmatprep.subr.bf16.mxu1 %v1774_v12  ;;  %v1762_v8 = vcombine.high %v726_v3, %v730_v4  ;;  %v738_v12 = vld [vmem:[#allocation13 + $0x178] sm:$0xff]  ;;  %v1761_v14 = vcombine.low %v726_v3, %v730_v4 }
 0x1f1   : > { %1132 = vmatpush1.bf16.msra.mxu1 %v1773_v11  ;;  %v734_v11 = vld [vmem:[#allocation13 + $0x158] sm:$0xff] }
 0x1f2   : > { %1133 = vmatprep.subr.bf16.mxu1 %v1782_v20  ;;  %v1770_v16 = vcombine.high %v734_v11, %v738_v12  ;;  %v746_v20 = vld [vmem:[#allocation13 + $0x1b8] sm:$0xff]  ;;  %v1769_v22 = vcombine.low %v734_v11, %v738_v12 }
 0x1f5   : > { %1134 = vmatpush1.bf16.msra.mxu1 %v1781_v19  ;;  %v742_v19 = vld [vmem:[#allocation13 + $0x198] sm:$0xff] }
 0x1f6   : > { %1205 = vmatprep.subr.bf16.mxu1 %v1730_v28  ;;  %v1778_v24 = vcombine.high %v742_v19, %v746_v20  ;;  %v754_v28 = vld [vmem:[#allocation13 + $0x1f8] sm:$0xff] }
 0x2ab   : > { %v664_v31 = vpop.f32.mrb[0].mxu1 }
 0x2ac   : > { %v678_v33 = vmul.f32 %v1721_v30, %v664_v31  ;;  %v1813_v34 = vpop.f32.mrb[1].mxu1 }
 0x2ad   : > { %v667_v35 = vpop.f32.mrb[2].mxu1 }
 0x2ae   : > { %v687_v36 = vadd.f32 %v1722_v32, %v678_v33  ;;  %v679_v37 = vmul.f32 %v1721_v30, %v667_v35  ;;  %v1814_v38 = vpop.f32.mrb[3].mxu1  ;;  %v1777_v30 = vcombine.low %v742_v19, %v746_v20  ;;  %v1250_v35 = vlaneseq }
 0x2b0   : > { %v688_v39 = vadd.f32 %v1722_v32, %v679_v37  ;;  %v689_v44 = vmax.f32 %v687_v36, 0.0  ;;  %v2594_v36 = vshrl.u32 %v1250_v35, 7 }
 0x2b2   : > { %v690_v45 = vmax.f32 %v688_v39, 0.0  ;;  %v1252_v37 = vsub.s32 0, %v2594_v36  ;;  %v1260_v38 = vsub.s32 2, %v2594_v36  ;;  %v2598_v39 = vld [vmem:[#allocation14] sm:$0xff]  ;;  %v1256_v40 = vsub.s32 1, %v2594_v36 }
 0x2b3   : > { %v1264_v41 = vsub.s32 3, %v2594_v36 }
 0x2b4   : > { %v2588_v46 = vpack.c.bf16 %v690_v45, %v689_v44  ;;  %v1253_v43 = vrot.slane %v2598_v39, %v1252_v37  ;;  %v1261_v44 = vrot.slane %v2598_v39, %v1260_v38  ;;  %v1257_v45 = vrot.slane %v2598_v39, %v1256_v40 }
 0x2b5   : > { %v1315_v51 = vrot.slane %v2602_v42, %v1256_v40  ;;  %v1323_v52 = vrot.slane %v2602_v42, %v1264_v41 }
 0x2b6   : > { %1109 = vmatmul.mubr.bf16.vlgmr.msra.gmra.mrb[4].mxu0 %v2588_v46  ;;  %1152 = vmatmul.mubr.bf16.vlgmr.msra.gmra.mrb[4].mxu1 %v2588_v46 }
 0x2b7   : > { %1163 = vmatpush1.bf16.msra.mxu0 %v1727_v26  ;;  %1206 = vmatpush1.bf16.msra.mxu1 %v1729_v27  ;;  %v753_v26 = vld [vmem:[#allocation13 + $0x1f0] sm:$0xff]  ;;  %v750_v27 = vld [vmem:[#allocation13 + $0x1d8] sm:$0xff] }
 0x2b8   : > { %1164 = vmatprep.subr.bf16.mxu0 %v1736_v47  ;;  %1207 = vmatprep.subr.bf16.mxu1 %v1738_v48  ;;  %v1784_v31 = vcombine.high %v749_v25, %v753_v26  ;;  %v1786_v32 = vcombine.high %v750_v27, %v754_v28  ;;  %v1783_v33 = vcombine.low %v749_v25, %v753_v26 }
 0x2b9   : > { %1194 = vmatprep.mubr.bf16.mxu0 %v2254_v29  ;;  %1237 = vmatprep.mubr.bf16.mxu1 %v2254_v29  ;;  %v1775_v29 = vcombine.low %v741_v17, %v745_v18  ;;  %v1785_v34 = vcombine.low %v750_v27, %v754_v28  ;;  %v1311_v47 = vrot.slane %v2602_v42, %v1252_v37 }
 0x2ba   : > { %v1319_v48 = vrot.slane %v2602_v42, %v1260_v38 }
 0x2bb   : > { %1165 = vmatpush1.bf16.msra.mxu0 %v1735_v53  ;;  %1208 = vmatpush1.bf16.msra.mxu1 %v1737_v54 }
 0x2bc   : > { %1166 = vmatprep.subr.bf16.mxu0 %v1744_v55  ;;  %1209 = vmatprep.subr.bf16.mxu1 %v1746_v56 }
 0x2bf   : > { %1167 = vmatpush1.bf16.msra.mxu0 %v1743_v61  ;;  %1210 = vmatpush1.bf16.msra.mxu1 %v1745_v62 }
 0x2c0   : > { %1168 = vmatprep.subr.bf16.mxu0 %v1752_v63  ;;  %1211 = vmatprep.subr.bf16.mxu1 %v1754_v0 }
 0x2c3   : > { %1169 = vmatpush1.bf16.msra.mxu0 %v1751_v5  ;;  %1212 = vmatpush1.bf16.msra.mxu1 %v1753_v6 }
 0x2c4   : > { %1170 = vmatprep.subr.bf16.mxu0 %v1760_v7  ;;  %1213 = vmatprep.subr.bf16.mxu1 %v1762_v8 }
 0x2c7   : > { %1171 = vmatpush1.bf16.msra.mxu0 %v1759_v13  ;;  %1214 = vmatpush1.bf16.msra.mxu1 %v1761_v14 }
 0x2c8   : > { %1172 = vmatprep.subr.bf16.mxu0 %v1768_v15  ;;  %1215 = vmatprep.subr.bf16.mxu1 %v1770_v16 }
 0x2cb   : > { %1173 = vmatpush1.bf16.msra.mxu0 %v1767_v21  ;;  %1216 = vmatpush1.bf16.msra.mxu1 %v1769_v22 }
 0x2cc   : > { %1174 = vmatprep.subr.bf16.mxu0 %v1776_v23  ;;  %1217 = vmatprep.subr.bf16.mxu1 %v1778_v24 }
 0x2cf   : > { %1175 = vmatpush1.bf16.msra.mxu0 %v1775_v29  ;;  %1218 = vmatpush1.bf16.msra.mxu1 %v1777_v30  ;;  %v2255_v30 = vmov 1966171168  }
 0x2d0   : > { %1176 = vmatprep.subr.bf16.mxu0 %v1784_v31  ;;  %1219 = vmatprep.subr.bf16.mxu1 %v1786_v32  ;;  %v1484_v31 = vunpack.c.l.s4 %v2255_v30 }
 0x2d3   : > { %1177 = vmatpush1.bf16.msra.mxu0 %v1783_v33  ;;  %1220 = vmatpush1.bf16.msra.mxu1 %v1785_v34 }
 0x2d6   : > { %1195 = vmatmul.mubr.bf16.vlgmr.msra.gmra.mrb[8].mxu0 %v2588_v46  ;;  %1238 = vmatmul.mubr.bf16.vlgmr.msra.gmra.mrb[8].mxu1 %v2588_v46  ;;  %v1265_v46 = vrot.slane %v2598_v39, %v1264_v41 }
 0x389   : > { %v1110_v49 = vpop.f32.mrb[4].mxu0  ;;  %v1153_v50 = vpop.f32.mrb[4].mxu1 }
 0x38a   : > { %v1290_v53 = vmul.f32 %v1253_v43, %v1110_v49  ;;  %v1292_v54 = vmul.f32 %v1261_v44, %v1153_v50  ;;  %v1112_v55 = vpop.f32.mrb[5].mxu0  ;;  %v1155_v56 = vpop.f32.mrb[5].mxu1 }
 0x38b   : > { %v1291_v57 = vmul.f32 %v1257_v45, %v1112_v55  ;;  %v1293_v58 = vmul.f32 %v1265_v46, %v1155_v56  ;;  %v1114_v59 = vpop.f32.mrb[6].mxu0  ;;  %v1157_v60 = vpop.f32.mrb[6].mxu1  ;;  %v1268_v56 = vsub.s32 4, %v2594_v36 }
 0x38c   : > { %v1348_v61 = vadd.f32 %v1311_v47, %v1290_v53  ;;  %v1350_v62 = vadd.f32 %v1319_v48, %v1292_v54  ;;  %v1298_v63 = vmul.f32 %v1253_v43, %v1114_v59  ;;  %v1300_v0 = vmul.f32 %v1261_v44, %v1157_v60  ;;  %v1116_v1 = vpop.f32.mrb[7].mxu0  ;;  %v1159_v2 = vpop.f32.mrb[7].mxu1 }
 0x38d   : > { %v1349_v3 = vadd.f32 %v1315_v51, %v1291_v57  ;;  %v1351_v4 = vadd.f32 %v1323_v52, %v1293_v58  ;;  %v1299_v5 = vmul.f32 %v1257_v45, %v1116_v1  ;;  %v1301_v6 = vmul.f32 %v1265_v46, %v1159_v2 }
 0x38e   : > { %v1356_v7 = vadd.f32 %v1311_v47, %v1298_v63  ;;  %v1358_v8 = vadd.f32 %v1319_v48, %v1300_v0  ;;  %v1364_v11 = vmax.f32 %v1348_v61, 0.0  ;;  %v1366_v12 = vmax.f32 %v1350_v62, 0.0 }
 0x38f   : > { %v1357_v9 = vadd.f32 %v1315_v51, %v1299_v5  ;;  %v1359_v10 = vadd.f32 %v1323_v52, %v1301_v6  ;;  %v1365_v15 = vmax.f32 %v1349_v3, 0.0  ;;  %v1367_v16 = vmax.f32 %v1351_v4, 0.0 }
 0x390   : > { %v1372_v13 = vmax.f32 %v1356_v7, 0.0  ;;  %v1374_v14 = vmax.f32 %v1358_v8, 0.0  ;;  %v1485_v43 = vunpack.c.0.s8 %v1484_v31  ;;  %v1276_v57 = vsub.s32 6, %v2594_v36 }
 0x391   : > { %v1373_v17 = vmax.f32 %v1357_v9, 0.0  ;;  %v1375_v18 = vmax.f32 %v1359_v10, 0.0  ;;  %v1272_v60 = vsub.s32 5, %v2594_v36  ;;  %v1280_v61 = vsub.s32 7, %v2594_v36 }
 0x392   : > { %v1380_v19 = vmax.f32 %v1364_v11, %v1372_v13  ;;  %v1382_v20 = vmax.f32 %v1366_v12, %v1374_v14  ;;  %v2613_v52 = vsub.s32 %v1485_v43, %v2594_v36  ;;  %v1269_v63 = vrot.slane %v2598_v39, %v1268_v56 }
 0x393   : > { %v1381_v21 = vmax.f32 %v1365_v15, %v1373_v17  ;;  %v1383_v22 = vmax.f32 %v1367_v16, %v1375_v18  ;;  %v1277_v0 = vrot.slane %v2598_v39, %v1276_v57  ;;  %v1273_v1 = vrot.slane %v2598_v39, %v1272_v60 }
 0x394   : > { %v1423_v23 = vrot.slane %v1380_v19, 4  ;;  %v1435_v24 = vrot.slane %v1382_v20, 4  ;;  %v1281_v2 = vrot.slane %v2598_v39, %v1280_v61  ;;  %v1327_v3 = vrot.slane %v2602_v42, %v1268_v56 }
 0x395   : > { %v1429_v25 = vrot.slane %v1381_v21, 4  ;;  %v1441_v26 = vrot.slane %v1383_v22, 4  ;;  %v1335_v4 = vrot.slane %v2602_v42, %v1276_v57  ;;  %v1331_v7 = vrot.slane %v2602_v42, %v1272_v60 }
 0x396   : > { %v1424_v27 = vmax.f32 %v1380_v19, %v1423_v23  ;;  %v1436_v28 = vmax.f32 %v1382_v20, %v1435_v24  ;;  %v1339_v36 = vrot.slane %v2602_v42, %v1280_v61 }
 0x397   : > { %v1430_v29 = vmax.f32 %v1381_v21, %v1429_v25  ;;  %v1442_v32 = vmax.f32 %v1383_v22, %v1441_v26 }
 0x398   : > { %v1425_v33 = vrot.slane %v1424_v27, 2  ;;  %v1437_v34 = vrot.slane %v1436_v28, 2 }
 0x399   : > { %v1431_v35 = vrot.slane %v1430_v29, 2  ;;  %v1443_v37 = vrot.slane %v1442_v32, 2 }
 0x39a   : > { %v1426_v38 = vmax.f32 %v1424_v27, %v1425_v33  ;;  %v1438_v40 = vmax.f32 %v1436_v28, %v1437_v34 }
 0x39b   : > { %v1432_v41 = vmax.f32 %v1430_v29, %v1431_v35  ;;  %v1444_v44 = vmax.f32 %v1442_v32, %v1443_v37 }
 0x39c   : > { %v1427_v45 = vrot.slane %v1426_v38, 1  ;;  %v1439_v46 = vrot.slane %v1438_v40, 1 }
 0x39d   : > { %v1433_v47 = vrot.slane %v1432_v41, 1  ;;  %v1445_v48 = vrot.slane %v1444_v44, 1 }
 0x39e   : > { %v1428_v49 = vmax.f32 %v1426_v38, %v1427_v45  ;;  %v1440_v50 = vmax.f32 %v1438_v40, %v1439_v46 }
 0x39f   : > { %v1434_v51 = vmax.f32 %v1432_v41, %v1433_v47  ;;  %v1446_v53 = vmax.f32 %v1444_v44, %v1445_v48 }
 0x3a1   : > { %v1479_v54 = vcombine.low %v1428_v49, %v1434_v51  ;;  %v1480_v55 = vcombine.low %v1440_v50, %v1446_v53 }
 0x3a3   : > { %v2618_v58 = vrot.slane %v1479_v54, %v2613_v52  ;;  %v2621_v59 = vrot.slane %v1480_v55, %v2613_v52 }
 0x3a5   : > { %v1511_v62 = vcombine.low %v2618_v58, %v2621_v59 }
 0x3a9   : > { %v1196_v5 = vpop.f32.mrb[8].mxu0  ;;  %v1239_v6 = vpop.f32.mrb[8].mxu1 }
 0x3aa   : > { %v1294_v8 = vmul.f32 %v1269_v63, %v1196_v5  ;;  %v1296_v9 = vmul.f32 %v1277_v0, %v1239_v6  ;;  %v1198_v10 = vpop.f32.mrb[9].mxu0  ;;  %v1241_v11 = vpop.f32.mrb[9].mxu1 }
 0x3ab   : > { %v1295_v12 = vmul.f32 %v1273_v1, %v1198_v10  ;;  %v1297_v13 = vmul.f32 %v1281_v2, %v1241_v11  ;;  %v1200_v14 = vpop.f32.mrb[10].mxu0  ;;  %v1243_v15 = vpop.f32.mrb[10].mxu1  ;;  %v1519_v11 = vrot.slane %v1511_v62, %v2613_v52 }
 0x3ac   : > { %v1352_v16 = vadd.f32 %v1327_v3, %v1294_v8  ;;  %v1354_v39 = vadd.f32 %v1335_v4, %v1296_v9  ;;  %v1302_v17 = vmul.f32 %v1269_v63, %v1200_v14  ;;  %v1304_v18 = vmul.f32 %v1277_v0, %v1243_v15  ;;  %v1202_v19 = vpop.f32.mrb[11].mxu0  ;;  %v1245_v20 = vpop.f32.mrb[11].mxu1 }
 0x3ad   : > { %v1353_v21 = vadd.f32 %v1331_v7, %v1295_v12  ;;  %v1355_v22 = vadd.f32 %v1339_v36, %v1297_v13  ;;  %v1303_v23 = vmul.f32 %v1273_v1, %v1202_v19  ;;  %v1305_v24 = vmul.f32 %v1281_v2, %v1245_v20 }
 0x3ae   : > { %v1360_v25 = vadd.f32 %v1327_v3, %v1302_v17  ;;  %v1362_v42 = vadd.f32 %v1335_v4, %v1304_v18  ;;  %v1368_v28 = vmax.f32 %v1352_v16, 0.0  ;;  %v1370_v29 = vmax.f32 %v1354_v39, 0.0 }
 0x3af   : > { %v1361_v26 = vadd.f32 %v1331_v7, %v1303_v23  ;;  %v1363_v27 = vadd.f32 %v1339_v36, %v1305_v24  ;;  %v1369_v32 = vmax.f32 %v1353_v21, 0.0  ;;  %v1371_v33 = vmax.f32 %v1355_v22, 0.0 }
 0x3b0   : > { %v1376_v30 = vmax.f32 %v1360_v25, 0.0  ;;  %v1378_v31 = vmax.f32 %v1362_v42, 0.0 }
 0x3b1   : > { %v1377_v34 = vmax.f32 %v1361_v26, 0.0  ;;  %v1379_v35 = vmax.f32 %v1363_v27, 0.0 }
 0x3b2   : > { %v1384_v37 = vmax.f32 %v1368_v28, %v1376_v30  ;;  %v1386_v38 = vmax.f32 %v1370_v29, %v1378_v31 }
 0x3b3   : > { %v1385_v40 = vmax.f32 %v1369_v32, %v1377_v34  ;;  %v1387_v41 = vmax.f32 %v1371_v33, %v1379_v35 }
 0x3b4   : > { %v1447_v43 = vrot.slane %v1384_v37, 4  ;;  %v1459_v44 = vrot.slane %v1386_v38, 4 }
 0x3b5   : > { %v1453_v45 = vrot.slane %v1385_v40, 4  ;;  %v1465_v46 = vrot.slane %v1387_v41, 4 }
 0x3b6   : > { %v1448_v47 = vmax.f32 %v1384_v37, %v1447_v43  ;;  %v1460_v48 = vmax.f32 %v1386_v38, %v1459_v44 }
 0x3b7   : > { %v1454_v49 = vmax.f32 %v1385_v40, %v1453_v45  ;;  %v1466_v50 = vmax.f32 %v1387_v41, %v1465_v46 }
 0x3b8   : > { %v1449_v51 = vrot.slane %v1448_v47, 2  ;;  %v1461_v53 = vrot.slane %v1460_v48, 2 }
 0x3b9   : > { %v1455_v54 = vrot.slane %v1454_v49, 2  ;;  %v1467_v55 = vrot.slane %v1466_v50, 2 }
 0x3ba   : > { %v1450_v56 = vmax.f32 %v1448_v47, %v1449_v51  ;;  %v1462_v57 = vmax.f32 %v1460_v48, %v1461_v53 }
 0x3bb   : > { %v1456_v60 = vmax.f32 %v1454_v49, %v1455_v54  ;;  %v1468_v61 = vmax.f32 %v1466_v50, %v1467_v55 }
 0x3bc   : > { %v1451_v63 = vrot.slane %v1450_v56, 1  ;;  %v1463_v0 = vrot.slane %v1462_v57, 1 }
 0x3bd   : > { %v1457_v1 = vrot.slane %v1456_v60, 1  ;;  %v1469_v2 = vrot.slane %v1468_v61, 1 }
 0x3be   : > { %v1452_v3 = vmax.f32 %v1450_v56, %v1451_v63  ;;  %v1464_v4 = vmax.f32 %v1462_v57, %v1463_v0 }
 0x3bf   : > { %v1458_v5 = vmax.f32 %v1456_v60, %v1457_v1  ;;  %v1470_v6 = vmax.f32 %v1468_v61, %v1469_v2 }
 0x3c1   : > { %v1481_v7 = vcombine.low %v1452_v3, %v1458_v5  ;;  %v1482_v36 = vcombine.low %v1464_v4, %v1470_v6 }
 0x3c3   : > { %v1503_v8 = vrot.slane %v1481_v7, %v2613_v52  ;;  %v1510_v9 = vrot.slane %v1482_v36, %v2613_v52 }
 0x3c5   : > { %v1512_v10 = vcombine.low %v1503_v8, %v1510_v9 }
 0x3c7   : > { %v1526_v12 = vrot.slane %v1512_v10, %v2613_v52 }
 0x3c9   : > { %v1527_v13 = vcombine.low %v1519_v11, %v1526_v12 }
 0x3cb   : > { %1529 = vst [vmem:[%s502_s12] sm:$0xff] %v1527_v13 }
 0x3cc PF: > { %s25_s15 = sadd.s32 1, %s2237_s15   ;;  %s2682_s13 = smov %s2233_s14 }
 0x3cd   : > { %p22_p7 = scmp.ge.s32.totalorder %s25_s15, 4   ;;  %s2683_s14 = smov %s2685_s28 }
 0x3cf   :  { %24 = sbr.rel (!%p22_p7) target bundleno = 9 (0x9), region = 135 }
 0x3d6   :  { %1549 = vsyncpa [#allocation4], 1 }
 0x3d7   :  { %1551 = vsyncpa [#allocation4 + $0x1], 1 }
 0x3d8   :  { %1552 = vsyncpa [#allocation6], 1 }
 0x3d9   :  { %1553 = vsyncpa [#allocation9], 1 }
 0x3da   :  { %1554 = vsyncpa [#allocation12], 1 }
 0x3db   :  { %1555 = vsyncpa [#allocation15], 1 }

// kernel: pointnet_forward.8
= control target key start
LH: loop header
LB: loop body
LE: loop exit
PB: predicated region body
PF: predicated region fallthrough
CT: control target
= control target key end

     0   :  { %s3080_s0 = inlined_call_operand.vmem [shape: bf16[2,16,8], index: 0, kind: input, shape index: {}]   ;;  %s3081_s1 = inlined_call_operand.vmem [shape: bf16[2,8,64], index: 1, kind: input, shape index: {}]   ;;  %s3082_s2 = inlined_call_operand.hbm [shape: f32[1,64], index: 2, kind: input, shape index: {}]   ;;  %s3083_s3 = inlined_call_operand.hbm [shape: f32[1,64], index: 3, kind: input, shape index: {}]   ;;  %s3084_s4 = inlined_call_operand.hbm [shape: bf16[64,64], index: 4, kind: input, shape index: {}]   ;;  %s3085_s5 = inlined_call_operand.hbm [shape: f32[1,64], index: 5, kind: input, shape index: {}]   ;;  %s3086_s6 = inlined_call_operand.hbm [shape: f32[1,64], index: 6, kind: input, shape index: {}]   ;;  %s3087_s7 = inlined_call_operand.hbm [shape: bf16[64,128], index: 7, kind: input, shape index: {}]   ;;  %s3088_s8 = inlined_call_operand.hbm [shape: f32[1,128], index: 8, kind: input, shape index: {}]   ;;  %s3089_s9 = inlined_call_operand.hbm [shape: f32[1,128], index: 9, kind: input, shape index: {}]   ;;  %s3090_s10 = inlined_call_operand.hbm [shape: bf16[128,1024], index: 10, kind: input, shape index: {}]   ;;  %s3091_s11 = inlined_call_operand.hbm [shape: f32[1,1024], index: 11, kind: input, shape index: {}]   ;;  %s3092_s12 = inlined_call_operand.hbm [shape: f32[1,1024], index: 12, kind: input, shape index: {}]   ;;  %s3093_s13 = inlined_call_operand.vmem [shape: f32[2,1,1024], index: 13, kind: output, shape index: {}]  }
   0x1   :  { %3100 = sst [smem:[#allocation27_spill]] %s3081_s1 }
   0x2   :  { %3101 = sst [smem:[#allocation28_spill]] %s3082_s2 }
   0x3   :  { %3102 = sst [smem:[#allocation29_spill]] %s3083_s3 }
   0x4   :  { %3103 = sst [smem:[#allocation30_spill]] %s3093_s13 }
   0x5   :  { %18 = vsyncpa [#allocation4], 0 }
   0x6   :  { %19 = vsyncpa [#allocation6], 0 }
   0x7   :  { %20 = vsyncpa [#allocation9], 0 }
   0x8   :  { %21 = vsyncpa [#allocation12], 0 }
   0x9   :  { %22 = vsyncpa [#allocation15], 0 }
   0xa   :  { %23 = vsyncpa [#allocation18], 0  ;;  %s2694_s25 = smov 0   ;;  %s2696_s26 = smov 0  }
   0xb   :  { %s2698_s27 = smov 0  }
   0xc LB: > { %3104 = sst [smem:[#allocation26_spill]] %s2603_s27  ;;  %s2605_s28 = smov [#allocation5]   ;;  %s2603_s27 = sphi %s2698_s27, %s29_s27   ;;  %s2599_s26 = sphi %s2696_s26, %s3119_s26   ;;  %s2595_s25 = sphi %s2694_s25, %s3118_s25  }
   0xd   : > { %s381_s29 = sshll.u32 %s2605_s28, 4  ;;  %s1939_s30 = sadd.s32 4294967295, %s2603_s27   ;;  %s2716_s29 = int_to_ptr.vmem [resolvable:$true] %s381_s29 }
   0xe   : > { %p1941_p0 = scmp.ge.s32.totalorder %s2603_s27, 1  ;;  %p357_p1 = scmp.lt.s32.totalorder %s2603_s27, 3 }
   0xf   : > { %p2712_p2 = scmp.eq.s32.totalorder %s1939_s30, 0  ;;  %s2606_s16 = smov [#allocation8]  }
  0x10   : > { %p2718_p3 = pnand %p1941_p0, %p357_p1  ;;  %s405_s17 = sshll.u32 %s2606_s16, 4  ;;  %s2724_s17 = int_to_ptr.vmem [resolvable:$true] %s405_s17 }
  0x11   : > { %s3105_s14 = scalar_select %p2712_p2, 1, 0 }
  0x12   : > { %s3106_s15 = scalar_select %p2718_p3, 1, 0 }
  0x13   : > { %p2141_p4 = pneg %p2718_p3  ;;  %s2607_s19 = smov [#allocation11]  }
  0x14   : > { %s426_s20 = sshll.u32 %s2607_s19, 4  ;;  %s2608_s21 = smov [#allocation14]   ;;  %s2732_s20 = int_to_ptr.vmem [resolvable:$true] %s426_s20 }
  0x15   : > { %p2728_p5 = pnand %p2712_p2, %p2141_p4  ;;  %s2734_s22 = sshll.u32 %s2608_s21, 4  ;;  %s452_s22 = int_to_ptr.vmem [resolvable:$true] %s2734_s22 }
  0x16   : > { %s3108_s3 = sld [smem:[#allocation29_spill]] }
  0x17   : > { %p2744_p7 = pneg %p2728_p5 }
  0x1c   : > { %s2249_s28 = scalar_lea.hbm %s3108_s3, 16 }
  0x1d   : > { %p2250_p6 = scmp.ne.s32.totalorder %s3108_s3, %s2249_s28  ;;  %p2256_p10 = scmp.lt.u32.totalorder %s2249_s28, %s3108_s3 }
  0x1f   : > { %p2252_p8 = pnand %p2744_p7, %p2250_p6 }
  0x21   : > { %p2253_p9 = pneg %p2252_p8 }
  0x23   : > { %p2258_p11 = pnand %p2256_p10, %p2253_p9 }
  0x25   : > { %2261 = shalt.err (!%p2258_p11)
}
  0x26   : > { %s2262_s23 = scalar_lea.vmem %s2716_s29, 16  ;;  %s2269_s24 = scalar_lea.vmem %s2716_s29, 32 }
  0x27   : > { %p2263_p12 = scmp.ne.s32.totalorder %s2716_s29, %s2262_s23  ;;  %p2270_p1 = scmp.lt.s32.totalorder %s2716_s29, %s2716_s29 }
  0x28   : > { %p2271_p4 = scmp.lt.s32.totalorder %s2269_s24, %s2262_s23 }
  0x29   : > { %p2265_p13 = pnand %p2263_p12, %p2744_p7 }
  0x2a   : > { %p2272_p6 = por %p2271_p4, %p2270_p1 }
  0x2b   : > { %p2266_p0 = pneg %p2265_p13 }
  0x2d   : > { %p2273_p8 = pnand %p2272_p6, %p2266_p0 }
  0x2f   : > { %2276 = shalt.err (!%p2273_p8)
}
  0x30   : > { %2147 = dma.hbm_to_vmem [thread:$0]  (!%p2728_p5), %s3108_s3, 16, %s2716_s29, [#allocation6]  }
  0x31   : > { %s2277_s21 = scalar_lea.hbm %s3085_s5, 16 }
  0x32   : > { %p2278_p9 = scmp.ne.s32.totalorder %s3085_s5, %s2277_s21  ;;  %p2284_p12 = scmp.lt.u32.totalorder %s2277_s21, %s3085_s5 }
  0x34   : > { %p2280_p10 = pnand %p2278_p9, %p2744_p7 }
  0x36   : > { %p2281_p11 = pneg %p2280_p10 }
  0x38   : > { %p2286_p13 = pnand %p2284_p12, %p2281_p11 }
  0x3a   : > { %2289 = shalt.err (!%p2286_p13)
}
  0x3b   : > { %s2290_s29 = scalar_lea.vmem %s2724_s17, 16  ;;  %s2297_s1 = scalar_lea.vmem %s2724_s17, 32 }
  0x3c   : > { %p2291_p0 = scmp.ne.s32.totalorder %s2724_s17, %s2290_s29  ;;  %p2298_p6 = scmp.lt.s32.totalorder %s2724_s17, %s2724_s17 }
  0x3d   : > { %p2299_p8 = scmp.lt.s32.totalorder %s2297_s1, %s2290_s29 }
  0x3e   : > { %p2293_p1 = pnand %p2291_p0, %p2744_p7 }
  0x3f   : > { %p2300_p9 = por %p2299_p8, %p2298_p6 }
  0x40   : > { %p2294_p4 = pneg %p2293_p1 }
  0x42   : > { %p2301_p10 = pnand %p2300_p9, %p2294_p4 }
  0x44   : > { %2304 = shalt.err (!%p2301_p10)
}
  0x45   : > { %2153 = dma.hbm_to_vmem [thread:$0]  (!%p2728_p5), %s3085_s5, 16, %s2724_s17, [#allocation9]  }
  0x46   : > { %s2305_s19 = scalar_lea.hbm %s3087_s7, 512 }
  0x47   : > { %p2306_p11 = scmp.ne.s32.totalorder %s3087_s7, %s2305_s19  ;;  %p2312_p0 = scmp.lt.u32.totalorder %s2305_s19, %s3087_s7 }
  0x49   : > { %p2308_p12 = pnand %p2306_p11, %p2744_p7 }
  0x4b   : > { %p2309_p13 = pneg %p2308_p12 }
  0x4d   : > { %p2314_p1 = pnand %p2312_p0, %p2309_p13 }
  0x4f   : > { %2317 = shalt.err (!%p2314_p1)
}
  0x50   : > { %s2318_s17 = scalar_lea.vmem %s2732_s20, 512  ;;  %p2326_p9 = scmp.lt.s32.totalorder %s2732_s20, %s2732_s20 }
  0x51   : > { %p2319_p4 = scmp.ne.s32.totalorder %s2732_s20, %s2318_s17  ;;  %p2327_p10 = scmp.lt.s32.totalorder %s2318_s17, %s2318_s17 }
  0x53   : > { %p2321_p6 = pnand %p2319_p4, %p2744_p7  ;;  %p2328_p11 = por %p2327_p10, %p2326_p9 }
  0x55   : > { %p2322_p8 = pneg %p2321_p6 }
  0x57   : > { %p2329_p12 = pnand %p2328_p11, %p2322_p8 }
  0x59   : > { %2332 = shalt.err (!%p2329_p12)
}
  0x5a   : > { %s3098_s1 = smov 64   ;;  %s3099_s13 = smov 4  }
  0x5b   : > { %2159 = dma.hbm_to_vmem [thread:$0]  (!%p2728_p5), %s3087_s7, 512, %s2732_s20, [#allocation12], %s3098_s1, %s3098_s1, %s3099_s13  }
  0x5c   : > { %s2333_s21 = scalar_lea.hbm %s3089_s9, 16 }
  0x5d   : > { %p2334_p13 = scmp.ne.s32.totalorder %s3089_s9, %s2333_s21  ;;  %p2340_p4 = scmp.lt.u32.totalorder %s2333_s21, %s3089_s9 }
  0x5f   : > { %p2336_p0 = pnand %p2334_p13, %p2744_p7 }
  0x61   : > { %p2337_p1 = pneg %p2336_p0 }
  0x63   : > { %p2342_p6 = pnand %p2340_p4, %p2337_p1 }
  0x65   : > { %2345 = shalt.err (!%p2342_p6)
}
  0x66   : > { %s2346_s28 = scalar_lea.vmem %s452_s22, 16  ;;  %s2353_s20 = scalar_lea.vmem %s452_s22, 32 }
  0x67   : > { %p2347_p8 = scmp.ne.s32.totalorder %s452_s22, %s2346_s28  ;;  %p2354_p11 = scmp.lt.s32.totalorder %s452_s22, %s452_s22 }
  0x68   : > { %p2355_p12 = scmp.lt.s32.totalorder %s2353_s20, %s2346_s28 }
  0x69   : > { %p2349_p9 = pnand %p2347_p8, %p2744_p7 }
  0x6a   : > { %p2356_p2 = por %p2355_p12, %p2354_p11 }
  0x6b   : > { %p2350_p10 = pneg %p2349_p9 }
  0x6d   : > { %p2357_p3 = pnand %p2356_p2, %p2350_p10 }
  0x6f   : > { %2360 = shalt.err (!%p2357_p3)
}
  0x70   : > { %2165 = dma.hbm_to_vmem [thread:$0]  (!%p2728_p5), %s3089_s9, 16, %s452_s22, [#allocation15]  }
  0x71   : > { %s2611_s19 = smov [#allocation17]   ;;  %s2361_s29 = scalar_lea.hbm %s3091_s11, 128 }
  0x72   : > { %s475_s21 = sshll.u32 %s2611_s19, 4  ;;  %p2362_p13 = scmp.ne.s32.totalorder %s3091_s11, %s2361_s29  ;;  %s476_s21 = int_to_ptr.vmem [resolvable:$true] %s475_s21 }
  0x73   : > { %p2368_p0 = scmp.lt.u32.totalorder %s2361_s29, %s3091_s11 }
  0x74   : > { %p2364_p2 = pnand %p2362_p13, %p2744_p7 }
  0x76   : > { %p2365_p3 = pneg %p2364_p2 }
  0x78   : > { %p2370_p1 = pnand %p2368_p0, %p2365_p3 }
  0x7a   : > { %2373 = shalt.err (!%p2370_p1)
}
  0x7b   : > { %s2374_s22 = scalar_lea.vmem %s476_s21, 128  ;;  %p2382_p9 = scmp.lt.s32.totalorder %s476_s21, %s476_s21 }
  0x7c   : > { %p2375_p4 = scmp.ne.s32.totalorder %s476_s21, %s2374_s22  ;;  %p2383_p10 = scmp.lt.s32.totalorder %s2374_s22, %s2374_s22 }
  0x7e   : > { %p2377_p6 = pnand %p2375_p4, %p2744_p7  ;;  %p2384_p11 = por %p2383_p10, %p2382_p9 }
  0x80   : > { %p2378_p8 = pneg %p2377_p6 }
  0x82   : > { %p2385_p12 = pnand %p2384_p11, %p2378_p8 }
  0x84   : > { %2388 = shalt.err (!%p2385_p12)
}
  0x85   : > { %2171 = dma.hbm_to_vmem [thread:$0]  (!%p2728_p5), %s3091_s11, 128, %s476_s21, [#allocation18]  }
  0x86   : > { %s41_s16 = sadd.s32 1, %s2599_s26  ;;  %s2612_s19 = smov [#allocation3]  }
  0x87   : > { %p43_p13 = scmp.ge.s32.totalorder %s41_s16, 2  ;;  %s370_s23 = sshll.u32 %s2612_s19, 4  ;;  %s371_s23 = int_to_ptr.vmem [resolvable:$true] %s370_s23 }
  0x88   : > { %s3110_s2 = sld [smem:[#allocation28_spill]] }
  0x89   : > { %s3121_s16 = smov (%p43_p13, %s41_s16), 0 }
  0x8e   : > { %s2389_s17 = scalar_lea.hbm %s3110_s2, 16 }
  0x8f   : > { %p2390_p2 = scmp.ne.s32.totalorder %s3110_s2, %s2389_s17  ;;  %p2396_p1 = scmp.lt.u32.totalorder %s2389_s17, %s3110_s2 }
  0x91   : > { %p2392_p3 = pnand %p2390_p2, %p2744_p7 }
  0x93   : > { %p2393_p0 = pneg %p2392_p3 }
  0x95   : > { %p2398_p4 = pnand %p2396_p1, %p2393_p0 }
  0x97   : > { %2401 = shalt.err (!%p2398_p4)
}
  0x98   : > { %s2402_s1 = scalar_lea.vmem %s371_s23, 16  ;;  %s2409_s30 = scalar_lea.vmem %s371_s23, 32 }
  0x99   : > { %p2403_p6 = scmp.ne.s32.totalorder %s371_s23, %s2402_s1  ;;  %p2410_p10 = scmp.lt.s32.totalorder %s371_s23, %s371_s23 }
  0x9a   : > { %p2411_p11 = scmp.lt.s32.totalorder %s2409_s30, %s2402_s1 }
  0x9b   : > { %p2405_p8 = pnand %p2403_p6, %p2744_p7 }
  0x9c   : > { %p2412_p12 = por %p2411_p11, %p2410_p10 }
  0x9d   : > { %p2406_p9 = pneg %p2405_p8 }
  0x9f   : > { %p2413_p13 = pnand %p2412_p12, %p2406_p9 }
  0xa1   : > { %2416 = shalt.err (!%p2413_p13)
}
  0xa2   : > { %2144 = dma.hbm_to_vmem [thread:$0]  (!%p2728_p5), %s3110_s2, 16, %s371_s23, [#allocation4]  }
  0xa3   : > { %s2613_s29 = smov [#allocation7]   ;;  %s2614_s28 = smov [#allocation10]  }
  0xa4   : > { %s391_s17 = sshll.u32 %s2613_s29, 4  ;;  %s416_s20 = sshll.u32 %s2614_s28, 4  ;;  %s392_s17 = int_to_ptr.vmem [resolvable:$true] %s391_s17  ;;  %s417_s20 = int_to_ptr.vmem [resolvable:$true] %s416_s20 }
  0xa5   : > { %s2417_s13 = scalar_lea.hbm %s3084_s4, 512 }
  0xa6   : > { %p2418_p2 = scmp.ne.s32.totalorder %s3084_s4, %s2417_s13  ;;  %p2424_p1 = scmp.lt.u32.totalorder %s2417_s13, %s3084_s4 }
  0xa8   : > { %p2420_p3 = pnand %p2418_p2, %p2744_p7 }
  0xaa   : > { %p2421_p0 = pneg %p2420_p3 }
  0xac   : > { %p2426_p4 = pnand %p2424_p1, %p2421_p0 }
  0xae   : > { %2429 = shalt.err (!%p2426_p4)
}
  0xaf   : > { %s2430_s23 = scalar_lea.vmem %s392_s17, 512  ;;  %p2438_p10 = scmp.lt.s32.totalorder %s392_s17, %s392_s17 }
  0xb0   : > { %p2431_p6 = scmp.ne.s32.totalorder %s392_s17, %s2430_s23  ;;  %p2439_p11 = scmp.lt.s32.totalorder %s2430_s23, %s2430_s23 }
  0xb2   : > { %p2433_p8 = pnand %p2431_p6, %p2744_p7  ;;  %p2440_p12 = por %p2439_p11, %p2438_p10 }
  0xb4   : > { %p2434_p9 = pneg %p2433_p8 }
  0xb6   : > { %p2441_p13 = pnand %p2440_p12, %p2434_p9 }
  0xb8   : > { %2444 = shalt.err (!%p2441_p13)
}
  0xb9   : > { %s3111_s24 = smov 4   ;;  %s3112_s29 = smov 64  }
  0xba   : > { %2150 = dma.hbm_to_vmem [thread:$0]  (!%p2728_p5), %s3084_s4, 512, %s392_s17, [#allocation6], %s3112_s29, %s3112_s29, %s3111_s24  }
  0xbb   : > { %s2445_s21 = scalar_lea.hbm %s3086_s6, 16 }
  0xbc   : > { %p2446_p2 = scmp.ne.s32.totalorder %s3086_s6, %s2445_s21  ;;  %p2452_p1 = scmp.lt.u32.totalorder %s2445_s21, %s3086_s6 }
  0xbe   : > { %p2448_p3 = pnand %p2446_p2, %p2744_p7 }
  0xc0   : > { %p2449_p0 = pneg %p2448_p3 }
  0xc2   : > { %p2454_p4 = pnand %p2452_p1, %p2449_p0 }
  0xc4   : > { %2457 = shalt.err (!%p2454_p4)
}
  0xc5   : > { %s2458_s3 = scalar_lea.vmem %s417_s20, 16  ;;  %s2465_s17 = scalar_lea.vmem %s417_s20, 32 }
  0xc6   : > { %p2459_p6 = scmp.ne.s32.totalorder %s417_s20, %s2458_s3  ;;  %p2466_p10 = scmp.lt.s32.totalorder %s417_s20, %s417_s20 }
  0xc7   : > { %p2467_p11 = scmp.lt.s32.totalorder %s2465_s17, %s2458_s3 }
  0xc8   : > { %p2461_p8 = pnand %p2459_p6, %p2744_p7 }
  0xc9   : > { %p2468_p12 = por %p2467_p11, %p2466_p10 }
  0xca   : > { %p2462_p9 = pneg %p2461_p8 }
  0xcc   : > { %p2469_p13 = pnand %p2468_p12, %p2462_p9 }
  0xce   : > { %2472 = shalt.err (!%p2469_p13)
}
  0xcf   : > { %2156 = dma.hbm_to_vmem [thread:$0]  (!%p2728_p5), %s3086_s6, 16, %s417_s20, [#allocation9]  }
  0xd0   : > { %s2615_s13 = smov [#allocation13]   ;;  %s2616_s22 = smov [#allocation16]  }
  0xd1   : > { %s440_s28 = sshll.u32 %s2615_s13, 4  ;;  %s461_s21 = sshll.u32 %s2616_s22, 4  ;;  %s441_s28 = int_to_ptr.vmem [resolvable:$true] %s440_s28  ;;  %s462_s21 = int_to_ptr.vmem [resolvable:$true] %s461_s21 }
  0xd2   : > { %s2473_s19 = scalar_lea.hbm %s3088_s8, 16 }
  0xd3   : > { %p2474_p2 = scmp.ne.s32.totalorder %s3088_s8, %s2473_s19  ;;  %p2480_p1 = scmp.lt.u32.totalorder %s2473_s19, %s3088_s8 }
  0xd5   : > { %p2476_p3 = pnand %p2474_p2, %p2744_p7 }
  0xd7   : > { %p2477_p0 = pneg %p2476_p3 }
  0xd9   : > { %p2482_p4 = pnand %p2480_p1, %p2477_p0 }
  0xdb   : > { %2485 = shalt.err (!%p2482_p4)
}
  0xdc   : > { %s2486_s20 = scalar_lea.vmem %s441_s28, 16  ;;  %s2493_s29 = scalar_lea.vmem %s441_s28, 32 }
  0xdd   : > { %p2487_p6 = scmp.ne.s32.totalorder %s441_s28, %s2486_s20  ;;  %p2494_p10 = scmp.lt.s32.totalorder %s441_s28, %s441_s28 }
  0xde   : > { %p2495_p11 = scmp.lt.s32.totalorder %s2493_s29, %s2486_s20 }
  0xdf   : > { %p2489_p8 = pnand %p2487_p6, %p2744_p7 }
  0xe0   : > { %p2496_p12 = por %p2495_p11, %p2494_p10 }
  0xe1   : > { %p2490_p9 = pneg %p2489_p8 }
  0xe3   : > { %p2497_p13 = pnand %p2496_p12, %p2490_p9 }
  0xe5   : > { %2500 = shalt.err (!%p2497_p13)
}
  0xe6   : > { %2162 = dma.hbm_to_vmem [thread:$0]  (!%p2728_p5), %s3088_s8, 16, %s441_s28, [#allocation12]  }
  0xe7   : > { %s2501_s19 = scalar_lea.hbm %s3090_s10, 8192 }
  0xe8   : > { %p2502_p2 = scmp.ne.s32.totalorder %s3090_s10, %s2501_s19  ;;  %p2508_p1 = scmp.lt.u32.totalorder %s2501_s19, %s3090_s10 }
  0xea   : > { %p2504_p3 = pnand %p2502_p2, %p2744_p7 }
  0xec   : > { %p2505_p0 = pneg %p2504_p3 }
  0xee   : > { %p2510_p4 = pnand %p2508_p1, %p2505_p0 }
  0xf0   : > { %2513 = shalt.err (!%p2510_p4)
}
  0xf1   : > { %s2514_s20 = scalar_lea.vmem %s462_s21, 8192  ;;  %p2522_p10 = scmp.lt.s32.totalorder %s462_s21, %s462_s21 }
  0xf2   : > { %p2515_p6 = scmp.ne.s32.totalorder %s462_s21, %s2514_s20  ;;  %p2523_p11 = scmp.lt.s32.totalorder %s2514_s20, %s2514_s20 }
  0xf4   : > { %p2517_p8 = pnand %p2515_p6, %p2744_p7  ;;  %p2524_p12 = por %p2523_p11, %p2522_p10 }
  0xf6   : > { %p2518_p9 = pneg %p2517_p8 }
  0xf8   : > { %p2525_p13 = pnand %p2524_p12, %p2518_p9 }
  0xfa   : > { %2528 = shalt.err (!%p2525_p13)
}
  0xfb   : > { %s2617_s28 = smov 512   ;;  %s2618_s29 = smov 32  }
  0xfc   : > { %2168 = dma.hbm_to_vmem [thread:$0]  (!%p2728_p5), %s3090_s10, 8192, %s462_s21, [#allocation15], %s2617_s28, %s2617_s28, %s2618_s29  }
  0xfd   : > { %s2619_s1 = smov [#allocation19]   ;;  %s2529_s3 = scalar_lea.hbm %s3092_s12, 128 }
  0xfe   : > { %s486_s30 = sshll.u32 %s2619_s1, 4  ;;  %p2530_p2 = scmp.ne.s32.totalorder %s3092_s12, %s2529_s3  ;;  %s487_s30 = int_to_ptr.vmem [resolvable:$true] %s486_s30 }
  0xff   : > { %p2536_p1 = scmp.lt.u32.totalorder %s2529_s3, %s3092_s12 }
 0x100   : > { %p2532_p3 = pnand %p2530_p2, %p2744_p7 }
 0x102   : > { %p2533_p0 = pneg %p2532_p3 }
 0x104   : > { %p2538_p4 = pnand %p2536_p1, %p2533_p0 }
 0x106   : > { %2541 = shalt.err (!%p2538_p4)
}
 0x107   : > { %s2542_s21 = scalar_lea.vmem %s487_s30, 128  ;;  %p2550_p10 = scmp.lt.s32.totalorder %s487_s30, %s487_s30 }
 0x108   : > { %p2543_p6 = scmp.ne.s32.totalorder %s487_s30, %s2542_s21  ;;  %p2551_p11 = scmp.lt.s32.totalorder %s2542_s21, %s2542_s21 }
 0x10a   : > { %p2545_p8 = pnand %p2543_p6, %p2744_p7  ;;  %p2552_p12 = por %p2551_p11, %p2550_p10 }
 0x10c   : > { %p2546_p9 = pneg %p2545_p8 }
 0x10e   : > { %p2553_p13 = pnand %p2552_p12, %p2546_p9 }
 0x110   : > { %2556 = shalt.err (!%p2553_p13)
}
 0x111   : > { %2174 = dma.hbm_to_vmem [thread:$0]  (!%p2728_p5), %s3092_s12, 128, %s487_s30, [#allocation18]  }
 0x112   : > { %p3113_p2 = scmp.ne.s32.totalorder %s3106_s15, 0 }
 0x113   : > { %p3114_p3 = scmp.ne.s32.totalorder (!%p3113_p2), %s3105_s14, 0 }
 0x114   : > { %519 = sbr.rel (%p3113_p2) target bundleno = 1250 (0x4e2), region = 72 }
 0x11b   : > { %2570 = dma.done.wait (%p3114_p3), [#allocation4], 16  }
 0x11c   : > { %2572 = vsyncadd (%p3114_p3), [#allocation4], 4294967280 }
 0x11d   : > { %2574 = dma.done.wait (%p3114_p3), [#allocation6], 528  }
 0x11e   : > { %2576 = vsyncadd (%p3114_p3), [#allocation6], 4294966768 }
 0x11f   : > { %2578 = dma.done.wait (%p3114_p3), [#allocation9], 32  }
 0x120   : > { %2580 = vsyncadd (%p3114_p3), [#allocation9], 4294967264 }
 0x121   : > { %2582 = dma.done.wait (%p3114_p3), [#allocation12], 528  }
 0x122   : > { %2584 = vsyncadd (%p3114_p3), [#allocation12], 4294966768 }
 0x123   : > { %2586 = dma.done.wait (%p3114_p3), [#allocation15], 8208  }
 0x124   : > { %2588 = vsyncadd (%p3114_p3), [#allocation15], 4294959088 }
 0x125   : > { %2590 = dma.done.wait (%p3114_p3), [#allocation18], 256  }
 0x126   : > { %2592 = vsyncadd (%p3114_p3), [#allocation18], 4294967040  ;;  %p611_p5 = scmp.lt.s32.totalorder %s2595_s25, 1  ;;  %v2620_v0 = vmov 0.0   ;;  %vm2621_vm0 = vmmov 0   ;;  %s3115_s1 = sld [smem:[#allocation27_spill]] }
 0x127   : > { %2067 = vmatprep.subr.bf16.mxu0 %v2620_v0  ;;  %2069 = vmatprep.mubr.msk.bf16.mxu0 %vm2621_vm0, %v2620_v0  ;;  %vm653_vm1 = vcmask 1043456   ;;  %vm649_vm2 = vcmask 64512   ;;  %v2241_v4 = vld [vmem:[#allocation7] sm:$0xff]   ;;  %v2242_v5 = vld [vmem:[#allocation7 + $0x8] sm:$0xff]   ;;  %v2243_v6 = vld [vmem:[#allocation7 + $0x10] sm:$0xff]   ;;  %vm751_vm3 = vcmask 523264  }
 0x128   : > { %s3123_s25 = smov (!%p611_p5, %s2595_s25), 1  ;;  %2073 = vmatprep.subr.bf16.mxu1 %v2620_v0  ;;  %2081 = vmatprep.mubr.msk.bf16.mxu1 %vm2621_vm0, %v2620_v0  ;;  %v2244_v7 = vld [vmem:[#allocation7 + $0x18] sm:$0xff]   ;;  %v2245_v8 = vld [vmem:[#allocation11] sm:$0xff]   ;;  %v2246_v22 = vld [vmem:[#allocation11 + $0x8] sm:$0xff]   ;;  %s3116_s3 = sld [smem:[#allocation30_spill]] }
 0x129   : > { %s2054_s2 = sshll.u32 %s3123_s25, 3  ;;  %s1968_s27 = sshll.u32 %s3123_s25, 2  ;;  %2074 = vmatpush3.bf16.msra.mxu1 %v2241_v4  ;;  %v1972_v9 = vld [vmem:[#allocation3] ss:$0 sm:$0xff]  ;;  %v1973_v11 = vld [vmem:[#allocation5] ss:$0 sm:$0xff] }
 0x12a   : > { %s618_s18 = scalar_lea.vmem %s3080_s0, %s2054_s2  ;;  %2075 = vmatprep.subr.bf16.mxu1 %v2620_v0  ;;  %v2247_v23 = vld [vmem:[#allocation11 + $0x10] sm:$0xff]   ;;  %v2248_v24 = vld [vmem:[#allocation11 + $0x18] sm:$0xff]   ;;  %v913_v25 = vld [vmem:[#allocation16] sm:$0xff] }
 0x12b   : > { %v2240_v3 = vld [vmem:[%s618_s18] sm:$0xff]   ;;  %v917_v26 = vld [vmem:[#allocation16 + $0x20] sm:$0xff]  ;;  %v914_v27 = vld [vmem:[#allocation16 + $0x8] sm:$0xff] }
 0x12c   : > { %s623_s30 = scalar_lea.vmem %s3115_s1, %s1968_s27  ;;  %v1988_v28 = vcombine.low %v913_v25, %v917_v26  ;;  %v1989_v29 = vcombine.high %v913_v25, %v917_v26  ;;  %v918_v30 = vld [vmem:[#allocation16 + $0x28] sm:$0xff]  ;;  %v921_v31 = vld [vmem:[#allocation16 + $0x40] sm:$0xff]  ;;  %v1979_v53 = vld [vmem:[#allocation8] ss:$0 sm:$0xff] }
 0x12d   : > { %v643_v1 = vld [vmem:[%s623_s30] sm:$0xf]  ;;  %2076 = vmatpush3.bf16.msra.mxu1 %v2242_v5  ;;  %v925_v32 = vld [vmem:[#allocation16 + $0x60] sm:$0xff]  ;;  %v1990_v33 = vcombine.low %v914_v27, %v918_v30  ;;  %v1991_v34 = vcombine.high %v914_v27, %v918_v30  ;;  %v1980_v55 = vld [vmem:[#allocation10] ss:$0 sm:$0xff] }
 0x12e   : > { %v655_v2 = vsel %vm653_vm1, %v643_v1, 0  ;;  %2077 = vmatprep.subr.bf16.mxu1 %v2620_v0  ;;  %v1997_v35 = vcombine.high %v921_v31, %v925_v32  ;;  %v1996_v36 = vcombine.low %v921_v31, %v925_v32  ;;  %v929_v37 = vld [vmem:[#allocation16 + $0x80] sm:$0xff]  ;;  %v922_v63 = vld [vmem:[#allocation16 + $0x48] sm:$0xff]  ;;  %s627_s17 = scalar_lea.vmem %s3116_s3, %s2054_s2 }
 0x12f   : > { %2068 = vmatpush3.bf16.msra.mxu0 %v655_v2  ;;  %v933_v38 = vld [vmem:[#allocation16 + $0xa0] sm:$0xff]  ;;  %v930_v5 = vld [vmem:[#allocation16 + $0x88] sm:$0xff] }
 0x130   : > { %2085 = vmatprep.subr.bf16.mxu0 %v2620_v0  ;;  %v2005_v39 = vcombine.high %v929_v37, %v933_v38  ;;  %v2004_v40 = vcombine.low %v929_v37, %v933_v38  ;;  %v937_v41 = vld [vmem:[#allocation16 + $0xc0] sm:$0xff]  ;;  %v966_v26 = vld [vmem:[#allocation16 + $0x1a8] sm:$0xff]  ;;  %v915_v38 = vld [vmem:[#allocation16 + $0x10] sm:$0xff] }
 0x131   : > { %2078 = vmatpush3.bf16.msra.mxu1 %v2243_v6  ;;  %v941_v42 = vld [vmem:[#allocation16 + $0xe0] sm:$0xff]  ;;  %v934_v6 = vld [vmem:[#allocation16 + $0xa8] sm:$0xff] }
 0x132   : > { %2070 = vmatmul.mubr.msk.bf16.vlgmr.msra.gmra.mrb[0].mxu0 %vm649_vm2, %v2240_v3  ;;  %2079 = vmatprep.subr.bf16.mxu1 %v2620_v0  ;;  %v2013_v43 = vcombine.high %v937_v41, %v941_v42  ;;  %v2012_v44 = vcombine.low %v937_v41, %v941_v42  ;;  %v945_v45 = vld [vmem:[#allocation16 + $0x100] sm:$0xff]  ;;  %v970_v32 = vld [vmem:[#allocation16 + $0x1c8] sm:$0xff]  ;;  %v920_v42 = vld [vmem:[#allocation16 + $0x38] sm:$0xff] }
 0x133   : > { %2093 = vmatprep.mubr.msk.bf16.mxu0 %vm2621_vm0, %v2620_v0  ;;  %2086 = vmatpush3.bf16.msra.mxu0 %v2245_v8  ;;  %v949_v46 = vld [vmem:[#allocation16 + $0x120] sm:$0xff]  ;;  %v2007_v8 = vcombine.high %v930_v5, %v934_v6 }
 0x134   : > { %2087 = vmatprep.subr.bf16.mxu0 %v2620_v0  ;;  %v2021_v47 = vcombine.high %v945_v45, %v949_v46  ;;  %v2020_v48 = vcombine.low %v945_v45, %v949_v46  ;;  %v953_v49 = vld [vmem:[#allocation16 + $0x140] sm:$0xff]  ;;  %v2622_v46 = vmov 0  }
 0x135   : > { %2080 = vmatpush3.bf16.msra.mxu1 %v2244_v7  ;;  %v957_v50 = vld [vmem:[#allocation16 + $0x160] sm:$0xff] }
 0x136   : > { %1298 = vmatprep.subr.bf16.mxu1 %v1989_v29  ;;  %v2029_v51 = vcombine.high %v953_v49, %v957_v50  ;;  %v2028_v52 = vcombine.low %v953_v49, %v957_v50  ;;  %v969_v30 = vld [vmem:[#allocation16 + $0x1c0] sm:$0xff]  ;;  %v1987_v49 = vld [vmem:[#allocation14] ss:$0 sm:$0xff] }
 0x137   : > { %2088 = vmatpush3.bf16.msra.mxu0 %v2246_v22  ;;  %v961_v22 = vld [vmem:[#allocation16 + $0x180] sm:$0xff] }
 0x138   : > { %2089 = vmatprep.subr.bf16.mxu0 %v2620_v0  ;;  %v973_v31 = vld [vmem:[#allocation16 + $0x1e0] sm:$0xff] }
 0x13b   : > { %2090 = vmatpush3.bf16.msra.mxu0 %v2247_v23  ;;  %v965_v23 = vld [vmem:[#allocation16 + $0x1a0] sm:$0xff] }
 0x13c   : > { %2091 = vmatprep.subr.bf16.mxu0 %v2620_v0  ;;  %v926_v0 = vld [vmem:[#allocation16 + $0x68] sm:$0xff]  ;;  %v2037_v25 = vcombine.high %v961_v22, %v965_v23  ;;  %v2036_v27 = vcombine.low %v961_v22, %v965_v23 }
 0x13d   : > { %v1999_v4 = vcombine.high %v922_v63, %v926_v0  ;;  %v1998_v7 = vcombine.low %v922_v63, %v926_v0 }
 0x13f   : > { %2092 = vmatpush3.bf16.msra.mxu0 %v2248_v24  ;;  %v962_v24 = vld [vmem:[#allocation16 + $0x188] sm:$0xff] }
 0x140   : > { %1341 = vmatprep.subr.bf16.mxu0 %v1991_v34  ;;  %v2039_v29 = vcombine.high %v962_v24, %v966_v26  ;;  %v974_v34 = vld [vmem:[#allocation16 + $0x1e8] sm:$0xff] }
 0x141   : > { %v2047_v37 = vcombine.high %v970_v32, %v974_v34 }
 0x205   : > { %v691_v10 = vpop.f32.mrb[0].mxu0 }
 0x206   : > { %v705_v12 = vmul.f32 %v1972_v9, %v691_v10  ;;  %v2071_v13 = vpop.f32.mrb[1].mxu0  ;;  %v942_v10 = vld [vmem:[#allocation16 + $0xe8] sm:$0xff] }
 0x207   : > { %v694_v14 = vpop.f32.mrb[2].mxu0  ;;  %v946_v13 = vld [vmem:[#allocation16 + $0x108] sm:$0xff] }
 0x208   : > { %v714_v15 = vadd.f32 %v1973_v11, %v705_v12  ;;  %v706_v16 = vmul.f32 %v1972_v9, %v694_v14  ;;  %v2072_v17 = vpop.f32.mrb[3].mxu0  ;;  %v938_v9 = vld [vmem:[#allocation16 + $0xc8] sm:$0xff] }
 0x209   : > { %v2015_v12 = vcombine.high %v938_v9, %v942_v10  ;;  %v950_v14 = vld [vmem:[#allocation16 + $0x128] sm:$0xff] }
 0x20a   : > { %v715_v18 = vadd.f32 %v1973_v11, %v706_v16  ;;  %v716_v19 = vmax.f32 %v714_v15, 0.0  ;;  %v2006_v11 = vcombine.low %v930_v5, %v934_v6  ;;  %v2014_v15 = vcombine.low %v938_v9, %v942_v10  ;;  %v954_v17 = vld [vmem:[#allocation16 + $0x148] sm:$0xff]  ;;  %v936_v5 = vld [vmem:[#allocation16 + $0xb8] sm:$0xff]  ;;  %v939_v10 = vld [vmem:[#allocation16 + $0xd0] sm:$0xff] }
 0x20b   : > { %v2023_v16 = vcombine.high %v946_v13, %v950_v14 }
 0x20c   : > { %v717_v20 = vmax.f32 %v715_v18, 0.0  ;;  %v958_v18 = vld [vmem:[#allocation16 + $0x168] sm:$0xff] }
 0x20e   : > { %v726_v21 = vpack.c.bf16 %v717_v20, %v716_v19  ;;  %v2022_v19 = vcombine.low %v946_v13, %v950_v14  ;;  %v2031_v20 = vcombine.high %v954_v17, %v958_v18  ;;  %v944_v13 = vld [vmem:[#allocation16 + $0xf8] sm:$0xff] }
 0x210   : > { %2082 = vmatmul.mubr.msk.bf16.vlgmr.msra.gmra.mrb[0].mxu1 %vm751_vm3, %v726_v21  ;;  %v2030_v21 = vcombine.low %v954_v17, %v958_v18  ;;  %v947_v18 = vld [vmem:[#allocation16 + $0x110] sm:$0xff] }
 0x211   : > { %1299 = vmatpush1.bf16.msra.mxu1 %v1988_v28  ;;  %v2038_v28 = vcombine.low %v962_v24, %v966_v26  ;;  %1330 = vmatprep.mubr.bf16.mxu1 %v2622_v46  ;;  %v955_v26 = vld [vmem:[#allocation16 + $0x150] sm:$0xff] }
 0x212   : > { %1300 = vmatprep.subr.bf16.mxu1 %v1997_v35  ;;  %v2044_v35 = vcombine.low %v969_v30, %v973_v31 }
 0x215   : > { %1301 = vmatpush1.bf16.msra.mxu1 %v1996_v36  ;;  %v2046_v36 = vcombine.low %v970_v32, %v974_v34  ;;  %v963_v34 = vld [vmem:[#allocation16 + $0x190] sm:$0xff] }
 0x216   : > { %1302 = vmatprep.subr.bf16.mxu1 %v2005_v39  ;;  %v919_v39 = vld [vmem:[#allocation16 + $0x30] sm:$0xff] }
 0x217   : > { %v1993_v41 = vcombine.high %v915_v38, %v919_v39 }
 0x219   : > { %1303 = vmatpush1.bf16.msra.mxu1 %v2004_v40  ;;  %v916_v40 = vld [vmem:[#allocation16 + $0x18] sm:$0xff] }
 0x21a   : > { %1304 = vmatprep.subr.bf16.mxu1 %v2013_v43  ;;  %v1992_v43 = vcombine.low %v915_v38, %v919_v39  ;;  %v1995_v45 = vcombine.high %v916_v40, %v920_v42 }
 0x21d   : > { %1305 = vmatpush1.bf16.msra.mxu1 %v2012_v44  ;;  %v1994_v44 = vcombine.low %v916_v40, %v920_v42  ;;  %v971_v42 = vld [vmem:[#allocation16 + $0x1d0] sm:$0xff] }
 0x21e   : > { %1306 = vmatprep.subr.bf16.mxu1 %v2021_v47  ;;  %v1986_v47 = vld [vmem:[#allocation13] ss:$0 sm:$0xff] }
 0x221   : > { %1307 = vmatpush1.bf16.msra.mxu1 %v2020_v48 }
 0x222   : > { %1308 = vmatprep.subr.bf16.mxu1 %v2029_v51 }
 0x225   : > { %1309 = vmatpush1.bf16.msra.mxu1 %v2028_v52 }
 0x226   : > { %1310 = vmatprep.subr.bf16.mxu1 %v2037_v25 }
 0x229   : > { %1311 = vmatpush1.bf16.msra.mxu1 %v2036_v27  ;;  %v959_v27 = vld [vmem:[#allocation16 + $0x170] sm:$0xff] }
 0x22a   : > { %v2033_v32 = vcombine.high %v955_v26, %v959_v27  ;;  %v2032_v38 = vcombine.low %v955_v26, %v959_v27 }
 0x2e3   : > { %v789_v54 = vpop.f32.mrb[0].mxu1 }
 0x2e4   : > { %v803_v56 = vmul.f32 %v1979_v53, %v789_v54  ;;  %v2083_v57 = vpop.f32.mrb[1].mxu1 }
 0x2e5   : > { %v792_v58 = vpop.f32.mrb[2].mxu1  ;;  %v923_v57 = vld [vmem:[#allocation16 + $0x50] sm:$0xff] }
 0x2e6   : > { %v812_v59 = vadd.f32 %v1980_v55, %v803_v56  ;;  %v804_v60 = vmul.f32 %v1979_v53, %v792_v58  ;;  %v2084_v61 = vpop.f32.mrb[3].mxu1  ;;  %v927_v58 = vld [vmem:[#allocation16 + $0x70] sm:$0xff] }
 0x2e7   : > { %v2001_v0 = vcombine.high %v923_v57, %v927_v58  ;;  %v2000_v6 = vcombine.low %v923_v57, %v927_v58 }
 0x2e8   : > { %v813_v62 = vadd.f32 %v1980_v55, %v804_v60  ;;  %v814_v1 = vmax.f32 %v812_v59, 0.0  ;;  %v924_v59 = vld [vmem:[#allocation16 + $0x58] sm:$0xff] }
 0x2e9   : > { %v928_v60 = vld [vmem:[#allocation16 + $0x78] sm:$0xff] }
 0x2ea   : > { %v815_v2 = vmax.f32 %v813_v62, 0.0 }
 0x2ec   : > { %v824_v3 = vpack.c.bf16 %v815_v2, %v814_v1  ;;  %v2003_v1 = vcombine.high %v924_v59, %v928_v60  ;;  %v931_v2 = vld [vmem:[#allocation16 + $0x90] sm:$0xff] }
 0x2ee   : > { %2094 = vmatmul.mubr.msk.bf16.vlgmr.msra.gmra.mrb[4].mxu0 %vm751_vm3, %v824_v3  ;;  %v935_v3 = vld [vmem:[#allocation16 + $0xb0] sm:$0xff] }
 0x2ef   : > { %1342 = vmatpush1.bf16.msra.mxu0 %v1990_v33  ;;  %v2045_v33 = vcombine.high %v969_v30, %v973_v31  ;;  %1373 = vmatprep.mubr.bf16.mxu0 %v2622_v46  ;;  %v2008_v14 = vcombine.low %v931_v2, %v935_v3 }
 0x2f0   : > { %1343 = vmatprep.subr.bf16.mxu0 %v1999_v4  ;;  %v932_v4 = vld [vmem:[#allocation16 + $0x98] sm:$0xff] }
 0x2f1   : > { %1312 = vmatprep.subr.bf16.mxu1 %v2045_v33  ;;  %v2011_v9 = vcombine.high %v932_v4, %v936_v5 }
 0x2f2   : > { %1313 = vmatpush1.bf16.msra.mxu1 %v2044_v35  ;;  %v967_v35 = vld [vmem:[#allocation16 + $0x1b0] sm:$0xff] }
 0x2f3   : > { %1344 = vmatpush1.bf16.msra.mxu0 %v1998_v7  ;;  %1384 = vmatprep.subr.bf16.mxu1 %v1993_v41  ;;  %v2002_v7 = vcombine.low %v924_v59, %v928_v60  ;;  %v2041_v40 = vcombine.high %v963_v34, %v967_v35  ;;  %v3026_v59 = vld [vmem:[#allocation19] sm:$0xff] }
 0x2f4   : > { %1345 = vmatprep.subr.bf16.mxu0 %v2007_v8  ;;  %v2009_v8 = vcombine.high %v931_v2, %v935_v3 }
 0x2f7   : > { %1346 = vmatpush1.bf16.msra.mxu0 %v2006_v11  ;;  %v943_v11 = vld [vmem:[#allocation16 + $0xf0] sm:$0xff] }
 0x2f8   : > { %1347 = vmatprep.subr.bf16.mxu0 %v2015_v12  ;;  %v940_v12 = vld [vmem:[#allocation16 + $0xd8] sm:$0xff]  ;;  %v2016_v22 = vcombine.low %v939_v10, %v943_v11 }
 0x2f9   : > { %v2019_v17 = vcombine.high %v940_v12, %v944_v13  ;;  %v2018_v23 = vcombine.low %v940_v12, %v944_v13 }
 0x2fb   : > { %1348 = vmatpush1.bf16.msra.mxu0 %v2014_v15  ;;  %v2010_v15 = vcombine.low %v932_v4, %v936_v5 }
 0x2fc   : > { %1349 = vmatprep.subr.bf16.mxu0 %v2023_v16  ;;  %v2017_v16 = vcombine.high %v939_v10, %v943_v11 }
 0x2ff   : > { %1350 = vmatpush1.bf16.msra.mxu0 %v2022_v19  ;;  %v951_v19 = vld [vmem:[#allocation16 + $0x130] sm:$0xff] }
 0x300   : > { %1351 = vmatprep.subr.bf16.mxu0 %v2031_v20  ;;  %v948_v20 = vld [vmem:[#allocation16 + $0x118] sm:$0xff]  ;;  %v2025_v24 = vcombine.high %v947_v18, %v951_v19  ;;  %v2024_v30 = vcombine.low %v947_v18, %v951_v19 }
 0x303   : > { %1352 = vmatpush1.bf16.msra.mxu0 %v2030_v21  ;;  %v952_v21 = vld [vmem:[#allocation16 + $0x138] sm:$0xff] }
 0x304   : > { %1353 = vmatprep.subr.bf16.mxu0 %v2039_v29  ;;  %v2027_v25 = vcombine.high %v948_v20, %v952_v21  ;;  %v960_v29 = vld [vmem:[#allocation16 + $0x178] sm:$0xff]  ;;  %v2026_v31 = vcombine.low %v948_v20, %v952_v21 }
 0x307   : > { %1354 = vmatpush1.bf16.msra.mxu0 %v2038_v28  ;;  %v956_v28 = vld [vmem:[#allocation16 + $0x158] sm:$0xff] }
 0x308   : > { %1355 = vmatprep.subr.bf16.mxu0 %v2047_v37  ;;  %v2035_v33 = vcombine.high %v956_v28, %v960_v29  ;;  %v968_v37 = vld [vmem:[#allocation16 + $0x1b8] sm:$0xff]  ;;  %v2034_v39 = vcombine.low %v956_v28, %v960_v29 }
 0x30b   : > { %1356 = vmatpush1.bf16.msra.mxu0 %v2046_v36  ;;  %v964_v36 = vld [vmem:[#allocation16 + $0x198] sm:$0xff] }
 0x30c   : > { %1427 = vmatprep.subr.bf16.mxu0 %v1995_v45  ;;  %v2043_v41 = vcombine.high %v964_v36, %v968_v37  ;;  %v976_v45 = vld [vmem:[#allocation16 + $0x1f8] sm:$0xff] }
 0x3c1   : > { %v886_v48 = vpop.f32.mrb[4].mxu0 }
 0x3c2   : > { %v900_v50 = vmul.f32 %v1986_v47, %v886_v48  ;;  %v2095_v51 = vpop.f32.mrb[5].mxu0 }
 0x3c3   : > { %v889_v52 = vpop.f32.mrb[6].mxu0 }
 0x3c4   : > { %v909_v53 = vadd.f32 %v1987_v49, %v900_v50  ;;  %v901_v54 = vmul.f32 %v1986_v47, %v889_v52  ;;  %v2096_v55 = vpop.f32.mrb[7].mxu0  ;;  %v2042_v47 = vcombine.low %v964_v36, %v968_v37  ;;  %v1472_v52 = vlaneseq }
 0x3c6   : > { %v910_v56 = vadd.f32 %v1987_v49, %v901_v54  ;;  %v911_v61 = vmax.f32 %v909_v53, 0.0  ;;  %v3018_v53 = vshrl.u32 %v1472_v52, 7 }
 0x3c8   : > { %v912_v62 = vmax.f32 %v910_v56, 0.0  ;;  %v1474_v54 = vsub.s32 0, %v3018_v53  ;;  %v1482_v55 = vsub.s32 2, %v3018_v53  ;;  %v3022_v56 = vld [vmem:[#allocation17] sm:$0xff]  ;;  %v1478_v57 = vsub.s32 1, %v3018_v53 }
 0x3c9   : > { %v1486_v58 = vsub.s32 3, %v3018_v53 }
 0x3ca   : > { %v3012_v63 = vpack.c.bf16 %v912_v62, %v911_v61  ;;  %v1475_v60 = vrot.slane %v3022_v56, %v1474_v54  ;;  %v1483_v61 = vrot.slane %v3022_v56, %v1482_v55  ;;  %v1479_v62 = vrot.slane %v3022_v56, %v1478_v57 }
 0x3cb   : > { %v1537_v4 = vrot.slane %v3026_v59, %v1478_v57  ;;  %v1545_v5 = vrot.slane %v3026_v59, %v1486_v58 }
 0x3cc   : > { %1331 = vmatmul.mubr.bf16.vlgmr.msra.gmra.mrb[4].mxu1 %v3012_v63  ;;  %1374 = vmatmul.mubr.bf16.vlgmr.msra.gmra.mrb[8].mxu0 %v3012_v63 }
 0x3cd   : > { %1385 = vmatpush1.bf16.msra.mxu1 %v1992_v43  ;;  %1428 = vmatpush1.bf16.msra.mxu0 %v1994_v44  ;;  %v975_v43 = vld [vmem:[#allocation16 + $0x1f0] sm:$0xff]  ;;  %v972_v44 = vld [vmem:[#allocation16 + $0x1d8] sm:$0xff] }
 0x3ce   : > { %1386 = vmatprep.subr.bf16.mxu1 %v2001_v0  ;;  %1429 = vmatprep.subr.bf16.mxu0 %v2003_v1  ;;  %v2049_v48 = vcombine.high %v971_v42, %v975_v43  ;;  %v2051_v49 = vcombine.high %v972_v44, %v976_v45  ;;  %v2048_v50 = vcombine.low %v971_v42, %v975_v43 }
 0x3cf   : > { %1416 = vmatprep.mubr.bf16.mxu1 %v2622_v46  ;;  %1459 = vmatprep.mubr.bf16.mxu0 %v2622_v46  ;;  %v2040_v46 = vcombine.low %v963_v34, %v967_v35  ;;  %v2050_v51 = vcombine.low %v972_v44, %v976_v45  ;;  %v1533_v0 = vrot.slane %v3026_v59, %v1474_v54 }
 0x3d0   : > { %v1541_v1 = vrot.slane %v3026_v59, %v1482_v55 }
 0x3d1   : > { %1387 = vmatpush1.bf16.msra.mxu1 %v2000_v6  ;;  %1430 = vmatpush1.bf16.msra.mxu0 %v2002_v7 }
 0x3d2   : > { %1388 = vmatprep.subr.bf16.mxu1 %v2009_v8  ;;  %1431 = vmatprep.subr.bf16.mxu0 %v2011_v9 }
 0x3d5   : > { %1389 = vmatpush1.bf16.msra.mxu1 %v2008_v14  ;;  %1432 = vmatpush1.bf16.msra.mxu0 %v2010_v15 }
 0x3d6   : > { %1390 = vmatprep.subr.bf16.mxu1 %v2017_v16  ;;  %1433 = vmatprep.subr.bf16.mxu0 %v2019_v17 }
 0x3d9   : > { %1391 = vmatpush1.bf16.msra.mxu1 %v2016_v22  ;;  %1434 = vmatpush1.bf16.msra.mxu0 %v2018_v23 }
 0x3da   : > { %1392 = vmatprep.subr.bf16.mxu1 %v2025_v24  ;;  %1435 = vmatprep.subr.bf16.mxu0 %v2027_v25 }
 0x3dd   : > { %1393 = vmatpush1.bf16.msra.mxu1 %v2024_v30  ;;  %1436 = vmatpush1.bf16.msra.mxu0 %v2026_v31 }
 0x3de   : > { %1394 = vmatprep.subr.bf16.mxu1 %v2033_v32  ;;  %1437 = vmatprep.subr.bf16.mxu0 %v2035_v33 }
 0x3e1   : > { %1395 = vmatpush1.bf16.msra.mxu1 %v2032_v38  ;;  %1438 = vmatpush1.bf16.msra.mxu0 %v2034_v39 }
 0x3e2   : > { %1396 = vmatprep.subr.bf16.mxu1 %v2041_v40  ;;  %1439 = vmatprep.subr.bf16.mxu0 %v2043_v41 }
 0x3e5   : > { %1397 = vmatpush1.bf16.msra.mxu1 %v2040_v46  ;;  %1440 = vmatpush1.bf16.msra.mxu0 %v2042_v47  ;;  %v2623_v47 = vmov 1966171168  }
 0x3e6   : > { %1398 = vmatprep.subr.bf16.mxu1 %v2049_v48  ;;  %1441 = vmatprep.subr.bf16.mxu0 %v2051_v49  ;;  %v1706_v48 = vunpack.c.l.s4 %v2623_v47 }
 0x3e9   : > { %1399 = vmatpush1.bf16.msra.mxu1 %v2048_v50  ;;  %1442 = vmatpush1.bf16.msra.mxu0 %v2050_v51 }
 0x3ec   : > { %1417 = vmatmul.mubr.bf16.vlgmr.msra.gmra.mrb[8].mxu1 %v3012_v63  ;;  %1460 = vmatmul.mubr.bf16.vlgmr.msra.gmra.mrb[12].mxu0 %v3012_v63  ;;  %v1487_v63 = vrot.slane %v3022_v56, %v1486_v58 }
 0x49f   : > { %v1332_v2 = vpop.f32.mrb[4].mxu1  ;;  %v1375_v3 = vpop.f32.mrb[8].mxu0 }
 0x4a0   : > { %v1512_v6 = vmul.f32 %v1475_v60, %v1332_v2  ;;  %v1514_v7 = vmul.f32 %v1483_v61, %v1375_v3  ;;  %v1334_v8 = vpop.f32.mrb[5].mxu1  ;;  %v1377_v9 = vpop.f32.mrb[9].mxu0 }
 0x4a1   : > { %v1513_v10 = vmul.f32 %v1479_v62, %v1334_v8  ;;  %v1515_v11 = vmul.f32 %v1487_v63, %v1377_v9  ;;  %v1336_v12 = vpop.f32.mrb[6].mxu1  ;;  %v1379_v13 = vpop.f32.mrb[10].mxu0  ;;  %v1490_v9 = vsub.s32 4, %v3018_v53 }
 0x4a2   : > { %v1570_v14 = vadd.f32 %v1533_v0, %v1512_v6  ;;  %v1572_v15 = vadd.f32 %v1541_v1, %v1514_v7  ;;  %v1520_v16 = vmul.f32 %v1475_v60, %v1336_v12  ;;  %v1522_v17 = vmul.f32 %v1483_v61, %v1379_v13  ;;  %v1338_v18 = vpop.f32.mrb[7].mxu1  ;;  %v1381_v19 = vpop.f32.mrb[11].mxu0 }
 0x4a3   : > { %v1571_v20 = vadd.f32 %v1537_v4, %v1513_v10  ;;  %v1573_v21 = vadd.f32 %v1545_v5, %v1515_v11  ;;  %v1521_v22 = vmul.f32 %v1479_v62, %v1338_v18  ;;  %v1523_v23 = vmul.f32 %v1487_v63, %v1381_v19 }
 0x4a4   : > { %v1578_v24 = vadd.f32 %v1533_v0, %v1520_v16  ;;  %v1580_v25 = vadd.f32 %v1541_v1, %v1522_v17  ;;  %v1586_v28 = vmax.f32 %v1570_v14, 0.0  ;;  %v1588_v29 = vmax.f32 %v1572_v15, 0.0 }
 0x4a5   : > { %v1579_v26 = vadd.f32 %v1537_v4, %v1521_v22  ;;  %v1581_v27 = vadd.f32 %v1545_v5, %v1523_v23  ;;  %v1587_v32 = vmax.f32 %v1571_v20, 0.0  ;;  %v1589_v33 = vmax.f32 %v1573_v21, 0.0 }
 0x4a6   : > { %v1594_v30 = vmax.f32 %v1578_v24, 0.0  ;;  %v1596_v31 = vmax.f32 %v1580_v25, 0.0  ;;  %v1707_v60 = vunpack.c.0.s8 %v1706_v48  ;;  %v1498_v10 = vsub.s32 6, %v3018_v53 }
 0x4a7   : > { %v1595_v34 = vmax.f32 %v1579_v26, 0.0  ;;  %v1597_v35 = vmax.f32 %v1581_v27, 0.0  ;;  %v1494_v13 = vsub.s32 5, %v3018_v53  ;;  %v1502_v14 = vsub.s32 7, %v3018_v53 }
 0x4a8   : > { %v1602_v36 = vmax.f32 %v1586_v28, %v1594_v30  ;;  %v1604_v37 = vmax.f32 %v1588_v29, %v1596_v31  ;;  %v3037_v5 = vsub.s32 %v1707_v60, %v3018_v53  ;;  %v1491_v16 = vrot.slane %v3022_v56, %v1490_v9 }
 0x4a9   : > { %v1603_v38 = vmax.f32 %v1587_v32, %v1595_v34  ;;  %v1605_v39 = vmax.f32 %v1589_v33, %v1597_v35  ;;  %v1499_v17 = vrot.slane %v3022_v56, %v1498_v10  ;;  %v1495_v18 = vrot.slane %v3022_v56, %v1494_v13 }
 0x4aa   : > { %v1645_v40 = vrot.slane %v1602_v36, 4  ;;  %v1657_v41 = vrot.slane %v1604_v37, 4  ;;  %v1503_v19 = vrot.slane %v3022_v56, %v1502_v14  ;;  %v1549_v20 = vrot.slane %v3026_v59, %v1490_v9 }
 0x4ab   : > { %v1651_v42 = vrot.slane %v1603_v38, 4  ;;  %v1663_v43 = vrot.slane %v1605_v39, 4  ;;  %v1557_v21 = vrot.slane %v3026_v59, %v1498_v10  ;;  %v1553_v24 = vrot.slane %v3026_v59, %v1494_v13 }
 0x4ac   : > { %v1646_v44 = vmax.f32 %v1602_v36, %v1645_v40  ;;  %v1658_v45 = vmax.f32 %v1604_v37, %v1657_v41  ;;  %v1561_v53 = vrot.slane %v3026_v59, %v1502_v14 }
 0x4ad   : > { %v1652_v46 = vmax.f32 %v1603_v38, %v1651_v42  ;;  %v1664_v49 = vmax.f32 %v1605_v39, %v1663_v43 }
 0x4ae   : > { %v1647_v50 = vrot.slane %v1646_v44, 2  ;;  %v1659_v51 = vrot.slane %v1658_v45, 2 }
 0x4af   : > { %v1653_v52 = vrot.slane %v1652_v46, 2  ;;  %v1665_v54 = vrot.slane %v1664_v49, 2 }
 0x4b0   : > { %v1648_v55 = vmax.f32 %v1646_v44, %v1647_v50  ;;  %v1660_v57 = vmax.f32 %v1658_v45, %v1659_v51 }
 0x4b1   : > { %v1654_v58 = vmax.f32 %v1652_v46, %v1653_v52  ;;  %v1666_v61 = vmax.f32 %v1664_v49, %v1665_v54 }
 0x4b2   : > { %v1649_v62 = vrot.slane %v1648_v55, 1  ;;  %v1661_v63 = vrot.slane %v1660_v57, 1 }
 0x4b3   : > { %v1655_v0 = vrot.slane %v1654_v58, 1  ;;  %v1667_v1 = vrot.slane %v1666_v61, 1 }
 0x4b4   : > { %v1650_v2 = vmax.f32 %v1648_v55, %v1649_v62  ;;  %v1662_v3 = vmax.f32 %v1660_v57, %v1661_v63 }
 0x4b5   : > { %v1656_v4 = vmax.f32 %v1654_v58, %v1655_v0  ;;  %v1668_v6 = vmax.f32 %v1666_v61, %v1667_v1 }
 0x4b7   : > { %v1701_v7 = vcombine.low %v1650_v2, %v1656_v4  ;;  %v1702_v8 = vcombine.low %v1662_v3, %v1668_v6 }
 0x4b9   : > { %v3042_v11 = vrot.slane %v1701_v7, %v3037_v5  ;;  %v3045_v12 = vrot.slane %v1702_v8, %v3037_v5 }
 0x4bb   : > { %v1733_v15 = vcombine.low %v3042_v11, %v3045_v12 }
 0x4bf   : > { %v1418_v22 = vpop.f32.mrb[8].mxu1  ;;  %v1461_v23 = vpop.f32.mrb[12].mxu0 }
 0x4c0   : > { %v1516_v25 = vmul.f32 %v1491_v16, %v1418_v22  ;;  %v1518_v26 = vmul.f32 %v1499_v17, %v1461_v23  ;;  %v1420_v27 = vpop.f32.mrb[9].mxu1  ;;  %v1463_v28 = vpop.f32.mrb[13].mxu0 }
 0x4c1   : > { %v1517_v29 = vmul.f32 %v1495_v18, %v1420_v27  ;;  %v1519_v30 = vmul.f32 %v1503_v19, %v1463_v28  ;;  %v1422_v31 = vpop.f32.mrb[10].mxu1  ;;  %v1465_v32 = vpop.f32.mrb[14].mxu0  ;;  %v1741_v28 = vrot.slane %v1733_v15, %v3037_v5 }
 0x4c2   : > { %v1574_v33 = vadd.f32 %v1549_v20, %v1516_v25  ;;  %v1576_v56 = vadd.f32 %v1557_v21, %v1518_v26  ;;  %v1524_v34 = vmul.f32 %v1491_v16, %v1422_v31  ;;  %v1526_v35 = vmul.f32 %v1499_v17, %v1465_v32  ;;  %v1424_v36 = vpop.f32.mrb[11].mxu1  ;;  %v1467_v37 = vpop.f32.mrb[15].mxu0 }
 0x4c3   : > { %v1575_v38 = vadd.f32 %v1553_v24, %v1517_v29  ;;  %v1577_v39 = vadd.f32 %v1561_v53, %v1519_v30  ;;  %v1525_v40 = vmul.f32 %v1495_v18, %v1424_v36  ;;  %v1527_v41 = vmul.f32 %v1503_v19, %v1467_v37 }
 0x4c4   : > { %v1582_v42 = vadd.f32 %v1549_v20, %v1524_v34  ;;  %v1584_v59 = vadd.f32 %v1557_v21, %v1526_v35  ;;  %v1590_v45 = vmax.f32 %v1574_v33, 0.0  ;;  %v1592_v46 = vmax.f32 %v1576_v56, 0.0 }
 0x4c5   : > { %v1583_v43 = vadd.f32 %v1553_v24, %v1525_v40  ;;  %v1585_v44 = vadd.f32 %v1561_v53, %v1527_v41  ;;  %v1591_v49 = vmax.f32 %v1575_v38, 0.0  ;;  %v1593_v50 = vmax.f32 %v1577_v39, 0.0 }
 0x4c6   : > { %v1598_v47 = vmax.f32 %v1582_v42, 0.0  ;;  %v1600_v48 = vmax.f32 %v1584_v59, 0.0 }
 0x4c7   : > { %v1599_v51 = vmax.f32 %v1583_v43, 0.0  ;;  %v1601_v52 = vmax.f32 %v1585_v44, 0.0 }
 0x4c8   : > { %v1606_v54 = vmax.f32 %v1590_v45, %v1598_v47  ;;  %v1608_v55 = vmax.f32 %v1592_v46, %v1600_v48 }
 0x4c9   : > { %v1607_v57 = vmax.f32 %v1591_v49, %v1599_v51  ;;  %v1609_v58 = vmax.f32 %v1593_v50, %v1601_v52 }
 0x4ca   : > { %v1669_v60 = vrot.slane %v1606_v54, 4  ;;  %v1681_v61 = vrot.slane %v1608_v55, 4 }
 0x4cb   : > { %v1675_v62 = vrot.slane %v1607_v57, 4  ;;  %v1687_v63 = vrot.slane %v1609_v58, 4 }
 0x4cc   : > { %v1670_v0 = vmax.f32 %v1606_v54, %v1669_v60  ;;  %v1682_v1 = vmax.f32 %v1608_v55, %v1681_v61 }
 0x4cd   : > { %v1676_v2 = vmax.f32 %v1607_v57, %v1675_v62  ;;  %v1688_v3 = vmax.f32 %v1609_v58, %v1687_v63 }
 0x4ce   : > { %v1671_v4 = vrot.slane %v1670_v0, 2  ;;  %v1683_v6 = vrot.slane %v1682_v1, 2 }
 0x4cf   : > { %v1677_v7 = vrot.slane %v1676_v2, 2  ;;  %v1689_v8 = vrot.slane %v1688_v3, 2 }
 0x4d0   : > { %v1672_v9 = vmax.f32 %v1670_v0, %v1671_v4  ;;  %v1684_v10 = vmax.f32 %v1682_v1, %v1683_v6 }
 0x4d1   : > { %v1678_v13 = vmax.f32 %v1676_v2, %v1677_v7  ;;  %v1690_v14 = vmax.f32 %v1688_v3, %v1689_v8 }
 0x4d2   : > { %v1673_v16 = vrot.slane %v1672_v9, 1  ;;  %v1685_v17 = vrot.slane %v1684_v10, 1 }
 0x4d3   : > { %v1679_v18 = vrot.slane %v1678_v13, 1  ;;  %v1691_v19 = vrot.slane %v1690_v14, 1 }
 0x4d4   : > { %v1674_v20 = vmax.f32 %v1672_v9, %v1673_v16  ;;  %v1686_v21 = vmax.f32 %v1684_v10, %v1685_v17 }
 0x4d5   : > { %v1680_v22 = vmax.f32 %v1678_v13, %v1679_v18  ;;  %v1692_v23 = vmax.f32 %v1690_v14, %v1691_v19 }
 0x4d7   : > { %v1703_v24 = vcombine.low %v1674_v20, %v1680_v22  ;;  %v1704_v53 = vcombine.low %v1686_v21, %v1692_v23 }
 0x4d9   : > { %v1725_v25 = vrot.slane %v1703_v24, %v3037_v5  ;;  %v1732_v26 = vrot.slane %v1704_v53, %v3037_v5 }
 0x4db   : > { %v1734_v27 = vcombine.low %v1725_v25, %v1732_v26 }
 0x4dd   : > { %v1748_v29 = vrot.slane %v1734_v27, %v3037_v5 }
 0x4df   : > { %v1749_v30 = vcombine.low %v1741_v28, %v1748_v29 }
 0x4e1   : > { %1751 = vst [vmem:[%s627_s17] sm:$0xff] %v1749_v30 }
 0x4e2 PF: > { %s3117_s24 = sld [smem:[#allocation26_spill]]  ;;  %s3118_s25 = smov %s2599_s26 }
 0x4e3   : > { %s3119_s26 = smov %s3121_s16 }
 0x4e8   : > { %s29_s27 = sadd.s32 1, %s3117_s24  }
 0x4e9   : > { %p26_p7 = scmp.ge.s32.totalorder %s29_s27, 4  }
 0x4eb   :  { %28 = sbr.rel (!%p26_p7) target bundleno = 12 (0xc), region = 158 }
 0x4f2   :  { %1771 = vsyncpa [#allocation4], 1 }
 0x4f3   :  { %1773 = vsyncpa [#allocation4 + $0x1], 1 }
 0x4f4   :  { %1774 = vsyncpa [#allocation6], 1 }
 0x4f5   :  { %1775 = vsyncpa [#allocation9], 1 }
 0x4f6   :  { %1776 = vsyncpa [#allocation12], 1 }
 0x4f7   :  { %1777 = vsyncpa [#allocation15], 1 }
 0x4f8   :  { %1778 = vsyncpa [#allocation18], 1 }

// kernel: pointnet_forward.7
= control target key start
LH: loop header
LB: loop body
LE: loop exit
PB: predicated region body
PF: predicated region fallthrough
CT: control target
= control target key end

     0   :  { %15 = vsyncpa [#allocation3], 0  ;;  %s4195_s0 = inlined_call_operand.vmem [shape: bf16[8,1024], index: 0, kind: input, shape index: {}]   ;;  %s4196_s1 = inlined_call_operand.hbm [shape: bf16[1024,512], index: 1, kind: input, shape index: {}]   ;;  %s4197_s2 = inlined_call_operand.hbm [shape: f32[1,512], index: 2, kind: input, shape index: {}]   ;;  %s4198_s3 = inlined_call_operand.hbm [shape: f32[1,512], index: 3, kind: input, shape index: {}]   ;;  %s4199_s4 = inlined_call_operand.hbm [shape: bf16[512,256], index: 4, kind: input, shape index: {}]   ;;  %s4200_s5 = inlined_call_operand.hbm [shape: f32[1,256], index: 5, kind: input, shape index: {}]   ;;  %s4201_s6 = inlined_call_operand.hbm [shape: f32[1,256], index: 6, kind: input, shape index: {}]   ;;  %s4202_s7 = inlined_call_operand.hbm [shape: bf16[256,128], index: 7, kind: input, shape index: {}]   ;;  %s4203_s8 = inlined_call_operand.hbm [shape: f32[1,128], index: 8, kind: input, shape index: {}]   ;;  %s4204_s9 = inlined_call_operand.hbm [shape: f32[1,128], index: 9, kind: input, shape index: {}]   ;;  %s4205_s10 = inlined_call_operand.vmem [shape: f32[8,128], index: 10, kind: output, shape index: {}]  }
   0x1   :  { %16 = vsyncpa [#allocation5], 0 }
   0x2   :  { %17 = vsyncpa [#allocation8], 0 }
   0x3   :  { %18 = vsyncpa [#allocation11], 0 }
   0x4   :  { %19 = vsyncpa [#allocation14], 0  ;;  %s3915_s13 = smov [#allocation4]   ;;  %s3916_s15 = smov [#allocation7]  }
   0x5   :  { %s40_s14 = sshll.u32 %s3915_s13, 4  ;;  %s59_s16 = sshll.u32 %s3916_s15, 4  ;;  %s41_s14 = int_to_ptr.vmem [resolvable:$true] %s40_s14  ;;  %s3985_s16 = int_to_ptr.vmem [resolvable:$true] %s59_s16 }
   0x6   :  { %s3707_s19 = scalar_lea.hbm %s4197_s2, 64 }
   0x7   :  { %p3708_p0 = scmp.ne.s32.totalorder %s4197_s2, %s3707_s19  ;;  %p3711_p1 = scmp.lt.u32.totalorder %s3707_s19, %s4197_s2 }
   0x9   :  { %p3713_p2 = pnand %p3711_p1, %p3708_p0 }
   0xb   :  { %3716 = shalt.err (!%p3713_p2)
}
   0xc   :  { %s3717_s24 = scalar_lea.vmem %s41_s14, 64  ;;  %p3722_p4 = scmp.lt.s32.totalorder %s41_s14, %s41_s14 }
   0xd   :  { %p3718_p3 = scmp.ne.s32.totalorder %s41_s14, %s3717_s24  ;;  %p3723_p5 = scmp.lt.s32.totalorder %s3717_s24, %s3717_s24 }
   0xf   :  { %p3724_p6 = por %p3723_p5, %p3722_p4 }
  0x11   :  { %p3725_p7 = pnand %p3724_p6, %p3718_p3 }
  0x13   :  { %3728 = shalt.err (!%p3725_p7)
}
  0x14   :  { %43 = dma.hbm_to_vmem [thread:$0]  %s4197_s2, 64, %s41_s14, [#allocation5]  }
  0x15   :  { %s3729_s29 = scalar_lea.hbm %s4199_s4, 8192 }
  0x16   :  { %p3730_p8 = scmp.ne.s32.totalorder %s4199_s4, %s3729_s29  ;;  %p3733_p9 = scmp.lt.u32.totalorder %s3729_s29, %s4199_s4 }
  0x18   :  { %p3735_p10 = pnand %p3733_p9, %p3730_p8 }
  0x1a   :  { %3738 = shalt.err (!%p3735_p10)
}
  0x1b   :  { %s3739_s15 = scalar_lea.vmem %s3985_s16, 8192  ;;  %p3744_p12 = scmp.lt.s32.totalorder %s3985_s16, %s3985_s16 }
  0x1c   :  { %p3740_p11 = scmp.ne.s32.totalorder %s3985_s16, %s3739_s15  ;;  %p3745_p13 = scmp.lt.s32.totalorder %s3739_s15, %s3739_s15 }
  0x1e   :  { %p3746_p0 = por %p3745_p13, %p3744_p12 }
  0x20   :  { %p3747_p1 = pnand %p3746_p0, %p3740_p11 }
  0x22   :  { %3750 = shalt.err (!%p3747_p1)
}
  0x23   :  { %s3917_s2 = smov 128   ;;  %s3918_s14 = smov 8  }
  0x24   :  { %65 = dma.hbm_to_vmem [thread:$0]  %s4199_s4, 8192, %s3985_s16, [#allocation8], %s3917_s2, %s3917_s2, %s3918_s14  }
  0x25   :  { %s3919_s19 = smov [#allocation10]   ;;  %s3920_s21 = smov [#allocation13]  }
  0x26   :  { %s82_s20 = sshll.u32 %s3919_s19, 4  ;;  %s104_s22 = sshll.u32 %s3920_s21, 4  ;;  %s83_s20 = int_to_ptr.vmem [resolvable:$true] %s82_s20  ;;  %s105_s22 = int_to_ptr.vmem [resolvable:$true] %s104_s22 }
  0x27   :  { %s3751_s25 = scalar_lea.hbm %s4201_s6, 32 }
  0x28   :  { %p3752_p2 = scmp.ne.s32.totalorder %s4201_s6, %s3751_s25  ;;  %p3755_p3 = scmp.lt.u32.totalorder %s3751_s25, %s4201_s6 }
  0x2a   :  { %p3757_p4 = pnand %p3755_p3, %p3752_p2 }
  0x2c   :  { %3760 = shalt.err (!%p3757_p4)
}
  0x2d   :  { %s3761_s4 = scalar_lea.vmem %s83_s20, 32  ;;  %p3766_p6 = scmp.lt.s32.totalorder %s83_s20, %s83_s20 }
  0x2e   :  { %p3762_p5 = scmp.ne.s32.totalorder %s83_s20, %s3761_s4  ;;  %p3767_p7 = scmp.lt.s32.totalorder %s3761_s4, %s3761_s4 }
  0x30   :  { %p3768_p8 = por %p3767_p7, %p3766_p6 }
  0x32   :  { %p3769_p9 = pnand %p3768_p8, %p3762_p5 }
  0x34   :  { %3772 = shalt.err (!%p3769_p9)
}
  0x35   :  { %85 = dma.hbm_to_vmem [thread:$0]  %s4201_s6, 32, %s83_s20, [#allocation11]  }
  0x36   :  { %s3773_s13 = scalar_lea.hbm %s4203_s8, 16 }
  0x37   :  { %p3774_p10 = scmp.ne.s32.totalorder %s4203_s8, %s3773_s13  ;;  %p3777_p11 = scmp.lt.u32.totalorder %s3773_s13, %s4203_s8 }
  0x39   :  { %p3779_p12 = pnand %p3777_p11, %p3774_p10 }
  0x3b   :  { %3782 = shalt.err (!%p3779_p12)
}
  0x3c   :  { %s3783_s18 = scalar_lea.vmem %s105_s22, 16  ;;  %s3787_s19 = scalar_lea.vmem %s105_s22, 32 }
  0x3d   :  { %p3784_p13 = scmp.ne.s32.totalorder %s105_s22, %s3783_s18  ;;  %p3788_p0 = scmp.lt.s32.totalorder %s105_s22, %s105_s22 }
  0x3e   :  { %p3789_p1 = scmp.lt.s32.totalorder %s3787_s19, %s3783_s18 }
  0x40   :  { %p3790_p2 = por %p3789_p1, %p3788_p0 }
  0x42   :  { %p3791_p3 = pnand %p3790_p2, %p3784_p13 }
  0x44   :  { %3794 = shalt.err (!%p3791_p3)
}
  0x45   :  { %107 = dma.hbm_to_vmem [thread:$0]  %s4203_s8, 16, %s105_s22, [#allocation14]  }
  0x46   :  { %s3921_s21 = smov [#allocation2]   ;;  %s3795_s26 = scalar_lea.hbm %s4196_s1, 32768 }
  0x47   :  { %s27_s23 = sshll.u32 %s3921_s21, 4  ;;  %p3796_p4 = scmp.ne.s32.totalorder %s4196_s1, %s3795_s26  ;;  %s28_s23 = int_to_ptr.vmem [resolvable:$true] %s27_s23 }
  0x48   :  { %p3799_p5 = scmp.lt.u32.totalorder %s3795_s26, %s4196_s1 }
  0x4a   :  { %p3801_p6 = pnand %p3799_p5, %p3796_p4 }
  0x4c   :  { %3804 = shalt.err (!%p3801_p6)
}
  0x4d   :  { %s3805_s16 = scalar_lea.vmem %s28_s23, 32768  ;;  %p3810_p8 = scmp.lt.s32.totalorder %s28_s23, %s28_s23 }
  0x4e   :  { %p3806_p7 = scmp.ne.s32.totalorder %s28_s23, %s3805_s16  ;;  %p3811_p9 = scmp.lt.s32.totalorder %s3805_s16, %s3805_s16 }
  0x50   :  { %p3812_p10 = por %p3811_p9, %p3810_p8 }
  0x52   :  { %p3813_p11 = pnand %p3812_p10, %p3806_p7 }
  0x54   :  { %3816 = shalt.err (!%p3813_p11)
}
  0x55   :  { %s3922_s8 = smov 256   ;;  %s3923_s22 = smov 16  }
  0x56   :  { %33 = dma.hbm_to_vmem [thread:$0]  %s4196_s1, 32768, %s28_s23, [#allocation3], %s3922_s8, %s3922_s8, %s3923_s22  }
  0x57   :  { %s3924_s12 = smov [#allocation6]   ;;  %s3925_s15 = smov [#allocation9]  }
  0x58   :  { %s50_s13 = sshll.u32 %s3924_s12, 4  ;;  %s72_s2 = sshll.u32 %s3925_s15, 4  ;;  %s51_s13 = int_to_ptr.vmem [resolvable:$true] %s50_s13  ;;  %s73_s2 = int_to_ptr.vmem [resolvable:$true] %s72_s2 }
  0x59   :  { %s3817_s18 = scalar_lea.hbm %s4198_s3, 64 }
  0x5a   :  { %p3818_p12 = scmp.ne.s32.totalorder %s4198_s3, %s3817_s18  ;;  %p3821_p13 = scmp.lt.u32.totalorder %s3817_s18, %s4198_s3 }
  0x5c   :  { %p3823_p0 = pnand %p3821_p13, %p3818_p12 }
  0x5e   :  { %3826 = shalt.err (!%p3823_p0)
}
  0x5f   :  { %s3827_s1 = scalar_lea.vmem %s51_s13, 64  ;;  %p3832_p2 = scmp.lt.s32.totalorder %s51_s13, %s51_s13 }
  0x60   :  { %p3828_p1 = scmp.ne.s32.totalorder %s51_s13, %s3827_s1  ;;  %p3833_p3 = scmp.lt.s32.totalorder %s3827_s1, %s3827_s1 }
  0x62   :  { %p3834_p4 = por %p3833_p3, %p3832_p2 }
  0x64   :  { %p3835_p5 = pnand %p3834_p4, %p3828_p1 }
  0x66   :  { %3838 = shalt.err (!%p3835_p5)
}
  0x67   :  { %53 = dma.hbm_to_vmem [thread:$0]  %s4198_s3, 64, %s51_s13, [#allocation5]  }
  0x68   :  { %s3839_s27 = scalar_lea.hbm %s4200_s5, 32 }
  0x69   :  { %p3840_p6 = scmp.ne.s32.totalorder %s4200_s5, %s3839_s27  ;;  %p3843_p7 = scmp.lt.u32.totalorder %s3839_s27, %s4200_s5 }
  0x6b   :  { %p3845_p8 = pnand %p3843_p7, %p3840_p6 }
  0x6d   :  { %3848 = shalt.err (!%p3845_p8)
}
  0x6e   :  { %s3849_s8 = scalar_lea.vmem %s73_s2, 32  ;;  %p3854_p10 = scmp.lt.s32.totalorder %s73_s2, %s73_s2 }
  0x6f   :  { %p3850_p9 = scmp.ne.s32.totalorder %s73_s2, %s3849_s8  ;;  %p3855_p11 = scmp.lt.s32.totalorder %s3849_s8, %s3849_s8 }
  0x71   :  { %p3856_p12 = por %p3855_p11, %p3854_p10 }
  0x73   :  { %p3857_p13 = pnand %p3856_p12, %p3850_p9 }
  0x75   :  { %3860 = shalt.err (!%p3857_p13)
}
  0x76   :  { %75 = dma.hbm_to_vmem [thread:$0]  %s4200_s5, 32, %s73_s2, [#allocation8]  }
  0x77   :  { %s3926_s30 = smov [#allocation12]   ;;  %s3861_s15 = scalar_lea.hbm %s4202_s7, 2048 }
  0x78   :  { %s91_s11 = sshll.u32 %s3926_s30, 4  ;;  %p3862_p0 = scmp.ne.s32.totalorder %s4202_s7, %s3861_s15  ;;  %s92_s11 = int_to_ptr.vmem [resolvable:$true] %s91_s11 }
  0x79   :  { %p3865_p1 = scmp.lt.u32.totalorder %s3861_s15, %s4202_s7 }
  0x7b   :  { %p3867_p2 = pnand %p3865_p1, %p3862_p0 }
  0x7d   :  { %3870 = shalt.err (!%p3867_p2)
}
  0x7e   :  { %s3871_s6 = scalar_lea.vmem %s92_s11, 2048  ;;  %p3876_p4 = scmp.lt.s32.totalorder %s92_s11, %s92_s11 }
  0x7f   :  { %p3872_p3 = scmp.ne.s32.totalorder %s92_s11, %s3871_s6  ;;  %p3877_p5 = scmp.lt.s32.totalorder %s3871_s6, %s3871_s6 }
  0x81   :  { %p3878_p6 = por %p3877_p5, %p3876_p4 }
  0x83   :  { %p3879_p7 = pnand %p3878_p6, %p3872_p3 }
  0x85   :  { %3882 = shalt.err (!%p3879_p7)
}
  0x86   :  { %s3927_s5 = smov 64   ;;  %s3928_s2 = smov 4  }
  0x87   :  { %97 = dma.hbm_to_vmem [thread:$0]  %s4202_s7, 2048, %s92_s11, [#allocation11], %s3927_s5, %s3927_s5, %s3928_s2  }
  0x88   :  { %s3929_s1 = smov [#allocation15]   ;;  %s3883_s26 = scalar_lea.hbm %s4204_s9, 16 }
  0x89   :  { %s114_s23 = sshll.u32 %s3929_s1, 4  ;;  %p3884_p8 = scmp.ne.s32.totalorder %s4204_s9, %s3883_s26  ;;  %s115_s23 = int_to_ptr.vmem [resolvable:$true] %s114_s23 }
  0x8a   :  { %p3887_p9 = scmp.lt.u32.totalorder %s3883_s26, %s4204_s9 }
  0x8c   :  { %p3889_p10 = pnand %p3887_p9, %p3884_p8 }
  0x8e   :  { %3892 = shalt.err (!%p3889_p10)
}
  0x8f   :  { %s3893_s16 = scalar_lea.vmem %s115_s23, 16  ;;  %s3897_s7 = scalar_lea.vmem %s115_s23, 32 }
  0x90   :  { %p3894_p11 = scmp.ne.s32.totalorder %s115_s23, %s3893_s16  ;;  %p3898_p12 = scmp.lt.s32.totalorder %s115_s23, %s115_s23 }
  0x91   :  { %p3899_p13 = scmp.lt.s32.totalorder %s3897_s7, %s3893_s16 }
  0x93   :  { %p3900_p0 = por %p3899_p13, %p3898_p12 }
  0x95   :  { %p3901_p1 = pnand %p3900_p0, %p3894_p11 }
  0x97   :  { %3904 = shalt.err (!%p3901_p1)
}
  0x98   :  { %117 = dma.hbm_to_vmem [thread:$0]  %s4204_s9, 16, %s115_s23, [#allocation14]  }
  0x99   :  { %3905 = dma.done.wait [#allocation3], 32768  }
  0x9a   :  { %3906 = vsyncadd [#allocation3], 4294934528 }
  0x9b   :  { %3907 = dma.done.wait [#allocation5], 128  }
  0x9c   :  { %3908 = vsyncadd [#allocation5], 4294967168 }
  0x9d   :  { %3909 = dma.done.wait [#allocation8], 8224  }
  0x9e   :  { %3910 = vsyncadd [#allocation8], 4294959072 }
  0x9f   :  { %3911 = dma.done.wait [#allocation11], 2080  }
  0xa0   :  { %3912 = vsyncadd [#allocation11], 4294965216 }
  0xa1   :  { %3913 = dma.done.wait [#allocation14], 32  }
  0xa2   :  { %3914 = vsyncadd [#allocation14], 4294967264  ;;  %v3203_v0 = vld [vmem:[#allocation2 + $0x4] ss:$16 sps:$4 sm:$0xff]   ;;  %v3207_v2 = vld [vmem:[#allocation2] ss:$16 sps:$4 sm:$0xff]  }
  0xa3   :  { %v3205_v1 = vld [vmem:[#allocation2 + $0x204] ss:$16 sps:$4 sm:$0xff]   ;;  %1714 = vmatprep.subr.bf16.mxu1 %v3203_v0  ;;  %v3208_v3 = vld [vmem:[#allocation2 + $0x200] ss:$16 sps:$4 sm:$0xff]   ;;  %v147_v48 = vld [vmem:[%s4195_s0 + $0x8] sm:$0xff] }
  0xa4   :  { %1755 = vmatprep.subr.bf16.mxu0 %v3205_v1  ;;  %v3209_v4 = vld [vmem:[#allocation2 + $0x24] ss:$16 sps:$4 sm:$0xff]   ;;  %1715 = vmatpush1.bf16.msra.mxu1 %v3207_v2  ;;  %v3213_v6 = vld [vmem:[#allocation2 + $0x20] ss:$16 sps:$4 sm:$0xff]   ;;  %v4108_v51 = vcombine.high %v147_v48, %v147_v48 }
  0xa5   :  { %1756 = vmatpush1.bf16.msra.mxu0 %v3208_v3  ;;  %v3211_v5 = vld [vmem:[#allocation2 + $0x224] ss:$16 sps:$4 sm:$0xff]   ;;  %1716 = vmatprep.subr.bf16.mxu1 %v3209_v4  ;;  %v3214_v7 = vld [vmem:[#allocation2 + $0x220] ss:$16 sps:$4 sm:$0xff]  }
  0xa6   :  { %1757 = vmatprep.subr.bf16.mxu0 %v3211_v5  ;;  %v3215_v8 = vld [vmem:[#allocation2 + $0x44] ss:$16 sps:$4 sm:$0xff]   ;;  %v3219_v10 = vld [vmem:[#allocation2 + $0x40] ss:$16 sps:$4 sm:$0xff]   ;;  %1787 = vmatprep.mubr.bf16.mxu0 %v4108_v51  ;;  %v3308_v5 = vld [vmem:[#allocation2 + $0xc] ss:$16 sps:$4 sm:$0xff]  }
  0xa7   :  { %v3217_v9 = vld [vmem:[#allocation2 + $0x244] ss:$16 sps:$4 sm:$0xff]   ;;  %v3220_v11 = vld [vmem:[#allocation2 + $0x240] ss:$16 sps:$4 sm:$0xff]  }
  0xa8   :  { %1717 = vmatpush1.bf16.msra.mxu1 %v3213_v6  ;;  %v3221_v12 = vld [vmem:[#allocation2 + $0x64] ss:$16 sps:$4 sm:$0xff]   ;;  %v3225_v14 = vld [vmem:[#allocation2 + $0x60] ss:$16 sps:$4 sm:$0xff]  }
  0xa9   :  { %1758 = vmatpush1.bf16.msra.mxu0 %v3214_v7  ;;  %1718 = vmatprep.subr.bf16.mxu1 %v3215_v8  ;;  %v3223_v13 = vld [vmem:[#allocation2 + $0x264] ss:$16 sps:$4 sm:$0xff]   ;;  %v3226_v15 = vld [vmem:[#allocation2 + $0x260] ss:$16 sps:$4 sm:$0xff]   ;;  %v4114_v7 = vcombine.low %v147_v48, %v147_v48 }
  0xaa   :  { %1759 = vmatprep.subr.bf16.mxu0 %v3217_v9  ;;  %v3227_v16 = vld [vmem:[#allocation2 + $0x84] ss:$16 sps:$4 sm:$0xff]   ;;  %v3231_v18 = vld [vmem:[#allocation2 + $0x80] ss:$16 sps:$4 sm:$0xff]   ;;  %v3306_v9 = vld [vmem:[#allocation2 + $0x8] ss:$16 sps:$4 sm:$0xff]  }
  0xab   :  { %v3229_v17 = vld [vmem:[#allocation2 + $0x284] ss:$16 sps:$4 sm:$0xff]   ;;  %v3232_v19 = vld [vmem:[#allocation2 + $0x280] ss:$16 sps:$4 sm:$0xff]  }
  0xac   :  { %1719 = vmatpush1.bf16.msra.mxu1 %v3219_v10  ;;  %v3233_v20 = vld [vmem:[#allocation2 + $0xa4] ss:$16 sps:$4 sm:$0xff]   ;;  %v3237_v22 = vld [vmem:[#allocation2 + $0xa0] ss:$16 sps:$4 sm:$0xff]  }
  0xad   :  { %1760 = vmatpush1.bf16.msra.mxu0 %v3220_v11  ;;  %1720 = vmatprep.subr.bf16.mxu1 %v3221_v12  ;;  %v3235_v21 = vld [vmem:[#allocation2 + $0x2a4] ss:$16 sps:$4 sm:$0xff]   ;;  %v3238_v23 = vld [vmem:[#allocation2 + $0x2a0] ss:$16 sps:$4 sm:$0xff]   ;;  %v3314_v11 = vld [vmem:[#allocation2 + $0x2c] ss:$16 sps:$4 sm:$0xff]  }
  0xae   :  { %1761 = vmatprep.subr.bf16.mxu0 %v3223_v13  ;;  %v3239_v24 = vld [vmem:[#allocation2 + $0xc4] ss:$16 sps:$4 sm:$0xff]   ;;  %v3243_v26 = vld [vmem:[#allocation2 + $0xc0] ss:$16 sps:$4 sm:$0xff]   ;;  %v3312_v13 = vld [vmem:[#allocation2 + $0x28] ss:$16 sps:$4 sm:$0xff]  }
  0xaf   :  { %v3241_v25 = vld [vmem:[#allocation2 + $0x2c4] ss:$16 sps:$4 sm:$0xff]   ;;  %v3244_v27 = vld [vmem:[#allocation2 + $0x2c0] ss:$16 sps:$4 sm:$0xff]  }
  0xb0   :  { %1721 = vmatpush1.bf16.msra.mxu1 %v3225_v14  ;;  %v3245_v28 = vld [vmem:[#allocation2 + $0xe4] ss:$16 sps:$4 sm:$0xff]   ;;  %v3249_v30 = vld [vmem:[#allocation2 + $0xe0] ss:$16 sps:$4 sm:$0xff]  }
  0xb1   :  { %1762 = vmatpush1.bf16.msra.mxu0 %v3226_v15  ;;  %1722 = vmatprep.subr.bf16.mxu1 %v3227_v16  ;;  %v3247_v29 = vld [vmem:[#allocation2 + $0x2e4] ss:$16 sps:$4 sm:$0xff]   ;;  %v3250_v31 = vld [vmem:[#allocation2 + $0x2e0] ss:$16 sps:$4 sm:$0xff]   ;;  %v3320_v15 = vld [vmem:[#allocation2 + $0x4c] ss:$16 sps:$4 sm:$0xff]  }
  0xb2   :  { %1763 = vmatprep.subr.bf16.mxu0 %v3229_v17  ;;  %v3251_v32 = vld [vmem:[#allocation2 + $0x104] ss:$16 sps:$4 sm:$0xff]   ;;  %v3255_v34 = vld [vmem:[#allocation2 + $0x100] ss:$16 sps:$4 sm:$0xff]   ;;  %v3318_v17 = vld [vmem:[#allocation2 + $0x48] ss:$16 sps:$4 sm:$0xff]  }
  0xb3   :  { %v3253_v33 = vld [vmem:[#allocation2 + $0x304] ss:$16 sps:$4 sm:$0xff]   ;;  %v3256_v35 = vld [vmem:[#allocation2 + $0x300] ss:$16 sps:$4 sm:$0xff]  }
  0xb4   :  { %1723 = vmatpush1.bf16.msra.mxu1 %v3231_v18  ;;  %v3257_v36 = vld [vmem:[#allocation2 + $0x124] ss:$16 sps:$4 sm:$0xff]   ;;  %v3261_v38 = vld [vmem:[#allocation2 + $0x120] ss:$16 sps:$4 sm:$0xff]  }
  0xb5   :  { %1764 = vmatpush1.bf16.msra.mxu0 %v3232_v19  ;;  %1724 = vmatprep.subr.bf16.mxu1 %v3233_v20  ;;  %v3259_v37 = vld [vmem:[#allocation2 + $0x324] ss:$16 sps:$4 sm:$0xff]   ;;  %v3262_v39 = vld [vmem:[#allocation2 + $0x320] ss:$16 sps:$4 sm:$0xff]   ;;  %v3326_v19 = vld [vmem:[#allocation2 + $0x6c] ss:$16 sps:$4 sm:$0xff]  }
  0xb6   :  { %1765 = vmatprep.subr.bf16.mxu0 %v3235_v21  ;;  %v3263_v40 = vld [vmem:[#allocation2 + $0x144] ss:$16 sps:$4 sm:$0xff]   ;;  %v3267_v42 = vld [vmem:[#allocation2 + $0x140] ss:$16 sps:$4 sm:$0xff]   ;;  %v3324_v21 = vld [vmem:[#allocation2 + $0x68] ss:$16 sps:$4 sm:$0xff]  }
  0xb7   :  { %v3265_v41 = vld [vmem:[#allocation2 + $0x344] ss:$16 sps:$4 sm:$0xff]   ;;  %v3268_v43 = vld [vmem:[#allocation2 + $0x340] ss:$16 sps:$4 sm:$0xff]  }
  0xb8   :  { %1725 = vmatpush1.bf16.msra.mxu1 %v3237_v22  ;;  %v3269_v44 = vld [vmem:[#allocation2 + $0x164] ss:$16 sps:$4 sm:$0xff]   ;;  %v3273_v49 = vld [vmem:[#allocation2 + $0x160] ss:$16 sps:$4 sm:$0xff]  }
  0xb9   :  { %1766 = vmatpush1.bf16.msra.mxu0 %v3238_v23  ;;  %1726 = vmatprep.subr.bf16.mxu1 %v3239_v24  ;;  %v3271_v45 = vld [vmem:[#allocation2 + $0x364] ss:$16 sps:$4 sm:$0xff]   ;;  %v3274_v50 = vld [vmem:[#allocation2 + $0x360] ss:$16 sps:$4 sm:$0xff]   ;;  %v3332_v23 = vld [vmem:[#allocation2 + $0x8c] ss:$16 sps:$4 sm:$0xff]  }
  0xba   :  { %1767 = vmatprep.subr.bf16.mxu0 %v3241_v25  ;;  %v146_v46 = vld [vmem:[%s4195_s0] sm:$0xff]  ;;  %v3330_v25 = vld [vmem:[#allocation2 + $0x88] ss:$16 sps:$4 sm:$0xff]  }
  0xbb   :  { %v4103_v47 = vcombine.high %v146_v46, %v146_v46  ;;  %v3275_v52 = vld [vmem:[#allocation2 + $0x184] ss:$16 sps:$4 sm:$0xff]   ;;  %v3279_v54 = vld [vmem:[#allocation2 + $0x180] ss:$16 sps:$4 sm:$0xff]   ;;  %v4112_v6 = vcombine.low %v146_v46, %v146_v46 }
  0xbc   :  { %1727 = vmatpush1.bf16.msra.mxu1 %v3243_v26  ;;  %v3277_v53 = vld [vmem:[#allocation2 + $0x384] ss:$16 sps:$4 sm:$0xff]   ;;  %v3280_v55 = vld [vmem:[#allocation2 + $0x380] ss:$16 sps:$4 sm:$0xff]  }
  0xbd   :  { %1768 = vmatpush1.bf16.msra.mxu0 %v3244_v27  ;;  %1728 = vmatprep.subr.bf16.mxu1 %v3245_v28  ;;  %v3281_v56 = vld [vmem:[#allocation2 + $0x1a4] ss:$16 sps:$4 sm:$0xff]   ;;  %v3285_v58 = vld [vmem:[#allocation2 + $0x1a0] ss:$16 sps:$4 sm:$0xff]   ;;  %v3338_v27 = vld [vmem:[#allocation2 + $0xac] ss:$16 sps:$4 sm:$0xff]  }
  0xbe   :  { %1769 = vmatprep.subr.bf16.mxu0 %v3247_v29  ;;  %1746 = vmatprep.mubr.bf16.mxu1 %v4103_v47  ;;  %v3283_v57 = vld [vmem:[#allocation2 + $0x3a4] ss:$16 sps:$4 sm:$0xff]   ;;  %v3286_v59 = vld [vmem:[#allocation2 + $0x3a0] ss:$16 sps:$4 sm:$0xff]   ;;  %v3336_v29 = vld [vmem:[#allocation2 + $0xa8] ss:$16 sps:$4 sm:$0xff]  }
  0xbf   :  { %v3287_v60 = vld [vmem:[#allocation2 + $0x1c4] ss:$16 sps:$4 sm:$0xff]   ;;  %v3291_v62 = vld [vmem:[#allocation2 + $0x1c0] ss:$16 sps:$4 sm:$0xff]  }
  0xc0   :  { %1729 = vmatpush1.bf16.msra.mxu1 %v3249_v30  ;;  %v3289_v61 = vld [vmem:[#allocation2 + $0x3c4] ss:$16 sps:$4 sm:$0xff]   ;;  %v3292_v63 = vld [vmem:[#allocation2 + $0x3c0] ss:$16 sps:$4 sm:$0xff]  }
  0xc1   :  { %1770 = vmatpush1.bf16.msra.mxu0 %v3250_v31  ;;  %1730 = vmatprep.subr.bf16.mxu1 %v3251_v32  ;;  %v3293_v0 = vld [vmem:[#allocation2 + $0x1e4] ss:$16 sps:$4 sm:$0xff]   ;;  %v3297_v2 = vld [vmem:[#allocation2 + $0x1e0] ss:$16 sps:$4 sm:$0xff]   ;;  %v3344_v31 = vld [vmem:[#allocation2 + $0xcc] ss:$16 sps:$4 sm:$0xff]  }
  0xc2   :  { %1771 = vmatprep.subr.bf16.mxu0 %v3253_v33  ;;  %v3295_v1 = vld [vmem:[#allocation2 + $0x3e4] ss:$16 sps:$4 sm:$0xff]   ;;  %v3298_v3 = vld [vmem:[#allocation2 + $0x3e0] ss:$16 sps:$4 sm:$0xff]  }
  0xc3   :  { %v3305_v4 = vld [vmem:[#allocation2 + $0x404] ss:$16 sps:$4 sm:$0xff]   ;;  %v3303_v8 = vld [vmem:[#allocation2 + $0x400] ss:$16 sps:$4 sm:$0xff]  }
  0xc4   :  { %1731 = vmatpush1.bf16.msra.mxu1 %v3255_v34  ;;  %v3311_v10 = vld [vmem:[#allocation2 + $0x424] ss:$16 sps:$4 sm:$0xff]   ;;  %v3309_v12 = vld [vmem:[#allocation2 + $0x420] ss:$16 sps:$4 sm:$0xff]  }
  0xc5   :  { %1772 = vmatpush1.bf16.msra.mxu0 %v3256_v35  ;;  %1732 = vmatprep.subr.bf16.mxu1 %v3257_v36  ;;  %v3317_v14 = vld [vmem:[#allocation2 + $0x444] ss:$16 sps:$4 sm:$0xff]   ;;  %v3315_v16 = vld [vmem:[#allocation2 + $0x440] ss:$16 sps:$4 sm:$0xff]   ;;  %v3342_v35 = vld [vmem:[#allocation2 + $0xc8] ss:$16 sps:$4 sm:$0xff]  }
  0xc6   :  { %1773 = vmatprep.subr.bf16.mxu0 %v3259_v37  ;;  %v3323_v18 = vld [vmem:[#allocation2 + $0x464] ss:$16 sps:$4 sm:$0xff]   ;;  %v3321_v20 = vld [vmem:[#allocation2 + $0x460] ss:$16 sps:$4 sm:$0xff]   ;;  %v3350_v37 = vld [vmem:[#allocation2 + $0xec] ss:$16 sps:$4 sm:$0xff]  }
  0xc7   :  { %v3329_v22 = vld [vmem:[#allocation2 + $0x484] ss:$16 sps:$4 sm:$0xff]   ;;  %v3327_v24 = vld [vmem:[#allocation2 + $0x480] ss:$16 sps:$4 sm:$0xff]  }
  0xc8   :  { %1733 = vmatpush1.bf16.msra.mxu1 %v3261_v38  ;;  %v3335_v26 = vld [vmem:[#allocation2 + $0x4a4] ss:$16 sps:$4 sm:$0xff]   ;;  %v3333_v28 = vld [vmem:[#allocation2 + $0x4a0] ss:$16 sps:$4 sm:$0xff]  }
  0xc9   :  { %1774 = vmatpush1.bf16.msra.mxu0 %v3262_v39  ;;  %1734 = vmatprep.subr.bf16.mxu1 %v3263_v40  ;;  %v3341_v30 = vld [vmem:[#allocation2 + $0x4c4] ss:$16 sps:$4 sm:$0xff]   ;;  %v3339_v33 = vld [vmem:[#allocation2 + $0x4c0] ss:$16 sps:$4 sm:$0xff]   ;;  %v3348_v39 = vld [vmem:[#allocation2 + $0xe8] ss:$16 sps:$4 sm:$0xff]  }
  0xca   :  { %1775 = vmatprep.subr.bf16.mxu0 %v3265_v41  ;;  %v4122_v32 = vld [vmem:[%s4195_s0 + $0x10] sm:$0xff]  ;;  %v3356_v41 = vld [vmem:[#allocation2 + $0x10c] ss:$16 sps:$4 sm:$0xff]  }
  0xcb   :  { %v4126_v34 = vcombine.high %v4122_v32, %v4122_v32  ;;  %v3347_v36 = vld [vmem:[#allocation2 + $0x4e4] ss:$16 sps:$4 sm:$0xff]   ;;  %v3345_v38 = vld [vmem:[#allocation2 + $0x4e0] ss:$16 sps:$4 sm:$0xff]  }
  0xcc   :  { %1735 = vmatpush1.bf16.msra.mxu1 %v3267_v42  ;;  %v3353_v40 = vld [vmem:[#allocation2 + $0x504] ss:$16 sps:$4 sm:$0xff]   ;;  %v3351_v42 = vld [vmem:[#allocation2 + $0x500] ss:$16 sps:$4 sm:$0xff]  }
  0xcd   :  { %1776 = vmatpush1.bf16.msra.mxu0 %v3268_v43  ;;  %1736 = vmatprep.subr.bf16.mxu1 %v3269_v44  ;;  %v3354_v43 = vld [vmem:[#allocation2 + $0x108] ss:$16 sps:$4 sm:$0xff]   ;;  %v3359_v44 = vld [vmem:[#allocation2 + $0x524] ss:$16 sps:$4 sm:$0xff]   ;;  %v3357_v46 = vld [vmem:[#allocation2 + $0x520] ss:$16 sps:$4 sm:$0xff]  }
  0xce   :  { %1777 = vmatprep.subr.bf16.mxu0 %v3271_v45  ;;  %v3362_v45 = vld [vmem:[#allocation2 + $0x12c] ss:$16 sps:$4 sm:$0xff]   ;;  %v3365_v48 = vld [vmem:[#allocation2 + $0x544] ss:$16 sps:$4 sm:$0xff]  }
  0xd0   :  { %1737 = vmatpush1.bf16.msra.mxu1 %v3273_v49  ;;  %v3368_v49 = vld [vmem:[#allocation2 + $0x14c] ss:$16 sps:$4 sm:$0xff]  }
  0xd1   :  { %1778 = vmatpush1.bf16.msra.mxu0 %v3274_v50  ;;  %1738 = vmatprep.subr.bf16.mxu1 %v3275_v52  ;;  %v3363_v50 = vld [vmem:[#allocation2 + $0x540] ss:$16 sps:$4 sm:$0xff]   ;;  %v3366_v52 = vld [vmem:[#allocation2 + $0x148] ss:$16 sps:$4 sm:$0xff]  }
  0xd2   :  { %1779 = vmatprep.subr.bf16.mxu0 %v3277_v53  ;;  %v3371_v53 = vld [vmem:[#allocation2 + $0x564] ss:$16 sps:$4 sm:$0xff]  }
  0xd4   :  { %1739 = vmatpush1.bf16.msra.mxu1 %v3279_v54  ;;  %v3374_v54 = vld [vmem:[#allocation2 + $0x16c] ss:$16 sps:$4 sm:$0xff]  }
  0xd5   :  { %1780 = vmatpush1.bf16.msra.mxu0 %v3280_v55  ;;  %1740 = vmatprep.subr.bf16.mxu1 %v3281_v56  ;;  %v3369_v55 = vld [vmem:[#allocation2 + $0x560] ss:$16 sps:$4 sm:$0xff]   ;;  %v3372_v56 = vld [vmem:[#allocation2 + $0x168] ss:$16 sps:$4 sm:$0xff]  }
  0xd6   :  { %1781 = vmatprep.subr.bf16.mxu0 %v3283_v57  ;;  %v3377_v57 = vld [vmem:[#allocation2 + $0x584] ss:$16 sps:$4 sm:$0xff]  }
  0xd8   :  { %1741 = vmatpush1.bf16.msra.mxu1 %v3285_v58  ;;  %v3380_v58 = vld [vmem:[#allocation2 + $0x18c] ss:$16 sps:$4 sm:$0xff]  }
  0xd9   :  { %1782 = vmatpush1.bf16.msra.mxu0 %v3286_v59  ;;  %1742 = vmatprep.subr.bf16.mxu1 %v3287_v60  ;;  %v3375_v59 = vld [vmem:[#allocation2 + $0x580] ss:$16 sps:$4 sm:$0xff]   ;;  %v3378_v60 = vld [vmem:[#allocation2 + $0x188] ss:$16 sps:$4 sm:$0xff]  }
  0xda   :  { %1783 = vmatprep.subr.bf16.mxu0 %v3289_v61  ;;  %v3383_v61 = vld [vmem:[#allocation2 + $0x5a4] ss:$16 sps:$4 sm:$0xff]  }
  0xdc   :  { %1743 = vmatpush1.bf16.msra.mxu1 %v3291_v62  ;;  %v3386_v62 = vld [vmem:[#allocation2 + $0x1ac] ss:$16 sps:$4 sm:$0xff]  }
  0xdd   :  { %1784 = vmatpush1.bf16.msra.mxu0 %v3292_v63  ;;  %1744 = vmatprep.subr.bf16.mxu1 %v3293_v0  ;;  %v3381_v63 = vld [vmem:[#allocation2 + $0x5a0] ss:$16 sps:$4 sm:$0xff]   ;;  %v3384_v0 = vld [vmem:[#allocation2 + $0x1a8] ss:$16 sps:$4 sm:$0xff]  }
  0xde   :  { %1785 = vmatprep.subr.bf16.mxu0 %v3295_v1  ;;  %v3389_v1 = vld [vmem:[#allocation2 + $0x5c4] ss:$16 sps:$4 sm:$0xff]  }
  0xe0   :  { %1745 = vmatpush1.bf16.msra.mxu1 %v3297_v2  ;;  %v3392_v2 = vld [vmem:[#allocation2 + $0x1cc] ss:$16 sps:$4 sm:$0xff]  }
  0xe1   :  { %1786 = vmatpush1.bf16.msra.mxu0 %v3298_v3  ;;  %1878 = vmatprep.subr.bf16.mxu1 %v3308_v5  ;;  %v3387_v3 = vld [vmem:[#allocation2 + $0x5c0] ss:$16 sps:$4 sm:$0xff]   ;;  %v3395_v5 = vld [vmem:[#allocation2 + $0x5e4] ss:$16 sps:$4 sm:$0xff]  }
  0xe2   :  { %1796 = vmatprep.subr.bf16.mxu0 %v3305_v4  ;;  %v3390_v4 = vld [vmem:[#allocation2 + $0x1c8] ss:$16 sps:$4 sm:$0xff]  }
  0xe3   :  { %1747 = vmatmul.mubr.bf16.vlgmr.msra.gmra.mrb[0].mxu1 %v4112_v6 }
  0xe4   :  { %1788 = vmatmul.mubr.bf16.vlgmr.msra.gmra.mrb[0].mxu0 %v4114_v7  ;;  %1879 = vmatpush1.bf16.msra.mxu1 %v3306_v9  ;;  %v3393_v9 = vld [vmem:[#allocation2 + $0x5e0] ss:$16 sps:$4 sm:$0xff]  }
  0xe5   :  { %1797 = vmatpush1.bf16.msra.mxu0 %v3303_v8  ;;  %1880 = vmatprep.subr.bf16.mxu1 %v3314_v11  ;;  %v3398_v8 = vld [vmem:[#allocation2 + $0x1ec] ss:$16 sps:$4 sm:$0xff]   ;;  %v3403_v11 = vld [vmem:[#allocation2 + $0x604] ss:$16 sps:$4 sm:$0xff]  }
  0xe6   :  { %1798 = vmatprep.subr.bf16.mxu0 %v3311_v10  ;;  %1910 = vmatprep.mubr.bf16.mxu1 %v4103_v47  ;;  %v3360_v47 = vld [vmem:[#allocation2 + $0x128] ss:$16 sps:$4 sm:$0xff]  }
  0xe7   :  { %1828 = vmatprep.mubr.bf16.mxu0 %v4126_v34  ;;  %v3396_v10 = vld [vmem:[#allocation2 + $0x1e8] ss:$16 sps:$4 sm:$0xff]  }
  0xe8   :  { %1881 = vmatpush1.bf16.msra.mxu1 %v3312_v13  ;;  %v4131_v13 = vcombine.low %v4122_v32, %v4122_v32  ;;  %v3428_v32 = vld [vmem:[#allocation2 + $0x288] ss:$16 sps:$4 sm:$0xff]  }
  0xe9   :  { %1799 = vmatpush1.bf16.msra.mxu0 %v3309_v12  ;;  %1882 = vmatprep.subr.bf16.mxu1 %v3320_v15  ;;  %v3406_v12 = vld [vmem:[#allocation2 + $0x20c] ss:$16 sps:$4 sm:$0xff]   ;;  %v3404_v15 = vld [vmem:[#allocation2 + $0x208] ss:$16 sps:$4 sm:$0xff]  }
  0xea   :  { %1800 = vmatprep.subr.bf16.mxu0 %v3317_v14  ;;  %v3401_v14 = vld [vmem:[#allocation2 + $0x600] ss:$16 sps:$4 sm:$0xff]  }
  0xec   :  { %1883 = vmatpush1.bf16.msra.mxu1 %v3318_v17  ;;  %v3412_v17 = vld [vmem:[#allocation2 + $0x22c] ss:$16 sps:$4 sm:$0xff]  }
  0xed   :  { %1801 = vmatpush1.bf16.msra.mxu0 %v3315_v16  ;;  %1884 = vmatprep.subr.bf16.mxu1 %v3326_v19  ;;  %v3409_v16 = vld [vmem:[#allocation2 + $0x624] ss:$16 sps:$4 sm:$0xff]  }
  0xee   :  { %1802 = vmatprep.subr.bf16.mxu0 %v3323_v18  ;;  %v4136_v18 = vld [vmem:[%s4195_s0 + $0x18] sm:$0xff] }
  0xef   :  { %v4140_v19 = vcombine.high %v4136_v18, %v4136_v18 }
  0xf0   :  { %1885 = vmatpush1.bf16.msra.mxu1 %v3324_v21  ;;  %v3410_v21 = vld [vmem:[#allocation2 + $0x228] ss:$16 sps:$4 sm:$0xff]  }
  0xf1   :  { %1803 = vmatpush1.bf16.msra.mxu0 %v3321_v20  ;;  %1886 = vmatprep.subr.bf16.mxu1 %v3332_v23  ;;  %v3407_v20 = vld [vmem:[#allocation2 + $0x620] ss:$16 sps:$4 sm:$0xff]   ;;  %v3418_v23 = vld [vmem:[#allocation2 + $0x24c] ss:$16 sps:$4 sm:$0xff]  }
  0xf2   :  { %1804 = vmatprep.subr.bf16.mxu0 %v3329_v22  ;;  %v3415_v22 = vld [vmem:[#allocation2 + $0x644] ss:$16 sps:$4 sm:$0xff]  }
  0xf4   :  { %1887 = vmatpush1.bf16.msra.mxu1 %v3330_v25  ;;  %v3416_v25 = vld [vmem:[#allocation2 + $0x248] ss:$16 sps:$4 sm:$0xff]  }
  0xf5   :  { %1805 = vmatpush1.bf16.msra.mxu0 %v3327_v24  ;;  %1888 = vmatprep.subr.bf16.mxu1 %v3338_v27  ;;  %v3413_v24 = vld [vmem:[#allocation2 + $0x640] ss:$16 sps:$4 sm:$0xff]  }
  0xf6   :  { %1806 = vmatprep.subr.bf16.mxu0 %v3335_v26  ;;  %v3421_v26 = vld [vmem:[#allocation2 + $0x664] ss:$16 sps:$4 sm:$0xff]   ;;  %v3419_v27 = vld [vmem:[#allocation2 + $0x660] ss:$16 sps:$4 sm:$0xff]  }
  0xf8   :  { %1889 = vmatpush1.bf16.msra.mxu1 %v3336_v29  ;;  %v3427_v29 = vld [vmem:[#allocation2 + $0x684] ss:$16 sps:$4 sm:$0xff]  }
  0xf9   :  { %1807 = vmatpush1.bf16.msra.mxu0 %v3333_v28  ;;  %1890 = vmatprep.subr.bf16.mxu1 %v3344_v31  ;;  %v3422_v28 = vld [vmem:[#allocation2 + $0x268] ss:$16 sps:$4 sm:$0xff]   ;;  %v3425_v31 = vld [vmem:[#allocation2 + $0x680] ss:$16 sps:$4 sm:$0xff]  }
  0xfa   :  { %1808 = vmatprep.subr.bf16.mxu0 %v3341_v30  ;;  %v3430_v30 = vld [vmem:[#allocation2 + $0x28c] ss:$16 sps:$4 sm:$0xff]  }
  0xfc   :  { %1891 = vmatpush1.bf16.msra.mxu1 %v3342_v35  ;;  %v3431_v35 = vld [vmem:[#allocation2 + $0x6a0] ss:$16 sps:$4 sm:$0xff]  }
  0xfd   :  { %1809 = vmatpush1.bf16.msra.mxu0 %v3339_v33  ;;  %1892 = vmatprep.subr.bf16.mxu1 %v3350_v37  ;;  %v3436_v33 = vld [vmem:[#allocation2 + $0x2ac] ss:$16 sps:$4 sm:$0xff]   ;;  %v3439_v37 = vld [vmem:[#allocation2 + $0x6c4] ss:$16 sps:$4 sm:$0xff]  }
  0xfe   :  { %1810 = vmatprep.subr.bf16.mxu0 %v3347_v36  ;;  %v3434_v36 = vld [vmem:[#allocation2 + $0x2a8] ss:$16 sps:$4 sm:$0xff]  }
 0x100   :  { %1893 = vmatpush1.bf16.msra.mxu1 %v3348_v39  ;;  %v3437_v39 = vld [vmem:[#allocation2 + $0x6c0] ss:$16 sps:$4 sm:$0xff]  }
 0x101   :  { %1811 = vmatpush1.bf16.msra.mxu0 %v3345_v38  ;;  %1894 = vmatprep.subr.bf16.mxu1 %v3356_v41  ;;  %v3442_v38 = vld [vmem:[#allocation2 + $0x2cc] ss:$16 sps:$4 sm:$0xff]   ;;  %v3445_v41 = vld [vmem:[#allocation2 + $0x6e4] ss:$16 sps:$4 sm:$0xff]  }
 0x102   :  { %1812 = vmatprep.subr.bf16.mxu0 %v3353_v40  ;;  %v3440_v40 = vld [vmem:[#allocation2 + $0x2c8] ss:$16 sps:$4 sm:$0xff]  }
 0x104   :  { %1895 = vmatpush1.bf16.msra.mxu1 %v3354_v43  ;;  %v3443_v43 = vld [vmem:[#allocation2 + $0x6e0] ss:$16 sps:$4 sm:$0xff]  }
 0x105   :  { %1813 = vmatpush1.bf16.msra.mxu0 %v3351_v42  ;;  %1896 = vmatprep.subr.bf16.mxu1 %v3362_v45  ;;  %v3448_v42 = vld [vmem:[#allocation2 + $0x2ec] ss:$16 sps:$4 sm:$0xff]   ;;  %v3451_v45 = vld [vmem:[#allocation2 + $0x704] ss:$16 sps:$4 sm:$0xff]  }
 0x106   :  { %1814 = vmatprep.subr.bf16.mxu0 %v3359_v44  ;;  %v3446_v44 = vld [vmem:[#allocation2 + $0x2e8] ss:$16 sps:$4 sm:$0xff]  }
 0x108   :  { %1897 = vmatpush1.bf16.msra.mxu1 %v3360_v47  ;;  %v3449_v47 = vld [vmem:[#allocation2 + $0x700] ss:$16 sps:$4 sm:$0xff]  }
 0x109   :  { %1815 = vmatpush1.bf16.msra.mxu0 %v3357_v46  ;;  %1898 = vmatprep.subr.bf16.mxu1 %v3368_v49  ;;  %v3454_v46 = vld [vmem:[#allocation2 + $0x30c] ss:$16 sps:$4 sm:$0xff]   ;;  %v3457_v49 = vld [vmem:[#allocation2 + $0x724] ss:$16 sps:$4 sm:$0xff]  }
 0x10a   :  { %1816 = vmatprep.subr.bf16.mxu0 %v3365_v48  ;;  %v3452_v48 = vld [vmem:[#allocation2 + $0x308] ss:$16 sps:$4 sm:$0xff]  }
 0x10c   :  { %1899 = vmatpush1.bf16.msra.mxu1 %v3366_v52  ;;  %v3455_v52 = vld [vmem:[#allocation2 + $0x720] ss:$16 sps:$4 sm:$0xff]  }
 0x10d   :  { %1817 = vmatpush1.bf16.msra.mxu0 %v3363_v50  ;;  %1900 = vmatprep.subr.bf16.mxu1 %v3374_v54  ;;  %v3460_v50 = vld [vmem:[#allocation2 + $0x32c] ss:$16 sps:$4 sm:$0xff]   ;;  %v3463_v54 = vld [vmem:[#allocation2 + $0x744] ss:$16 sps:$4 sm:$0xff]  }
 0x10e   :  { %1818 = vmatprep.subr.bf16.mxu0 %v3371_v53  ;;  %v3458_v53 = vld [vmem:[#allocation2 + $0x328] ss:$16 sps:$4 sm:$0xff]  }
 0x110   :  { %1901 = vmatpush1.bf16.msra.mxu1 %v3372_v56  ;;  %v3461_v56 = vld [vmem:[#allocation2 + $0x740] ss:$16 sps:$4 sm:$0xff]  }
 0x111   :  { %1819 = vmatpush1.bf16.msra.mxu0 %v3369_v55  ;;  %1902 = vmatprep.subr.bf16.mxu1 %v3380_v58  ;;  %v3466_v55 = vld [vmem:[#allocation2 + $0x34c] ss:$16 sps:$4 sm:$0xff]   ;;  %v3469_v58 = vld [vmem:[#allocation2 + $0x764] ss:$16 sps:$4 sm:$0xff]  }
 0x112   :  { %1820 = vmatprep.subr.bf16.mxu0 %v3377_v57  ;;  %v3464_v57 = vld [vmem:[#allocation2 + $0x348] ss:$16 sps:$4 sm:$0xff]  }
 0x114   :  { %1903 = vmatpush1.bf16.msra.mxu1 %v3378_v60  ;;  %v3467_v60 = vld [vmem:[#allocation2 + $0x760] ss:$16 sps:$4 sm:$0xff]  }
 0x115   :  { %1821 = vmatpush1.bf16.msra.mxu0 %v3375_v59  ;;  %1904 = vmatprep.subr.bf16.mxu1 %v3386_v62  ;;  %v3472_v59 = vld [vmem:[#allocation2 + $0x36c] ss:$16 sps:$4 sm:$0xff]   ;;  %v3475_v62 = vld [vmem:[#allocation2 + $0x784] ss:$16 sps:$4 sm:$0xff]  }
 0x116   :  { %1822 = vmatprep.subr.bf16.mxu0 %v3383_v61  ;;  %v3470_v61 = vld [vmem:[#allocation2 + $0x368] ss:$16 sps:$4 sm:$0xff]  }
 0x118   :  { %1905 = vmatpush1.bf16.msra.mxu1 %v3384_v0  ;;  %v3473_v0 = vld [vmem:[#allocation2 + $0x780] ss:$16 sps:$4 sm:$0xff]  }
 0x119   :  { %1823 = vmatpush1.bf16.msra.mxu0 %v3381_v63  ;;  %1906 = vmatprep.subr.bf16.mxu1 %v3392_v2  ;;  %v3478_v63 = vld [vmem:[#allocation2 + $0x38c] ss:$16 sps:$4 sm:$0xff]   ;;  %v3481_v2 = vld [vmem:[#allocation2 + $0x7a4] ss:$16 sps:$4 sm:$0xff]  }
 0x11a   :  { %1824 = vmatprep.subr.bf16.mxu0 %v3389_v1  ;;  %v3476_v1 = vld [vmem:[#allocation2 + $0x388] ss:$16 sps:$4 sm:$0xff]  }
 0x11c   :  { %1907 = vmatpush1.bf16.msra.mxu1 %v3390_v4  ;;  %v3479_v4 = vld [vmem:[#allocation2 + $0x7a0] ss:$16 sps:$4 sm:$0xff]  }
 0x11d   :  { %1825 = vmatpush1.bf16.msra.mxu0 %v3387_v3  ;;  %1908 = vmatprep.subr.bf16.mxu1 %v3398_v8  ;;  %v3484_v3 = vld [vmem:[#allocation2 + $0x3ac] ss:$16 sps:$4 sm:$0xff]   ;;  %v3487_v8 = vld [vmem:[#allocation2 + $0x7c4] ss:$16 sps:$4 sm:$0xff]  }
 0x11e   :  { %1826 = vmatprep.subr.bf16.mxu0 %v3395_v5  ;;  %v3482_v5 = vld [vmem:[#allocation2 + $0x3a8] ss:$16 sps:$4 sm:$0xff]  }
 0x120   :  { %1909 = vmatpush1.bf16.msra.mxu1 %v3396_v10  ;;  %v3485_v10 = vld [vmem:[#allocation2 + $0x7c0] ss:$16 sps:$4 sm:$0xff]  }
 0x121   :  { %1827 = vmatpush1.bf16.msra.mxu0 %v3393_v9  ;;  %1919 = vmatprep.subr.bf16.mxu1 %v3406_v12  ;;  %v3490_v9 = vld [vmem:[#allocation2 + $0x3cc] ss:$16 sps:$4 sm:$0xff]   ;;  %v3493_v12 = vld [vmem:[#allocation2 + $0x7e4] ss:$16 sps:$4 sm:$0xff]  }
 0x122   :  { %1837 = vmatprep.subr.bf16.mxu0 %v3403_v11  ;;  %v3488_v11 = vld [vmem:[#allocation2 + $0x3c8] ss:$16 sps:$4 sm:$0xff]  }
 0x123   :  { %1911 = vmatmul.mubr.bf16.vlgmr.msra.gmra.mrb[4].mxu1 %v4112_v6  ;;  %v3424_v6 = vld [vmem:[#allocation2 + $0x26c] ss:$16 sps:$4 sm:$0xff]  }
 0x124   :  { %1829 = vmatmul.mubr.bf16.vlgmr.msra.gmra.mrb[0].mxu0 %v4131_v13  ;;  %1920 = vmatpush1.bf16.msra.mxu1 %v3404_v15  ;;  %v3491_v15 = vld [vmem:[#allocation2 + $0x7e0] ss:$16 sps:$4 sm:$0xff]  }
 0x125   :  { %1838 = vmatpush1.bf16.msra.mxu0 %v3401_v14  ;;  %1921 = vmatprep.subr.bf16.mxu1 %v3412_v17  ;;  %v3496_v14 = vld [vmem:[#allocation2 + $0x3ec] ss:$16 sps:$4 sm:$0xff]  }
 0x126   :  { %1839 = vmatprep.subr.bf16.mxu0 %v3409_v16  ;;  %1869 = vmatprep.mubr.bf16.mxu0 %v4140_v19  ;;  %v3494_v16 = vld [vmem:[#allocation2 + $0x3e8] ss:$16 sps:$4 sm:$0xff]   ;;  %v3501_v17 = vld [vmem:[#allocation2 + $0x40c] ss:$16 sps:$4 sm:$0xff]  }
 0x127   :  { %1951 = vmatprep.mubr.bf16.mxu1 %v4108_v51  ;;  %v3433_v51 = vld [vmem:[#allocation2 + $0x6a4] ss:$16 sps:$4 sm:$0xff]  }
 0x128   :  { %1922 = vmatpush1.bf16.msra.mxu1 %v3410_v21  ;;  %v4148_v21 = vcombine.low %v4136_v18, %v4136_v18  ;;  %v3598_v18 = vld [vmem:[#allocation7 + $0x10] ss:$8 sps:$4 sm:$0xff]  }
 0x129   :  { %1840 = vmatpush1.bf16.msra.mxu0 %v3407_v20  ;;  %1923 = vmatprep.subr.bf16.mxu1 %v3418_v23  ;;  %v3499_v20 = vld [vmem:[#allocation2 + $0x408] ss:$16 sps:$4 sm:$0xff]  }
 0x12a   :  { %1841 = vmatprep.subr.bf16.mxu0 %v3415_v22  ;;  %v3504_v22 = vld [vmem:[#allocation2 + $0x42c] ss:$16 sps:$4 sm:$0xff]   ;;  %v3595_v23 = vld [vmem:[#allocation7] ss:$8 sps:$4 sm:$0xff]  }
 0x12c   :  { %1924 = vmatpush1.bf16.msra.mxu1 %v3416_v25  ;;  %v3502_v25 = vld [vmem:[#allocation2 + $0x428] ss:$16 sps:$4 sm:$0xff]  }
 0x12d   :  { %1842 = vmatpush1.bf16.msra.mxu0 %v3413_v24  ;;  %1925 = vmatprep.subr.bf16.mxu1 %v3424_v6  ;;  %v3597_v24 = vld [vmem:[#allocation7 + $0x4] ss:$8 sps:$4 sm:$0xff]  }
 0x12e   :  { %1843 = vmatprep.subr.bf16.mxu0 %v3421_v26  ;;  %v3600_v26 = vld [vmem:[#allocation7 + $0x14] ss:$8 sps:$4 sm:$0xff]  }
 0x12f   :  { %v3507_v6 = vld [vmem:[#allocation2 + $0x44c] ss:$16 sps:$4 sm:$0xff]  }
 0x130   :  { %1926 = vmatpush1.bf16.msra.mxu1 %v3422_v28  ;;  %v3505_v28 = vld [vmem:[#allocation2 + $0x448] ss:$16 sps:$4 sm:$0xff]  }
 0x131   :  { %1844 = vmatpush1.bf16.msra.mxu0 %v3419_v27  ;;  %1927 = vmatprep.subr.bf16.mxu1 %v3430_v30  ;;  %v3603_v27 = vld [vmem:[#allocation7 + $0x24] ss:$8 sps:$4 sm:$0xff]   ;;  %v3508_v30 = vld [vmem:[#allocation2 + $0x468] ss:$16 sps:$4 sm:$0xff]  }
 0x132   :  { %1845 = vmatprep.subr.bf16.mxu0 %v3427_v29  ;;  %v3510_v29 = vld [vmem:[#allocation2 + $0x46c] ss:$16 sps:$4 sm:$0xff]  }
 0x134   :  { %1928 = vmatpush1.bf16.msra.mxu1 %v3428_v32  ;;  %v3606_v32 = vld [vmem:[#allocation7 + $0x34] ss:$8 sps:$4 sm:$0xff]  }
 0x135   :  { %1846 = vmatpush1.bf16.msra.mxu0 %v3425_v31  ;;  %1929 = vmatprep.subr.bf16.mxu1 %v3436_v33  ;;  %v3513_v31 = vld [vmem:[#allocation2 + $0x48c] ss:$16 sps:$4 sm:$0xff]   ;;  %v3511_v33 = vld [vmem:[#allocation2 + $0x488] ss:$16 sps:$4 sm:$0xff]  }
 0x136   :  { %1847 = vmatprep.subr.bf16.mxu0 %v3433_v51  ;;  %v3609_v51 = vld [vmem:[#allocation7 + $0x44] ss:$8 sps:$4 sm:$0xff]  }
 0x138   :  { %1930 = vmatpush1.bf16.msra.mxu1 %v3434_v36  ;;  %v3607_v36 = vld [vmem:[#allocation7 + $0x40] ss:$8 sps:$4 sm:$0xff]  }
 0x139   :  { %1848 = vmatpush1.bf16.msra.mxu0 %v3431_v35  ;;  %1931 = vmatprep.subr.bf16.mxu1 %v3442_v38  ;;  %v3516_v35 = vld [vmem:[#allocation2 + $0x4ac] ss:$16 sps:$4 sm:$0xff]   ;;  %v3514_v38 = vld [vmem:[#allocation2 + $0x4a8] ss:$16 sps:$4 sm:$0xff]  }
 0x13a   :  { %1849 = vmatprep.subr.bf16.mxu0 %v3439_v37  ;;  %v3612_v37 = vld [vmem:[#allocation7 + $0x54] ss:$8 sps:$4 sm:$0xff]  }
 0x13c   :  { %1932 = vmatpush1.bf16.msra.mxu1 %v3440_v40  ;;  %v3610_v40 = vld [vmem:[#allocation7 + $0x50] ss:$8 sps:$4 sm:$0xff]  }
 0x13d   :  { %1850 = vmatpush1.bf16.msra.mxu0 %v3437_v39  ;;  %1933 = vmatprep.subr.bf16.mxu1 %v3448_v42  ;;  %v3519_v39 = vld [vmem:[#allocation2 + $0x4cc] ss:$16 sps:$4 sm:$0xff]   ;;  %v3517_v42 = vld [vmem:[#allocation2 + $0x4c8] ss:$16 sps:$4 sm:$0xff]  }
 0x13e   :  { %1851 = vmatprep.subr.bf16.mxu0 %v3445_v41  ;;  %v3615_v41 = vld [vmem:[#allocation7 + $0x64] ss:$8 sps:$4 sm:$0xff]  }
 0x140   :  { %1934 = vmatpush1.bf16.msra.mxu1 %v3446_v44  ;;  %v3613_v44 = vld [vmem:[#allocation7 + $0x60] ss:$8 sps:$4 sm:$0xff]  }
 0x141   :  { %1852 = vmatpush1.bf16.msra.mxu0 %v3443_v43  ;;  %1935 = vmatprep.subr.bf16.mxu1 %v3454_v46  ;;  %v3522_v43 = vld [vmem:[#allocation2 + $0x4ec] ss:$16 sps:$4 sm:$0xff]   ;;  %v3520_v46 = vld [vmem:[#allocation2 + $0x4e8] ss:$16 sps:$4 sm:$0xff]  }
 0x142   :  { %1853 = vmatprep.subr.bf16.mxu0 %v3451_v45  ;;  %v3618_v45 = vld [vmem:[#allocation7 + $0x74] ss:$8 sps:$4 sm:$0xff]  }
 0x144   :  { %1936 = vmatpush1.bf16.msra.mxu1 %v3452_v48  ;;  %v3616_v48 = vld [vmem:[#allocation7 + $0x70] ss:$8 sps:$4 sm:$0xff]  }
 0x145   :  { %1854 = vmatpush1.bf16.msra.mxu0 %v3449_v47  ;;  %1937 = vmatprep.subr.bf16.mxu1 %v3460_v50  ;;  %v3525_v47 = vld [vmem:[#allocation2 + $0x50c] ss:$16 sps:$4 sm:$0xff]   ;;  %v3523_v50 = vld [vmem:[#allocation2 + $0x508] ss:$16 sps:$4 sm:$0xff]  }
 0x146   :  { %1855 = vmatprep.subr.bf16.mxu0 %v3457_v49  ;;  %v3621_v49 = vld [vmem:[#allocation7 + $0x84] ss:$8 sps:$4 sm:$0xff]  }
 0x148   :  { %1938 = vmatpush1.bf16.msra.mxu1 %v3458_v53  ;;  %v3619_v53 = vld [vmem:[#allocation7 + $0x80] ss:$8 sps:$4 sm:$0xff]  }
 0x149   :  { %1856 = vmatpush1.bf16.msra.mxu0 %v3455_v52  ;;  %1939 = vmatprep.subr.bf16.mxu1 %v3466_v55  ;;  %v3528_v52 = vld [vmem:[#allocation2 + $0x52c] ss:$16 sps:$4 sm:$0xff]   ;;  %v3526_v55 = vld [vmem:[#allocation2 + $0x528] ss:$16 sps:$4 sm:$0xff]  }
 0x14a   :  { %1857 = vmatprep.subr.bf16.mxu0 %v3463_v54  ;;  %v3624_v54 = vld [vmem:[#allocation7 + $0x94] ss:$8 sps:$4 sm:$0xff]  }
 0x14c   :  { %1940 = vmatpush1.bf16.msra.mxu1 %v3464_v57  ;;  %v3622_v57 = vld [vmem:[#allocation7 + $0x90] ss:$8 sps:$4 sm:$0xff]  }
 0x14d   :  { %1858 = vmatpush1.bf16.msra.mxu0 %v3461_v56  ;;  %1941 = vmatprep.subr.bf16.mxu1 %v3472_v59  ;;  %v3531_v56 = vld [vmem:[#allocation2 + $0x54c] ss:$16 sps:$4 sm:$0xff]   ;;  %v3529_v59 = vld [vmem:[#allocation2 + $0x548] ss:$16 sps:$4 sm:$0xff]  }
 0x14e   :  { %1859 = vmatprep.subr.bf16.mxu0 %v3469_v58  ;;  %v3627_v58 = vld [vmem:[#allocation7 + $0xa4] ss:$8 sps:$4 sm:$0xff]  }
 0x150   :  { %1942 = vmatpush1.bf16.msra.mxu1 %v3470_v61  ;;  %v3625_v61 = vld [vmem:[#allocation7 + $0xa0] ss:$8 sps:$4 sm:$0xff]  }
 0x151   :  { %1860 = vmatpush1.bf16.msra.mxu0 %v3467_v60  ;;  %1943 = vmatprep.subr.bf16.mxu1 %v3478_v63  ;;  %v3534_v60 = vld [vmem:[#allocation2 + $0x56c] ss:$16 sps:$4 sm:$0xff]   ;;  %v3532_v63 = vld [vmem:[#allocation2 + $0x568] ss:$16 sps:$4 sm:$0xff]  }
 0x152   :  { %1861 = vmatprep.subr.bf16.mxu0 %v3475_v62  ;;  %v3630_v62 = vld [vmem:[#allocation7 + $0xb4] ss:$8 sps:$4 sm:$0xff]  }
 0x154   :  { %1944 = vmatpush1.bf16.msra.mxu1 %v3476_v1  ;;  %v3628_v1 = vld [vmem:[#allocation7 + $0xb0] ss:$8 sps:$4 sm:$0xff]  }
 0x155   :  { %1862 = vmatpush1.bf16.msra.mxu0 %v3473_v0  ;;  %1945 = vmatprep.subr.bf16.mxu1 %v3484_v3  ;;  %v3537_v0 = vld [vmem:[#allocation2 + $0x58c] ss:$16 sps:$4 sm:$0xff]   ;;  %v3535_v3 = vld [vmem:[#allocation2 + $0x588] ss:$16 sps:$4 sm:$0xff]  }
 0x156   :  { %1863 = vmatprep.subr.bf16.mxu0 %v3481_v2  ;;  %v3633_v2 = vld [vmem:[#allocation7 + $0xc4] ss:$8 sps:$4 sm:$0xff]  }
 0x158   :  { %1946 = vmatpush1.bf16.msra.mxu1 %v3482_v5  ;;  %v3631_v5 = vld [vmem:[#allocation7 + $0xc0] ss:$8 sps:$4 sm:$0xff]  }
 0x159   :  { %1864 = vmatpush1.bf16.msra.mxu0 %v3479_v4  ;;  %1947 = vmatprep.subr.bf16.mxu1 %v3490_v9  ;;  %v3540_v4 = vld [vmem:[#allocation2 + $0x5ac] ss:$16 sps:$4 sm:$0xff]  }
 0x15a   :  { %1865 = vmatprep.subr.bf16.mxu0 %v3487_v8  ;;  %v3538_v8 = vld [vmem:[#allocation2 + $0x5a8] ss:$16 sps:$4 sm:$0xff]   ;;  %v3543_v9 = vld [vmem:[#allocation2 + $0x5cc] ss:$16 sps:$4 sm:$0xff]  }
 0x15c   :  { %1948 = vmatpush1.bf16.msra.mxu1 %v3488_v11  ;;  %v3546_v11 = vld [vmem:[#allocation2 + $0x5ec] ss:$16 sps:$4 sm:$0xff]  }
 0x15d   :  { %1866 = vmatpush1.bf16.msra.mxu0 %v3485_v10  ;;  %1949 = vmatprep.subr.bf16.mxu1 %v3496_v14  ;;  %v3541_v10 = vld [vmem:[#allocation2 + $0x5c8] ss:$16 sps:$4 sm:$0xff]   ;;  %v3549_v14 = vld [vmem:[#allocation2 + $0x60c] ss:$16 sps:$4 sm:$0xff]  }
 0x15e   :  { %1867 = vmatprep.subr.bf16.mxu0 %v3493_v12  ;;  %v3544_v12 = vld [vmem:[#allocation2 + $0x5e8] ss:$16 sps:$4 sm:$0xff]  }
 0x160   :  { %1950 = vmatpush1.bf16.msra.mxu1 %v3494_v16  ;;  %v3552_v16 = vld [vmem:[#allocation2 + $0x62c] ss:$16 sps:$4 sm:$0xff]  }
 0x161   :  { %1868 = vmatpush1.bf16.msra.mxu0 %v3491_v15  ;;  %1960 = vmatprep.subr.bf16.mxu1 %v3501_v17  ;;  %v3547_v15 = vld [vmem:[#allocation2 + $0x608] ss:$16 sps:$4 sm:$0xff]  }
 0x162   :  { %2486 = vmatprep.subr.bf16.mxu0 %v3597_v24  ;;  %v3550_v17 = vld [vmem:[#allocation2 + $0x628] ss:$16 sps:$4 sm:$0xff]  }
 0x163   :  { %1952 = vmatmul.mubr.bf16.vlgmr.msra.gmra.mrb[4].mxu1 %v4114_v7  ;;  %v3601_v7 = vld [vmem:[#allocation7 + $0x20] ss:$8 sps:$4 sm:$0xff]  }
 0x164   :  { %1870 = vmatmul.mubr.bf16.vlgmr.msra.gmra.mrb[0].mxu0 %v4148_v21  ;;  %1961 = vmatpush1.bf16.msra.mxu1 %v3499_v20  ;;  %v3555_v20 = vld [vmem:[#allocation2 + $0x64c] ss:$16 sps:$4 sm:$0xff]   ;;  %v3556_v24 = vld [vmem:[#allocation2 + $0x668] ss:$16 sps:$4 sm:$0xff]  }
 0x165   :  { %1992 = vmatprep.mubr.bf16.mxu1 %v4126_v34  ;;  %1962 = vmatprep.subr.bf16.mxu1 %v3504_v22  ;;  %v3604_v34 = vld [vmem:[#allocation7 + $0x30] ss:$8 sps:$4 sm:$0xff]  }
 0x166   :  { %2487 = vmatpush1.bf16.msra.mxu0 %v3595_v23  ;;  %v3553_v22 = vld [vmem:[#allocation2 + $0x648] ss:$16 sps:$4 sm:$0xff]   ;;  %v3558_v23 = vld [vmem:[#allocation2 + $0x66c] ss:$16 sps:$4 sm:$0xff]  }
 0x167   :  { %2488 = vmatprep.subr.bf16.mxu0 %v3600_v26  ;;  %v3559_v26 = vld [vmem:[#allocation2 + $0x688] ss:$16 sps:$4 sm:$0xff]  }
 0x168   :  { %1963 = vmatpush1.bf16.msra.mxu1 %v3502_v25  ;;  %v3561_v25 = vld [vmem:[#allocation2 + $0x68c] ss:$16 sps:$4 sm:$0xff]  }
 0x169   :  { %1964 = vmatprep.subr.bf16.mxu1 %v3507_v6  ;;  %v3564_v6 = vld [vmem:[#allocation2 + $0x6ac] ss:$16 sps:$4 sm:$0xff]  }
 0x16a   :  { %2489 = vmatpush1.bf16.msra.mxu0 %v3598_v18  ;;  %v3567_v18 = vld [vmem:[#allocation2 + $0x6cc] ss:$16 sps:$4 sm:$0xff]  }
 0x16b   :  { %2490 = vmatprep.subr.bf16.mxu0 %v3603_v27  ;;  %v3636_v27 = vld [vmem:[#allocation7 + $0xd4] ss:$8 sps:$4 sm:$0xff]  }
 0x16c   :  { %1965 = vmatpush1.bf16.msra.mxu1 %v3505_v28  ;;  %v3634_v28 = vld [vmem:[#allocation7 + $0xd0] ss:$8 sps:$4 sm:$0xff]  }
 0x16d   :  { %1966 = vmatprep.subr.bf16.mxu1 %v3510_v29 }
 0x16e   :  { %2491 = vmatpush1.bf16.msra.mxu0 %v3601_v7  ;;  %v3565_v7 = vld [vmem:[#allocation2 + $0x6c8] ss:$16 sps:$4 sm:$0xff]  }
 0x16f   :  { %2492 = vmatprep.subr.bf16.mxu0 %v3606_v32  ;;  %v3570_v32 = vld [vmem:[#allocation2 + $0x6ec] ss:$16 sps:$4 sm:$0xff]  }
 0x170   :  { %1967 = vmatpush1.bf16.msra.mxu1 %v3508_v30 }
 0x171   :  { %1968 = vmatprep.subr.bf16.mxu1 %v3513_v31 }
 0x172   :  { %2493 = vmatpush1.bf16.msra.mxu0 %v3604_v34  ;;  %v3639_v34 = vld [vmem:[#allocation7 + $0xe4] ss:$8 sps:$4 sm:$0xff]  }
 0x173   :  { %2494 = vmatprep.subr.bf16.mxu0 %v3609_v51  ;;  %v3637_v51 = vld [vmem:[#allocation7 + $0xe0] ss:$8 sps:$4 sm:$0xff]  }
 0x174   :  { %1969 = vmatpush1.bf16.msra.mxu1 %v3511_v33  ;;  %v3568_v33 = vld [vmem:[#allocation2 + $0x6e8] ss:$16 sps:$4 sm:$0xff]  }
 0x175   :  { %1970 = vmatprep.subr.bf16.mxu1 %v3516_v35  ;;  %v3573_v35 = vld [vmem:[#allocation2 + $0x70c] ss:$16 sps:$4 sm:$0xff]  }
 0x176   :  { %2495 = vmatpush1.bf16.msra.mxu0 %v3607_v36  ;;  %v3642_v36 = vld [vmem:[#allocation7 + $0xf4] ss:$8 sps:$4 sm:$0xff]  }
 0x177   :  { %2496 = vmatprep.subr.bf16.mxu0 %v3612_v37  ;;  %v3640_v37 = vld [vmem:[#allocation7 + $0xf0] ss:$8 sps:$4 sm:$0xff]  }
 0x178   :  { %1971 = vmatpush1.bf16.msra.mxu1 %v3514_v38  ;;  %v3571_v38 = vld [vmem:[#allocation2 + $0x708] ss:$16 sps:$4 sm:$0xff]  }
 0x179   :  { %1972 = vmatprep.subr.bf16.mxu1 %v3519_v39  ;;  %v3576_v39 = vld [vmem:[#allocation2 + $0x72c] ss:$16 sps:$4 sm:$0xff]  }
 0x17a   :  { %2497 = vmatpush1.bf16.msra.mxu0 %v3610_v40  ;;  %v3645_v40 = vld [vmem:[#allocation7 + $0x104] ss:$8 sps:$4 sm:$0xff]  }
 0x17b   :  { %2498 = vmatprep.subr.bf16.mxu0 %v3615_v41  ;;  %v3574_v41 = vld [vmem:[#allocation2 + $0x728] ss:$16 sps:$4 sm:$0xff]  }
 0x17c   :  { %1973 = vmatpush1.bf16.msra.mxu1 %v3517_v42  ;;  %v3579_v42 = vld [vmem:[#allocation2 + $0x74c] ss:$16 sps:$4 sm:$0xff]  }
 0x17d   :  { %1974 = vmatprep.subr.bf16.mxu1 %v3522_v43  ;;  %v3577_v43 = vld [vmem:[#allocation2 + $0x748] ss:$16 sps:$4 sm:$0xff]  }
 0x17e   :  { %2499 = vmatpush1.bf16.msra.mxu0 %v3613_v44  ;;  %v3582_v44 = vld [vmem:[#allocation2 + $0x76c] ss:$16 sps:$4 sm:$0xff]  }
 0x17f   :  { %2500 = vmatprep.subr.bf16.mxu0 %v3618_v45  ;;  %v3580_v45 = vld [vmem:[#allocation2 + $0x768] ss:$16 sps:$4 sm:$0xff]  }
 0x180   :  { %1975 = vmatpush1.bf16.msra.mxu1 %v3520_v46  ;;  %v3585_v46 = vld [vmem:[#allocation2 + $0x78c] ss:$16 sps:$4 sm:$0xff]  }
 0x181   :  { %1976 = vmatprep.subr.bf16.mxu1 %v3525_v47  ;;  %v3583_v47 = vld [vmem:[#allocation2 + $0x788] ss:$16 sps:$4 sm:$0xff]  }
 0x182   :  { %2501 = vmatpush1.bf16.msra.mxu0 %v3616_v48  ;;  %v3588_v48 = vld [vmem:[#allocation2 + $0x7ac] ss:$16 sps:$4 sm:$0xff]  }
 0x183   :  { %2502 = vmatprep.subr.bf16.mxu0 %v3621_v49  ;;  %v3586_v49 = vld [vmem:[#allocation2 + $0x7a8] ss:$16 sps:$4 sm:$0xff]  }
 0x184   :  { %1977 = vmatpush1.bf16.msra.mxu1 %v3523_v50  ;;  %v3591_v50 = vld [vmem:[#allocation2 + $0x7cc] ss:$16 sps:$4 sm:$0xff]  }
 0x185   :  { %1978 = vmatprep.subr.bf16.mxu1 %v3528_v52  ;;  %v3589_v52 = vld [vmem:[#allocation2 + $0x7c8] ss:$16 sps:$4 sm:$0xff]  }
 0x186   :  { %2503 = vmatpush1.bf16.msra.mxu0 %v3619_v53  ;;  %v3594_v53 = vld [vmem:[#allocation2 + $0x7ec] ss:$16 sps:$4 sm:$0xff]  }
 0x187   :  { %2504 = vmatprep.subr.bf16.mxu0 %v3624_v54  ;;  %v3592_v54 = vld [vmem:[#allocation2 + $0x7e8] ss:$16 sps:$4 sm:$0xff]  }
 0x188   :  { %1979 = vmatpush1.bf16.msra.mxu1 %v3526_v55  ;;  %v2044_v55 = vlaneseq }
 0x189   :  { %1980 = vmatprep.subr.bf16.mxu1 %v3531_v56 }
 0x18a   :  { %2505 = vmatpush1.bf16.msra.mxu0 %v3622_v57  ;;  %v4160_v56 = vshrl.u32 %v2044_v55, 7  ;;  %v3690_v55 = vld [vmem:[#allocation7 + $0x1f4] ss:$8 sps:$4 sm:$0xff]  }
 0x18b   :  { %2506 = vmatprep.subr.bf16.mxu0 %v3627_v58  ;;  %v4165_v58 = vld [vmem:[#allocation4] sm:$0xf] }
 0x18c   :  { %1981 = vmatpush1.bf16.msra.mxu1 %v3529_v59  ;;  %v4163_v57 = vsub.s32 0, %v4160_v56  ;;  %v4168_v59 = vsub.s32 1, %v4160_v56 }
 0x18d   :  { %1982 = vmatprep.subr.bf16.mxu1 %v3534_v60  ;;  %v4170_v60 = vld [vmem:[#allocation6] sm:$0xf] }
 0x18e   :  { %2507 = vmatpush1.bf16.msra.mxu0 %v3625_v61  ;;  %v2047_v61 = vrot.slane %v4165_v58, %v4163_v57 }
 0x18f   :  { %2508 = vmatprep.subr.bf16.mxu0 %v3630_v62 }
 0x190   :  { %1983 = vmatpush1.bf16.msra.mxu1 %v3532_v63 }
 0x191   :  { %1984 = vmatprep.subr.bf16.mxu1 %v3537_v0  ;;  %v2073_v0 = vrot.slane %v4170_v60, %v4163_v57 }
 0x192   :  { %2509 = vmatpush1.bf16.msra.mxu0 %v3628_v1 }
 0x193   :  { %2510 = vmatprep.subr.bf16.mxu0 %v3633_v2 }
 0x194   :  { %1985 = vmatpush1.bf16.msra.mxu1 %v3535_v3  ;;  %v2077_v3 = vrot.slane %v4170_v60, %v4168_v59 }
 0x195   :  { %1986 = vmatprep.subr.bf16.mxu1 %v3540_v4 }
 0x196   :  { %2511 = vmatpush1.bf16.msra.mxu0 %v3631_v5 }
 0x197   :  { %2512 = vmatprep.subr.bf16.mxu0 %v3636_v27  ;;  %v3696_v27 = vld [vmem:[#allocation12 + $0x10] sm:$0xff]  }
 0x198   :  { %1987 = vmatpush1.bf16.msra.mxu1 %v3538_v8 }
 0x199   :  { %1988 = vmatprep.subr.bf16.mxu1 %v3543_v9 }
 0x19a   :  { %2513 = vmatpush1.bf16.msra.mxu0 %v3634_v28  ;;  %v3697_v28 = vld [vmem:[#allocation12 + $0x58] sm:$0xff]  }
 0x19b   :  { %2514 = vmatprep.subr.bf16.mxu0 %v3639_v34  ;;  %v3700_v34 = vld [vmem:[#allocation12 + $0x20] sm:$0xff]  }
 0x19c   :  { %1989 = vmatpush1.bf16.msra.mxu1 %v3541_v10 }
 0x19d   :  { %1990 = vmatprep.subr.bf16.mxu1 %v3546_v11 }
 0x19e   :  { %2515 = vmatpush1.bf16.msra.mxu0 %v3637_v51  ;;  %v3660_v51 = vld [vmem:[#allocation7 + $0x154] ss:$8 sps:$4 sm:$0xff]  }
 0x19f   :  { %2516 = vmatprep.subr.bf16.mxu0 %v3642_v36  ;;  %v3663_v36 = vld [vmem:[#allocation7 + $0x164] ss:$8 sps:$4 sm:$0xff]  }
 0x1a0   :  { %1991 = vmatpush1.bf16.msra.mxu1 %v3544_v12 }
 0x1a1   :  { %2001 = vmatprep.subr.bf16.mxu1 %v3549_v14 }
 0x1a2   :  { %2517 = vmatpush1.bf16.msra.mxu0 %v3640_v37  ;;  %v3661_v37 = vld [vmem:[#allocation7 + $0x160] ss:$8 sps:$4 sm:$0xff]  }
 0x1a3   :  { %1993 = vmatmul.mubr.bf16.vlgmr.msra.gmra.mrb[4].mxu1 %v4131_v13  ;;  %v3562_v13 = vld [vmem:[#allocation2 + $0x6a8] ss:$16 sps:$4 sm:$0xff]   ;;  %2527 = vmatprep.subr.bf16.mxu0 %v3645_v40  ;;  %v3669_v40 = vld [vmem:[#allocation7 + $0x184] ss:$8 sps:$4 sm:$0xff]  }
 0x1a4   :  { %2002 = vmatpush1.bf16.msra.mxu1 %v3547_v15  ;;  %2033 = vmatprep.mubr.bf16.mxu1 %v4140_v19 }
 0x1a5   :  { %2003 = vmatprep.subr.bf16.mxu1 %v3552_v16  ;;  %v3643_v16 = vld [vmem:[#allocation7 + $0x100] ss:$8 sps:$4 sm:$0xff]  }
 0x1a8   :  { %2004 = vmatpush1.bf16.msra.mxu1 %v3550_v17  ;;  %v3648_v17 = vld [vmem:[#allocation7 + $0x114] ss:$8 sps:$4 sm:$0xff]  }
 0x1a9   :  { %2005 = vmatprep.subr.bf16.mxu1 %v3555_v20 }
 0x1ac   :  { %2006 = vmatpush1.bf16.msra.mxu1 %v3553_v22  ;;  %v3691_v22 = vld [vmem:[#allocation12 + $0x40] sm:$0xff]  }
 0x1ad   :  { %2007 = vmatprep.subr.bf16.mxu1 %v3558_v23  ;;  %v3692_v23 = vld [vmem:[#allocation12] sm:$0xff]  }
 0x1b0   :  { %2008 = vmatpush1.bf16.msra.mxu1 %v3556_v24  ;;  %v3693_v24 = vld [vmem:[#allocation12 + $0x48] sm:$0xff]  }
 0x1b1   :  { %2009 = vmatprep.subr.bf16.mxu1 %v3561_v25  ;;  %v3646_v25 = vld [vmem:[#allocation7 + $0x110] ss:$8 sps:$4 sm:$0xff]  }
 0x1b4   :  { %2010 = vmatpush1.bf16.msra.mxu1 %v3559_v26  ;;  %v3694_v26 = vld [vmem:[#allocation12 + $0x8] sm:$0xff]  }
 0x1b5   :  { %2011 = vmatprep.subr.bf16.mxu1 %v3564_v6  ;;  %v3651_v6 = vld [vmem:[#allocation7 + $0x124] ss:$8 sps:$4 sm:$0xff]  }
 0x1b6   :  { %v4155_v19 = vpop.f32.mrb[0].mxu1 }
 0x1b7   :  { %v4157_v29 = vpop.f32.mrb[1].mxu1 }
 0x1b8   :  { %v1752_v30 = vpop.f32.mrb[2].mxu1  ;;  %2012 = vmatpush1.bf16.msra.mxu1 %v3562_v13  ;;  %v3695_v13 = vld [vmem:[#allocation12 + $0x50] sm:$0xff]  }
 0x1b9   :  { %v1753_v31 = vpop.f32.mrb[3].mxu1  ;;  %2013 = vmatprep.subr.bf16.mxu1 %v3567_v18  ;;  %v3649_v18 = vld [vmem:[#allocation7 + $0x120] ss:$8 sps:$4 sm:$0xff]  }
 0x1ba   :  { %v3698_v30 = vld [vmem:[#allocation12 + $0x18] sm:$0xff]   ;;  %v3699_v31 = vld [vmem:[#allocation12 + $0x60] sm:$0xff]  }
 0x1bc   :  { %2014 = vmatpush1.bf16.msra.mxu1 %v3565_v7  ;;  %v3657_v7 = vld [vmem:[#allocation7 + $0x144] ss:$8 sps:$4 sm:$0xff]  }
 0x1bd   :  { %2015 = vmatprep.subr.bf16.mxu1 %v3570_v32  ;;  %v3655_v32 = vld [vmem:[#allocation7 + $0x140] ss:$8 sps:$4 sm:$0xff]  }
 0x1c0   :  { %2016 = vmatpush1.bf16.msra.mxu1 %v3568_v33  ;;  %v3701_v33 = vld [vmem:[#allocation12 + $0x68] sm:$0xff]  }
 0x1c1   :  { %2017 = vmatprep.subr.bf16.mxu1 %v3573_v35  ;;  %v3658_v35 = vld [vmem:[#allocation7 + $0x150] ss:$8 sps:$4 sm:$0xff]  }
 0x1c4   :  { %2018 = vmatpush1.bf16.msra.mxu1 %v3571_v38  ;;  %v3666_v38 = vld [vmem:[#allocation7 + $0x174] ss:$8 sps:$4 sm:$0xff]  }
 0x1c5   :  { %2019 = vmatprep.subr.bf16.mxu1 %v3576_v39  ;;  %v3664_v39 = vld [vmem:[#allocation7 + $0x170] ss:$8 sps:$4 sm:$0xff]  }
 0x1c8   :  { %2020 = vmatpush1.bf16.msra.mxu1 %v3574_v41  ;;  %v3667_v41 = vld [vmem:[#allocation7 + $0x180] ss:$8 sps:$4 sm:$0xff]  }
 0x1c9   :  { %2021 = vmatprep.subr.bf16.mxu1 %v3579_v42  ;;  %v3672_v42 = vld [vmem:[#allocation7 + $0x194] ss:$8 sps:$4 sm:$0xff]  }
 0x1cc   :  { %2022 = vmatpush1.bf16.msra.mxu1 %v3577_v43  ;;  %v3670_v43 = vld [vmem:[#allocation7 + $0x190] ss:$8 sps:$4 sm:$0xff]  }
 0x1cd   :  { %2023 = vmatprep.subr.bf16.mxu1 %v3582_v44  ;;  %v3675_v44 = vld [vmem:[#allocation7 + $0x1a4] ss:$8 sps:$4 sm:$0xff]  }
 0x1d0   :  { %2024 = vmatpush1.bf16.msra.mxu1 %v3580_v45  ;;  %v3673_v45 = vld [vmem:[#allocation7 + $0x1a0] ss:$8 sps:$4 sm:$0xff]  }
 0x1d1   :  { %2025 = vmatprep.subr.bf16.mxu1 %v3585_v46  ;;  %v3678_v46 = vld [vmem:[#allocation7 + $0x1b4] ss:$8 sps:$4 sm:$0xff]  }
 0x1d4   :  { %2026 = vmatpush1.bf16.msra.mxu1 %v3583_v47  ;;  %v3676_v47 = vld [vmem:[#allocation7 + $0x1b0] ss:$8 sps:$4 sm:$0xff]  }
 0x1d5   :  { %2027 = vmatprep.subr.bf16.mxu1 %v3588_v48  ;;  %v3681_v48 = vld [vmem:[#allocation7 + $0x1c4] ss:$8 sps:$4 sm:$0xff]  }
 0x1d8   :  { %2028 = vmatpush1.bf16.msra.mxu1 %v3586_v49  ;;  %v3679_v49 = vld [vmem:[#allocation7 + $0x1c0] ss:$8 sps:$4 sm:$0xff]  }
 0x1d9   :  { %2029 = vmatprep.subr.bf16.mxu1 %v3591_v50  ;;  %v3684_v50 = vld [vmem:[#allocation7 + $0x1d4] ss:$8 sps:$4 sm:$0xff]  }
 0x1dc   :  { %2030 = vmatpush1.bf16.msra.mxu1 %v3589_v52  ;;  %v3682_v52 = vld [vmem:[#allocation7 + $0x1d0] ss:$8 sps:$4 sm:$0xff]  }
 0x1dd   :  { %2031 = vmatprep.subr.bf16.mxu1 %v3594_v53  ;;  %v3687_v53 = vld [vmem:[#allocation7 + $0x1e4] ss:$8 sps:$4 sm:$0xff]  }
 0x1e0   :  { %2032 = vmatpush1.bf16.msra.mxu1 %v3592_v54  ;;  %v3685_v54 = vld [vmem:[#allocation7 + $0x1e0] ss:$8 sps:$4 sm:$0xff]  }
 0x1e1   :  { %3140 = vmatprep.subr.bf16.mxu1 %v3691_v22  ;;  %v3706_v22 = vld [vmem:[#allocation12 + $0x38] sm:$0xff]  }
 0x1e3   :  { %2034 = vmatmul.mubr.bf16.vlgmr.msra.gmra.mrb[4].mxu1 %v4148_v21  ;;  %v2051_v21 = vrot.slane %v4165_v58, %v4168_v59 }
 0x1e4   :  { %3141 = vmatpush3.bf16.msra.mxu1 %v3692_v23  ;;  %v2568_v23 = vld [vmem:[#allocation9] sm:$0x3] }
 0x1e5   :  { %3142 = vmatprep.subr.bf16.mxu1 %v3693_v24  ;;  %v2582_v24 = vld [vmem:[#allocation10] sm:$0x3] }
 0x1e8   :  { %3143 = vmatpush3.bf16.msra.mxu1 %v3694_v26  ;;  %v2577_v26 = vrot.slane %v2568_v23, %v4168_v59 }
 0x1e9   :  { %3144 = vmatprep.subr.bf16.mxu1 %v3695_v13 }
 0x1ec   :  { %3145 = vmatpush3.bf16.msra.mxu1 %v3696_v27 }
 0x1ed   :  { %3146 = vmatprep.subr.bf16.mxu1 %v3697_v28 }
 0x1f0   :  { %3147 = vmatpush3.bf16.msra.mxu1 %v3698_v30 }
 0x1f1   :  { %3148 = vmatprep.subr.bf16.mxu1 %v3699_v31 }
 0x1f4   :  { %3149 = vmatpush3.bf16.msra.mxu1 %v3700_v34 }
 0x1f5   :  { %3150 = vmatprep.subr.bf16.mxu1 %v3701_v33 }
 0x237   :  { %v1871_v62 = vpop.f32.mrb[0].mxu0 }
 0x238   :  { %v3162_v63 = vadd.f32 %v1871_v62, %v4155_v19  ;;  %v1873_v1 = vpop.f32.mrb[1].mxu0  ;;  %v3654_v19 = vld [vmem:[#allocation7 + $0x134] ss:$8 sps:$4 sm:$0xff]   ;;  %v2054_v62 = vsub.s32 2, %v4160_v56 }
 0x239   :  { %v3163_v2 = vadd.f32 %v1873_v1, %v4157_v29  ;;  %v1875_v4 = vpop.f32.mrb[2].mxu0  ;;  %v3652_v29 = vld [vmem:[#allocation7 + $0x130] ss:$8 sps:$4 sm:$0xff]  }
 0x23a   :  { %v2064_v5 = vmul.f32 %v3162_v63, %v2047_v61  ;;  %v1876_v8 = vpop.f32.mrb[3].mxu0  ;;  %v3688_v61 = vld [vmem:[#allocation7 + $0x1f0] ss:$8 sps:$4 sm:$0xff]   ;;  %v2055_v63 = vrot.slane %v4165_v58, %v2054_v62  ;;  %v2081_v1 = vrot.slane %v4170_v60, %v2054_v62 }
 0x23b   :  { %v2065_v9 = vmul.f32 %v3163_v2, %v2051_v21  ;;  %v2058_v21 = vsub.s32 3, %v4160_v56 }
 0x23c   :  { %v2090_v10 = vadd.f32 %v2073_v0, %v2064_v5 }
 0x23d   :  { %v2091_v11 = vadd.f32 %v2077_v3, %v2065_v9  ;;  %v2059_v0 = vrot.slane %v4165_v58, %v2058_v21  ;;  %v2085_v3 = vrot.slane %v4170_v60, %v2058_v21  ;;  %v3703_v58 = vld [vmem:[#allocation12 + $0x70] sm:$0xff]   ;;  %v3705_v60 = vld [vmem:[#allocation12 + $0x78] sm:$0xff]  }
 0x23e   :  { %v2094_v12 = vmax.f32 %v2090_v10, 0.0 }
 0x23f   :  { %v2095_v14 = vmax.f32 %v2091_v11, 0.0 }
 0x240   :  { %v2098_v20 = vpack.c.bf16 %v2094_v12, %v2094_v12 }
 0x241   :  { %v2099_v15 = vpack.c.bf16 %v2095_v14, %v2095_v14 }
 0x243   :  { %2518 = vmatprep.mubr.bf16.mxu0 %v2099_v15 }
 0x244   :  { %2519 = vmatmul.mubr.bf16.vlgmr.msra.gmra.mrb[4].mxu0 %v2098_v20  ;;  %v3704_v20 = vld [vmem:[#allocation12 + $0x30] sm:$0xff]  }
 0x245   :  { %2528 = vmatpush1.bf16.msra.mxu0 %v3643_v16 }
 0x246   :  { %2529 = vmatprep.subr.bf16.mxu0 %v3648_v17  ;;  %v3702_v17 = vld [vmem:[#allocation12 + $0x28] sm:$0xff]  }
 0x247   :  { %3151 = vmatpush3.bf16.msra.mxu1 %v3702_v17 }
 0x248   :  { %3152 = vmatprep.subr.bf16.mxu1 %v3703_v58 }
 0x249   :  { %2530 = vmatpush1.bf16.msra.mxu0 %v3646_v25  ;;  %v2573_v25 = vrot.slane %v2568_v23, %v4163_v57 }
 0x24a   :  { %2531 = vmatprep.subr.bf16.mxu0 %v3651_v6  ;;  %v2587_v6 = vrot.slane %v2582_v24, %v4163_v57 }
 0x24b   :  { %3153 = vmatpush3.bf16.msra.mxu1 %v3704_v20 }
 0x24c   :  { %3154 = vmatprep.subr.bf16.mxu1 %v3705_v60 }
 0x24d   :  { %2532 = vmatpush1.bf16.msra.mxu0 %v3649_v18  ;;  %v2591_v18 = vrot.slane %v2582_v24, %v4168_v59 }
 0x24e   :  { %2533 = vmatprep.subr.bf16.mxu0 %v3654_v19 }
 0x24f   :  { %3155 = vmatpush3.bf16.msra.mxu1 %v3706_v22 }
 0x251   :  { %2534 = vmatpush1.bf16.msra.mxu0 %v3652_v29 }
 0x252   :  { %2535 = vmatprep.subr.bf16.mxu0 %v3657_v7 }
 0x255   :  { %2536 = vmatpush1.bf16.msra.mxu0 %v3655_v32 }
 0x256   :  { %2537 = vmatprep.subr.bf16.mxu0 %v3660_v51 }
 0x259   :  { %2538 = vmatpush1.bf16.msra.mxu0 %v3658_v35 }
 0x25a   :  { %2539 = vmatprep.subr.bf16.mxu0 %v3663_v36 }
 0x25d   :  { %2540 = vmatpush1.bf16.msra.mxu0 %v3661_v37  ;;  %v3138_v37 = vld [vmem:[#allocation13] ss:$0 sm:$0xff] }
 0x25e   :  { %2541 = vmatprep.subr.bf16.mxu0 %v3666_v38 }
 0x261   :  { %2542 = vmatpush1.bf16.msra.mxu0 %v3664_v39  ;;  %v3139_v39 = vld [vmem:[#allocation15] ss:$0 sm:$0xff] }
 0x262   :  { %2543 = vmatprep.subr.bf16.mxu0 %v3669_v40 }
 0x265   :  { %2544 = vmatpush1.bf16.msra.mxu0 %v3667_v41 }
 0x266   :  { %2545 = vmatprep.subr.bf16.mxu0 %v3672_v42 }
 0x269   :  { %2546 = vmatpush1.bf16.msra.mxu0 %v3670_v43 }
 0x26a   :  { %2547 = vmatprep.subr.bf16.mxu0 %v3675_v44 }
 0x26d   :  { %2548 = vmatpush1.bf16.msra.mxu0 %v3673_v45 }
 0x26e   :  { %2549 = vmatprep.subr.bf16.mxu0 %v3678_v46 }
 0x271   :  { %2550 = vmatpush1.bf16.msra.mxu0 %v3676_v47 }
 0x272   :  { %2551 = vmatprep.subr.bf16.mxu0 %v3681_v48 }
 0x275   :  { %2552 = vmatpush1.bf16.msra.mxu0 %v3679_v49 }
 0x276   :  { %2553 = vmatprep.subr.bf16.mxu0 %v3684_v50 }
 0x279   :  { %2554 = vmatpush1.bf16.msra.mxu0 %v3682_v52 }
 0x27a   :  { %2555 = vmatprep.subr.bf16.mxu0 %v3687_v53 }
 0x27d   :  { %2556 = vmatpush1.bf16.msra.mxu0 %v3685_v54 }
 0x27e   :  { %2557 = vmatprep.subr.bf16.mxu0 %v3690_v55 }
 0x281   :  { %2558 = vmatpush1.bf16.msra.mxu0 %v3688_v61 }
 0x2b6   :  { %v2035_v2 = vpop.f32.mrb[4].mxu1 }
 0x2b7   :  { %v2066_v4 = vmul.f32 %v2055_v63, %v2035_v2  ;;  %v2037_v5 = vpop.f32.mrb[5].mxu1 }
 0x2b8   :  { %v2067_v8 = vmul.f32 %v2059_v0, %v2037_v5  ;;  %v2039_v9 = vpop.f32.mrb[6].mxu1 }
 0x2b9   :  { %v2092_v10 = vadd.f32 %v2081_v1, %v2066_v4  ;;  %v2040_v11 = vpop.f32.mrb[7].mxu1 }
 0x2ba   :  { %v2093_v12 = vadd.f32 %v2085_v3, %v2067_v8 }
 0x2bb   :  { %v2096_v14 = vmax.f32 %v2092_v10, 0.0 }
 0x2bc   :  { %v2097_v15 = vmax.f32 %v2093_v12, 0.0 }
 0x2bd   :  { %v2100_v56 = vpack.c.bf16 %v2096_v14, %v2096_v14 }
 0x2be   :  { %v2101_v16 = vpack.c.bf16 %v2097_v15, %v2097_v15 }
 0x2c0   :  { %2559 = vmatprep.mubr.bf16.mxu0 %v2101_v16 }
 0x2c1   :  { %2560 = vmatmul.mubr.bf16.vlgmr.msra.gmra.mrb[4].mxu0 %v2100_v56 }
 0x394   :  { %v2561_v13 = vpop.f32.mrb[4].mxu0 }
 0x395   :  { %v2580_v27 = vmul.f32 %v2573_v25, %v2561_v13  ;;  %v2563_v19 = vpop.f32.mrb[5].mxu0 }
 0x396   :  { %v2581_v28 = vmul.f32 %v2577_v26, %v2563_v19  ;;  %v2565_v29 = vpop.f32.mrb[6].mxu0 }
 0x397   :  { %v2594_v30 = vadd.f32 %v2587_v6, %v2580_v27  ;;  %v2566_v7 = vpop.f32.mrb[7].mxu0 }
 0x398   :  { %v2595_v31 = vadd.f32 %v2591_v18, %v2581_v28 }
 0x399   :  { %v2596_v32 = vmax.f32 %v2594_v30, 0.0 }
 0x39a   :  { %v2597_v34 = vmax.f32 %v2595_v31, 0.0 }
 0x39b   :  { %v2598_v33 = vpack.c.bf16 %v2596_v32, %v2596_v32 }
 0x39c   :  { %v2599_v51 = vpack.c.bf16 %v2597_v34, %v2597_v34 }
 0x39e   :  { %2760 = vmatprep.mubr.bf16.mxu1 %v2599_v51 }
 0x39f   :  { %2761 = vmatmul.mubr.bf16.vlgmr.msra.gmra.mrb[8].mxu1 %v2598_v33 }
 0x472   :  { %v3156_v35 = vpop.f32.mrb[8].mxu1 }
 0x473   :  { %v3157_v36 = vpop.f32.mrb[9].mxu1 }
 0x474   :  { %v3158_v57 = vadd.f32 %v3157_v36, %v3156_v35  ;;  %v3159_v38 = vpop.f32.mrb[10].mxu1 }
 0x475   :  { %v3160_v59 = vpop.f32.mrb[11].mxu1 }
 0x476   :  { %v2775_v40 = vmul.f32 %v3158_v57, %v3138_v37 }
 0x478   :  { %v2783_v41 = vadd.f32 %v3139_v39, %v2775_v40 }
 0x47a   :  { %2784 = vst [vmem:[%s4205_s10] sm:$0xff] %v2783_v41 }
 0x47b   :  { %2789 = vsyncpa [#allocation3], 1 }
 0x47c   :  { %2790 = vsyncpa [#allocation5], 1 }
 0x47d   :  { %2791 = vsyncpa [#allocation8], 1 }
 0x47e   :  { %2792 = vsyncpa [#allocation11], 1 }
 0x47f   :  { %2793 = vsyncpa [#allocation14], 1 }

// kernel: pointnet_forward.10
= control target key start
LH: loop header
LB: loop body
LE: loop exit
PB: predicated region body
PF: predicated region fallthrough
CT: control target
= control target key end

     0   :  { %s1756_s13 = smov 0   ;;  %s1758_s14 = smov 0   ;;  %s2068_s0 = inlined_call_operand.vmem [shape: bf16[2,16,8], index: 0, kind: input, shape index: {}]   ;;  %s2069_s1 = inlined_call_operand.vmem [shape: bf16[2,8,64], index: 1, kind: input, shape index: {}]   ;;  %s2070_s2 = inlined_call_operand.vmem [shape: f32[1,64], index: 2, kind: input, shape index: {}]   ;;  %s2071_s3 = inlined_call_operand.vmem [shape: f32[1,64], index: 3, kind: input, shape index: {}]   ;;  %s2072_s4 = inlined_call_operand.vmem [shape: bf16[2,64,128], index: 4, kind: input, shape index: {}]   ;;  %s2073_s5 = inlined_call_operand.vmem [shape: f32[1,128], index: 5, kind: input, shape index: {}]   ;;  %s2074_s6 = inlined_call_operand.vmem [shape: f32[1,128], index: 6, kind: input, shape index: {}]   ;;  %s2075_s7 = inlined_call_operand.vmem [shape: bf16[128,1024], index: 7, kind: input, shape index: {}]   ;;  %s2076_s8 = inlined_call_operand.vmem [shape: f32[1,1024], index: 8, kind: input, shape index: {}]   ;;  %s2077_s9 = inlined_call_operand.vmem [shape: f32[1,1024], index: 9, kind: input, shape index: {}]   ;;  %s2078_s10 = inlined_call_operand.vmem [shape: f32[2,1,1024], index: 10, kind: output, shape index: {}]  }
   0x1   :  { %s1760_s15 = smov 0  }
   0x2 LB: > { %s32_s16 = sadd.s32 1, %s1691_s14  ;;  %p1529_p0 = scmp.ge.s32.totalorder %s1695_s15, 1  ;;  %s1695_s15 = sphi %s1760_s15, %s20_s15   ;;  %s1691_s14 = sphi %s1758_s14, %s2080_s14   ;;  %s1687_s13 = sphi %s1756_s13, %s2079_s13  }
   0x3   : > { %p34_p1 = scmp.ge.s32.totalorder %s32_s16, 2  ;;  %p350_p2 = scmp.lt.s32.totalorder %s1695_s15, 3 }
   0x5   : > { %s2082_s16 = smov (%p34_p1, %s32_s16), 0  ;;  %p351_p3 = pnand %p1529_p0, %p350_p2 }
   0x6   : > { %p401_p4 = scmp.lt.s32.totalorder (!%p351_p3), %s1687_s13, 1  ;;  %v1697_v0 = vmov (!%p351_p3), 0.0   ;;  %vm1698_vm0 = vmmov (!%p351_p3), 0   ;;  %vm448_vm1 = vcmask (!%p351_p3), 1043456   ;;  %vm444_vm2 = vcmask (!%p351_p3), 64512   ;;  %v611_v8 = vld [vmem:[%s2075_s7] sm:$0xff] (!%p351_p3) }
   0x7   : > { %354 = sbr.rel (%p351_p3) target bundleno = 742 (0x2e6), region = 60  ;;  %1622 = vmatprep.subr.bf16.mxu0 (!%p351_p3), %v1697_v0  ;;  %1624 = vmatprep.mubr.msk.bf16.mxu0 (!%p351_p3), %vm1698_vm0, %v1697_v0  ;;  %v615_v9 = vld [vmem:[%s2075_s7 + $0x20] sm:$0xff] (!%p351_p3)  ;;  %v612_v10 = vld [vmem:[%s2075_s7 + $0x8] sm:$0xff] (!%p351_p3)  ;;  %vm546_vm3 = vcmask (!%p351_p3), 523264  }
   0x8   : > { %1628 = vmatprep.subr.bf16.mxu1 (!%p351_p3), %v1697_v0  ;;  %1636 = vmatprep.mubr.msk.bf16.mxu1 (!%p351_p3), %vm1698_vm0, %v1697_v0  ;;  %v1547_v11 = vcombine.low (!%p351_p3), %v611_v8, %v615_v9  ;;  %v1548_v12 = vcombine.high (!%p351_p3), %v611_v8, %v615_v9  ;;  %v616_v13 = vld [vmem:[%s2075_s7 + $0x28] sm:$0xff] (!%p351_p3)  ;;  %v619_v14 = vld [vmem:[%s2075_s7 + $0x40] sm:$0xff] (!%p351_p3) }
   0x9   : > { %v623_v15 = vld [vmem:[%s2075_s7 + $0x60] sm:$0xff] (!%p351_p3)  ;;  %v1549_v16 = vcombine.low (!%p351_p3), %v612_v10, %v616_v13  ;;  %v1550_v17 = vcombine.high (!%p351_p3), %v612_v10, %v616_v13  ;;  %v620_v46 = vld [vmem:[%s2075_s7 + $0x48] sm:$0xff] (!%p351_p3) }
   0xa   : > { %v1556_v18 = vcombine.high (!%p351_p3), %v619_v14, %v623_v15  ;;  %v1555_v19 = vcombine.low (!%p351_p3), %v619_v14, %v623_v15  ;;  %v627_v20 = vld [vmem:[%s2075_s7 + $0x80] sm:$0xff] (!%p351_p3)  ;;  %v624_v47 = vld [vmem:[%s2075_s7 + $0x68] sm:$0xff] (!%p351_p3) }
   0xb   : > { %v631_v21 = vld [vmem:[%s2075_s7 + $0xa0] sm:$0xff] (!%p351_p3)  ;;  %v1558_v51 = vcombine.high (!%p351_p3), %v620_v46, %v624_v47  ;;  %v628_v52 = vld [vmem:[%s2075_s7 + $0x88] sm:$0xff] (!%p351_p3)  ;;  %v1557_v54 = vcombine.low (!%p351_p3), %v620_v46, %v624_v47 }
   0xc   : > { %v1564_v22 = vcombine.high (!%p351_p3), %v627_v20, %v631_v21  ;;  %v1563_v23 = vcombine.low (!%p351_p3), %v627_v20, %v631_v21  ;;  %v635_v24 = vld [vmem:[%s2075_s7 + $0xc0] sm:$0xff] (!%p351_p3)  ;;  %v632_v53 = vld [vmem:[%s2075_s7 + $0xa8] sm:$0xff] (!%p351_p3)  ;;  %v613_v21 = vld [vmem:[%s2075_s7 + $0x10] sm:$0xff] (!%p351_p3) }
   0xd   : > { %v639_v25 = vld [vmem:[%s2075_s7 + $0xe0] sm:$0xff] (!%p351_p3)  ;;  %v1566_v55 = vcombine.high (!%p351_p3), %v628_v52, %v632_v53  ;;  %v636_v56 = vld [vmem:[%s2075_s7 + $0xc8] sm:$0xff] (!%p351_p3)  ;;  %v1565_v58 = vcombine.low (!%p351_p3), %v628_v52, %v632_v53  ;;  %v634_v52 = vld [vmem:[%s2075_s7 + $0xb8] sm:$0xff] (!%p351_p3) }
   0xe   : > { %s2084_s13 = smov (!%p401_p4, %s1687_s13), 1  ;;  %v1572_v26 = vcombine.high %v635_v24, %v639_v25  ;;  %v1571_v27 = vcombine.low %v635_v24, %v639_v25  ;;  %v643_v28 = vld [vmem:[%s2075_s7 + $0x100] sm:$0xff]  ;;  %v640_v57 = vld [vmem:[%s2075_s7 + $0xe8] sm:$0xff]  ;;  %v618_v25 = vld [vmem:[%s2075_s7 + $0x38] sm:$0xff] }
   0xf   : > { %s1532_s17 = sshll.u32 %s2084_s13, 2  ;;  %s1614_s18 = sshll.u32 %s2084_s13, 5  ;;  %v647_v29 = vld [vmem:[%s2075_s7 + $0x120] sm:$0xff]  ;;  %v1574_v59 = vcombine.high %v636_v56, %v640_v57  ;;  %v644_v60 = vld [vmem:[%s2075_s7 + $0x108] sm:$0xff]  ;;  %v1573_v62 = vcombine.low %v636_v56, %v640_v57  ;;  %v637_v57 = vld [vmem:[%s2075_s7 + $0xd0] sm:$0xff] }
  0x10   : > { %s413_s21 = scalar_lea.vmem %s2069_s1, %s1532_s17  ;;  %s418_s24 = scalar_lea.vmem %s2072_s4, %s1614_s18  ;;  %v1580_v30 = vcombine.high %v643_v28, %v647_v29  ;;  %v1579_v31 = vcombine.low %v643_v28, %v647_v29  ;;  %v651_v32 = vld [vmem:[%s2075_s7 + $0x140] sm:$0xff]  ;;  %v648_v61 = vld [vmem:[%s2075_s7 + $0x128] sm:$0xff]  ;;  %v1699_v29 = vmov 0  }
  0x11   : > { %v438_v1 = vld [vmem:[%s413_s21] sm:$0xf]  ;;  %s1613_s25 = sshll.u32 %s2084_s13, 3  ;;  %v1670_v5 = vld [vmem:[%s418_s24 + $0x8] sm:$0xff]   ;;  %v1671_v6 = vld [vmem:[%s418_s24 + $0x10] sm:$0xff]   ;;  %v1582_v63 = vcombine.high %v644_v60, %v648_v61 }
  0x12   : > { %v1669_v2 = vld [vmem:[%s418_s24] sm:$0xff]   ;;  %v450_v3 = vsel %vm448_vm1, %v438_v1, 0  ;;  %s408_s28 = scalar_lea.vmem %s2068_s0, %s1613_s25  ;;  %v1672_v7 = vld [vmem:[%s418_s24 + $0x18] sm:$0xff]   ;;  %v656_v1 = vld [vmem:[%s2075_s7 + $0x168] sm:$0xff]  ;;  %s422_s20 = scalar_lea.vmem %s2078_s10, %s1613_s25 }
  0x13   : > { %1623 = vmatpush3.bf16.msra.mxu0 %v450_v3  ;;  %v1668_v4 = vld [vmem:[%s408_s28] sm:$0xff]   ;;  %1629 = vmatpush3.bf16.msra.mxu1 %v1669_v2  ;;  %v1581_v2 = vcombine.low %v644_v60, %v648_v61  ;;  %v664_v9 = vld [vmem:[%s2075_s7 + $0x1a8] sm:$0xff]  ;;  %v642_v60 = vld [vmem:[%s2075_s7 + $0xf8] sm:$0xff] }
  0x14   : > { %1630 = vmatprep.subr.bf16.mxu1 %v1697_v0  ;;  %996 = vmatprep.subr.bf16.mxu0 %v1548_v12  ;;  %v655_v33 = vld [vmem:[%s2075_s7 + $0x160] sm:$0xff]  ;;  %v668_v15 = vld [vmem:[%s2075_s7 + $0x1c8] sm:$0xff] }
  0x15   : > { %v1588_v34 = vcombine.high %v651_v32, %v655_v33  ;;  %v1587_v35 = vcombine.low %v651_v32, %v655_v33  ;;  %v1538_v36 = vld [vmem:[%s2070_s2] ss:$0 sm:$0xff] }
  0x16   : > { %1625 = vmatmul.mubr.msk.bf16.vlgmr.msra.gmra.mrb[0].mxu0 %vm444_vm2, %v1668_v4  ;;  %v1539_v38 = vld [vmem:[%s2071_s3] ss:$0 sm:$0xff] }
  0x17   : > { %1631 = vmatpush3.bf16.msra.mxu1 %v1670_v5  ;;  %997 = vmatpush1.bf16.msra.mxu0 %v1547_v11  ;;  %v659_v5 = vld [vmem:[%s2075_s7 + $0x180] sm:$0xff] }
  0x18   : > { %1632 = vmatprep.subr.bf16.mxu1 %v1697_v0  ;;  %998 = vmatprep.subr.bf16.mxu0 %v1556_v18  ;;  %v667_v13 = vld [vmem:[%s2075_s7 + $0x1c0] sm:$0xff] }
  0x19   : > { %v671_v14 = vld [vmem:[%s2075_s7 + $0x1e0] sm:$0xff]  ;;  %1028 = vmatprep.mubr.bf16.mxu0 %v1699_v29 }
  0x1a   : > { %v1603_v18 = vcombine.low %v667_v13, %v671_v14  ;;  %v1546_v32 = vld [vmem:[%s2074_s6] ss:$0 sm:$0xff] }
  0x1b   : > { %1633 = vmatpush3.bf16.msra.mxu1 %v1671_v6  ;;  %999 = vmatpush1.bf16.msra.mxu0 %v1555_v19  ;;  %v663_v6 = vld [vmem:[%s2075_s7 + $0x1a0] sm:$0xff] }
  0x1c   : > { %1634 = vmatprep.subr.bf16.mxu1 %v1697_v0  ;;  %1000 = vmatprep.subr.bf16.mxu0 %v1564_v22  ;;  %v652_v0 = vld [vmem:[%s2075_s7 + $0x148] sm:$0xff]  ;;  %v1596_v8 = vcombine.high %v659_v5, %v663_v6  ;;  %v1595_v10 = vcombine.low %v659_v5, %v663_v6  ;;  %v617_v22 = vld [vmem:[%s2075_s7 + $0x30] sm:$0xff] }
  0x1d   : > { %v1590_v3 = vcombine.high %v652_v0, %v656_v1  ;;  %v1589_v4 = vcombine.low %v652_v0, %v656_v1  ;;  %v1552_v24 = vcombine.high %v613_v21, %v617_v22  ;;  %v645_v1 = vld [vmem:[%s2075_s7 + $0x110] sm:$0xff] }
  0x1f   : > { %1635 = vmatpush3.bf16.msra.mxu1 %v1672_v7  ;;  %1001 = vmatpush1.bf16.msra.mxu0 %v1563_v23  ;;  %v660_v7 = vld [vmem:[%s2075_s7 + $0x188] sm:$0xff]  ;;  %v614_v23 = vld [vmem:[%s2075_s7 + $0x18] sm:$0xff] }
  0x20   : > { %1039 = vmatprep.subr.bf16.mxu1 %v1550_v17  ;;  %1002 = vmatprep.subr.bf16.mxu0 %v1572_v26  ;;  %v1597_v11 = vcombine.low %v660_v7, %v664_v9  ;;  %v1598_v12 = vcombine.high %v660_v7, %v664_v9  ;;  %v672_v17 = vld [vmem:[%s2075_s7 + $0x1e8] sm:$0xff]  ;;  %v1551_v26 = vcombine.low %v613_v21, %v617_v22  ;;  %v653_v9 = vld [vmem:[%s2075_s7 + $0x150] sm:$0xff] }
  0x21   : > { %v1605_v19 = vcombine.low %v668_v15, %v672_v17  ;;  %v1606_v20 = vcombine.high %v668_v15, %v672_v17  ;;  %v1554_v28 = vcombine.high %v614_v23, %v618_v25  ;;  %v661_v17 = vld [vmem:[%s2075_s7 + $0x190] sm:$0xff] }
  0x23   : > { %1003 = vmatpush1.bf16.msra.mxu0 %v1571_v27  ;;  %v1553_v27 = vcombine.low %v614_v23, %v618_v25  ;;  %v669_v25 = vld [vmem:[%s2075_s7 + $0x1d0] sm:$0xff] }
  0x24   : > { %1004 = vmatprep.subr.bf16.mxu0 %v1580_v30  ;;  %v1545_v30 = vld [vmem:[%s2073_s5] ss:$0 sm:$0xff] }
  0x27   : > { %1005 = vmatpush1.bf16.msra.mxu0 %v1579_v31 }
  0x28   : > { %1006 = vmatprep.subr.bf16.mxu0 %v1588_v34 }
  0x2b   : > { %1007 = vmatpush1.bf16.msra.mxu0 %v1587_v35 }
  0x2c   : > { %1008 = vmatprep.subr.bf16.mxu0 %v1596_v8 }
  0x2f   : > { %1009 = vmatpush1.bf16.msra.mxu0 %v1595_v10  ;;  %v657_v10 = vld [vmem:[%s2075_s7 + $0x170] sm:$0xff] }
  0x30   : > { %v1592_v15 = vcombine.high %v653_v9, %v657_v10  ;;  %v1591_v21 = vcombine.low %v653_v9, %v657_v10 }
  0xe9   : > { %v486_v37 = vpop.f32.mrb[0].mxu0 }
  0xea   : > { %v500_v39 = vmul.f32 %v1538_v36, %v486_v37  ;;  %v1626_v40 = vpop.f32.mrb[1].mxu0 }
  0xeb   : > { %v489_v41 = vpop.f32.mrb[2].mxu0  ;;  %v621_v40 = vld [vmem:[%s2075_s7 + $0x50] sm:$0xff] }
  0xec   : > { %v509_v42 = vadd.f32 %v1539_v38, %v500_v39  ;;  %v501_v43 = vmul.f32 %v1538_v36, %v489_v41  ;;  %v1627_v44 = vpop.f32.mrb[3].mxu0  ;;  %v625_v41 = vld [vmem:[%s2075_s7 + $0x70] sm:$0xff] }
  0xed   : > { %v1560_v47 = vcombine.high %v621_v40, %v625_v41  ;;  %v1559_v53 = vcombine.low %v621_v40, %v625_v41 }
  0xee   : > { %v510_v45 = vadd.f32 %v1539_v38, %v501_v43  ;;  %v511_v48 = vmax.f32 %v509_v42, 0.0  ;;  %v622_v42 = vld [vmem:[%s2075_s7 + $0x58] sm:$0xff] }
  0xef   : > { %v626_v43 = vld [vmem:[%s2075_s7 + $0x78] sm:$0xff] }
  0xf0   : > { %v512_v49 = vmax.f32 %v510_v45, 0.0 }
  0xf2   : > { %v521_v50 = vpack.c.bf16 %v512_v49, %v511_v48  ;;  %v1562_v48 = vcombine.high %v622_v42, %v626_v43  ;;  %v629_v49 = vld [vmem:[%s2075_s7 + $0x90] sm:$0xff] }
  0xf4   : > { %1637 = vmatmul.mubr.msk.bf16.vlgmr.msra.gmra.mrb[0].mxu1 %vm546_vm3, %v521_v50  ;;  %v633_v50 = vld [vmem:[%s2075_s7 + $0xb0] sm:$0xff] }
  0xf5   : > { %1040 = vmatpush1.bf16.msra.mxu1 %v1549_v16  ;;  %v1604_v16 = vcombine.high %v667_v13, %v671_v14  ;;  %1071 = vmatprep.mubr.bf16.mxu1 %v1699_v29  ;;  %v1567_v61 = vcombine.low %v629_v49, %v633_v50 }
  0xf6   : > { %1041 = vmatprep.subr.bf16.mxu1 %v1558_v51  ;;  %v630_v51 = vld [vmem:[%s2075_s7 + $0x98] sm:$0xff] }
  0xf7   : > { %1010 = vmatprep.subr.bf16.mxu0 %v1604_v16  ;;  %v1570_v56 = vcombine.high %v630_v51, %v634_v52 }
  0xf8   : > { %1011 = vmatpush1.bf16.msra.mxu0 %v1603_v18  ;;  %v665_v18 = vld [vmem:[%s2075_s7 + $0x1b0] sm:$0xff] }
  0xf9   : > { %1042 = vmatpush1.bf16.msra.mxu1 %v1557_v54  ;;  %1082 = vmatprep.subr.bf16.mxu0 %v1552_v24  ;;  %v1561_v54 = vcombine.low %v622_v42, %v626_v43  ;;  %v1600_v23 = vcombine.high %v661_v17, %v665_v18 }
  0xfa   : > { %1043 = vmatprep.subr.bf16.mxu1 %v1566_v55  ;;  %v1568_v55 = vcombine.high %v629_v49, %v633_v50 }
  0xfd   : > { %1044 = vmatpush1.bf16.msra.mxu1 %v1565_v58  ;;  %v641_v58 = vld [vmem:[%s2075_s7 + $0xf0] sm:$0xff] }
  0xfe   : > { %1045 = vmatprep.subr.bf16.mxu1 %v1574_v59  ;;  %v638_v59 = vld [vmem:[%s2075_s7 + $0xd8] sm:$0xff]  ;;  %v1575_v5 = vcombine.low %v637_v57, %v641_v58 }
  0xff   : > { %v1578_v0 = vcombine.high %v638_v59, %v642_v60  ;;  %v1577_v6 = vcombine.low %v638_v59, %v642_v60 }
 0x101   : > { %1046 = vmatpush1.bf16.msra.mxu1 %v1573_v62  ;;  %v1569_v62 = vcombine.low %v630_v51, %v634_v52 }
 0x102   : > { %1047 = vmatprep.subr.bf16.mxu1 %v1582_v63  ;;  %v1576_v63 = vcombine.high %v637_v57, %v641_v58 }
 0x105   : > { %1048 = vmatpush1.bf16.msra.mxu1 %v1581_v2  ;;  %v649_v2 = vld [vmem:[%s2075_s7 + $0x130] sm:$0xff] }
 0x106   : > { %1049 = vmatprep.subr.bf16.mxu1 %v1590_v3  ;;  %v646_v3 = vld [vmem:[%s2075_s7 + $0x118] sm:$0xff]  ;;  %v1584_v7 = vcombine.high %v645_v1, %v649_v2  ;;  %v1583_v13 = vcombine.low %v645_v1, %v649_v2 }
 0x109   : > { %1050 = vmatpush1.bf16.msra.mxu1 %v1589_v4  ;;  %v650_v4 = vld [vmem:[%s2075_s7 + $0x138] sm:$0xff] }
 0x10a   : > { %1051 = vmatprep.subr.bf16.mxu1 %v1598_v12  ;;  %v1586_v8 = vcombine.high %v646_v3, %v650_v4  ;;  %v658_v12 = vld [vmem:[%s2075_s7 + $0x178] sm:$0xff]  ;;  %v1585_v14 = vcombine.low %v646_v3, %v650_v4 }
 0x10d   : > { %1052 = vmatpush1.bf16.msra.mxu1 %v1597_v11  ;;  %v654_v11 = vld [vmem:[%s2075_s7 + $0x158] sm:$0xff] }
 0x10e   : > { %1053 = vmatprep.subr.bf16.mxu1 %v1606_v20  ;;  %v1594_v16 = vcombine.high %v654_v11, %v658_v12  ;;  %v666_v20 = vld [vmem:[%s2075_s7 + $0x1b8] sm:$0xff]  ;;  %v1593_v22 = vcombine.low %v654_v11, %v658_v12 }
 0x111   : > { %1054 = vmatpush1.bf16.msra.mxu1 %v1605_v19  ;;  %v662_v19 = vld [vmem:[%s2075_s7 + $0x198] sm:$0xff] }
 0x112   : > { %1125 = vmatprep.subr.bf16.mxu1 %v1554_v28  ;;  %v1602_v24 = vcombine.high %v662_v19, %v666_v20  ;;  %v674_v28 = vld [vmem:[%s2075_s7 + $0x1f8] sm:$0xff] }
 0x1c7   : > { %v584_v31 = vpop.f32.mrb[0].mxu1 }
 0x1c8   : > { %v598_v33 = vmul.f32 %v1545_v30, %v584_v31  ;;  %v1638_v34 = vpop.f32.mrb[1].mxu1 }
 0x1c9   : > { %v587_v35 = vpop.f32.mrb[2].mxu1 }
 0x1ca   : > { %v607_v36 = vadd.f32 %v1546_v32, %v598_v33  ;;  %v599_v37 = vmul.f32 %v1545_v30, %v587_v35  ;;  %v1639_v38 = vpop.f32.mrb[3].mxu1  ;;  %v1601_v30 = vcombine.low %v662_v19, %v666_v20  ;;  %v1170_v35 = vlaneseq }
 0x1cc   : > { %v608_v39 = vadd.f32 %v1546_v32, %v599_v37  ;;  %v609_v44 = vmax.f32 %v607_v36, 0.0  ;;  %v2000_v36 = vshrl.u32 %v1170_v35, 7 }
 0x1ce   : > { %v610_v45 = vmax.f32 %v608_v39, 0.0  ;;  %v1172_v37 = vsub.s32 0, %v2000_v36  ;;  %v1180_v38 = vsub.s32 2, %v2000_v36  ;;  %v2007_v39 = vld [vmem:[%s2076_s8] sm:$0xff]  ;;  %v1176_v40 = vsub.s32 1, %v2000_v36 }
 0x1cf   : > { %v1184_v41 = vsub.s32 3, %v2000_v36 }
 0x1d0   : > { %v1922_v46 = vpack.c.bf16 %v610_v45, %v609_v44  ;;  %v1173_v42 = vrot.slane %v2007_v39, %v1172_v37  ;;  %v1181_v43 = vrot.slane %v2007_v39, %v1180_v38  ;;  %v2016_v44 = vld [vmem:[%s2077_s9] sm:$0xff]  ;;  %v1177_v45 = vrot.slane %v2007_v39, %v1176_v40 }
 0x1d1   : > { %v1231_v50 = vrot.slane %v2016_v44, %v1172_v37  ;;  %v1239_v52 = vrot.slane %v2016_v44, %v1180_v38  ;;  %v1243_v58 = vrot.slane %v2016_v44, %v1184_v41 }
 0x1d2   : > { %1029 = vmatmul.mubr.bf16.vlgmr.msra.gmra.mrb[4].mxu0 %v1922_v46  ;;  %1072 = vmatmul.mubr.bf16.vlgmr.msra.gmra.mrb[4].mxu1 %v1922_v46 }
 0x1d3   : > { %1083 = vmatpush1.bf16.msra.mxu0 %v1551_v26  ;;  %1126 = vmatpush1.bf16.msra.mxu1 %v1553_v27  ;;  %v673_v26 = vld [vmem:[%s2075_s7 + $0x1f0] sm:$0xff]  ;;  %v670_v27 = vld [vmem:[%s2075_s7 + $0x1d8] sm:$0xff] }
 0x1d4   : > { %1084 = vmatprep.subr.bf16.mxu0 %v1560_v47  ;;  %1127 = vmatprep.subr.bf16.mxu1 %v1562_v48  ;;  %v1608_v31 = vcombine.high %v669_v25, %v673_v26  ;;  %v1610_v32 = vcombine.high %v670_v27, %v674_v28  ;;  %v1607_v33 = vcombine.low %v669_v25, %v673_v26 }
 0x1d5   : > { %1114 = vmatprep.mubr.bf16.mxu0 %v1699_v29  ;;  %1157 = vmatprep.mubr.bf16.mxu1 %v1699_v29  ;;  %v1599_v29 = vcombine.low %v661_v17, %v665_v18  ;;  %v1609_v34 = vcombine.low %v670_v27, %v674_v28 }
 0x1d7   : > { %1085 = vmatpush1.bf16.msra.mxu0 %v1559_v53  ;;  %1128 = vmatpush1.bf16.msra.mxu1 %v1561_v54 }
 0x1d8   : > { %1086 = vmatprep.subr.bf16.mxu0 %v1568_v55  ;;  %1129 = vmatprep.subr.bf16.mxu1 %v1570_v56  ;;  %v1235_v56 = vrot.slane %v2016_v44, %v1176_v40 }
 0x1db   : > { %1087 = vmatpush1.bf16.msra.mxu0 %v1567_v61  ;;  %1130 = vmatpush1.bf16.msra.mxu1 %v1569_v62 }
 0x1dc   : > { %1088 = vmatprep.subr.bf16.mxu0 %v1576_v63  ;;  %1131 = vmatprep.subr.bf16.mxu1 %v1578_v0 }
 0x1df   : > { %1089 = vmatpush1.bf16.msra.mxu0 %v1575_v5  ;;  %1132 = vmatpush1.bf16.msra.mxu1 %v1577_v6 }
 0x1e0   : > { %1090 = vmatprep.subr.bf16.mxu0 %v1584_v7  ;;  %1133 = vmatprep.subr.bf16.mxu1 %v1586_v8 }
 0x1e3   : > { %1091 = vmatpush1.bf16.msra.mxu0 %v1583_v13  ;;  %1134 = vmatpush1.bf16.msra.mxu1 %v1585_v14 }
 0x1e4   : > { %1092 = vmatprep.subr.bf16.mxu0 %v1592_v15  ;;  %1135 = vmatprep.subr.bf16.mxu1 %v1594_v16 }
 0x1e7   : > { %1093 = vmatpush1.bf16.msra.mxu0 %v1591_v21  ;;  %1136 = vmatpush1.bf16.msra.mxu1 %v1593_v22  ;;  %v1700_v22 = vmov 1966171168  }
 0x1e8   : > { %1094 = vmatprep.subr.bf16.mxu0 %v1600_v23  ;;  %1137 = vmatprep.subr.bf16.mxu1 %v1602_v24  ;;  %v1388_v23 = vunpack.c.l.s4 %v1700_v22 }
 0x1eb   : > { %1095 = vmatpush1.bf16.msra.mxu0 %v1599_v29  ;;  %1138 = vmatpush1.bf16.msra.mxu1 %v1601_v30 }
 0x1ec   : > { %1096 = vmatprep.subr.bf16.mxu0 %v1608_v31  ;;  %1139 = vmatprep.subr.bf16.mxu1 %v1610_v32  ;;  %v1389_v32 = vunpack.c.0.s8 %v1388_v23 }
 0x1ef   : > { %1097 = vmatpush1.bf16.msra.mxu0 %v1607_v33  ;;  %1140 = vmatpush1.bf16.msra.mxu1 %v1609_v34 }
 0x1f2   : > { %1115 = vmatmul.mubr.bf16.vlgmr.msra.gmra.mrb[8].mxu0 %v1922_v46  ;;  %1158 = vmatmul.mubr.bf16.vlgmr.msra.gmra.mrb[8].mxu1 %v1922_v46  ;;  %v1185_v46 = vrot.slane %v2007_v39, %v1184_v41 }
 0x2a5   : > { %v1030_v47 = vpop.f32.mrb[4].mxu0  ;;  %v1073_v48 = vpop.f32.mrb[4].mxu1 }
 0x2a6   : > { %v1210_v49 = vmul.f32 %v1173_v42, %v1030_v47  ;;  %v1212_v51 = vmul.f32 %v1181_v43, %v1073_v48  ;;  %v1032_v53 = vpop.f32.mrb[5].mxu0  ;;  %v1075_v54 = vpop.f32.mrb[5].mxu1 }
 0x2a7   : > { %v1211_v55 = vmul.f32 %v1177_v45, %v1032_v53  ;;  %v1213_v57 = vmul.f32 %v1185_v46, %v1075_v54  ;;  %v1034_v59 = vpop.f32.mrb[6].mxu0  ;;  %v1077_v60 = vpop.f32.mrb[6].mxu1  ;;  %v1192_v53 = vsub.s32 5, %v2000_v36  ;;  %v1200_v54 = vsub.s32 7, %v2000_v36 }
 0x2a8   : > { %v1218_v61 = vmul.f32 %v1173_v42, %v1034_v59  ;;  %v1220_v62 = vmul.f32 %v1181_v43, %v1077_v60  ;;  %v1036_v63 = vpop.f32.mrb[7].mxu0  ;;  %v1079_v0 = vpop.f32.mrb[7].mxu1  ;;  %v1268_v3 = vadd.f32 %v1231_v50, %v1210_v49  ;;  %v1270_v4 = vadd.f32 %v1239_v52, %v1212_v51 }
 0x2a9   : > { %v1219_v1 = vmul.f32 %v1177_v45, %v1036_v63  ;;  %v1221_v2 = vmul.f32 %v1185_v46, %v1079_v0  ;;  %v1269_v7 = vadd.f32 %v1235_v56, %v1211_v55  ;;  %v1271_v8 = vadd.f32 %v1243_v58, %v1213_v57 }
 0x2aa   : > { %v1276_v5 = vadd.f32 %v1231_v50, %v1218_v61  ;;  %v1278_v6 = vadd.f32 %v1239_v52, %v1220_v62  ;;  %v2025_v43 = vsub.s32 %v1389_v32, %v2000_v36  ;;  %v1188_v50 = vsub.s32 4, %v2000_v36 }
 0x2ab   : > { %v1277_v9 = vadd.f32 %v1235_v56, %v1219_v1  ;;  %v1279_v10 = vadd.f32 %v1243_v58, %v1221_v2  ;;  %v1196_v51 = vsub.s32 6, %v2000_v36  ;;  %v1193_v57 = vrot.slane %v2007_v39, %v1192_v53 }
 0x2ac   : > { %v1284_v11 = vmax.f32 %v1268_v3, %v1276_v5  ;;  %v1286_v12 = vmax.f32 %v1270_v4, %v1278_v6  ;;  %v1189_v55 = vrot.slane %v2007_v39, %v1188_v50  ;;  %v1201_v58 = vrot.slane %v2007_v39, %v1200_v54 }
 0x2ad   : > { %v1285_v13 = vmax.f32 %v1269_v7, %v1277_v9  ;;  %v1287_v14 = vmax.f32 %v1271_v8, %v1279_v10  ;;  %v1197_v56 = vrot.slane %v2007_v39, %v1196_v51  ;;  %v1247_v62 = vrot.slane %v2016_v44, %v1188_v50 }
 0x2ae   : > { %v1327_v15 = vrot.slane %v1284_v11, 4  ;;  %v1339_v16 = vrot.slane %v1286_v12, 4  ;;  %v1255_v0 = vrot.slane %v2016_v44, %v1196_v51  ;;  %v1251_v36 = vrot.slane %v2016_v44, %v1192_v53 }
 0x2af   : > { %v1333_v17 = vrot.slane %v1285_v13, 4  ;;  %v1345_v18 = vrot.slane %v1287_v14, 4  ;;  %v1259_v5 = vrot.slane %v2016_v44, %v1200_v54 }
 0x2b0   : > { %v1328_v19 = vmax.f32 %v1284_v11, %v1327_v15  ;;  %v1340_v20 = vmax.f32 %v1286_v12, %v1339_v16 }
 0x2b1   : > { %v1334_v21 = vmax.f32 %v1285_v13, %v1333_v17  ;;  %v1346_v24 = vmax.f32 %v1287_v14, %v1345_v18 }
 0x2b2   : > { %v1329_v25 = vrot.slane %v1328_v19, 2  ;;  %v1341_v26 = vrot.slane %v1340_v20, 2 }
 0x2b3   : > { %v1335_v27 = vrot.slane %v1334_v21, 2  ;;  %v1347_v28 = vrot.slane %v1346_v24, 2 }
 0x2b4   : > { %v1330_v29 = vmax.f32 %v1328_v19, %v1329_v25  ;;  %v1342_v30 = vmax.f32 %v1340_v20, %v1341_v26 }
 0x2b5   : > { %v1336_v31 = vmax.f32 %v1334_v21, %v1335_v27  ;;  %v1348_v33 = vmax.f32 %v1346_v24, %v1347_v28 }
 0x2b6   : > { %v1331_v34 = vrot.slane %v1330_v29, 1  ;;  %v1343_v35 = vrot.slane %v1342_v30, 1 }
 0x2b7   : > { %v1337_v37 = vrot.slane %v1336_v31, 1  ;;  %v1349_v38 = vrot.slane %v1348_v33, 1 }
 0x2b8   : > { %v1332_v40 = vmax.f32 %v1330_v29, %v1331_v34  ;;  %v1344_v41 = vmax.f32 %v1342_v30, %v1343_v35 }
 0x2b9   : > { %v1338_v42 = vmax.f32 %v1336_v31, %v1337_v37  ;;  %v1350_v45 = vmax.f32 %v1348_v33, %v1349_v38 }
 0x2bb   : > { %v1383_v46 = vcombine.low %v1332_v40, %v1338_v42  ;;  %v1384_v47 = vcombine.low %v1344_v41, %v1350_v45 }
 0x2bd   : > { %v2028_v48 = vrot.slane %v1383_v46, %v2025_v43  ;;  %v2031_v49 = vrot.slane %v1384_v47, %v2025_v43 }
 0x2bf   : > { %v1415_v52 = vcombine.low %v2028_v48, %v2031_v49 }
 0x2c5   : > { %v1116_v59 = vpop.f32.mrb[8].mxu0  ;;  %v1159_v60 = vpop.f32.mrb[8].mxu1 }
 0x2c6   : > { %v1214_v61 = vmul.f32 %v1189_v55, %v1116_v59  ;;  %v1216_v63 = vmul.f32 %v1197_v56, %v1159_v60  ;;  %v1118_v1 = vpop.f32.mrb[9].mxu0  ;;  %v1161_v2 = vpop.f32.mrb[9].mxu1  ;;  %v1423_v60 = vrot.slane %v1415_v52, %v2025_v43 }
 0x2c7   : > { %v1215_v3 = vmul.f32 %v1193_v57, %v1118_v1  ;;  %v1217_v4 = vmul.f32 %v1201_v58, %v1161_v2  ;;  %v1120_v6 = vpop.f32.mrb[10].mxu0  ;;  %v1163_v7 = vpop.f32.mrb[10].mxu1 }
 0x2c8   : > { %v1222_v8 = vmul.f32 %v1189_v55, %v1120_v6  ;;  %v1224_v39 = vmul.f32 %v1197_v56, %v1163_v7  ;;  %v1122_v9 = vpop.f32.mrb[11].mxu0  ;;  %v1165_v10 = vpop.f32.mrb[11].mxu1  ;;  %v1272_v13 = vadd.f32 %v1247_v62, %v1214_v61  ;;  %v1274_v14 = vadd.f32 %v1255_v0, %v1216_v63 }
 0x2c9   : > { %v1223_v11 = vmul.f32 %v1193_v57, %v1122_v9  ;;  %v1225_v12 = vmul.f32 %v1201_v58, %v1165_v10  ;;  %v1273_v17 = vadd.f32 %v1251_v36, %v1215_v3  ;;  %v1275_v18 = vadd.f32 %v1259_v5, %v1217_v4 }
 0x2ca   : > { %v1280_v15 = vadd.f32 %v1247_v62, %v1222_v8  ;;  %v1282_v16 = vadd.f32 %v1255_v0, %v1224_v39 }
 0x2cb   : > { %v1281_v19 = vadd.f32 %v1251_v36, %v1223_v11  ;;  %v1283_v20 = vadd.f32 %v1259_v5, %v1225_v12 }
 0x2cc   : > { %v1288_v21 = vmax.f32 %v1272_v13, %v1280_v15  ;;  %v1290_v22 = vmax.f32 %v1274_v14, %v1282_v16 }
 0x2cd   : > { %v1289_v23 = vmax.f32 %v1273_v17, %v1281_v19  ;;  %v1291_v44 = vmax.f32 %v1275_v18, %v1283_v20 }
 0x2ce   : > { %v1351_v24 = vrot.slane %v1288_v21, 4  ;;  %v1363_v25 = vrot.slane %v1290_v22, 4 }
 0x2cf   : > { %v1357_v26 = vrot.slane %v1289_v23, 4  ;;  %v1369_v27 = vrot.slane %v1291_v44, 4 }
 0x2d0   : > { %v1352_v28 = vmax.f32 %v1288_v21, %v1351_v24  ;;  %v1364_v29 = vmax.f32 %v1290_v22, %v1363_v25 }
 0x2d1   : > { %v1358_v30 = vmax.f32 %v1289_v23, %v1357_v26  ;;  %v1370_v31 = vmax.f32 %v1291_v44, %v1369_v27 }
 0x2d2   : > { %v1353_v32 = vrot.slane %v1352_v28, 2  ;;  %v1365_v33 = vrot.slane %v1364_v29, 2 }
 0x2d3   : > { %v1359_v34 = vrot.slane %v1358_v30, 2  ;;  %v1371_v35 = vrot.slane %v1370_v31, 2 }
 0x2d4   : > { %v1354_v37 = vmax.f32 %v1352_v28, %v1353_v32  ;;  %v1366_v38 = vmax.f32 %v1364_v29, %v1365_v33 }
 0x2d5   : > { %v1360_v40 = vmax.f32 %v1358_v30, %v1359_v34  ;;  %v1372_v41 = vmax.f32 %v1370_v31, %v1371_v35 }
 0x2d6   : > { %v1355_v42 = vrot.slane %v1354_v37, 1  ;;  %v1367_v45 = vrot.slane %v1366_v38, 1 }
 0x2d7   : > { %v1361_v46 = vrot.slane %v1360_v40, 1  ;;  %v1373_v47 = vrot.slane %v1372_v41, 1 }
 0x2d8   : > { %v1356_v50 = vmax.f32 %v1354_v37, %v1355_v42  ;;  %v1368_v51 = vmax.f32 %v1366_v38, %v1367_v45 }
 0x2d9   : > { %v1362_v53 = vmax.f32 %v1360_v40, %v1361_v46  ;;  %v1374_v54 = vmax.f32 %v1372_v41, %v1373_v47 }
 0x2db   : > { %v1385_v55 = vcombine.low %v1356_v50, %v1362_v53  ;;  %v1386_v56 = vcombine.low %v1368_v51, %v1374_v54 }
 0x2dd   : > { %v1407_v57 = vrot.slane %v1385_v55, %v2025_v43  ;;  %v1414_v58 = vrot.slane %v1386_v56, %v2025_v43 }
 0x2df   : > { %v1416_v59 = vcombine.low %v1407_v57, %v1414_v58 }
 0x2e1   : > { %v1430_v61 = vrot.slane %v1416_v59, %v2025_v43 }
 0x2e3   : > { %v1431_v62 = vcombine.low %v1423_v60, %v1430_v61 }
 0x2e5   : > { %1433 = vst [vmem:[%s422_s20] sm:$0xff] %v1431_v62 }
 0x2e6 PF: > { %s20_s15 = sadd.s32 1, %s1695_s15   ;;  %s2079_s13 = smov %s1691_s14 }
 0x2e7   : > { %p17_p5 = scmp.ge.s32.totalorder %s20_s15, 4   ;;  %s2080_s14 = smov %s2082_s16 }
 0x2e9   :  { %19 = sbr.rel (!%p17_p5) target bundleno = 2 (0x2), region = 104 }

// kernel: pointnet_forward.11
= control target key start
LH: loop header
LB: loop body
LE: loop exit
PB: predicated region body
PF: predicated region fallthrough
CT: control target
= control target key end

     0   :  { %s4753_s1 = inlined_call_operand.vmem [shape: bf16[1024,512], index: 1, kind: input, shape index: {}]   ;;  %s4754_s0 = inlined_call_operand.vmem [shape: bf16[8,1024], index: 0, kind: input, shape index: {}]   ;;  %s4755_s4 = inlined_call_operand.vmem [shape: bf16[512,256], index: 4, kind: input, shape index: {}]   ;;  %s4756_s2 = inlined_call_operand.vmem [shape: f32[1,512], index: 2, kind: input, shape index: {}]   ;;  %s4757_s3 = inlined_call_operand.vmem [shape: f32[1,512], index: 3, kind: input, shape index: {}]   ;;  %s4758_s7 = inlined_call_operand.vmem [shape: bf16[256,128], index: 7, kind: input, shape index: {}]   ;;  %s4759_s5 = inlined_call_operand.vmem [shape: f32[1,256], index: 5, kind: input, shape index: {}]   ;;  %s4760_s6 = inlined_call_operand.vmem [shape: f32[1,256], index: 6, kind: input, shape index: {}]   ;;  %s4761_s8 = inlined_call_operand.vmem [shape: f32[1,128], index: 8, kind: input, shape index: {}]   ;;  %s4762_s9 = inlined_call_operand.vmem [shape: f32[1,128], index: 9, kind: input, shape index: {}]   ;;  %s4763_s10 = inlined_call_operand.vmem [shape: f32[8,128], index: 10, kind: output, shape index: {}]  }
   0x1   :  { %v3073_v0 = vld [vmem:[%s4753_s1 + $0x4] ss:$16 sps:$4 sm:$0xff]   ;;  %v3077_v2 = vld [vmem:[%s4753_s1] ss:$16 sps:$4 sm:$0xff]   ;;  %v37_v48 = vld [vmem:[%s4754_s0 + $0x8] sm:$0xff] }
   0x2   :  { %v3075_v1 = vld [vmem:[%s4753_s1 + $0x204] ss:$16 sps:$4 sm:$0xff]   ;;  %1604 = vmatprep.subr.bf16.mxu1 %v3073_v0  ;;  %v3078_v3 = vld [vmem:[%s4753_s1 + $0x200] ss:$16 sps:$4 sm:$0xff]   ;;  %v3784_v51 = vcombine.high %v37_v48, %v37_v48 }
   0x3   :  { %1645 = vmatprep.subr.bf16.mxu0 %v3075_v1  ;;  %v3079_v4 = vld [vmem:[%s4753_s1 + $0x24] ss:$16 sps:$4 sm:$0xff]   ;;  %1605 = vmatpush1.bf16.msra.mxu1 %v3077_v2  ;;  %v3083_v6 = vld [vmem:[%s4753_s1 + $0x20] ss:$16 sps:$4 sm:$0xff]  }
   0x4   :  { %1646 = vmatpush1.bf16.msra.mxu0 %v3078_v3  ;;  %v3081_v5 = vld [vmem:[%s4753_s1 + $0x224] ss:$16 sps:$4 sm:$0xff]   ;;  %1606 = vmatprep.subr.bf16.mxu1 %v3079_v4  ;;  %v3084_v7 = vld [vmem:[%s4753_s1 + $0x220] ss:$16 sps:$4 sm:$0xff]  }
   0x5   :  { %1647 = vmatprep.subr.bf16.mxu0 %v3081_v5  ;;  %v3085_v8 = vld [vmem:[%s4753_s1 + $0x44] ss:$16 sps:$4 sm:$0xff]   ;;  %v3089_v10 = vld [vmem:[%s4753_s1 + $0x40] ss:$16 sps:$4 sm:$0xff]   ;;  %1677 = vmatprep.mubr.bf16.mxu0 %v3784_v51  ;;  %v3178_v5 = vld [vmem:[%s4753_s1 + $0xc] ss:$16 sps:$4 sm:$0xff]  }
   0x6   :  { %v3087_v9 = vld [vmem:[%s4753_s1 + $0x244] ss:$16 sps:$4 sm:$0xff]   ;;  %v3090_v11 = vld [vmem:[%s4753_s1 + $0x240] ss:$16 sps:$4 sm:$0xff]  }
   0x7   :  { %1607 = vmatpush1.bf16.msra.mxu1 %v3083_v6  ;;  %v3091_v12 = vld [vmem:[%s4753_s1 + $0x64] ss:$16 sps:$4 sm:$0xff]   ;;  %v3095_v14 = vld [vmem:[%s4753_s1 + $0x60] ss:$16 sps:$4 sm:$0xff]  }
   0x8   :  { %1648 = vmatpush1.bf16.msra.mxu0 %v3084_v7  ;;  %1608 = vmatprep.subr.bf16.mxu1 %v3085_v8  ;;  %v3093_v13 = vld [vmem:[%s4753_s1 + $0x264] ss:$16 sps:$4 sm:$0xff]   ;;  %v3096_v15 = vld [vmem:[%s4753_s1 + $0x260] ss:$16 sps:$4 sm:$0xff]   ;;  %v3844_v7 = vcombine.low %v37_v48, %v37_v48 }
   0x9   :  { %1649 = vmatprep.subr.bf16.mxu0 %v3087_v9  ;;  %v3097_v16 = vld [vmem:[%s4753_s1 + $0x84] ss:$16 sps:$4 sm:$0xff]   ;;  %v3101_v18 = vld [vmem:[%s4753_s1 + $0x80] ss:$16 sps:$4 sm:$0xff]   ;;  %v3176_v9 = vld [vmem:[%s4753_s1 + $0x8] ss:$16 sps:$4 sm:$0xff]  }
   0xa   :  { %v3099_v17 = vld [vmem:[%s4753_s1 + $0x284] ss:$16 sps:$4 sm:$0xff]   ;;  %v3102_v19 = vld [vmem:[%s4753_s1 + $0x280] ss:$16 sps:$4 sm:$0xff]  }
   0xb   :  { %1609 = vmatpush1.bf16.msra.mxu1 %v3089_v10  ;;  %v3103_v20 = vld [vmem:[%s4753_s1 + $0xa4] ss:$16 sps:$4 sm:$0xff]   ;;  %v3107_v22 = vld [vmem:[%s4753_s1 + $0xa0] ss:$16 sps:$4 sm:$0xff]  }
   0xc   :  { %1650 = vmatpush1.bf16.msra.mxu0 %v3090_v11  ;;  %1610 = vmatprep.subr.bf16.mxu1 %v3091_v12  ;;  %v3105_v21 = vld [vmem:[%s4753_s1 + $0x2a4] ss:$16 sps:$4 sm:$0xff]   ;;  %v3108_v23 = vld [vmem:[%s4753_s1 + $0x2a0] ss:$16 sps:$4 sm:$0xff]   ;;  %v3184_v11 = vld [vmem:[%s4753_s1 + $0x2c] ss:$16 sps:$4 sm:$0xff]  }
   0xd   :  { %1651 = vmatprep.subr.bf16.mxu0 %v3093_v13  ;;  %v3109_v24 = vld [vmem:[%s4753_s1 + $0xc4] ss:$16 sps:$4 sm:$0xff]   ;;  %v3113_v26 = vld [vmem:[%s4753_s1 + $0xc0] ss:$16 sps:$4 sm:$0xff]   ;;  %v3182_v13 = vld [vmem:[%s4753_s1 + $0x28] ss:$16 sps:$4 sm:$0xff]  }
   0xe   :  { %v3111_v25 = vld [vmem:[%s4753_s1 + $0x2c4] ss:$16 sps:$4 sm:$0xff]   ;;  %v3114_v27 = vld [vmem:[%s4753_s1 + $0x2c0] ss:$16 sps:$4 sm:$0xff]  }
   0xf   :  { %1611 = vmatpush1.bf16.msra.mxu1 %v3095_v14  ;;  %v3115_v28 = vld [vmem:[%s4753_s1 + $0xe4] ss:$16 sps:$4 sm:$0xff]   ;;  %v3119_v30 = vld [vmem:[%s4753_s1 + $0xe0] ss:$16 sps:$4 sm:$0xff]  }
  0x10   :  { %1652 = vmatpush1.bf16.msra.mxu0 %v3096_v15  ;;  %1612 = vmatprep.subr.bf16.mxu1 %v3097_v16  ;;  %v3117_v29 = vld [vmem:[%s4753_s1 + $0x2e4] ss:$16 sps:$4 sm:$0xff]   ;;  %v3120_v31 = vld [vmem:[%s4753_s1 + $0x2e0] ss:$16 sps:$4 sm:$0xff]   ;;  %v3190_v15 = vld [vmem:[%s4753_s1 + $0x4c] ss:$16 sps:$4 sm:$0xff]  }
  0x11   :  { %1653 = vmatprep.subr.bf16.mxu0 %v3099_v17  ;;  %v3121_v32 = vld [vmem:[%s4753_s1 + $0x104] ss:$16 sps:$4 sm:$0xff]   ;;  %v3125_v34 = vld [vmem:[%s4753_s1 + $0x100] ss:$16 sps:$4 sm:$0xff]   ;;  %v3188_v17 = vld [vmem:[%s4753_s1 + $0x48] ss:$16 sps:$4 sm:$0xff]  }
  0x12   :  { %v3123_v33 = vld [vmem:[%s4753_s1 + $0x304] ss:$16 sps:$4 sm:$0xff]   ;;  %v3126_v35 = vld [vmem:[%s4753_s1 + $0x300] ss:$16 sps:$4 sm:$0xff]  }
  0x13   :  { %1613 = vmatpush1.bf16.msra.mxu1 %v3101_v18  ;;  %v3127_v36 = vld [vmem:[%s4753_s1 + $0x124] ss:$16 sps:$4 sm:$0xff]   ;;  %v3131_v38 = vld [vmem:[%s4753_s1 + $0x120] ss:$16 sps:$4 sm:$0xff]  }
  0x14   :  { %1654 = vmatpush1.bf16.msra.mxu0 %v3102_v19  ;;  %1614 = vmatprep.subr.bf16.mxu1 %v3103_v20  ;;  %v3129_v37 = vld [vmem:[%s4753_s1 + $0x324] ss:$16 sps:$4 sm:$0xff]   ;;  %v3132_v39 = vld [vmem:[%s4753_s1 + $0x320] ss:$16 sps:$4 sm:$0xff]   ;;  %v3196_v19 = vld [vmem:[%s4753_s1 + $0x6c] ss:$16 sps:$4 sm:$0xff]  }
  0x15   :  { %1655 = vmatprep.subr.bf16.mxu0 %v3105_v21  ;;  %v3133_v40 = vld [vmem:[%s4753_s1 + $0x144] ss:$16 sps:$4 sm:$0xff]   ;;  %v3137_v42 = vld [vmem:[%s4753_s1 + $0x140] ss:$16 sps:$4 sm:$0xff]   ;;  %v3194_v21 = vld [vmem:[%s4753_s1 + $0x68] ss:$16 sps:$4 sm:$0xff]  }
  0x16   :  { %v3135_v41 = vld [vmem:[%s4753_s1 + $0x344] ss:$16 sps:$4 sm:$0xff]   ;;  %v3138_v43 = vld [vmem:[%s4753_s1 + $0x340] ss:$16 sps:$4 sm:$0xff]  }
  0x17   :  { %1615 = vmatpush1.bf16.msra.mxu1 %v3107_v22  ;;  %v3139_v44 = vld [vmem:[%s4753_s1 + $0x164] ss:$16 sps:$4 sm:$0xff]   ;;  %v3143_v49 = vld [vmem:[%s4753_s1 + $0x160] ss:$16 sps:$4 sm:$0xff]  }
  0x18   :  { %1656 = vmatpush1.bf16.msra.mxu0 %v3108_v23  ;;  %1616 = vmatprep.subr.bf16.mxu1 %v3109_v24  ;;  %v3141_v45 = vld [vmem:[%s4753_s1 + $0x364] ss:$16 sps:$4 sm:$0xff]   ;;  %v3144_v50 = vld [vmem:[%s4753_s1 + $0x360] ss:$16 sps:$4 sm:$0xff]   ;;  %v3202_v23 = vld [vmem:[%s4753_s1 + $0x8c] ss:$16 sps:$4 sm:$0xff]  }
  0x19   :  { %1657 = vmatprep.subr.bf16.mxu0 %v3111_v25  ;;  %v36_v46 = vld [vmem:[%s4754_s0] sm:$0xff]  ;;  %v3200_v25 = vld [vmem:[%s4753_s1 + $0x88] ss:$16 sps:$4 sm:$0xff]  }
  0x1a   :  { %v3773_v47 = vcombine.high %v36_v46, %v36_v46  ;;  %v3145_v52 = vld [vmem:[%s4753_s1 + $0x184] ss:$16 sps:$4 sm:$0xff]   ;;  %v3149_v54 = vld [vmem:[%s4753_s1 + $0x180] ss:$16 sps:$4 sm:$0xff]   ;;  %v3842_v6 = vcombine.low %v36_v46, %v36_v46 }
  0x1b   :  { %1617 = vmatpush1.bf16.msra.mxu1 %v3113_v26  ;;  %v3147_v53 = vld [vmem:[%s4753_s1 + $0x384] ss:$16 sps:$4 sm:$0xff]   ;;  %v3150_v55 = vld [vmem:[%s4753_s1 + $0x380] ss:$16 sps:$4 sm:$0xff]  }
  0x1c   :  { %1658 = vmatpush1.bf16.msra.mxu0 %v3114_v27  ;;  %1618 = vmatprep.subr.bf16.mxu1 %v3115_v28  ;;  %v3151_v56 = vld [vmem:[%s4753_s1 + $0x1a4] ss:$16 sps:$4 sm:$0xff]   ;;  %v3155_v58 = vld [vmem:[%s4753_s1 + $0x1a0] ss:$16 sps:$4 sm:$0xff]   ;;  %v3208_v27 = vld [vmem:[%s4753_s1 + $0xac] ss:$16 sps:$4 sm:$0xff]  }
  0x1d   :  { %1659 = vmatprep.subr.bf16.mxu0 %v3117_v29  ;;  %1636 = vmatprep.mubr.bf16.mxu1 %v3773_v47  ;;  %v3153_v57 = vld [vmem:[%s4753_s1 + $0x3a4] ss:$16 sps:$4 sm:$0xff]   ;;  %v3156_v59 = vld [vmem:[%s4753_s1 + $0x3a0] ss:$16 sps:$4 sm:$0xff]   ;;  %v3206_v29 = vld [vmem:[%s4753_s1 + $0xa8] ss:$16 sps:$4 sm:$0xff]  }
  0x1e   :  { %v3157_v60 = vld [vmem:[%s4753_s1 + $0x1c4] ss:$16 sps:$4 sm:$0xff]   ;;  %v3161_v62 = vld [vmem:[%s4753_s1 + $0x1c0] ss:$16 sps:$4 sm:$0xff]  }
  0x1f   :  { %1619 = vmatpush1.bf16.msra.mxu1 %v3119_v30  ;;  %v3159_v61 = vld [vmem:[%s4753_s1 + $0x3c4] ss:$16 sps:$4 sm:$0xff]   ;;  %v3162_v63 = vld [vmem:[%s4753_s1 + $0x3c0] ss:$16 sps:$4 sm:$0xff]  }
  0x20   :  { %1660 = vmatpush1.bf16.msra.mxu0 %v3120_v31  ;;  %1620 = vmatprep.subr.bf16.mxu1 %v3121_v32  ;;  %v3163_v0 = vld [vmem:[%s4753_s1 + $0x1e4] ss:$16 sps:$4 sm:$0xff]   ;;  %v3167_v2 = vld [vmem:[%s4753_s1 + $0x1e0] ss:$16 sps:$4 sm:$0xff]   ;;  %v3214_v31 = vld [vmem:[%s4753_s1 + $0xcc] ss:$16 sps:$4 sm:$0xff]  }
  0x21   :  { %1661 = vmatprep.subr.bf16.mxu0 %v3123_v33  ;;  %v3165_v1 = vld [vmem:[%s4753_s1 + $0x3e4] ss:$16 sps:$4 sm:$0xff]   ;;  %v3168_v3 = vld [vmem:[%s4753_s1 + $0x3e0] ss:$16 sps:$4 sm:$0xff]  }
  0x22   :  { %v3175_v4 = vld [vmem:[%s4753_s1 + $0x404] ss:$16 sps:$4 sm:$0xff]   ;;  %v3173_v8 = vld [vmem:[%s4753_s1 + $0x400] ss:$16 sps:$4 sm:$0xff]  }
  0x23   :  { %1621 = vmatpush1.bf16.msra.mxu1 %v3125_v34  ;;  %v3181_v10 = vld [vmem:[%s4753_s1 + $0x424] ss:$16 sps:$4 sm:$0xff]   ;;  %v3179_v12 = vld [vmem:[%s4753_s1 + $0x420] ss:$16 sps:$4 sm:$0xff]  }
  0x24   :  { %1662 = vmatpush1.bf16.msra.mxu0 %v3126_v35  ;;  %1622 = vmatprep.subr.bf16.mxu1 %v3127_v36  ;;  %v3187_v14 = vld [vmem:[%s4753_s1 + $0x444] ss:$16 sps:$4 sm:$0xff]   ;;  %v3185_v16 = vld [vmem:[%s4753_s1 + $0x440] ss:$16 sps:$4 sm:$0xff]   ;;  %v3212_v35 = vld [vmem:[%s4753_s1 + $0xc8] ss:$16 sps:$4 sm:$0xff]  }
  0x25   :  { %1663 = vmatprep.subr.bf16.mxu0 %v3129_v37  ;;  %v3193_v18 = vld [vmem:[%s4753_s1 + $0x464] ss:$16 sps:$4 sm:$0xff]   ;;  %v3191_v20 = vld [vmem:[%s4753_s1 + $0x460] ss:$16 sps:$4 sm:$0xff]   ;;  %v3220_v37 = vld [vmem:[%s4753_s1 + $0xec] ss:$16 sps:$4 sm:$0xff]  }
  0x26   :  { %v3199_v22 = vld [vmem:[%s4753_s1 + $0x484] ss:$16 sps:$4 sm:$0xff]   ;;  %v3197_v24 = vld [vmem:[%s4753_s1 + $0x480] ss:$16 sps:$4 sm:$0xff]  }
  0x27   :  { %1623 = vmatpush1.bf16.msra.mxu1 %v3131_v38  ;;  %v3205_v26 = vld [vmem:[%s4753_s1 + $0x4a4] ss:$16 sps:$4 sm:$0xff]   ;;  %v3203_v28 = vld [vmem:[%s4753_s1 + $0x4a0] ss:$16 sps:$4 sm:$0xff]  }
  0x28   :  { %1664 = vmatpush1.bf16.msra.mxu0 %v3132_v39  ;;  %1624 = vmatprep.subr.bf16.mxu1 %v3133_v40  ;;  %v3211_v30 = vld [vmem:[%s4753_s1 + $0x4c4] ss:$16 sps:$4 sm:$0xff]   ;;  %v3209_v33 = vld [vmem:[%s4753_s1 + $0x4c0] ss:$16 sps:$4 sm:$0xff]   ;;  %v3218_v39 = vld [vmem:[%s4753_s1 + $0xe8] ss:$16 sps:$4 sm:$0xff]  }
  0x29   :  { %1665 = vmatprep.subr.bf16.mxu0 %v3135_v41  ;;  %v3924_v32 = vld [vmem:[%s4754_s0 + $0x10] sm:$0xff]  ;;  %v3226_v41 = vld [vmem:[%s4753_s1 + $0x10c] ss:$16 sps:$4 sm:$0xff]  }
  0x2a   :  { %v3931_v34 = vcombine.high %v3924_v32, %v3924_v32  ;;  %v3217_v36 = vld [vmem:[%s4753_s1 + $0x4e4] ss:$16 sps:$4 sm:$0xff]   ;;  %v3215_v38 = vld [vmem:[%s4753_s1 + $0x4e0] ss:$16 sps:$4 sm:$0xff]  }
  0x2b   :  { %1625 = vmatpush1.bf16.msra.mxu1 %v3137_v42  ;;  %v3223_v40 = vld [vmem:[%s4753_s1 + $0x504] ss:$16 sps:$4 sm:$0xff]   ;;  %v3221_v42 = vld [vmem:[%s4753_s1 + $0x500] ss:$16 sps:$4 sm:$0xff]  }
  0x2c   :  { %1666 = vmatpush1.bf16.msra.mxu0 %v3138_v43  ;;  %1626 = vmatprep.subr.bf16.mxu1 %v3139_v44  ;;  %v3224_v43 = vld [vmem:[%s4753_s1 + $0x108] ss:$16 sps:$4 sm:$0xff]   ;;  %v3229_v44 = vld [vmem:[%s4753_s1 + $0x524] ss:$16 sps:$4 sm:$0xff]   ;;  %v3227_v46 = vld [vmem:[%s4753_s1 + $0x520] ss:$16 sps:$4 sm:$0xff]  }
  0x2d   :  { %1667 = vmatprep.subr.bf16.mxu0 %v3141_v45  ;;  %v3232_v45 = vld [vmem:[%s4753_s1 + $0x12c] ss:$16 sps:$4 sm:$0xff]   ;;  %v3235_v48 = vld [vmem:[%s4753_s1 + $0x544] ss:$16 sps:$4 sm:$0xff]  }
  0x2f   :  { %1627 = vmatpush1.bf16.msra.mxu1 %v3143_v49  ;;  %v3238_v49 = vld [vmem:[%s4753_s1 + $0x14c] ss:$16 sps:$4 sm:$0xff]  }
  0x30   :  { %1668 = vmatpush1.bf16.msra.mxu0 %v3144_v50  ;;  %1628 = vmatprep.subr.bf16.mxu1 %v3145_v52  ;;  %v3233_v50 = vld [vmem:[%s4753_s1 + $0x540] ss:$16 sps:$4 sm:$0xff]   ;;  %v3236_v52 = vld [vmem:[%s4753_s1 + $0x148] ss:$16 sps:$4 sm:$0xff]  }
  0x31   :  { %1669 = vmatprep.subr.bf16.mxu0 %v3147_v53  ;;  %v3241_v53 = vld [vmem:[%s4753_s1 + $0x564] ss:$16 sps:$4 sm:$0xff]  }
  0x33   :  { %1629 = vmatpush1.bf16.msra.mxu1 %v3149_v54  ;;  %v3244_v54 = vld [vmem:[%s4753_s1 + $0x16c] ss:$16 sps:$4 sm:$0xff]  }
  0x34   :  { %1670 = vmatpush1.bf16.msra.mxu0 %v3150_v55  ;;  %1630 = vmatprep.subr.bf16.mxu1 %v3151_v56  ;;  %v3239_v55 = vld [vmem:[%s4753_s1 + $0x560] ss:$16 sps:$4 sm:$0xff]   ;;  %v3242_v56 = vld [vmem:[%s4753_s1 + $0x168] ss:$16 sps:$4 sm:$0xff]  }
  0x35   :  { %1671 = vmatprep.subr.bf16.mxu0 %v3153_v57  ;;  %v3247_v57 = vld [vmem:[%s4753_s1 + $0x584] ss:$16 sps:$4 sm:$0xff]  }
  0x37   :  { %1631 = vmatpush1.bf16.msra.mxu1 %v3155_v58  ;;  %v3250_v58 = vld [vmem:[%s4753_s1 + $0x18c] ss:$16 sps:$4 sm:$0xff]  }
  0x38   :  { %1672 = vmatpush1.bf16.msra.mxu0 %v3156_v59  ;;  %1632 = vmatprep.subr.bf16.mxu1 %v3157_v60  ;;  %v3245_v59 = vld [vmem:[%s4753_s1 + $0x580] ss:$16 sps:$4 sm:$0xff]   ;;  %v3248_v60 = vld [vmem:[%s4753_s1 + $0x188] ss:$16 sps:$4 sm:$0xff]  }
  0x39   :  { %1673 = vmatprep.subr.bf16.mxu0 %v3159_v61  ;;  %v3253_v61 = vld [vmem:[%s4753_s1 + $0x5a4] ss:$16 sps:$4 sm:$0xff]  }
  0x3b   :  { %1633 = vmatpush1.bf16.msra.mxu1 %v3161_v62  ;;  %v3256_v62 = vld [vmem:[%s4753_s1 + $0x1ac] ss:$16 sps:$4 sm:$0xff]  }
  0x3c   :  { %1674 = vmatpush1.bf16.msra.mxu0 %v3162_v63  ;;  %1634 = vmatprep.subr.bf16.mxu1 %v3163_v0  ;;  %v3251_v63 = vld [vmem:[%s4753_s1 + $0x5a0] ss:$16 sps:$4 sm:$0xff]   ;;  %v3254_v0 = vld [vmem:[%s4753_s1 + $0x1a8] ss:$16 sps:$4 sm:$0xff]  }
  0x3d   :  { %1675 = vmatprep.subr.bf16.mxu0 %v3165_v1  ;;  %v3259_v1 = vld [vmem:[%s4753_s1 + $0x5c4] ss:$16 sps:$4 sm:$0xff]  }
  0x3f   :  { %1635 = vmatpush1.bf16.msra.mxu1 %v3167_v2  ;;  %v3262_v2 = vld [vmem:[%s4753_s1 + $0x1cc] ss:$16 sps:$4 sm:$0xff]  }
  0x40   :  { %1676 = vmatpush1.bf16.msra.mxu0 %v3168_v3  ;;  %1768 = vmatprep.subr.bf16.mxu1 %v3178_v5  ;;  %v3257_v3 = vld [vmem:[%s4753_s1 + $0x5c0] ss:$16 sps:$4 sm:$0xff]   ;;  %v3265_v5 = vld [vmem:[%s4753_s1 + $0x5e4] ss:$16 sps:$4 sm:$0xff]  }
  0x41   :  { %1686 = vmatprep.subr.bf16.mxu0 %v3175_v4  ;;  %v3260_v4 = vld [vmem:[%s4753_s1 + $0x1c8] ss:$16 sps:$4 sm:$0xff]  }
  0x42   :  { %1637 = vmatmul.mubr.bf16.vlgmr.msra.gmra.mrb[0].mxu1 %v3842_v6 }
  0x43   :  { %1678 = vmatmul.mubr.bf16.vlgmr.msra.gmra.mrb[0].mxu0 %v3844_v7  ;;  %1769 = vmatpush1.bf16.msra.mxu1 %v3176_v9  ;;  %v3263_v9 = vld [vmem:[%s4753_s1 + $0x5e0] ss:$16 sps:$4 sm:$0xff]  }
  0x44   :  { %1687 = vmatpush1.bf16.msra.mxu0 %v3173_v8  ;;  %1770 = vmatprep.subr.bf16.mxu1 %v3184_v11  ;;  %v3268_v8 = vld [vmem:[%s4753_s1 + $0x1ec] ss:$16 sps:$4 sm:$0xff]   ;;  %v3273_v11 = vld [vmem:[%s4753_s1 + $0x604] ss:$16 sps:$4 sm:$0xff]  }
  0x45   :  { %1688 = vmatprep.subr.bf16.mxu0 %v3181_v10  ;;  %1800 = vmatprep.mubr.bf16.mxu1 %v3773_v47  ;;  %v3230_v47 = vld [vmem:[%s4753_s1 + $0x128] ss:$16 sps:$4 sm:$0xff]  }
  0x46   :  { %1718 = vmatprep.mubr.bf16.mxu0 %v3931_v34  ;;  %v3266_v10 = vld [vmem:[%s4753_s1 + $0x1e8] ss:$16 sps:$4 sm:$0xff]  }
  0x47   :  { %1771 = vmatpush1.bf16.msra.mxu1 %v3182_v13  ;;  %v4053_v13 = vcombine.low %v3924_v32, %v3924_v32  ;;  %v3303_v32 = vld [vmem:[%s4753_s1 + $0x6a4] ss:$16 sps:$4 sm:$0xff]  }
  0x48   :  { %1689 = vmatpush1.bf16.msra.mxu0 %v3179_v12  ;;  %1772 = vmatprep.subr.bf16.mxu1 %v3190_v15  ;;  %v3276_v12 = vld [vmem:[%s4753_s1 + $0x20c] ss:$16 sps:$4 sm:$0xff]   ;;  %v3274_v15 = vld [vmem:[%s4753_s1 + $0x208] ss:$16 sps:$4 sm:$0xff]  }
  0x49   :  { %1690 = vmatprep.subr.bf16.mxu0 %v3187_v14  ;;  %v3271_v14 = vld [vmem:[%s4753_s1 + $0x600] ss:$16 sps:$4 sm:$0xff]  }
  0x4b   :  { %1773 = vmatpush1.bf16.msra.mxu1 %v3188_v17  ;;  %v3282_v17 = vld [vmem:[%s4753_s1 + $0x22c] ss:$16 sps:$4 sm:$0xff]  }
  0x4c   :  { %1691 = vmatpush1.bf16.msra.mxu0 %v3185_v16  ;;  %1774 = vmatprep.subr.bf16.mxu1 %v3196_v19  ;;  %v3279_v16 = vld [vmem:[%s4753_s1 + $0x624] ss:$16 sps:$4 sm:$0xff]  }
  0x4d   :  { %1692 = vmatprep.subr.bf16.mxu0 %v3193_v18  ;;  %v4070_v18 = vld [vmem:[%s4754_s0 + $0x18] sm:$0xff] }
  0x4e   :  { %v4074_v19 = vcombine.high %v4070_v18, %v4070_v18 }
  0x4f   :  { %1775 = vmatpush1.bf16.msra.mxu1 %v3194_v21  ;;  %v3280_v21 = vld [vmem:[%s4753_s1 + $0x228] ss:$16 sps:$4 sm:$0xff]  }
  0x50   :  { %1693 = vmatpush1.bf16.msra.mxu0 %v3191_v20  ;;  %1776 = vmatprep.subr.bf16.mxu1 %v3202_v23  ;;  %v3277_v20 = vld [vmem:[%s4753_s1 + $0x620] ss:$16 sps:$4 sm:$0xff]  }
  0x51   :  { %1694 = vmatprep.subr.bf16.mxu0 %v3199_v22  ;;  %v3285_v22 = vld [vmem:[%s4753_s1 + $0x644] ss:$16 sps:$4 sm:$0xff]   ;;  %v3283_v23 = vld [vmem:[%s4753_s1 + $0x640] ss:$16 sps:$4 sm:$0xff]  }
  0x53   :  { %1777 = vmatpush1.bf16.msra.mxu1 %v3200_v25  ;;  %v3291_v25 = vld [vmem:[%s4753_s1 + $0x664] ss:$16 sps:$4 sm:$0xff]  }
  0x54   :  { %1695 = vmatpush1.bf16.msra.mxu0 %v3197_v24  ;;  %1778 = vmatprep.subr.bf16.mxu1 %v3208_v27  ;;  %v3286_v24 = vld [vmem:[%s4753_s1 + $0x248] ss:$16 sps:$4 sm:$0xff]  }
  0x55   :  { %1696 = vmatprep.subr.bf16.mxu0 %v3205_v26  ;;  %v3289_v26 = vld [vmem:[%s4753_s1 + $0x660] ss:$16 sps:$4 sm:$0xff]   ;;  %v3292_v27 = vld [vmem:[%s4753_s1 + $0x268] ss:$16 sps:$4 sm:$0xff]  }
  0x57   :  { %1779 = vmatpush1.bf16.msra.mxu1 %v3206_v29  ;;  %v3300_v29 = vld [vmem:[%s4753_s1 + $0x28c] ss:$16 sps:$4 sm:$0xff]  }
  0x58   :  { %1697 = vmatpush1.bf16.msra.mxu0 %v3203_v28  ;;  %1780 = vmatprep.subr.bf16.mxu1 %v3214_v31  ;;  %v3297_v28 = vld [vmem:[%s4753_s1 + $0x684] ss:$16 sps:$4 sm:$0xff]   ;;  %v3298_v31 = vld [vmem:[%s4753_s1 + $0x288] ss:$16 sps:$4 sm:$0xff]  }
  0x59   :  { %1698 = vmatprep.subr.bf16.mxu0 %v3211_v30  ;;  %v3295_v30 = vld [vmem:[%s4753_s1 + $0x680] ss:$16 sps:$4 sm:$0xff]  }
  0x5b   :  { %1781 = vmatpush1.bf16.msra.mxu1 %v3212_v35  ;;  %v3301_v35 = vld [vmem:[%s4753_s1 + $0x6a0] ss:$16 sps:$4 sm:$0xff]  }
  0x5c   :  { %1699 = vmatpush1.bf16.msra.mxu0 %v3209_v33  ;;  %1782 = vmatprep.subr.bf16.mxu1 %v3220_v37  ;;  %v3306_v33 = vld [vmem:[%s4753_s1 + $0x2ac] ss:$16 sps:$4 sm:$0xff]   ;;  %v3309_v37 = vld [vmem:[%s4753_s1 + $0x6c4] ss:$16 sps:$4 sm:$0xff]  }
  0x5d   :  { %1700 = vmatprep.subr.bf16.mxu0 %v3217_v36  ;;  %v3304_v36 = vld [vmem:[%s4753_s1 + $0x2a8] ss:$16 sps:$4 sm:$0xff]  }
  0x5f   :  { %1783 = vmatpush1.bf16.msra.mxu1 %v3218_v39  ;;  %v3307_v39 = vld [vmem:[%s4753_s1 + $0x6c0] ss:$16 sps:$4 sm:$0xff]  }
  0x60   :  { %1701 = vmatpush1.bf16.msra.mxu0 %v3215_v38  ;;  %1784 = vmatprep.subr.bf16.mxu1 %v3226_v41  ;;  %v3312_v38 = vld [vmem:[%s4753_s1 + $0x2cc] ss:$16 sps:$4 sm:$0xff]   ;;  %v3315_v41 = vld [vmem:[%s4753_s1 + $0x6e4] ss:$16 sps:$4 sm:$0xff]  }
  0x61   :  { %1702 = vmatprep.subr.bf16.mxu0 %v3223_v40  ;;  %v3310_v40 = vld [vmem:[%s4753_s1 + $0x2c8] ss:$16 sps:$4 sm:$0xff]  }
  0x63   :  { %1785 = vmatpush1.bf16.msra.mxu1 %v3224_v43  ;;  %v3313_v43 = vld [vmem:[%s4753_s1 + $0x6e0] ss:$16 sps:$4 sm:$0xff]  }
  0x64   :  { %1703 = vmatpush1.bf16.msra.mxu0 %v3221_v42  ;;  %1786 = vmatprep.subr.bf16.mxu1 %v3232_v45  ;;  %v3318_v42 = vld [vmem:[%s4753_s1 + $0x2ec] ss:$16 sps:$4 sm:$0xff]   ;;  %v3321_v45 = vld [vmem:[%s4753_s1 + $0x704] ss:$16 sps:$4 sm:$0xff]  }
  0x65   :  { %1704 = vmatprep.subr.bf16.mxu0 %v3229_v44  ;;  %v3316_v44 = vld [vmem:[%s4753_s1 + $0x2e8] ss:$16 sps:$4 sm:$0xff]  }
  0x67   :  { %1787 = vmatpush1.bf16.msra.mxu1 %v3230_v47  ;;  %v3319_v47 = vld [vmem:[%s4753_s1 + $0x700] ss:$16 sps:$4 sm:$0xff]  }
  0x68   :  { %1705 = vmatpush1.bf16.msra.mxu0 %v3227_v46  ;;  %1788 = vmatprep.subr.bf16.mxu1 %v3238_v49  ;;  %v3324_v46 = vld [vmem:[%s4753_s1 + $0x30c] ss:$16 sps:$4 sm:$0xff]   ;;  %v3327_v49 = vld [vmem:[%s4753_s1 + $0x724] ss:$16 sps:$4 sm:$0xff]  }
  0x69   :  { %1706 = vmatprep.subr.bf16.mxu0 %v3235_v48  ;;  %v3322_v48 = vld [vmem:[%s4753_s1 + $0x308] ss:$16 sps:$4 sm:$0xff]  }
  0x6b   :  { %1789 = vmatpush1.bf16.msra.mxu1 %v3236_v52  ;;  %v3325_v52 = vld [vmem:[%s4753_s1 + $0x720] ss:$16 sps:$4 sm:$0xff]  }
  0x6c   :  { %1707 = vmatpush1.bf16.msra.mxu0 %v3233_v50  ;;  %1790 = vmatprep.subr.bf16.mxu1 %v3244_v54  ;;  %v3330_v50 = vld [vmem:[%s4753_s1 + $0x32c] ss:$16 sps:$4 sm:$0xff]   ;;  %v3333_v54 = vld [vmem:[%s4753_s1 + $0x744] ss:$16 sps:$4 sm:$0xff]  }
  0x6d   :  { %1708 = vmatprep.subr.bf16.mxu0 %v3241_v53  ;;  %v3328_v53 = vld [vmem:[%s4753_s1 + $0x328] ss:$16 sps:$4 sm:$0xff]  }
  0x6f   :  { %1791 = vmatpush1.bf16.msra.mxu1 %v3242_v56  ;;  %v3331_v56 = vld [vmem:[%s4753_s1 + $0x740] ss:$16 sps:$4 sm:$0xff]  }
  0x70   :  { %1709 = vmatpush1.bf16.msra.mxu0 %v3239_v55  ;;  %1792 = vmatprep.subr.bf16.mxu1 %v3250_v58  ;;  %v3336_v55 = vld [vmem:[%s4753_s1 + $0x34c] ss:$16 sps:$4 sm:$0xff]   ;;  %v3339_v58 = vld [vmem:[%s4753_s1 + $0x764] ss:$16 sps:$4 sm:$0xff]  }
  0x71   :  { %1710 = vmatprep.subr.bf16.mxu0 %v3247_v57  ;;  %v3334_v57 = vld [vmem:[%s4753_s1 + $0x348] ss:$16 sps:$4 sm:$0xff]  }
  0x73   :  { %1793 = vmatpush1.bf16.msra.mxu1 %v3248_v60  ;;  %v3337_v60 = vld [vmem:[%s4753_s1 + $0x760] ss:$16 sps:$4 sm:$0xff]  }
  0x74   :  { %1711 = vmatpush1.bf16.msra.mxu0 %v3245_v59  ;;  %1794 = vmatprep.subr.bf16.mxu1 %v3256_v62  ;;  %v3342_v59 = vld [vmem:[%s4753_s1 + $0x36c] ss:$16 sps:$4 sm:$0xff]   ;;  %v3345_v62 = vld [vmem:[%s4753_s1 + $0x784] ss:$16 sps:$4 sm:$0xff]  }
  0x75   :  { %1712 = vmatprep.subr.bf16.mxu0 %v3253_v61  ;;  %v3340_v61 = vld [vmem:[%s4753_s1 + $0x368] ss:$16 sps:$4 sm:$0xff]  }
  0x77   :  { %1795 = vmatpush1.bf16.msra.mxu1 %v3254_v0  ;;  %v3343_v0 = vld [vmem:[%s4753_s1 + $0x780] ss:$16 sps:$4 sm:$0xff]  }
  0x78   :  { %1713 = vmatpush1.bf16.msra.mxu0 %v3251_v63  ;;  %1796 = vmatprep.subr.bf16.mxu1 %v3262_v2  ;;  %v3348_v63 = vld [vmem:[%s4753_s1 + $0x38c] ss:$16 sps:$4 sm:$0xff]   ;;  %v3351_v2 = vld [vmem:[%s4753_s1 + $0x7a4] ss:$16 sps:$4 sm:$0xff]  }
  0x79   :  { %1714 = vmatprep.subr.bf16.mxu0 %v3259_v1  ;;  %v3346_v1 = vld [vmem:[%s4753_s1 + $0x388] ss:$16 sps:$4 sm:$0xff]  }
  0x7b   :  { %1797 = vmatpush1.bf16.msra.mxu1 %v3260_v4  ;;  %v3349_v4 = vld [vmem:[%s4753_s1 + $0x7a0] ss:$16 sps:$4 sm:$0xff]  }
  0x7c   :  { %1715 = vmatpush1.bf16.msra.mxu0 %v3257_v3  ;;  %1798 = vmatprep.subr.bf16.mxu1 %v3268_v8  ;;  %v3354_v3 = vld [vmem:[%s4753_s1 + $0x3ac] ss:$16 sps:$4 sm:$0xff]   ;;  %v3357_v8 = vld [vmem:[%s4753_s1 + $0x7c4] ss:$16 sps:$4 sm:$0xff]  }
  0x7d   :  { %1716 = vmatprep.subr.bf16.mxu0 %v3265_v5  ;;  %v3352_v5 = vld [vmem:[%s4753_s1 + $0x3a8] ss:$16 sps:$4 sm:$0xff]  }
  0x7f   :  { %1799 = vmatpush1.bf16.msra.mxu1 %v3266_v10  ;;  %v3355_v10 = vld [vmem:[%s4753_s1 + $0x7c0] ss:$16 sps:$4 sm:$0xff]  }
  0x80   :  { %1717 = vmatpush1.bf16.msra.mxu0 %v3263_v9  ;;  %1809 = vmatprep.subr.bf16.mxu1 %v3276_v12  ;;  %v3360_v9 = vld [vmem:[%s4753_s1 + $0x3cc] ss:$16 sps:$4 sm:$0xff]   ;;  %v3363_v12 = vld [vmem:[%s4753_s1 + $0x7e4] ss:$16 sps:$4 sm:$0xff]  }
  0x81   :  { %1727 = vmatprep.subr.bf16.mxu0 %v3273_v11  ;;  %v3358_v11 = vld [vmem:[%s4753_s1 + $0x3c8] ss:$16 sps:$4 sm:$0xff]  }
  0x82   :  { %1801 = vmatmul.mubr.bf16.vlgmr.msra.gmra.mrb[4].mxu1 %v3842_v6  ;;  %v3288_v6 = vld [vmem:[%s4753_s1 + $0x24c] ss:$16 sps:$4 sm:$0xff]  }
  0x83   :  { %1719 = vmatmul.mubr.bf16.vlgmr.msra.gmra.mrb[0].mxu0 %v4053_v13  ;;  %1810 = vmatpush1.bf16.msra.mxu1 %v3274_v15  ;;  %v3361_v15 = vld [vmem:[%s4753_s1 + $0x7e0] ss:$16 sps:$4 sm:$0xff]  }
  0x84   :  { %1728 = vmatpush1.bf16.msra.mxu0 %v3271_v14  ;;  %1811 = vmatprep.subr.bf16.mxu1 %v3282_v17  ;;  %v3366_v14 = vld [vmem:[%s4753_s1 + $0x3ec] ss:$16 sps:$4 sm:$0xff]  }
  0x85   :  { %1729 = vmatprep.subr.bf16.mxu0 %v3279_v16  ;;  %1759 = vmatprep.mubr.bf16.mxu0 %v4074_v19  ;;  %v3364_v16 = vld [vmem:[%s4753_s1 + $0x3e8] ss:$16 sps:$4 sm:$0xff]   ;;  %v3371_v17 = vld [vmem:[%s4753_s1 + $0x40c] ss:$16 sps:$4 sm:$0xff]  }
  0x86   :  { %1841 = vmatprep.mubr.bf16.mxu1 %v3784_v51  ;;  %v3294_v51 = vld [vmem:[%s4753_s1 + $0x26c] ss:$16 sps:$4 sm:$0xff]  }
  0x87   :  { %1812 = vmatpush1.bf16.msra.mxu1 %v3280_v21  ;;  %v3369_v21 = vld [vmem:[%s4753_s1 + $0x408] ss:$16 sps:$4 sm:$0xff]  }
  0x88   :  { %1730 = vmatpush1.bf16.msra.mxu0 %v3277_v20  ;;  %1813 = vmatprep.subr.bf16.mxu1 %v3288_v6  ;;  %v4259_v20 = vcombine.low %v4070_v18, %v4070_v18  ;;  %v3372_v18 = vld [vmem:[%s4753_s1 + $0x428] ss:$16 sps:$4 sm:$0xff]   ;;  %v3377_v6 = vld [vmem:[%s4753_s1 + $0x44c] ss:$16 sps:$4 sm:$0xff]  }
  0x89   :  { %1731 = vmatprep.subr.bf16.mxu0 %v3285_v22  ;;  %v3374_v22 = vld [vmem:[%s4753_s1 + $0x42c] ss:$16 sps:$4 sm:$0xff]  }
  0x8b   :  { %1814 = vmatpush1.bf16.msra.mxu1 %v3286_v24  ;;  %v3470_v24 = vld [vmem:[%s4755_s4 + $0x14] ss:$8 sps:$4 sm:$0xff]  }
  0x8c   :  { %1732 = vmatpush1.bf16.msra.mxu0 %v3283_v23  ;;  %1815 = vmatprep.subr.bf16.mxu1 %v3294_v51  ;;  %v3465_v23 = vld [vmem:[%s4755_s4] ss:$8 sps:$4 sm:$0xff]   ;;  %v3468_v51 = vld [vmem:[%s4755_s4 + $0x10] ss:$8 sps:$4 sm:$0xff]  }
  0x8d   :  { %1733 = vmatprep.subr.bf16.mxu0 %v3291_v25  ;;  %v3375_v25 = vld [vmem:[%s4753_s1 + $0x448] ss:$16 sps:$4 sm:$0xff]  }
  0x8f   :  { %1816 = vmatpush1.bf16.msra.mxu1 %v3292_v27  ;;  %v3378_v27 = vld [vmem:[%s4753_s1 + $0x468] ss:$16 sps:$4 sm:$0xff]  }
  0x90   :  { %1734 = vmatpush1.bf16.msra.mxu0 %v3289_v26  ;;  %1817 = vmatprep.subr.bf16.mxu1 %v3300_v29  ;;  %v3473_v26 = vld [vmem:[%s4755_s4 + $0x24] ss:$8 sps:$4 sm:$0xff]   ;;  %v3471_v29 = vld [vmem:[%s4755_s4 + $0x20] ss:$8 sps:$4 sm:$0xff]  }
  0x91   :  { %1735 = vmatprep.subr.bf16.mxu0 %v3297_v28  ;;  %v3383_v28 = vld [vmem:[%s4753_s1 + $0x48c] ss:$16 sps:$4 sm:$0xff]  }
  0x93   :  { %1818 = vmatpush1.bf16.msra.mxu1 %v3298_v31  ;;  %v3381_v31 = vld [vmem:[%s4753_s1 + $0x488] ss:$16 sps:$4 sm:$0xff]  }
  0x94   :  { %1736 = vmatpush1.bf16.msra.mxu0 %v3295_v30  ;;  %1819 = vmatprep.subr.bf16.mxu1 %v3306_v33  ;;  %v3476_v30 = vld [vmem:[%s4755_s4 + $0x34] ss:$8 sps:$4 sm:$0xff]   ;;  %v3474_v33 = vld [vmem:[%s4755_s4 + $0x30] ss:$8 sps:$4 sm:$0xff]  }
  0x95   :  { %1737 = vmatprep.subr.bf16.mxu0 %v3303_v32  ;;  %v3386_v32 = vld [vmem:[%s4753_s1 + $0x4ac] ss:$16 sps:$4 sm:$0xff]  }
  0x97   :  { %1820 = vmatpush1.bf16.msra.mxu1 %v3304_v36  ;;  %v3384_v36 = vld [vmem:[%s4753_s1 + $0x4a8] ss:$16 sps:$4 sm:$0xff]  }
  0x98   :  { %1738 = vmatpush1.bf16.msra.mxu0 %v3301_v35  ;;  %1821 = vmatprep.subr.bf16.mxu1 %v3312_v38  ;;  %v3479_v35 = vld [vmem:[%s4755_s4 + $0x44] ss:$8 sps:$4 sm:$0xff]   ;;  %v3477_v38 = vld [vmem:[%s4755_s4 + $0x40] ss:$8 sps:$4 sm:$0xff]  }
  0x99   :  { %1739 = vmatprep.subr.bf16.mxu0 %v3309_v37  ;;  %v3389_v37 = vld [vmem:[%s4753_s1 + $0x4cc] ss:$16 sps:$4 sm:$0xff]  }
  0x9b   :  { %1822 = vmatpush1.bf16.msra.mxu1 %v3310_v40  ;;  %v3387_v40 = vld [vmem:[%s4753_s1 + $0x4c8] ss:$16 sps:$4 sm:$0xff]  }
  0x9c   :  { %1740 = vmatpush1.bf16.msra.mxu0 %v3307_v39  ;;  %1823 = vmatprep.subr.bf16.mxu1 %v3318_v42  ;;  %v3482_v39 = vld [vmem:[%s4755_s4 + $0x54] ss:$8 sps:$4 sm:$0xff]  }
  0x9d   :  { %1741 = vmatprep.subr.bf16.mxu0 %v3315_v41  ;;  %v3480_v41 = vld [vmem:[%s4755_s4 + $0x50] ss:$8 sps:$4 sm:$0xff]   ;;  %v3392_v42 = vld [vmem:[%s4753_s1 + $0x4ec] ss:$16 sps:$4 sm:$0xff]  }
  0x9f   :  { %1824 = vmatpush1.bf16.msra.mxu1 %v3316_v44  ;;  %v3390_v44 = vld [vmem:[%s4753_s1 + $0x4e8] ss:$16 sps:$4 sm:$0xff]  }
  0xa0   :  { %1742 = vmatpush1.bf16.msra.mxu0 %v3313_v43  ;;  %1825 = vmatprep.subr.bf16.mxu1 %v3324_v46  ;;  %v3485_v43 = vld [vmem:[%s4755_s4 + $0x64] ss:$8 sps:$4 sm:$0xff]  }
  0xa1   :  { %1743 = vmatprep.subr.bf16.mxu0 %v3321_v45  ;;  %v3483_v45 = vld [vmem:[%s4755_s4 + $0x60] ss:$8 sps:$4 sm:$0xff]   ;;  %v3395_v46 = vld [vmem:[%s4753_s1 + $0x50c] ss:$16 sps:$4 sm:$0xff]  }
  0xa3   :  { %1826 = vmatpush1.bf16.msra.mxu1 %v3322_v48  ;;  %v3393_v48 = vld [vmem:[%s4753_s1 + $0x508] ss:$16 sps:$4 sm:$0xff]  }
  0xa4   :  { %1744 = vmatpush1.bf16.msra.mxu0 %v3319_v47  ;;  %1827 = vmatprep.subr.bf16.mxu1 %v3330_v50  ;;  %v3488_v47 = vld [vmem:[%s4755_s4 + $0x74] ss:$8 sps:$4 sm:$0xff]  }
  0xa5   :  { %1745 = vmatprep.subr.bf16.mxu0 %v3327_v49  ;;  %v3486_v49 = vld [vmem:[%s4755_s4 + $0x70] ss:$8 sps:$4 sm:$0xff]   ;;  %v3398_v50 = vld [vmem:[%s4753_s1 + $0x52c] ss:$16 sps:$4 sm:$0xff]  }
  0xa7   :  { %1828 = vmatpush1.bf16.msra.mxu1 %v3328_v53  ;;  %v3396_v53 = vld [vmem:[%s4753_s1 + $0x528] ss:$16 sps:$4 sm:$0xff]  }
  0xa8   :  { %1746 = vmatpush1.bf16.msra.mxu0 %v3325_v52  ;;  %1829 = vmatprep.subr.bf16.mxu1 %v3336_v55  ;;  %v3491_v52 = vld [vmem:[%s4755_s4 + $0x84] ss:$8 sps:$4 sm:$0xff]  }
  0xa9   :  { %1747 = vmatprep.subr.bf16.mxu0 %v3333_v54  ;;  %v3489_v54 = vld [vmem:[%s4755_s4 + $0x80] ss:$8 sps:$4 sm:$0xff]   ;;  %v3401_v55 = vld [vmem:[%s4753_s1 + $0x54c] ss:$16 sps:$4 sm:$0xff]  }
  0xab   :  { %1830 = vmatpush1.bf16.msra.mxu1 %v3334_v57  ;;  %v3399_v57 = vld [vmem:[%s4753_s1 + $0x548] ss:$16 sps:$4 sm:$0xff]  }
  0xac   :  { %1748 = vmatpush1.bf16.msra.mxu0 %v3331_v56  ;;  %1831 = vmatprep.subr.bf16.mxu1 %v3342_v59  ;;  %v3494_v56 = vld [vmem:[%s4755_s4 + $0x94] ss:$8 sps:$4 sm:$0xff]  }
  0xad   :  { %1749 = vmatprep.subr.bf16.mxu0 %v3339_v58  ;;  %v3492_v58 = vld [vmem:[%s4755_s4 + $0x90] ss:$8 sps:$4 sm:$0xff]   ;;  %v3404_v59 = vld [vmem:[%s4753_s1 + $0x56c] ss:$16 sps:$4 sm:$0xff]  }
  0xaf   :  { %1832 = vmatpush1.bf16.msra.mxu1 %v3340_v61  ;;  %v3402_v61 = vld [vmem:[%s4753_s1 + $0x568] ss:$16 sps:$4 sm:$0xff]  }
  0xb0   :  { %1750 = vmatpush1.bf16.msra.mxu0 %v3337_v60  ;;  %1833 = vmatprep.subr.bf16.mxu1 %v3348_v63  ;;  %v3497_v60 = vld [vmem:[%s4755_s4 + $0xa4] ss:$8 sps:$4 sm:$0xff]  }
  0xb1   :  { %1751 = vmatprep.subr.bf16.mxu0 %v3345_v62  ;;  %v3495_v62 = vld [vmem:[%s4755_s4 + $0xa0] ss:$8 sps:$4 sm:$0xff]   ;;  %v3407_v63 = vld [vmem:[%s4753_s1 + $0x58c] ss:$16 sps:$4 sm:$0xff]  }
  0xb3   :  { %1834 = vmatpush1.bf16.msra.mxu1 %v3346_v1  ;;  %v3405_v1 = vld [vmem:[%s4753_s1 + $0x588] ss:$16 sps:$4 sm:$0xff]  }
  0xb4   :  { %1752 = vmatpush1.bf16.msra.mxu0 %v3343_v0  ;;  %1835 = vmatprep.subr.bf16.mxu1 %v3354_v3  ;;  %v3500_v0 = vld [vmem:[%s4755_s4 + $0xb4] ss:$8 sps:$4 sm:$0xff]  }
  0xb5   :  { %1753 = vmatprep.subr.bf16.mxu0 %v3351_v2  ;;  %v3498_v2 = vld [vmem:[%s4755_s4 + $0xb0] ss:$8 sps:$4 sm:$0xff]   ;;  %v3410_v3 = vld [vmem:[%s4753_s1 + $0x5ac] ss:$16 sps:$4 sm:$0xff]  }
  0xb7   :  { %1836 = vmatpush1.bf16.msra.mxu1 %v3352_v5  ;;  %v3408_v5 = vld [vmem:[%s4753_s1 + $0x5a8] ss:$16 sps:$4 sm:$0xff]  }
  0xb8   :  { %1754 = vmatpush1.bf16.msra.mxu0 %v3349_v4  ;;  %1837 = vmatprep.subr.bf16.mxu1 %v3360_v9  ;;  %v3503_v4 = vld [vmem:[%s4755_s4 + $0xc4] ss:$8 sps:$4 sm:$0xff]  }
  0xb9   :  { %1755 = vmatprep.subr.bf16.mxu0 %v3357_v8  ;;  %v3501_v8 = vld [vmem:[%s4755_s4 + $0xc0] ss:$8 sps:$4 sm:$0xff]   ;;  %v3413_v9 = vld [vmem:[%s4753_s1 + $0x5cc] ss:$16 sps:$4 sm:$0xff]  }
  0xbb   :  { %1838 = vmatpush1.bf16.msra.mxu1 %v3358_v11  ;;  %v3416_v11 = vld [vmem:[%s4753_s1 + $0x5ec] ss:$16 sps:$4 sm:$0xff]  }
  0xbc   :  { %1756 = vmatpush1.bf16.msra.mxu0 %v3355_v10  ;;  %1839 = vmatprep.subr.bf16.mxu1 %v3366_v14  ;;  %v3411_v10 = vld [vmem:[%s4753_s1 + $0x5c8] ss:$16 sps:$4 sm:$0xff]   ;;  %v3419_v14 = vld [vmem:[%s4753_s1 + $0x60c] ss:$16 sps:$4 sm:$0xff]  }
  0xbd   :  { %1757 = vmatprep.subr.bf16.mxu0 %v3363_v12  ;;  %v3414_v12 = vld [vmem:[%s4753_s1 + $0x5e8] ss:$16 sps:$4 sm:$0xff]  }
  0xbf   :  { %1840 = vmatpush1.bf16.msra.mxu1 %v3364_v16  ;;  %v3422_v16 = vld [vmem:[%s4753_s1 + $0x62c] ss:$16 sps:$4 sm:$0xff]  }
  0xc0   :  { %1758 = vmatpush1.bf16.msra.mxu0 %v3361_v15  ;;  %1850 = vmatprep.subr.bf16.mxu1 %v3371_v17  ;;  %v3417_v15 = vld [vmem:[%s4753_s1 + $0x608] ss:$16 sps:$4 sm:$0xff]  }
  0xc1   :  { %v3420_v17 = vld [vmem:[%s4753_s1 + $0x628] ss:$16 sps:$4 sm:$0xff]  }
  0xc2   :  { %1842 = vmatmul.mubr.bf16.vlgmr.msra.gmra.mrb[4].mxu1 %v3844_v7  ;;  %v3467_v7 = vld [vmem:[%s4755_s4 + $0x4] ss:$8 sps:$4 sm:$0xff]  }
  0xc3   :  { %1760 = vmatmul.mubr.bf16.vlgmr.msra.gmra.mrb[0].mxu0 %v4259_v20  ;;  %1851 = vmatpush1.bf16.msra.mxu1 %v3369_v21  ;;  %v3425_v21 = vld [vmem:[%s4753_s1 + $0x64c] ss:$16 sps:$4 sm:$0xff]  }
  0xc4   :  { %1882 = vmatprep.mubr.bf16.mxu1 %v3931_v34  ;;  %1852 = vmatprep.subr.bf16.mxu1 %v3374_v22  ;;  %v3380_v34 = vld [vmem:[%s4753_s1 + $0x46c] ss:$16 sps:$4 sm:$0xff]   ;;  %v3423_v22 = vld [vmem:[%s4753_s1 + $0x648] ss:$16 sps:$4 sm:$0xff]  }
  0xc5   :  { %2376 = vmatprep.subr.bf16.mxu0 %v3467_v7  ;;  %v3432_v7 = vld [vmem:[%s4753_s1 + $0x6a8] ss:$16 sps:$4 sm:$0xff]  }
  0xc6   :  { %2377 = vmatpush1.bf16.msra.mxu0 %v3465_v23  ;;  %v3434_v23 = vld [vmem:[%s4753_s1 + $0x6ac] ss:$16 sps:$4 sm:$0xff]  }
  0xc7   :  { %1853 = vmatpush1.bf16.msra.mxu1 %v3372_v18  ;;  %2378 = vmatprep.subr.bf16.mxu0 %v3470_v24  ;;  %v3431_v18 = vld [vmem:[%s4753_s1 + $0x68c] ss:$16 sps:$4 sm:$0xff]  }
  0xc8   :  { %1854 = vmatprep.subr.bf16.mxu1 %v3377_v6  ;;  %v3429_v6 = vld [vmem:[%s4753_s1 + $0x688] ss:$16 sps:$4 sm:$0xff]   ;;  %v3437_v24 = vld [vmem:[%s4753_s1 + $0x6cc] ss:$16 sps:$4 sm:$0xff]  }
  0xca   :  { %2379 = vmatpush1.bf16.msra.mxu0 %v3468_v51  ;;  %v3504_v51 = vld [vmem:[%s4755_s4 + $0xd0] ss:$8 sps:$4 sm:$0xff]  }
  0xcb   :  { %1855 = vmatpush1.bf16.msra.mxu1 %v3375_v25  ;;  %2380 = vmatprep.subr.bf16.mxu0 %v3473_v26  ;;  %v3506_v25 = vld [vmem:[%s4755_s4 + $0xd4] ss:$8 sps:$4 sm:$0xff]  }
  0xcc   :  { %1856 = vmatprep.subr.bf16.mxu1 %v3380_v34 }
  0xce   :  { %2381 = vmatpush1.bf16.msra.mxu0 %v3471_v29 }
  0xcf   :  { %1857 = vmatpush1.bf16.msra.mxu1 %v3378_v27  ;;  %2382 = vmatprep.subr.bf16.mxu0 %v3476_v30  ;;  %v3440_v30 = vld [vmem:[%s4753_s1 + $0x6ec] ss:$16 sps:$4 sm:$0xff]  }
  0xd0   :  { %1858 = vmatprep.subr.bf16.mxu1 %v3383_v28  ;;  %v3435_v28 = vld [vmem:[%s4753_s1 + $0x6c8] ss:$16 sps:$4 sm:$0xff]  }
  0xd2   :  { %2383 = vmatpush1.bf16.msra.mxu0 %v3474_v33  ;;  %v3438_v33 = vld [vmem:[%s4753_s1 + $0x6e8] ss:$16 sps:$4 sm:$0xff]  }
  0xd3   :  { %1859 = vmatpush1.bf16.msra.mxu1 %v3381_v31  ;;  %2384 = vmatprep.subr.bf16.mxu0 %v3479_v35  ;;  %v3509_v31 = vld [vmem:[%s4755_s4 + $0xe4] ss:$8 sps:$4 sm:$0xff]  }
  0xd4   :  { %1860 = vmatprep.subr.bf16.mxu1 %v3386_v32  ;;  %v3507_v32 = vld [vmem:[%s4755_s4 + $0xe0] ss:$8 sps:$4 sm:$0xff]   ;;  %v3443_v35 = vld [vmem:[%s4753_s1 + $0x70c] ss:$16 sps:$4 sm:$0xff]  }
  0xd6   :  { %2385 = vmatpush1.bf16.msra.mxu0 %v3477_v38  ;;  %v3441_v38 = vld [vmem:[%s4753_s1 + $0x708] ss:$16 sps:$4 sm:$0xff]  }
  0xd7   :  { %1861 = vmatpush1.bf16.msra.mxu1 %v3384_v36  ;;  %2386 = vmatprep.subr.bf16.mxu0 %v3482_v39  ;;  %v3512_v36 = vld [vmem:[%s4755_s4 + $0xf4] ss:$8 sps:$4 sm:$0xff]  }
  0xd8   :  { %1862 = vmatprep.subr.bf16.mxu1 %v3389_v37  ;;  %v3510_v37 = vld [vmem:[%s4755_s4 + $0xf0] ss:$8 sps:$4 sm:$0xff]   ;;  %v3446_v39 = vld [vmem:[%s4753_s1 + $0x72c] ss:$16 sps:$4 sm:$0xff]  }
  0xda   :  { %2387 = vmatpush1.bf16.msra.mxu0 %v3480_v41  ;;  %v3444_v41 = vld [vmem:[%s4753_s1 + $0x728] ss:$16 sps:$4 sm:$0xff]  }
  0xdb   :  { %1863 = vmatpush1.bf16.msra.mxu1 %v3387_v40  ;;  %2388 = vmatprep.subr.bf16.mxu0 %v3485_v43  ;;  %v3515_v40 = vld [vmem:[%s4755_s4 + $0x104] ss:$8 sps:$4 sm:$0xff]   ;;  %v3447_v43 = vld [vmem:[%s4753_s1 + $0x748] ss:$16 sps:$4 sm:$0xff]  }
  0xdc   :  { %1864 = vmatprep.subr.bf16.mxu1 %v3392_v42  ;;  %v3449_v42 = vld [vmem:[%s4753_s1 + $0x74c] ss:$16 sps:$4 sm:$0xff]  }
  0xde   :  { %2389 = vmatpush1.bf16.msra.mxu0 %v3483_v45  ;;  %v3450_v45 = vld [vmem:[%s4753_s1 + $0x768] ss:$16 sps:$4 sm:$0xff]  }
  0xdf   :  { %1865 = vmatpush1.bf16.msra.mxu1 %v3390_v44  ;;  %2390 = vmatprep.subr.bf16.mxu0 %v3488_v47  ;;  %v3452_v44 = vld [vmem:[%s4753_s1 + $0x76c] ss:$16 sps:$4 sm:$0xff]   ;;  %v3453_v47 = vld [vmem:[%s4753_s1 + $0x788] ss:$16 sps:$4 sm:$0xff]  }
  0xe0   :  { %1866 = vmatprep.subr.bf16.mxu1 %v3395_v46  ;;  %v3455_v46 = vld [vmem:[%s4753_s1 + $0x78c] ss:$16 sps:$4 sm:$0xff]  }
  0xe2   :  { %2391 = vmatpush1.bf16.msra.mxu0 %v3486_v49  ;;  %v3456_v49 = vld [vmem:[%s4753_s1 + $0x7a8] ss:$16 sps:$4 sm:$0xff]  }
  0xe3   :  { %1867 = vmatpush1.bf16.msra.mxu1 %v3393_v48  ;;  %2392 = vmatprep.subr.bf16.mxu0 %v3491_v52  ;;  %v3458_v48 = vld [vmem:[%s4753_s1 + $0x7ac] ss:$16 sps:$4 sm:$0xff]   ;;  %v3459_v52 = vld [vmem:[%s4753_s1 + $0x7c8] ss:$16 sps:$4 sm:$0xff]  }
  0xe4   :  { %1868 = vmatprep.subr.bf16.mxu1 %v3398_v50  ;;  %v3461_v50 = vld [vmem:[%s4753_s1 + $0x7cc] ss:$16 sps:$4 sm:$0xff]  }
  0xe6   :  { %2393 = vmatpush1.bf16.msra.mxu0 %v3489_v54  ;;  %v3462_v54 = vld [vmem:[%s4753_s1 + $0x7e8] ss:$16 sps:$4 sm:$0xff]  }
  0xe7   :  { %1869 = vmatpush1.bf16.msra.mxu1 %v3396_v53  ;;  %2394 = vmatprep.subr.bf16.mxu0 %v3494_v56  ;;  %v3464_v53 = vld [vmem:[%s4753_s1 + $0x7ec] ss:$16 sps:$4 sm:$0xff]  }
  0xe8   :  { %1870 = vmatprep.subr.bf16.mxu1 %v3401_v55  ;;  %v1934_v55 = vlaneseq }
  0xea   :  { %2395 = vmatpush1.bf16.msra.mxu0 %v3492_v58  ;;  %v4559_v56 = vshrl.u32 %v1934_v55, 7  ;;  %v4567_v58 = vld [vmem:[%s4756_s2] sm:$0xf]  ;;  %v3560_v55 = vld [vmem:[%s4755_s4 + $0x1f4] ss:$8 sps:$4 sm:$0xff]  }
  0xeb   :  { %1871 = vmatpush1.bf16.msra.mxu1 %v3399_v57  ;;  %2396 = vmatprep.subr.bf16.mxu0 %v3497_v60  ;;  %v4575_v60 = vld [vmem:[%s4757_s3] sm:$0xf] }
  0xec   :  { %1872 = vmatprep.subr.bf16.mxu1 %v3404_v59  ;;  %v4562_v57 = vsub.s32 0, %v4559_v56  ;;  %v4570_v59 = vsub.s32 1, %v4559_v56 }
  0xee   :  { %2397 = vmatpush1.bf16.msra.mxu0 %v3495_v62  ;;  %v1941_v62 = vrot.slane %v4567_v58, %v4570_v59 }
  0xef   :  { %1873 = vmatpush1.bf16.msra.mxu1 %v3402_v61  ;;  %2398 = vmatprep.subr.bf16.mxu0 %v3500_v0  ;;  %v1963_v0 = vrot.slane %v4575_v60, %v4562_v57 }
  0xf0   :  { %1874 = vmatprep.subr.bf16.mxu1 %v3407_v63 }
  0xf2   :  { %2399 = vmatpush1.bf16.msra.mxu0 %v3498_v2 }
  0xf3   :  { %1875 = vmatpush1.bf16.msra.mxu1 %v3405_v1  ;;  %2400 = vmatprep.subr.bf16.mxu0 %v3503_v4 }
  0xf4   :  { %1876 = vmatprep.subr.bf16.mxu1 %v3410_v3  ;;  %v1967_v3 = vrot.slane %v4575_v60, %v4570_v59 }
  0xf6   :  { %2401 = vmatpush1.bf16.msra.mxu0 %v3501_v8 }
  0xf7   :  { %1877 = vmatpush1.bf16.msra.mxu1 %v3408_v5  ;;  %2402 = vmatprep.subr.bf16.mxu0 %v3506_v25  ;;  %v3524_v25 = vld [vmem:[%s4755_s4 + $0x134] ss:$8 sps:$4 sm:$0xff]  }
  0xf8   :  { %1878 = vmatprep.subr.bf16.mxu1 %v3413_v9 }
  0xfa   :  { %2403 = vmatpush1.bf16.msra.mxu0 %v3504_v51  ;;  %v3522_v51 = vld [vmem:[%s4755_s4 + $0x130] ss:$8 sps:$4 sm:$0xff]  }
  0xfb   :  { %1879 = vmatpush1.bf16.msra.mxu1 %v3411_v10  ;;  %2404 = vmatprep.subr.bf16.mxu0 %v3509_v31  ;;  %v3530_v31 = vld [vmem:[%s4755_s4 + $0x154] ss:$8 sps:$4 sm:$0xff]  }
  0xfc   :  { %1880 = vmatprep.subr.bf16.mxu1 %v3416_v11 }
  0xfe   :  { %2405 = vmatpush1.bf16.msra.mxu0 %v3507_v32  ;;  %v3570_v32 = vld [vmem:[%s4758_s7 + $0x20] sm:$0xff]  }
  0xff   :  { %1881 = vmatpush1.bf16.msra.mxu1 %v3414_v12  ;;  %2406 = vmatprep.subr.bf16.mxu0 %v3512_v36  ;;  %v3533_v36 = vld [vmem:[%s4755_s4 + $0x164] ss:$8 sps:$4 sm:$0xff]  }
 0x100   :  { %1891 = vmatprep.subr.bf16.mxu1 %v3419_v14 }
 0x102   :  { %1883 = vmatmul.mubr.bf16.vlgmr.msra.gmra.mrb[4].mxu1 %v4053_v13  ;;  %v3428_v13 = vld [vmem:[%s4753_s1 + $0x66c] ss:$16 sps:$4 sm:$0xff]   ;;  %2407 = vmatpush1.bf16.msra.mxu0 %v3510_v37  ;;  %v3531_v37 = vld [vmem:[%s4755_s4 + $0x160] ss:$8 sps:$4 sm:$0xff]  }
 0x103   :  { %1892 = vmatpush1.bf16.msra.mxu1 %v3417_v15  ;;  %1923 = vmatprep.mubr.bf16.mxu1 %v4074_v19  ;;  %v3426_v19 = vld [vmem:[%s4753_s1 + $0x668] ss:$16 sps:$4 sm:$0xff]  }
 0x104   :  { %1893 = vmatprep.subr.bf16.mxu1 %v3422_v16  ;;  %2417 = vmatprep.subr.bf16.mxu0 %v3515_v40  ;;  %v3513_v16 = vld [vmem:[%s4755_s4 + $0x100] ss:$8 sps:$4 sm:$0xff]   ;;  %v3539_v40 = vld [vmem:[%s4755_s4 + $0x184] ss:$8 sps:$4 sm:$0xff]  }
 0x107   :  { %1894 = vmatpush1.bf16.msra.mxu1 %v3420_v17 }
 0x108   :  { %1895 = vmatprep.subr.bf16.mxu1 %v3425_v21  ;;  %v3518_v21 = vld [vmem:[%s4755_s4 + $0x114] ss:$8 sps:$4 sm:$0xff]  }
 0x10b   :  { %1896 = vmatpush1.bf16.msra.mxu1 %v3423_v22  ;;  %v3516_v22 = vld [vmem:[%s4755_s4 + $0x110] ss:$8 sps:$4 sm:$0xff]  }
 0x10c   :  { %1897 = vmatprep.subr.bf16.mxu1 %v3428_v13  ;;  %v3561_v13 = vld [vmem:[%s4758_s7 + $0x40] sm:$0xff]  }
 0x10f   :  { %1898 = vmatpush1.bf16.msra.mxu1 %v3426_v19  ;;  %v3521_v19 = vld [vmem:[%s4755_s4 + $0x124] ss:$8 sps:$4 sm:$0xff]  }
 0x110   :  { %1899 = vmatprep.subr.bf16.mxu1 %v3431_v18  ;;  %v3562_v18 = vld [vmem:[%s4758_s7] sm:$0xff]  }
 0x113   :  { %1900 = vmatpush1.bf16.msra.mxu1 %v3429_v6  ;;  %v3563_v6 = vld [vmem:[%s4758_s7 + $0x48] sm:$0xff]  }
 0x114   :  { %1901 = vmatprep.subr.bf16.mxu1 %v3434_v23  ;;  %v3564_v23 = vld [vmem:[%s4758_s7 + $0x8] sm:$0xff]  }
 0x115   :  { %v4479_v34 = vpop.f32.mrb[0].mxu1 }
 0x116   :  { %v4484_v26 = vpop.f32.mrb[1].mxu1 }
 0x117   :  { %v1642_v27 = vpop.f32.mrb[2].mxu1  ;;  %1902 = vmatpush1.bf16.msra.mxu1 %v3432_v7  ;;  %v3565_v7 = vld [vmem:[%s4758_s7 + $0x50] sm:$0xff]  }
 0x118   :  { %v1643_v29 = vpop.f32.mrb[3].mxu1  ;;  %1903 = vmatprep.subr.bf16.mxu1 %v3437_v24  ;;  %v3519_v24 = vld [vmem:[%s4755_s4 + $0x120] ss:$8 sps:$4 sm:$0xff]   ;;  %v3527_v27 = vld [vmem:[%s4755_s4 + $0x144] ss:$8 sps:$4 sm:$0xff]  }
 0x119   :  { %v3569_v29 = vld [vmem:[%s4758_s7 + $0x60] sm:$0xff]  }
 0x11b   :  { %1904 = vmatpush1.bf16.msra.mxu1 %v3435_v28  ;;  %v3568_v28 = vld [vmem:[%s4758_s7 + $0x18] sm:$0xff]  }
 0x11c   :  { %1905 = vmatprep.subr.bf16.mxu1 %v3440_v30  ;;  %v3525_v30 = vld [vmem:[%s4755_s4 + $0x140] ss:$8 sps:$4 sm:$0xff]  }
 0x11f   :  { %1906 = vmatpush1.bf16.msra.mxu1 %v3438_v33  ;;  %v3571_v33 = vld [vmem:[%s4758_s7 + $0x68] sm:$0xff]  }
 0x120   :  { %1907 = vmatprep.subr.bf16.mxu1 %v3443_v35  ;;  %v3528_v35 = vld [vmem:[%s4755_s4 + $0x150] ss:$8 sps:$4 sm:$0xff]  }
 0x123   :  { %1908 = vmatpush1.bf16.msra.mxu1 %v3441_v38  ;;  %v3536_v38 = vld [vmem:[%s4755_s4 + $0x174] ss:$8 sps:$4 sm:$0xff]  }
 0x124   :  { %1909 = vmatprep.subr.bf16.mxu1 %v3446_v39  ;;  %v3534_v39 = vld [vmem:[%s4755_s4 + $0x170] ss:$8 sps:$4 sm:$0xff]  }
 0x127   :  { %1910 = vmatpush1.bf16.msra.mxu1 %v3444_v41  ;;  %v3537_v41 = vld [vmem:[%s4755_s4 + $0x180] ss:$8 sps:$4 sm:$0xff]  }
 0x128   :  { %1911 = vmatprep.subr.bf16.mxu1 %v3449_v42  ;;  %v3542_v42 = vld [vmem:[%s4755_s4 + $0x194] ss:$8 sps:$4 sm:$0xff]  }
 0x12b   :  { %1912 = vmatpush1.bf16.msra.mxu1 %v3447_v43  ;;  %v3540_v43 = vld [vmem:[%s4755_s4 + $0x190] ss:$8 sps:$4 sm:$0xff]  }
 0x12c   :  { %1913 = vmatprep.subr.bf16.mxu1 %v3452_v44  ;;  %v3545_v44 = vld [vmem:[%s4755_s4 + $0x1a4] ss:$8 sps:$4 sm:$0xff]  }
 0x12f   :  { %1914 = vmatpush1.bf16.msra.mxu1 %v3450_v45  ;;  %v3543_v45 = vld [vmem:[%s4755_s4 + $0x1a0] ss:$8 sps:$4 sm:$0xff]  }
 0x130   :  { %1915 = vmatprep.subr.bf16.mxu1 %v3455_v46  ;;  %v3548_v46 = vld [vmem:[%s4755_s4 + $0x1b4] ss:$8 sps:$4 sm:$0xff]  }
 0x133   :  { %1916 = vmatpush1.bf16.msra.mxu1 %v3453_v47  ;;  %v3546_v47 = vld [vmem:[%s4755_s4 + $0x1b0] ss:$8 sps:$4 sm:$0xff]  }
 0x134   :  { %1917 = vmatprep.subr.bf16.mxu1 %v3458_v48  ;;  %v3551_v48 = vld [vmem:[%s4755_s4 + $0x1c4] ss:$8 sps:$4 sm:$0xff]  }
 0x137   :  { %1918 = vmatpush1.bf16.msra.mxu1 %v3456_v49  ;;  %v3549_v49 = vld [vmem:[%s4755_s4 + $0x1c0] ss:$8 sps:$4 sm:$0xff]  }
 0x138   :  { %1919 = vmatprep.subr.bf16.mxu1 %v3461_v50  ;;  %v3554_v50 = vld [vmem:[%s4755_s4 + $0x1d4] ss:$8 sps:$4 sm:$0xff]  }
 0x13b   :  { %1920 = vmatpush1.bf16.msra.mxu1 %v3459_v52  ;;  %v3552_v52 = vld [vmem:[%s4755_s4 + $0x1d0] ss:$8 sps:$4 sm:$0xff]  }
 0x13c   :  { %1921 = vmatprep.subr.bf16.mxu1 %v3464_v53  ;;  %v3557_v53 = vld [vmem:[%s4755_s4 + $0x1e4] ss:$8 sps:$4 sm:$0xff]  }
 0x13f   :  { %1922 = vmatpush1.bf16.msra.mxu1 %v3462_v54  ;;  %v3555_v54 = vld [vmem:[%s4755_s4 + $0x1e0] ss:$8 sps:$4 sm:$0xff]  }
 0x140   :  { %3025 = vmatprep.subr.bf16.mxu1 %v3561_v13  ;;  %v2458_v13 = vld [vmem:[%s4759_s5] sm:$0x3] }
 0x142   :  { %1924 = vmatmul.mubr.bf16.vlgmr.msra.gmra.mrb[4].mxu1 %v4259_v20  ;;  %v1937_v20 = vrot.slane %v4567_v58, %v4562_v57 }
 0x143   :  { %3026 = vmatpush3.bf16.msra.mxu1 %v3562_v18  ;;  %v2463_v18 = vrot.slane %v2458_v13, %v4562_v57 }
 0x144   :  { %3027 = vmatprep.subr.bf16.mxu1 %v3563_v6  ;;  %v2467_v6 = vrot.slane %v2458_v13, %v4570_v59 }
 0x147   :  { %3028 = vmatpush3.bf16.msra.mxu1 %v3564_v23 }
 0x148   :  { %3029 = vmatprep.subr.bf16.mxu1 %v3565_v7 }
 0x196   :  { %v1761_v61 = vpop.f32.mrb[0].mxu0 }
 0x197   :  { %v3047_v63 = vadd.f32 %v1761_v61, %v4479_v34  ;;  %v1763_v1 = vpop.f32.mrb[1].mxu0  ;;  %v3566_v34 = vld [vmem:[%s4758_s7 + $0x10] sm:$0xff]   ;;  %v1944_v61 = vsub.s32 2, %v4559_v56 }
 0x198   :  { %v3048_v2 = vadd.f32 %v1763_v1, %v4484_v26  ;;  %v1765_v4 = vpop.f32.mrb[2].mxu0  ;;  %v3567_v26 = vld [vmem:[%s4758_s7 + $0x58] sm:$0xff]   ;;  %3030 = vmatpush3.bf16.msra.mxu1 %v3566_v34 }
 0x199   :  { %v1954_v5 = vmul.f32 %v3047_v63, %v1937_v20  ;;  %v1766_v8 = vpop.f32.mrb[3].mxu0  ;;  %3031 = vmatprep.subr.bf16.mxu1 %v3567_v26  ;;  %v3558_v20 = vld [vmem:[%s4755_s4 + $0x1f0] ss:$8 sps:$4 sm:$0xff]   ;;  %v1945_v63 = vrot.slane %v4567_v58, %v1944_v61  ;;  %v1971_v1 = vrot.slane %v4575_v60, %v1944_v61 }
 0x19a   :  { %v1955_v9 = vmul.f32 %v3048_v2, %v1941_v62  ;;  %v1948_v62 = vsub.s32 3, %v4559_v56 }
 0x19b   :  { %v1980_v10 = vadd.f32 %v1963_v0, %v1954_v5 }
 0x19c   :  { %v1981_v11 = vadd.f32 %v1967_v3, %v1955_v9  ;;  %3032 = vmatpush3.bf16.msra.mxu1 %v3568_v28  ;;  %v1949_v0 = vrot.slane %v4567_v58, %v1948_v62  ;;  %v1975_v3 = vrot.slane %v4575_v60, %v1948_v62  ;;  %v3572_v58 = vld [vmem:[%s4758_s7 + $0x28] sm:$0xff]   ;;  %v3573_v60 = vld [vmem:[%s4758_s7 + $0x70] sm:$0xff]  }
 0x19d   :  { %v1984_v12 = vmax.f32 %v1980_v10, 0.0  ;;  %3033 = vmatprep.subr.bf16.mxu1 %v3569_v29 }
 0x19e   :  { %v1985_v14 = vmax.f32 %v1981_v11, 0.0 }
 0x19f   :  { %v1988_v17 = vpack.c.bf16 %v1984_v12, %v1984_v12 }
 0x1a0   :  { %v1989_v15 = vpack.c.bf16 %v1985_v14, %v1985_v14  ;;  %3034 = vmatpush3.bf16.msra.mxu1 %v3570_v32 }
 0x1a1   :  { %3035 = vmatprep.subr.bf16.mxu1 %v3571_v33 }
 0x1a2   :  { %2408 = vmatprep.mubr.bf16.mxu0 %v1989_v15 }
 0x1a3   :  { %2409 = vmatmul.mubr.bf16.vlgmr.msra.gmra.mrb[4].mxu0 %v1988_v17  ;;  %v3574_v17 = vld [vmem:[%s4758_s7 + $0x30] sm:$0xff]  }
 0x1a4   :  { %2418 = vmatpush1.bf16.msra.mxu0 %v3513_v16  ;;  %3036 = vmatpush3.bf16.msra.mxu1 %v3572_v58 }
 0x1a5   :  { %2419 = vmatprep.subr.bf16.mxu0 %v3518_v21  ;;  %3037 = vmatprep.subr.bf16.mxu1 %v3573_v60  ;;  %v3575_v21 = vld [vmem:[%s4758_s7 + $0x78] sm:$0xff]  }
 0x1a8   :  { %2420 = vmatpush1.bf16.msra.mxu0 %v3516_v22  ;;  %3038 = vmatpush3.bf16.msra.mxu1 %v3574_v17  ;;  %v3576_v22 = vld [vmem:[%s4758_s7 + $0x38] sm:$0xff]  }
 0x1a9   :  { %2421 = vmatprep.subr.bf16.mxu0 %v3521_v19  ;;  %3039 = vmatprep.subr.bf16.mxu1 %v3575_v21  ;;  %v2472_v19 = vld [vmem:[%s4760_s6] sm:$0x3] }
 0x1aa   :  { %v2477_v23 = vrot.slane %v2472_v19, %v4562_v57  ;;  %v3023_v57 = vld [vmem:[%s4761_s8] ss:$0 sm:$0xff] }
 0x1ac   :  { %2422 = vmatpush1.bf16.msra.mxu0 %v3519_v24  ;;  %3040 = vmatpush3.bf16.msra.mxu1 %v3576_v22  ;;  %v2481_v24 = vrot.slane %v2472_v19, %v4570_v59 }
 0x1ad   :  { %2423 = vmatprep.subr.bf16.mxu0 %v3524_v25 }
 0x1b0   :  { %2424 = vmatpush1.bf16.msra.mxu0 %v3522_v51 }
 0x1b1   :  { %2425 = vmatprep.subr.bf16.mxu0 %v3527_v27 }
 0x1b4   :  { %2426 = vmatpush1.bf16.msra.mxu0 %v3525_v30 }
 0x1b5   :  { %2427 = vmatprep.subr.bf16.mxu0 %v3530_v31 }
 0x1b8   :  { %2428 = vmatpush1.bf16.msra.mxu0 %v3528_v35 }
 0x1b9   :  { %2429 = vmatprep.subr.bf16.mxu0 %v3533_v36 }
 0x1bc   :  { %2430 = vmatpush1.bf16.msra.mxu0 %v3531_v37 }
 0x1bd   :  { %2431 = vmatprep.subr.bf16.mxu0 %v3536_v38  ;;  %v3024_v38 = vld [vmem:[%s4762_s9] ss:$0 sm:$0xff] }
 0x1c0   :  { %2432 = vmatpush1.bf16.msra.mxu0 %v3534_v39 }
 0x1c1   :  { %2433 = vmatprep.subr.bf16.mxu0 %v3539_v40 }
 0x1c4   :  { %2434 = vmatpush1.bf16.msra.mxu0 %v3537_v41 }
 0x1c5   :  { %2435 = vmatprep.subr.bf16.mxu0 %v3542_v42 }
 0x1c8   :  { %2436 = vmatpush1.bf16.msra.mxu0 %v3540_v43 }
 0x1c9   :  { %2437 = vmatprep.subr.bf16.mxu0 %v3545_v44 }
 0x1cc   :  { %2438 = vmatpush1.bf16.msra.mxu0 %v3543_v45 }
 0x1cd   :  { %2439 = vmatprep.subr.bf16.mxu0 %v3548_v46 }
 0x1d0   :  { %2440 = vmatpush1.bf16.msra.mxu0 %v3546_v47 }
 0x1d1   :  { %2441 = vmatprep.subr.bf16.mxu0 %v3551_v48 }
 0x1d4   :  { %2442 = vmatpush1.bf16.msra.mxu0 %v3549_v49 }
 0x1d5   :  { %2443 = vmatprep.subr.bf16.mxu0 %v3554_v50 }
 0x1d8   :  { %2444 = vmatpush1.bf16.msra.mxu0 %v3552_v52 }
 0x1d9   :  { %2445 = vmatprep.subr.bf16.mxu0 %v3557_v53 }
 0x1dc   :  { %2446 = vmatpush1.bf16.msra.mxu0 %v3555_v54 }
 0x1dd   :  { %2447 = vmatprep.subr.bf16.mxu0 %v3560_v55 }
 0x1e0   :  { %2448 = vmatpush1.bf16.msra.mxu0 %v3558_v20 }
 0x215   :  { %v1925_v2 = vpop.f32.mrb[4].mxu1 }
 0x216   :  { %v1956_v4 = vmul.f32 %v1945_v63, %v1925_v2  ;;  %v1927_v5 = vpop.f32.mrb[5].mxu1 }
 0x217   :  { %v1957_v8 = vmul.f32 %v1949_v0, %v1927_v5  ;;  %v1929_v9 = vpop.f32.mrb[6].mxu1 }
 0x218   :  { %v1982_v10 = vadd.f32 %v1971_v1, %v1956_v4  ;;  %v1930_v11 = vpop.f32.mrb[7].mxu1 }
 0x219   :  { %v1983_v12 = vadd.f32 %v1975_v3, %v1957_v8 }
 0x21a   :  { %v1986_v14 = vmax.f32 %v1982_v10, 0.0 }
 0x21b   :  { %v1987_v15 = vmax.f32 %v1983_v12, 0.0 }
 0x21c   :  { %v1990_v56 = vpack.c.bf16 %v1986_v14, %v1986_v14 }
 0x21d   :  { %v1991_v16 = vpack.c.bf16 %v1987_v15, %v1987_v15 }
 0x21f   :  { %2449 = vmatprep.mubr.bf16.mxu0 %v1991_v16 }
 0x220   :  { %2450 = vmatmul.mubr.bf16.vlgmr.msra.gmra.mrb[4].mxu0 %v1990_v56 }
 0x2f3   :  { %v2451_v7 = vpop.f32.mrb[4].mxu0 }
 0x2f4   :  { %v2470_v25 = vmul.f32 %v2463_v18, %v2451_v7  ;;  %v2453_v34 = vpop.f32.mrb[5].mxu0 }
 0x2f5   :  { %v2471_v51 = vmul.f32 %v2467_v6, %v2453_v34  ;;  %v2455_v26 = vpop.f32.mrb[6].mxu0 }
 0x2f6   :  { %v2484_v27 = vadd.f32 %v2477_v23, %v2470_v25  ;;  %v2456_v28 = vpop.f32.mrb[7].mxu0 }
 0x2f7   :  { %v2485_v29 = vadd.f32 %v2481_v24, %v2471_v51 }
 0x2f8   :  { %v2486_v30 = vmax.f32 %v2484_v27, 0.0 }
 0x2f9   :  { %v2487_v31 = vmax.f32 %v2485_v29, 0.0 }
 0x2fa   :  { %v2488_v33 = vpack.c.bf16 %v2486_v30, %v2486_v30 }
 0x2fb   :  { %v2489_v32 = vpack.c.bf16 %v2487_v31, %v2487_v31 }
 0x2fd   :  { %2650 = vmatprep.mubr.bf16.mxu1 %v2489_v32 }
 0x2fe   :  { %2651 = vmatmul.mubr.bf16.vlgmr.msra.gmra.mrb[8].mxu1 %v2488_v33 }
 0x3d1   :  { %v3041_v35 = vpop.f32.mrb[8].mxu1 }
 0x3d2   :  { %v3042_v36 = vpop.f32.mrb[9].mxu1 }
 0x3d3   :  { %v3043_v59 = vadd.f32 %v3042_v36, %v3041_v35  ;;  %v3044_v37 = vpop.f32.mrb[10].mxu1 }
 0x3d4   :  { %v3045_v39 = vpop.f32.mrb[11].mxu1 }
 0x3d5   :  { %v2665_v40 = vmul.f32 %v3043_v59, %v3023_v57 }
 0x3d7   :  { %v2673_v41 = vadd.f32 %v3024_v38, %v2665_v40 }
 0x3d9   :  { %2674 = vst [vmem:[%s4763_s10] sm:$0xff] %v2673_v41 }

// kernel: pointnet_forward.9
= control target key start
LH: loop header
LB: loop body
LE: loop exit
PB: predicated region body
PF: predicated region fallthrough
CT: control target
= control target key end

     0   :  { %15 = vsyncpa [#allocation3], 0  ;;  %s10101_s0 = inlined_call_operand.vmem [shape: bf16[8,1024], index: 0, kind: input, shape index: {}]   ;;  %s10102_s1 = inlined_call_operand.hbm [shape: bf16[1024,512], index: 1, kind: input, shape index: {}]   ;;  %s10103_s2 = inlined_call_operand.vmem [shape: f32[1,512], index: 2, kind: input, shape index: {}]   ;;  %s10104_s3 = inlined_call_operand.vmem [shape: f32[1,512], index: 3, kind: input, shape index: {}]   ;;  %s10105_s4 = inlined_call_operand.hbm [shape: bf16[512,256], index: 4, kind: input, shape index: {}]   ;;  %s10106_s5 = inlined_call_operand.vmem [shape: f32[1,256], index: 5, kind: input, shape index: {}]   ;;  %s10107_s6 = inlined_call_operand.vmem [shape: f32[1,256], index: 6, kind: input, shape index: {}]   ;;  %s10108_s7 = inlined_call_operand.vmem [shape: bf16[256,4096], index: 7, kind: input, shape index: {}]   ;;  %s10109_s8 = inlined_call_operand.vmem [shape: f32[1,4096], index: 8, kind: input, shape index: {}]   ;;  %s10110_s9 = inlined_call_operand.vmem [shape: f32[1,4096], index: 9, kind: input, shape index: {}]   ;;  %s10111_s10 = inlined_call_operand.vmem [shape: f32[8,4096], index: 10, kind: output, shape index: {}]  }
   0x1   :  { %16 = vsyncpa [#allocation5], 0  ;;  %s8095_s13 = smov [#allocation2]   ;;  %s8047_s17 = scalar_lea.hbm %s10102_s1, 32768 }
   0x2   :  { %s24_s14 = sshll.u32 %s8095_s13, 4  ;;  %p8048_p0 = scmp.ne.s32.totalorder %s10102_s1, %s8047_s17  ;;  %s25_s14 = int_to_ptr.vmem [resolvable:$true] %s24_s14 }
   0x3   :  { %p8051_p1 = scmp.lt.u32.totalorder %s8047_s17, %s10102_s1 }
   0x5   :  { %p8053_p2 = pnand %p8051_p1, %p8048_p0 }
   0x7   :  { %8056 = shalt.err (!%p8053_p2)
}
   0x8   :  { %s8057_s22 = scalar_lea.vmem %s25_s14, 32768  ;;  %p8062_p4 = scmp.lt.s32.totalorder %s25_s14, %s25_s14 }
   0x9   :  { %p8058_p3 = scmp.ne.s32.totalorder %s25_s14, %s8057_s22  ;;  %p8063_p5 = scmp.lt.s32.totalorder %s8057_s22, %s8057_s22 }
   0xb   :  { %p8064_p6 = por %p8063_p5, %p8062_p4 }
   0xd   :  { %p8065_p7 = pnand %p8064_p6, %p8058_p3 }
   0xf   :  { %8068 = shalt.err (!%p8065_p7)
}
  0x10   :  { %s8096_s23 = smov 256   ;;  %s8097_s24 = smov 16  }
  0x11   :  { %30 = dma.hbm_to_vmem [thread:$0]  %s10102_s1, 32768, %s25_s14, [#allocation3], %s8096_s23, %s8096_s23, %s8097_s24  }
  0x12   :  { %s8098_s27 = smov [#allocation4]   ;;  %s8069_s11 = scalar_lea.hbm %s10105_s4, 8192 }
  0x13   :  { %s40_s28 = sshll.u32 %s8098_s27, 4  ;;  %p8070_p8 = scmp.ne.s32.totalorder %s10105_s4, %s8069_s11  ;;  %s41_s28 = int_to_ptr.vmem [resolvable:$true] %s40_s28 }
  0x14   :  { %p8073_p9 = scmp.lt.u32.totalorder %s8069_s11, %s10105_s4 }
  0x16   :  { %p8075_p10 = pnand %p8073_p9, %p8070_p8 }
  0x18   :  { %8078 = shalt.err (!%p8075_p10)
}
  0x19   :  { %s8079_s17 = scalar_lea.vmem %s41_s28, 8192  ;;  %p8084_p12 = scmp.lt.s32.totalorder %s41_s28, %s41_s28 }
  0x1a   :  { %p8080_p11 = scmp.ne.s32.totalorder %s41_s28, %s8079_s17  ;;  %p8085_p13 = scmp.lt.s32.totalorder %s8079_s17, %s8079_s17 }
  0x1c   :  { %p8086_p0 = por %p8085_p13, %p8084_p12 }
  0x1e   :  { %p8087_p1 = pnand %p8086_p0, %p8080_p11 }
  0x20   :  { %8090 = shalt.err (!%p8087_p1)
}
  0x21   :  { %s8099_s1 = smov 128   ;;  %s8100_s14 = smov 8  }
  0x22   :  { %46 = dma.hbm_to_vmem [thread:$0]  %s10105_s4, 8192, %s41_s28, [#allocation5], %s8099_s1, %s8099_s1, %s8100_s14  }
  0x23   :  { %8091 = dma.done.wait [#allocation3], 32768  }
  0x24   :  { %8092 = vsyncadd [#allocation3], 4294934528 }
  0x25   :  { %8093 = dma.done.wait [#allocation5], 8192  }
  0x26   :  { %8094 = vsyncadd [#allocation5], 4294959104  ;;  %v7557_v0 = vld [vmem:[#allocation2 + $0x4] ss:$16 sps:$4 sm:$0xff]   ;;  %v7559_v1 = vld [vmem:[#allocation2 + $0xc] ss:$16 sps:$4 sm:$0xff]  }
  0x27   :  { %1631 = vmatprep.subr.bf16.mxu0 %v7557_v0  ;;  %v7561_v2 = vld [vmem:[#allocation2] ss:$16 sps:$4 sm:$0xff]   ;;  %v7562_v3 = vld [vmem:[#allocation2 + $0x8] ss:$16 sps:$4 sm:$0xff]   ;;  %1795 = vmatprep.subr.bf16.mxu1 %v7559_v1  ;;  %v7563_v4 = vld [vmem:[#allocation2 + $0x24] ss:$16 sps:$4 sm:$0xff]  }
  0x28   :  { %1632 = vmatpush1.bf16.msra.mxu0 %v7561_v2  ;;  %1796 = vmatpush1.bf16.msra.mxu1 %v7562_v3  ;;  %v7565_v5 = vld [vmem:[#allocation2 + $0x2c] ss:$16 sps:$4 sm:$0xff]   ;;  %v7567_v6 = vld [vmem:[#allocation2 + $0x20] ss:$16 sps:$4 sm:$0xff]   ;;  %v7568_v7 = vld [vmem:[#allocation2 + $0x28] ss:$16 sps:$4 sm:$0xff]  }
  0x29   :  { %1633 = vmatprep.subr.bf16.mxu0 %v7563_v4  ;;  %1797 = vmatprep.subr.bf16.mxu1 %v7565_v5  ;;  %v7569_v8 = vld [vmem:[#allocation2 + $0x44] ss:$16 sps:$4 sm:$0xff]   ;;  %v7571_v9 = vld [vmem:[#allocation2 + $0x4c] ss:$16 sps:$4 sm:$0xff]   ;;  %v7573_v10 = vld [vmem:[#allocation2 + $0x40] ss:$16 sps:$4 sm:$0xff]  }
  0x2a   :  { %v7574_v11 = vld [vmem:[#allocation2 + $0x48] ss:$16 sps:$4 sm:$0xff]   ;;  %v7575_v12 = vld [vmem:[#allocation2 + $0x64] ss:$16 sps:$4 sm:$0xff]   ;;  %v7577_v13 = vld [vmem:[#allocation2 + $0x6c] ss:$16 sps:$4 sm:$0xff]  }
  0x2b   :  { %v7579_v14 = vld [vmem:[#allocation2 + $0x60] ss:$16 sps:$4 sm:$0xff]   ;;  %v7580_v15 = vld [vmem:[#allocation2 + $0x68] ss:$16 sps:$4 sm:$0xff]   ;;  %v7581_v16 = vld [vmem:[#allocation2 + $0x84] ss:$16 sps:$4 sm:$0xff]  }
  0x2c   :  { %1634 = vmatpush1.bf16.msra.mxu0 %v7567_v6  ;;  %1798 = vmatpush1.bf16.msra.mxu1 %v7568_v7  ;;  %v7583_v17 = vld [vmem:[#allocation2 + $0x8c] ss:$16 sps:$4 sm:$0xff]   ;;  %v7585_v18 = vld [vmem:[#allocation2 + $0x80] ss:$16 sps:$4 sm:$0xff]   ;;  %v7586_v19 = vld [vmem:[#allocation2 + $0x88] ss:$16 sps:$4 sm:$0xff]  }
  0x2d   :  { %1635 = vmatprep.subr.bf16.mxu0 %v7569_v8  ;;  %1799 = vmatprep.subr.bf16.mxu1 %v7571_v9  ;;  %v7587_v20 = vld [vmem:[#allocation2 + $0xa4] ss:$16 sps:$4 sm:$0xff]   ;;  %v7589_v21 = vld [vmem:[#allocation2 + $0xac] ss:$16 sps:$4 sm:$0xff]   ;;  %v7591_v22 = vld [vmem:[#allocation2 + $0xa0] ss:$16 sps:$4 sm:$0xff]  }
  0x2e   :  { %v7592_v23 = vld [vmem:[#allocation2 + $0xa8] ss:$16 sps:$4 sm:$0xff]   ;;  %v7593_v24 = vld [vmem:[#allocation2 + $0xc4] ss:$16 sps:$4 sm:$0xff]   ;;  %v7595_v25 = vld [vmem:[#allocation2 + $0xcc] ss:$16 sps:$4 sm:$0xff]  }
  0x2f   :  { %v7597_v26 = vld [vmem:[#allocation2 + $0xc0] ss:$16 sps:$4 sm:$0xff]   ;;  %v7598_v27 = vld [vmem:[#allocation2 + $0xc8] ss:$16 sps:$4 sm:$0xff]   ;;  %v7599_v28 = vld [vmem:[#allocation2 + $0xe4] ss:$16 sps:$4 sm:$0xff]  }
  0x30   :  { %1636 = vmatpush1.bf16.msra.mxu0 %v7573_v10  ;;  %1800 = vmatpush1.bf16.msra.mxu1 %v7574_v11  ;;  %v7601_v29 = vld [vmem:[#allocation2 + $0xec] ss:$16 sps:$4 sm:$0xff]   ;;  %v7603_v30 = vld [vmem:[#allocation2 + $0xe0] ss:$16 sps:$4 sm:$0xff]   ;;  %v7604_v31 = vld [vmem:[#allocation2 + $0xe8] ss:$16 sps:$4 sm:$0xff]  }
  0x31   :  { %1637 = vmatprep.subr.bf16.mxu0 %v7575_v12  ;;  %1801 = vmatprep.subr.bf16.mxu1 %v7577_v13  ;;  %v7605_v32 = vld [vmem:[#allocation2 + $0x104] ss:$16 sps:$4 sm:$0xff]   ;;  %v7607_v33 = vld [vmem:[#allocation2 + $0x10c] ss:$16 sps:$4 sm:$0xff]   ;;  %v7609_v34 = vld [vmem:[#allocation2 + $0x100] ss:$16 sps:$4 sm:$0xff]  }
  0x32   :  { %v7610_v35 = vld [vmem:[#allocation2 + $0x108] ss:$16 sps:$4 sm:$0xff]   ;;  %v7611_v36 = vld [vmem:[#allocation2 + $0x124] ss:$16 sps:$4 sm:$0xff]   ;;  %v7613_v37 = vld [vmem:[#allocation2 + $0x12c] ss:$16 sps:$4 sm:$0xff]  }
  0x33   :  { %v7615_v38 = vld [vmem:[#allocation2 + $0x120] ss:$16 sps:$4 sm:$0xff]   ;;  %v7616_v39 = vld [vmem:[#allocation2 + $0x128] ss:$16 sps:$4 sm:$0xff]   ;;  %v7617_v40 = vld [vmem:[#allocation2 + $0x144] ss:$16 sps:$4 sm:$0xff]  }
  0x34   :  { %1638 = vmatpush1.bf16.msra.mxu0 %v7579_v14  ;;  %1802 = vmatpush1.bf16.msra.mxu1 %v7580_v15  ;;  %v7619_v41 = vld [vmem:[#allocation2 + $0x14c] ss:$16 sps:$4 sm:$0xff]   ;;  %v7621_v42 = vld [vmem:[#allocation2 + $0x140] ss:$16 sps:$4 sm:$0xff]   ;;  %v7622_v43 = vld [vmem:[#allocation2 + $0x148] ss:$16 sps:$4 sm:$0xff]  }
  0x35   :  { %1639 = vmatprep.subr.bf16.mxu0 %v7581_v16  ;;  %1803 = vmatprep.subr.bf16.mxu1 %v7583_v17  ;;  %v7623_v44 = vld [vmem:[#allocation2 + $0x164] ss:$16 sps:$4 sm:$0xff]   ;;  %v7625_v45 = vld [vmem:[#allocation2 + $0x16c] ss:$16 sps:$4 sm:$0xff]   ;;  %v7627_v47 = vld [vmem:[#allocation2 + $0x160] ss:$16 sps:$4 sm:$0xff]  }
  0x36   :  { %v63_v46 = vld [vmem:[%s10101_s0] sm:$0xff]  ;;  %v7628_v49 = vld [vmem:[#allocation2 + $0x168] ss:$16 sps:$4 sm:$0xff]   ;;  %v7631_v51 = vld [vmem:[#allocation2 + $0x18c] ss:$16 sps:$4 sm:$0xff]  }
  0x37   :  { %v6684_v48 = vcombine.high %v63_v46, %v63_v46  ;;  %v7629_v50 = vld [vmem:[#allocation2 + $0x184] ss:$16 sps:$4 sm:$0xff]   ;;  %v7633_v52 = vld [vmem:[#allocation2 + $0x180] ss:$16 sps:$4 sm:$0xff]   ;;  %v7634_v53 = vld [vmem:[#allocation2 + $0x188] ss:$16 sps:$4 sm:$0xff]   ;;  %v6683_v4 = vcombine.low %v63_v46, %v63_v46 }
  0x38   :  { %1640 = vmatpush1.bf16.msra.mxu0 %v7585_v18  ;;  %1804 = vmatpush1.bf16.msra.mxu1 %v7586_v19  ;;  %v7635_v54 = vld [vmem:[#allocation2 + $0x1a4] ss:$16 sps:$4 sm:$0xff]   ;;  %v7637_v55 = vld [vmem:[#allocation2 + $0x1ac] ss:$16 sps:$4 sm:$0xff]   ;;  %v7639_v56 = vld [vmem:[#allocation2 + $0x1a0] ss:$16 sps:$4 sm:$0xff]  }
  0x39   :  { %1641 = vmatprep.subr.bf16.mxu0 %v7587_v20  ;;  %1805 = vmatprep.subr.bf16.mxu1 %v7589_v21  ;;  %v7640_v57 = vld [vmem:[#allocation2 + $0x1a8] ss:$16 sps:$4 sm:$0xff]   ;;  %v7641_v58 = vld [vmem:[#allocation2 + $0x1c4] ss:$16 sps:$4 sm:$0xff]   ;;  %v7643_v59 = vld [vmem:[#allocation2 + $0x1cc] ss:$16 sps:$4 sm:$0xff]  }
  0x3a   :  { %1663 = vmatprep.mubr.bf16.mxu0 %v6684_v48  ;;  %1827 = vmatprep.mubr.bf16.mxu1 %v6684_v48  ;;  %v7645_v60 = vld [vmem:[#allocation2 + $0x1c0] ss:$16 sps:$4 sm:$0xff]   ;;  %v7646_v61 = vld [vmem:[#allocation2 + $0x1c8] ss:$16 sps:$4 sm:$0xff]   ;;  %v7647_v62 = vld [vmem:[#allocation2 + $0x1e4] ss:$16 sps:$4 sm:$0xff]  }
  0x3b   :  { %v7649_v63 = vld [vmem:[#allocation2 + $0x1ec] ss:$16 sps:$4 sm:$0xff]   ;;  %v7651_v0 = vld [vmem:[#allocation2 + $0x1e0] ss:$16 sps:$4 sm:$0xff]   ;;  %v7652_v1 = vld [vmem:[#allocation2 + $0x1e8] ss:$16 sps:$4 sm:$0xff]  }
  0x3c   :  { %1642 = vmatpush1.bf16.msra.mxu0 %v7591_v22  ;;  %1806 = vmatpush1.bf16.msra.mxu1 %v7592_v23  ;;  %v7657_v2 = vld [vmem:[#allocation2 + $0x204] ss:$16 sps:$4 sm:$0xff]   ;;  %v7660_v3 = vld [vmem:[#allocation2 + $0x20c] ss:$16 sps:$4 sm:$0xff]   ;;  %v7655_v5 = vld [vmem:[#allocation2 + $0x200] ss:$16 sps:$4 sm:$0xff]  }
  0x3d   :  { %1643 = vmatprep.subr.bf16.mxu0 %v7593_v24  ;;  %1807 = vmatprep.subr.bf16.mxu1 %v7595_v25  ;;  %v7658_v6 = vld [vmem:[#allocation2 + $0x208] ss:$16 sps:$4 sm:$0xff]   ;;  %v7663_v7 = vld [vmem:[#allocation2 + $0x224] ss:$16 sps:$4 sm:$0xff]   ;;  %v7666_v8 = vld [vmem:[#allocation2 + $0x22c] ss:$16 sps:$4 sm:$0xff]  }
  0x3e   :  { %v7661_v9 = vld [vmem:[#allocation2 + $0x220] ss:$16 sps:$4 sm:$0xff]   ;;  %v7664_v10 = vld [vmem:[#allocation2 + $0x228] ss:$16 sps:$4 sm:$0xff]   ;;  %v7669_v11 = vld [vmem:[#allocation2 + $0x244] ss:$16 sps:$4 sm:$0xff]  }
  0x3f   :  { %v7672_v12 = vld [vmem:[#allocation2 + $0x24c] ss:$16 sps:$4 sm:$0xff]   ;;  %v7667_v13 = vld [vmem:[#allocation2 + $0x240] ss:$16 sps:$4 sm:$0xff]   ;;  %v7670_v14 = vld [vmem:[#allocation2 + $0x248] ss:$16 sps:$4 sm:$0xff]  }
  0x40   :  { %1644 = vmatpush1.bf16.msra.mxu0 %v7597_v26  ;;  %1808 = vmatpush1.bf16.msra.mxu1 %v7598_v27  ;;  %v7675_v15 = vld [vmem:[#allocation2 + $0x264] ss:$16 sps:$4 sm:$0xff]   ;;  %v7678_v16 = vld [vmem:[#allocation2 + $0x26c] ss:$16 sps:$4 sm:$0xff]   ;;  %v7673_v17 = vld [vmem:[#allocation2 + $0x260] ss:$16 sps:$4 sm:$0xff]  }
  0x41   :  { %1645 = vmatprep.subr.bf16.mxu0 %v7599_v28  ;;  %1809 = vmatprep.subr.bf16.mxu1 %v7601_v29  ;;  %v7676_v18 = vld [vmem:[#allocation2 + $0x268] ss:$16 sps:$4 sm:$0xff]   ;;  %v7681_v19 = vld [vmem:[#allocation2 + $0x284] ss:$16 sps:$4 sm:$0xff]   ;;  %v7684_v20 = vld [vmem:[#allocation2 + $0x28c] ss:$16 sps:$4 sm:$0xff]  }
  0x42   :  { %v7679_v21 = vld [vmem:[#allocation2 + $0x280] ss:$16 sps:$4 sm:$0xff]   ;;  %v7682_v22 = vld [vmem:[#allocation2 + $0x288] ss:$16 sps:$4 sm:$0xff]   ;;  %v7687_v23 = vld [vmem:[#allocation2 + $0x2a4] ss:$16 sps:$4 sm:$0xff]  }
  0x43   :  { %v7690_v24 = vld [vmem:[#allocation2 + $0x2ac] ss:$16 sps:$4 sm:$0xff]   ;;  %v7685_v25 = vld [vmem:[#allocation2 + $0x2a0] ss:$16 sps:$4 sm:$0xff]   ;;  %v7688_v26 = vld [vmem:[#allocation2 + $0x2a8] ss:$16 sps:$4 sm:$0xff]  }
  0x44   :  { %1646 = vmatpush1.bf16.msra.mxu0 %v7603_v30  ;;  %1810 = vmatpush1.bf16.msra.mxu1 %v7604_v31  ;;  %v7693_v27 = vld [vmem:[#allocation2 + $0x2c4] ss:$16 sps:$4 sm:$0xff]   ;;  %v7696_v28 = vld [vmem:[#allocation2 + $0x2cc] ss:$16 sps:$4 sm:$0xff]   ;;  %v7691_v31 = vld [vmem:[#allocation2 + $0x2c0] ss:$16 sps:$4 sm:$0xff]  }
  0x45   :  { %1647 = vmatprep.subr.bf16.mxu0 %v7605_v32  ;;  %1811 = vmatprep.subr.bf16.mxu1 %v7607_v33  ;;  %v8186_v29 = vld [vmem:[%s10101_s0 + $0x8] sm:$0xff]  ;;  %v7699_v33 = vld [vmem:[#allocation2 + $0x2e4] ss:$16 sps:$4 sm:$0xff]  }
  0x46   :  { %v6686_v30 = vcombine.high %v8186_v29, %v8186_v29  ;;  %v7694_v32 = vld [vmem:[#allocation2 + $0x2c8] ss:$16 sps:$4 sm:$0xff]   ;;  %v7720_v46 = vld [vmem:[#allocation2 + $0x34c] ss:$16 sps:$4 sm:$0xff]  }
  0x47   :  { %v7718_v48 = vld [vmem:[#allocation2 + $0x348] ss:$16 sps:$4 sm:$0xff]  }
  0x48   :  { %1648 = vmatpush1.bf16.msra.mxu0 %v7609_v34  ;;  %1812 = vmatpush1.bf16.msra.mxu1 %v7610_v35  ;;  %v7702_v34 = vld [vmem:[#allocation2 + $0x2ec] ss:$16 sps:$4 sm:$0xff]   ;;  %v7697_v35 = vld [vmem:[#allocation2 + $0x2e0] ss:$16 sps:$4 sm:$0xff]  }
  0x49   :  { %1649 = vmatprep.subr.bf16.mxu0 %v7611_v36  ;;  %1813 = vmatprep.subr.bf16.mxu1 %v7613_v37  ;;  %v7700_v36 = vld [vmem:[#allocation2 + $0x2e8] ss:$16 sps:$4 sm:$0xff]   ;;  %v7705_v37 = vld [vmem:[#allocation2 + $0x304] ss:$16 sps:$4 sm:$0xff]  }
  0x4c   :  { %1650 = vmatpush1.bf16.msra.mxu0 %v7615_v38  ;;  %1814 = vmatpush1.bf16.msra.mxu1 %v7616_v39  ;;  %v7708_v38 = vld [vmem:[#allocation2 + $0x30c] ss:$16 sps:$4 sm:$0xff]   ;;  %v7703_v39 = vld [vmem:[#allocation2 + $0x300] ss:$16 sps:$4 sm:$0xff]  }
  0x4d   :  { %1651 = vmatprep.subr.bf16.mxu0 %v7617_v40  ;;  %1815 = vmatprep.subr.bf16.mxu1 %v7619_v41  ;;  %v7706_v40 = vld [vmem:[#allocation2 + $0x308] ss:$16 sps:$4 sm:$0xff]   ;;  %v7711_v41 = vld [vmem:[#allocation2 + $0x324] ss:$16 sps:$4 sm:$0xff]  }
  0x50   :  { %1652 = vmatpush1.bf16.msra.mxu0 %v7621_v42  ;;  %1816 = vmatpush1.bf16.msra.mxu1 %v7622_v43  ;;  %v7714_v42 = vld [vmem:[#allocation2 + $0x32c] ss:$16 sps:$4 sm:$0xff]   ;;  %v7709_v43 = vld [vmem:[#allocation2 + $0x320] ss:$16 sps:$4 sm:$0xff]  }
  0x51   :  { %1653 = vmatprep.subr.bf16.mxu0 %v7623_v44  ;;  %1817 = vmatprep.subr.bf16.mxu1 %v7625_v45  ;;  %v7712_v44 = vld [vmem:[#allocation2 + $0x328] ss:$16 sps:$4 sm:$0xff]   ;;  %v7717_v45 = vld [vmem:[#allocation2 + $0x344] ss:$16 sps:$4 sm:$0xff]  }
  0x54   :  { %1654 = vmatpush1.bf16.msra.mxu0 %v7627_v47  ;;  %1818 = vmatpush1.bf16.msra.mxu1 %v7628_v49  ;;  %v7715_v47 = vld [vmem:[#allocation2 + $0x340] ss:$16 sps:$4 sm:$0xff]   ;;  %v7723_v49 = vld [vmem:[#allocation2 + $0x364] ss:$16 sps:$4 sm:$0xff]  }
  0x55   :  { %1655 = vmatprep.subr.bf16.mxu0 %v7629_v50  ;;  %1819 = vmatprep.subr.bf16.mxu1 %v7631_v51  ;;  %v7726_v50 = vld [vmem:[#allocation2 + $0x36c] ss:$16 sps:$4 sm:$0xff]   ;;  %v7721_v51 = vld [vmem:[#allocation2 + $0x360] ss:$16 sps:$4 sm:$0xff]  }
  0x58   :  { %1656 = vmatpush1.bf16.msra.mxu0 %v7633_v52  ;;  %1820 = vmatpush1.bf16.msra.mxu1 %v7634_v53  ;;  %v7724_v52 = vld [vmem:[#allocation2 + $0x368] ss:$16 sps:$4 sm:$0xff]   ;;  %v7729_v53 = vld [vmem:[#allocation2 + $0x384] ss:$16 sps:$4 sm:$0xff]  }
  0x59   :  { %1657 = vmatprep.subr.bf16.mxu0 %v7635_v54  ;;  %1821 = vmatprep.subr.bf16.mxu1 %v7637_v55  ;;  %v7732_v54 = vld [vmem:[#allocation2 + $0x38c] ss:$16 sps:$4 sm:$0xff]   ;;  %v7727_v55 = vld [vmem:[#allocation2 + $0x380] ss:$16 sps:$4 sm:$0xff]  }
  0x5c   :  { %1658 = vmatpush1.bf16.msra.mxu0 %v7639_v56  ;;  %1822 = vmatpush1.bf16.msra.mxu1 %v7640_v57  ;;  %v7730_v56 = vld [vmem:[#allocation2 + $0x388] ss:$16 sps:$4 sm:$0xff]   ;;  %v7735_v57 = vld [vmem:[#allocation2 + $0x3a4] ss:$16 sps:$4 sm:$0xff]  }
  0x5d   :  { %1659 = vmatprep.subr.bf16.mxu0 %v7641_v58  ;;  %1823 = vmatprep.subr.bf16.mxu1 %v7643_v59  ;;  %v7738_v58 = vld [vmem:[#allocation2 + $0x3ac] ss:$16 sps:$4 sm:$0xff]   ;;  %v7733_v59 = vld [vmem:[#allocation2 + $0x3a0] ss:$16 sps:$4 sm:$0xff]  }
  0x60   :  { %1660 = vmatpush1.bf16.msra.mxu0 %v7645_v60  ;;  %1824 = vmatpush1.bf16.msra.mxu1 %v7646_v61  ;;  %v7736_v60 = vld [vmem:[#allocation2 + $0x3a8] ss:$16 sps:$4 sm:$0xff]   ;;  %v7741_v61 = vld [vmem:[#allocation2 + $0x3c4] ss:$16 sps:$4 sm:$0xff]  }
  0x61   :  { %1661 = vmatprep.subr.bf16.mxu0 %v7647_v62  ;;  %1825 = vmatprep.subr.bf16.mxu1 %v7649_v63  ;;  %v7744_v62 = vld [vmem:[#allocation2 + $0x3cc] ss:$16 sps:$4 sm:$0xff]   ;;  %v7739_v63 = vld [vmem:[#allocation2 + $0x3c0] ss:$16 sps:$4 sm:$0xff]  }
  0x64   :  { %1662 = vmatpush1.bf16.msra.mxu0 %v7651_v0  ;;  %1826 = vmatpush1.bf16.msra.mxu1 %v7652_v1  ;;  %v7742_v0 = vld [vmem:[#allocation2 + $0x3c8] ss:$16 sps:$4 sm:$0xff]   ;;  %v7747_v1 = vld [vmem:[#allocation2 + $0x3e4] ss:$16 sps:$4 sm:$0xff]  }
  0x65   :  { %1672 = vmatprep.subr.bf16.mxu0 %v7657_v2  ;;  %1836 = vmatprep.subr.bf16.mxu1 %v7660_v3  ;;  %v7750_v2 = vld [vmem:[#allocation2 + $0x3ec] ss:$16 sps:$4 sm:$0xff]   ;;  %v7745_v3 = vld [vmem:[#allocation2 + $0x3e0] ss:$16 sps:$4 sm:$0xff]  }
  0x67   :  { %1664 = vmatmul.mubr.bf16.vlgmr.msra.gmra.mrb[0].mxu0 %v6683_v4  ;;  %1828 = vmatmul.mubr.bf16.vlgmr.msra.gmra.mrb[0].mxu1 %v6683_v4  ;;  %v7748_v4 = vld [vmem:[#allocation2 + $0x3e8] ss:$16 sps:$4 sm:$0xff]  }
  0x68   :  { %1673 = vmatpush1.bf16.msra.mxu0 %v7655_v5  ;;  %1837 = vmatpush1.bf16.msra.mxu1 %v7658_v6  ;;  %v7755_v5 = vld [vmem:[#allocation2 + $0x404] ss:$16 sps:$4 sm:$0xff]   ;;  %v7758_v6 = vld [vmem:[#allocation2 + $0x40c] ss:$16 sps:$4 sm:$0xff]  }
  0x69   :  { %1674 = vmatprep.subr.bf16.mxu0 %v7663_v7  ;;  %1838 = vmatprep.subr.bf16.mxu1 %v7666_v8  ;;  %v6685_v7 = vcombine.low %v8186_v29, %v8186_v29  ;;  %v7753_v8 = vld [vmem:[#allocation2 + $0x400] ss:$16 sps:$4 sm:$0xff]   ;;  %v7788_v29 = vld [vmem:[#allocation2 + $0x4ac] ss:$16 sps:$4 sm:$0xff]  }
  0x6a   :  { %1704 = vmatprep.mubr.bf16.mxu0 %v6686_v30  ;;  %1868 = vmatprep.mubr.bf16.mxu1 %v6686_v30  ;;  %v7783_v30 = vld [vmem:[#allocation2 + $0x4a0] ss:$16 sps:$4 sm:$0xff]  }
  0x6c   :  { %1675 = vmatpush1.bf16.msra.mxu0 %v7661_v9  ;;  %1839 = vmatpush1.bf16.msra.mxu1 %v7664_v10  ;;  %v7756_v9 = vld [vmem:[#allocation2 + $0x408] ss:$16 sps:$4 sm:$0xff]   ;;  %v7761_v10 = vld [vmem:[#allocation2 + $0x424] ss:$16 sps:$4 sm:$0xff]  }
  0x6d   :  { %1676 = vmatprep.subr.bf16.mxu0 %v7669_v11  ;;  %1840 = vmatprep.subr.bf16.mxu1 %v7672_v12  ;;  %v8195_v11 = vld [vmem:[%s10101_s0 + $0x10] sm:$0xff]  ;;  %v7764_v12 = vld [vmem:[#allocation2 + $0x42c] ss:$16 sps:$4 sm:$0xff]  }
  0x70   :  { %1677 = vmatpush1.bf16.msra.mxu0 %v7667_v13  ;;  %1841 = vmatpush1.bf16.msra.mxu1 %v7670_v14  ;;  %v6688_v13 = vcombine.high %v8195_v11, %v8195_v11  ;;  %v7759_v14 = vld [vmem:[#allocation2 + $0x420] ss:$16 sps:$4 sm:$0xff]  }
  0x71   :  { %1678 = vmatprep.subr.bf16.mxu0 %v7675_v15  ;;  %1842 = vmatprep.subr.bf16.mxu1 %v7678_v16  ;;  %v7762_v15 = vld [vmem:[#allocation2 + $0x428] ss:$16 sps:$4 sm:$0xff]   ;;  %v7767_v16 = vld [vmem:[#allocation2 + $0x444] ss:$16 sps:$4 sm:$0xff]  }
  0x74   :  { %1679 = vmatpush1.bf16.msra.mxu0 %v7673_v17  ;;  %1843 = vmatpush1.bf16.msra.mxu1 %v7676_v18  ;;  %v7770_v17 = vld [vmem:[#allocation2 + $0x44c] ss:$16 sps:$4 sm:$0xff]   ;;  %v7765_v18 = vld [vmem:[#allocation2 + $0x440] ss:$16 sps:$4 sm:$0xff]  }
  0x75   :  { %1680 = vmatprep.subr.bf16.mxu0 %v7681_v19  ;;  %1844 = vmatprep.subr.bf16.mxu1 %v7684_v20  ;;  %v7768_v19 = vld [vmem:[#allocation2 + $0x448] ss:$16 sps:$4 sm:$0xff]   ;;  %v7773_v20 = vld [vmem:[#allocation2 + $0x464] ss:$16 sps:$4 sm:$0xff]  }
  0x78   :  { %1681 = vmatpush1.bf16.msra.mxu0 %v7679_v21  ;;  %1845 = vmatpush1.bf16.msra.mxu1 %v7682_v22  ;;  %v7776_v21 = vld [vmem:[#allocation2 + $0x46c] ss:$16 sps:$4 sm:$0xff]   ;;  %v7771_v22 = vld [vmem:[#allocation2 + $0x460] ss:$16 sps:$4 sm:$0xff]  }
  0x79   :  { %1682 = vmatprep.subr.bf16.mxu0 %v7687_v23  ;;  %1846 = vmatprep.subr.bf16.mxu1 %v7690_v24  ;;  %v7774_v23 = vld [vmem:[#allocation2 + $0x468] ss:$16 sps:$4 sm:$0xff]   ;;  %v7779_v24 = vld [vmem:[#allocation2 + $0x484] ss:$16 sps:$4 sm:$0xff]  }
  0x7c   :  { %1683 = vmatpush1.bf16.msra.mxu0 %v7685_v25  ;;  %1847 = vmatpush1.bf16.msra.mxu1 %v7688_v26  ;;  %v7782_v25 = vld [vmem:[#allocation2 + $0x48c] ss:$16 sps:$4 sm:$0xff]   ;;  %v7777_v26 = vld [vmem:[#allocation2 + $0x480] ss:$16 sps:$4 sm:$0xff]  }
  0x7d   :  { %1684 = vmatprep.subr.bf16.mxu0 %v7693_v27  ;;  %1848 = vmatprep.subr.bf16.mxu1 %v7696_v28  ;;  %v7780_v27 = vld [vmem:[#allocation2 + $0x488] ss:$16 sps:$4 sm:$0xff]   ;;  %v7785_v28 = vld [vmem:[#allocation2 + $0x4a4] ss:$16 sps:$4 sm:$0xff]  }
  0x80   :  { %1685 = vmatpush1.bf16.msra.mxu0 %v7691_v31  ;;  %1849 = vmatpush1.bf16.msra.mxu1 %v7694_v32  ;;  %v7786_v31 = vld [vmem:[#allocation2 + $0x4a8] ss:$16 sps:$4 sm:$0xff]   ;;  %v7791_v32 = vld [vmem:[#allocation2 + $0x4c4] ss:$16 sps:$4 sm:$0xff]  }
  0x81   :  { %1686 = vmatprep.subr.bf16.mxu0 %v7699_v33  ;;  %1850 = vmatprep.subr.bf16.mxu1 %v7702_v34  ;;  %v7794_v33 = vld [vmem:[#allocation2 + $0x4cc] ss:$16 sps:$4 sm:$0xff]   ;;  %v7789_v34 = vld [vmem:[#allocation2 + $0x4c0] ss:$16 sps:$4 sm:$0xff]  }
  0x84   :  { %1687 = vmatpush1.bf16.msra.mxu0 %v7697_v35  ;;  %1851 = vmatpush1.bf16.msra.mxu1 %v7700_v36  ;;  %v7792_v35 = vld [vmem:[#allocation2 + $0x4c8] ss:$16 sps:$4 sm:$0xff]   ;;  %v7797_v36 = vld [vmem:[#allocation2 + $0x4e4] ss:$16 sps:$4 sm:$0xff]  }
  0x85   :  { %1688 = vmatprep.subr.bf16.mxu0 %v7705_v37  ;;  %1852 = vmatprep.subr.bf16.mxu1 %v7708_v38  ;;  %v7800_v37 = vld [vmem:[#allocation2 + $0x4ec] ss:$16 sps:$4 sm:$0xff]   ;;  %v7795_v38 = vld [vmem:[#allocation2 + $0x4e0] ss:$16 sps:$4 sm:$0xff]  }
  0x88   :  { %1689 = vmatpush1.bf16.msra.mxu0 %v7703_v39  ;;  %1853 = vmatpush1.bf16.msra.mxu1 %v7706_v40  ;;  %v7798_v39 = vld [vmem:[#allocation2 + $0x4e8] ss:$16 sps:$4 sm:$0xff]   ;;  %v7803_v40 = vld [vmem:[#allocation2 + $0x504] ss:$16 sps:$4 sm:$0xff]  }
  0x89   :  { %1690 = vmatprep.subr.bf16.mxu0 %v7711_v41  ;;  %1854 = vmatprep.subr.bf16.mxu1 %v7714_v42  ;;  %v7806_v41 = vld [vmem:[#allocation2 + $0x50c] ss:$16 sps:$4 sm:$0xff]   ;;  %v7801_v42 = vld [vmem:[#allocation2 + $0x500] ss:$16 sps:$4 sm:$0xff]  }
  0x8c   :  { %1691 = vmatpush1.bf16.msra.mxu0 %v7709_v43  ;;  %1855 = vmatpush1.bf16.msra.mxu1 %v7712_v44  ;;  %v7804_v43 = vld [vmem:[#allocation2 + $0x508] ss:$16 sps:$4 sm:$0xff]   ;;  %v7809_v44 = vld [vmem:[#allocation2 + $0x524] ss:$16 sps:$4 sm:$0xff]  }
  0x8d   :  { %1692 = vmatprep.subr.bf16.mxu0 %v7717_v45  ;;  %1856 = vmatprep.subr.bf16.mxu1 %v7720_v46  ;;  %v7812_v45 = vld [vmem:[#allocation2 + $0x52c] ss:$16 sps:$4 sm:$0xff]   ;;  %v7807_v46 = vld [vmem:[#allocation2 + $0x520] ss:$16 sps:$4 sm:$0xff]  }
  0x90   :  { %1693 = vmatpush1.bf16.msra.mxu0 %v7715_v47  ;;  %1857 = vmatpush1.bf16.msra.mxu1 %v7718_v48  ;;  %v7810_v47 = vld [vmem:[#allocation2 + $0x528] ss:$16 sps:$4 sm:$0xff]   ;;  %v7815_v48 = vld [vmem:[#allocation2 + $0x544] ss:$16 sps:$4 sm:$0xff]  }
  0x91   :  { %1694 = vmatprep.subr.bf16.mxu0 %v7723_v49  ;;  %1858 = vmatprep.subr.bf16.mxu1 %v7726_v50  ;;  %v7818_v49 = vld [vmem:[#allocation2 + $0x54c] ss:$16 sps:$4 sm:$0xff]   ;;  %v7813_v50 = vld [vmem:[#allocation2 + $0x540] ss:$16 sps:$4 sm:$0xff]  }
  0x94   :  { %1695 = vmatpush1.bf16.msra.mxu0 %v7721_v51  ;;  %1859 = vmatpush1.bf16.msra.mxu1 %v7724_v52  ;;  %v7816_v51 = vld [vmem:[#allocation2 + $0x548] ss:$16 sps:$4 sm:$0xff]   ;;  %v7821_v52 = vld [vmem:[#allocation2 + $0x564] ss:$16 sps:$4 sm:$0xff]  }
  0x95   :  { %1696 = vmatprep.subr.bf16.mxu0 %v7729_v53  ;;  %1860 = vmatprep.subr.bf16.mxu1 %v7732_v54  ;;  %v7824_v53 = vld [vmem:[#allocation2 + $0x56c] ss:$16 sps:$4 sm:$0xff]   ;;  %v7819_v54 = vld [vmem:[#allocation2 + $0x560] ss:$16 sps:$4 sm:$0xff]  }
  0x98   :  { %1697 = vmatpush1.bf16.msra.mxu0 %v7727_v55  ;;  %1861 = vmatpush1.bf16.msra.mxu1 %v7730_v56  ;;  %v7822_v55 = vld [vmem:[#allocation2 + $0x568] ss:$16 sps:$4 sm:$0xff]   ;;  %v7827_v56 = vld [vmem:[#allocation2 + $0x584] ss:$16 sps:$4 sm:$0xff]  }
  0x99   :  { %1698 = vmatprep.subr.bf16.mxu0 %v7735_v57  ;;  %1862 = vmatprep.subr.bf16.mxu1 %v7738_v58  ;;  %v7830_v57 = vld [vmem:[#allocation2 + $0x58c] ss:$16 sps:$4 sm:$0xff]   ;;  %v7825_v58 = vld [vmem:[#allocation2 + $0x580] ss:$16 sps:$4 sm:$0xff]  }
  0x9c   :  { %1699 = vmatpush1.bf16.msra.mxu0 %v7733_v59  ;;  %1863 = vmatpush1.bf16.msra.mxu1 %v7736_v60  ;;  %v7828_v59 = vld [vmem:[#allocation2 + $0x588] ss:$16 sps:$4 sm:$0xff]   ;;  %v7833_v60 = vld [vmem:[#allocation2 + $0x5a4] ss:$16 sps:$4 sm:$0xff]  }
  0x9d   :  { %1700 = vmatprep.subr.bf16.mxu0 %v7741_v61  ;;  %1864 = vmatprep.subr.bf16.mxu1 %v7744_v62  ;;  %v7836_v61 = vld [vmem:[#allocation2 + $0x5ac] ss:$16 sps:$4 sm:$0xff]   ;;  %v7831_v62 = vld [vmem:[#allocation2 + $0x5a0] ss:$16 sps:$4 sm:$0xff]  }
  0xa0   :  { %1701 = vmatpush1.bf16.msra.mxu0 %v7739_v63  ;;  %1865 = vmatpush1.bf16.msra.mxu1 %v7742_v0  ;;  %v7834_v63 = vld [vmem:[#allocation2 + $0x5a8] ss:$16 sps:$4 sm:$0xff]   ;;  %v7839_v0 = vld [vmem:[#allocation2 + $0x5c4] ss:$16 sps:$4 sm:$0xff]  }
  0xa1   :  { %1702 = vmatprep.subr.bf16.mxu0 %v7747_v1  ;;  %1866 = vmatprep.subr.bf16.mxu1 %v7750_v2  ;;  %v7842_v1 = vld [vmem:[#allocation2 + $0x5cc] ss:$16 sps:$4 sm:$0xff]   ;;  %v7837_v2 = vld [vmem:[#allocation2 + $0x5c0] ss:$16 sps:$4 sm:$0xff]  }
  0xa4   :  { %1703 = vmatpush1.bf16.msra.mxu0 %v7745_v3  ;;  %1867 = vmatpush1.bf16.msra.mxu1 %v7748_v4  ;;  %v7840_v3 = vld [vmem:[#allocation2 + $0x5c8] ss:$16 sps:$4 sm:$0xff]   ;;  %v7845_v4 = vld [vmem:[#allocation2 + $0x5e4] ss:$16 sps:$4 sm:$0xff]  }
  0xa5   :  { %1713 = vmatprep.subr.bf16.mxu0 %v7755_v5  ;;  %1877 = vmatprep.subr.bf16.mxu1 %v7758_v6  ;;  %v7848_v5 = vld [vmem:[#allocation2 + $0x5ec] ss:$16 sps:$4 sm:$0xff]   ;;  %v7843_v6 = vld [vmem:[#allocation2 + $0x5e0] ss:$16 sps:$4 sm:$0xff]  }
  0xa7   :  { %1705 = vmatmul.mubr.bf16.vlgmr.msra.gmra.mrb[0].mxu0 %v6685_v7  ;;  %1869 = vmatmul.mubr.bf16.vlgmr.msra.gmra.mrb[0].mxu1 %v6685_v7  ;;  %v7846_v7 = vld [vmem:[#allocation2 + $0x5e8] ss:$16 sps:$4 sm:$0xff]  }
  0xa8   :  { %1714 = vmatpush1.bf16.msra.mxu0 %v7753_v8  ;;  %1878 = vmatpush1.bf16.msra.mxu1 %v7756_v9  ;;  %v7853_v8 = vld [vmem:[#allocation2 + $0x604] ss:$16 sps:$4 sm:$0xff]   ;;  %v7856_v9 = vld [vmem:[#allocation2 + $0x60c] ss:$16 sps:$4 sm:$0xff]  }
  0xa9   :  { %1715 = vmatprep.subr.bf16.mxu0 %v7761_v10  ;;  %1879 = vmatprep.subr.bf16.mxu1 %v7764_v12  ;;  %v7851_v10 = vld [vmem:[#allocation2 + $0x600] ss:$16 sps:$4 sm:$0xff]   ;;  %v7854_v12 = vld [vmem:[#allocation2 + $0x608] ss:$16 sps:$4 sm:$0xff]  }
  0xaa   :  { %1745 = vmatprep.mubr.bf16.mxu0 %v6688_v13  ;;  %1909 = vmatprep.mubr.bf16.mxu1 %v6688_v13  ;;  %v8202_v13 = vld [vmem:[%s10101_s0 + $0x18] sm:$0xff] }
  0xac   :  { %1716 = vmatpush1.bf16.msra.mxu0 %v7759_v14  ;;  %1880 = vmatpush1.bf16.msra.mxu1 %v7762_v15  ;;  %v6687_v14 = vcombine.low %v8195_v11, %v8195_v11  ;;  %v7859_v15 = vld [vmem:[#allocation2 + $0x624] ss:$16 sps:$4 sm:$0xff]   ;;  %v7863_v11 = vld [vmem:[#allocation2 + $0x640] ss:$16 sps:$4 sm:$0xff]  }
  0xad   :  { %1717 = vmatprep.subr.bf16.mxu0 %v7767_v16  ;;  %1881 = vmatprep.subr.bf16.mxu1 %v7770_v17  ;;  %v7862_v16 = vld [vmem:[#allocation2 + $0x62c] ss:$16 sps:$4 sm:$0xff]   ;;  %v7857_v17 = vld [vmem:[#allocation2 + $0x620] ss:$16 sps:$4 sm:$0xff]  }
  0xb0   :  { %1718 = vmatpush1.bf16.msra.mxu0 %v7765_v18  ;;  %1882 = vmatpush1.bf16.msra.mxu1 %v7768_v19  ;;  %v7860_v18 = vld [vmem:[#allocation2 + $0x628] ss:$16 sps:$4 sm:$0xff]   ;;  %v6690_v19 = vcombine.high %v8202_v13, %v8202_v13 }
  0xb1   :  { %1719 = vmatprep.subr.bf16.mxu0 %v7773_v20  ;;  %1883 = vmatprep.subr.bf16.mxu1 %v7776_v21  ;;  %v7865_v20 = vld [vmem:[#allocation2 + $0x644] ss:$16 sps:$4 sm:$0xff]   ;;  %v7868_v21 = vld [vmem:[#allocation2 + $0x64c] ss:$16 sps:$4 sm:$0xff]  }
  0xb4   :  { %1720 = vmatpush1.bf16.msra.mxu0 %v7771_v22  ;;  %1884 = vmatpush1.bf16.msra.mxu1 %v7774_v23  ;;  %v7866_v22 = vld [vmem:[#allocation2 + $0x648] ss:$16 sps:$4 sm:$0xff]   ;;  %v7871_v23 = vld [vmem:[#allocation2 + $0x664] ss:$16 sps:$4 sm:$0xff]  }
  0xb5   :  { %1721 = vmatprep.subr.bf16.mxu0 %v7779_v24  ;;  %1885 = vmatprep.subr.bf16.mxu1 %v7782_v25  ;;  %v7874_v24 = vld [vmem:[#allocation2 + $0x66c] ss:$16 sps:$4 sm:$0xff]   ;;  %v7869_v25 = vld [vmem:[#allocation2 + $0x660] ss:$16 sps:$4 sm:$0xff]  }
  0xb8   :  { %1722 = vmatpush1.bf16.msra.mxu0 %v7777_v26  ;;  %1886 = vmatpush1.bf16.msra.mxu1 %v7780_v27  ;;  %v7872_v26 = vld [vmem:[#allocation2 + $0x668] ss:$16 sps:$4 sm:$0xff]   ;;  %v7877_v27 = vld [vmem:[#allocation2 + $0x684] ss:$16 sps:$4 sm:$0xff]  }
  0xb9   :  { %1723 = vmatprep.subr.bf16.mxu0 %v7785_v28  ;;  %1887 = vmatprep.subr.bf16.mxu1 %v7788_v29  ;;  %v7880_v28 = vld [vmem:[#allocation2 + $0x68c] ss:$16 sps:$4 sm:$0xff]   ;;  %v7875_v29 = vld [vmem:[#allocation2 + $0x680] ss:$16 sps:$4 sm:$0xff]  }
  0xbc   :  { %1724 = vmatpush1.bf16.msra.mxu0 %v7783_v30  ;;  %1888 = vmatpush1.bf16.msra.mxu1 %v7786_v31  ;;  %v7878_v30 = vld [vmem:[#allocation2 + $0x688] ss:$16 sps:$4 sm:$0xff]   ;;  %v7883_v31 = vld [vmem:[#allocation2 + $0x6a4] ss:$16 sps:$4 sm:$0xff]  }
  0xbd   :  { %1725 = vmatprep.subr.bf16.mxu0 %v7791_v32  ;;  %1889 = vmatprep.subr.bf16.mxu1 %v7794_v33  ;;  %v7886_v32 = vld [vmem:[#allocation2 + $0x6ac] ss:$16 sps:$4 sm:$0xff]   ;;  %v7881_v33 = vld [vmem:[#allocation2 + $0x6a0] ss:$16 sps:$4 sm:$0xff]  }
  0xc0   :  { %1726 = vmatpush1.bf16.msra.mxu0 %v7789_v34  ;;  %1890 = vmatpush1.bf16.msra.mxu1 %v7792_v35  ;;  %v7884_v34 = vld [vmem:[#allocation2 + $0x6a8] ss:$16 sps:$4 sm:$0xff]   ;;  %v7889_v35 = vld [vmem:[#allocation2 + $0x6c4] ss:$16 sps:$4 sm:$0xff]  }
  0xc1   :  { %1727 = vmatprep.subr.bf16.mxu0 %v7797_v36  ;;  %1891 = vmatprep.subr.bf16.mxu1 %v7800_v37  ;;  %v7892_v36 = vld [vmem:[#allocation2 + $0x6cc] ss:$16 sps:$4 sm:$0xff]   ;;  %v7887_v37 = vld [vmem:[#allocation2 + $0x6c0] ss:$16 sps:$4 sm:$0xff]  }
  0xc4   :  { %1728 = vmatpush1.bf16.msra.mxu0 %v7795_v38  ;;  %1892 = vmatpush1.bf16.msra.mxu1 %v7798_v39  ;;  %v7890_v38 = vld [vmem:[#allocation2 + $0x6c8] ss:$16 sps:$4 sm:$0xff]   ;;  %v7895_v39 = vld [vmem:[#allocation2 + $0x6e4] ss:$16 sps:$4 sm:$0xff]  }
  0xc5   :  { %1729 = vmatprep.subr.bf16.mxu0 %v7803_v40  ;;  %1893 = vmatprep.subr.bf16.mxu1 %v7806_v41  ;;  %v7898_v40 = vld [vmem:[#allocation2 + $0x6ec] ss:$16 sps:$4 sm:$0xff]   ;;  %v7893_v41 = vld [vmem:[#allocation2 + $0x6e0] ss:$16 sps:$4 sm:$0xff]  }
  0xc8   :  { %1730 = vmatpush1.bf16.msra.mxu0 %v7801_v42  ;;  %1894 = vmatpush1.bf16.msra.mxu1 %v7804_v43  ;;  %v7896_v42 = vld [vmem:[#allocation2 + $0x6e8] ss:$16 sps:$4 sm:$0xff]   ;;  %v7901_v43 = vld [vmem:[#allocation2 + $0x704] ss:$16 sps:$4 sm:$0xff]  }
  0xc9   :  { %1731 = vmatprep.subr.bf16.mxu0 %v7809_v44  ;;  %1895 = vmatprep.subr.bf16.mxu1 %v7812_v45  ;;  %v7904_v44 = vld [vmem:[#allocation2 + $0x70c] ss:$16 sps:$4 sm:$0xff]   ;;  %v7899_v45 = vld [vmem:[#allocation2 + $0x700] ss:$16 sps:$4 sm:$0xff]  }
  0xcc   :  { %1732 = vmatpush1.bf16.msra.mxu0 %v7807_v46  ;;  %1896 = vmatpush1.bf16.msra.mxu1 %v7810_v47  ;;  %v7902_v46 = vld [vmem:[#allocation2 + $0x708] ss:$16 sps:$4 sm:$0xff]   ;;  %v7907_v47 = vld [vmem:[#allocation2 + $0x724] ss:$16 sps:$4 sm:$0xff]  }
  0xcd   :  { %1733 = vmatprep.subr.bf16.mxu0 %v7815_v48  ;;  %1897 = vmatprep.subr.bf16.mxu1 %v7818_v49  ;;  %v7910_v48 = vld [vmem:[#allocation2 + $0x72c] ss:$16 sps:$4 sm:$0xff]   ;;  %v7905_v49 = vld [vmem:[#allocation2 + $0x720] ss:$16 sps:$4 sm:$0xff]  }
  0xd0   :  { %1734 = vmatpush1.bf16.msra.mxu0 %v7813_v50  ;;  %1898 = vmatpush1.bf16.msra.mxu1 %v7816_v51  ;;  %v7908_v50 = vld [vmem:[#allocation2 + $0x728] ss:$16 sps:$4 sm:$0xff]   ;;  %v7913_v51 = vld [vmem:[#allocation2 + $0x744] ss:$16 sps:$4 sm:$0xff]  }
  0xd1   :  { %1735 = vmatprep.subr.bf16.mxu0 %v7821_v52  ;;  %1899 = vmatprep.subr.bf16.mxu1 %v7824_v53  ;;  %v7916_v52 = vld [vmem:[#allocation2 + $0x74c] ss:$16 sps:$4 sm:$0xff]   ;;  %v7911_v53 = vld [vmem:[#allocation2 + $0x740] ss:$16 sps:$4 sm:$0xff]  }
  0xd4   :  { %1736 = vmatpush1.bf16.msra.mxu0 %v7819_v54  ;;  %1900 = vmatpush1.bf16.msra.mxu1 %v7822_v55  ;;  %v7914_v54 = vld [vmem:[#allocation2 + $0x748] ss:$16 sps:$4 sm:$0xff]   ;;  %v7919_v55 = vld [vmem:[#allocation2 + $0x764] ss:$16 sps:$4 sm:$0xff]  }
  0xd5   :  { %1737 = vmatprep.subr.bf16.mxu0 %v7827_v56  ;;  %1901 = vmatprep.subr.bf16.mxu1 %v7830_v57  ;;  %v7922_v56 = vld [vmem:[#allocation2 + $0x76c] ss:$16 sps:$4 sm:$0xff]   ;;  %v7917_v57 = vld [vmem:[#allocation2 + $0x760] ss:$16 sps:$4 sm:$0xff]  }
  0xd8   :  { %1738 = vmatpush1.bf16.msra.mxu0 %v7825_v58  ;;  %1902 = vmatpush1.bf16.msra.mxu1 %v7828_v59  ;;  %v7920_v58 = vld [vmem:[#allocation2 + $0x768] ss:$16 sps:$4 sm:$0xff]   ;;  %v7925_v59 = vld [vmem:[#allocation2 + $0x784] ss:$16 sps:$4 sm:$0xff]  }
  0xd9   :  { %1739 = vmatprep.subr.bf16.mxu0 %v7833_v60  ;;  %1903 = vmatprep.subr.bf16.mxu1 %v7836_v61  ;;  %v7928_v60 = vld [vmem:[#allocation2 + $0x78c] ss:$16 sps:$4 sm:$0xff]   ;;  %v7923_v61 = vld [vmem:[#allocation2 + $0x780] ss:$16 sps:$4 sm:$0xff]  }
  0xdc   :  { %1740 = vmatpush1.bf16.msra.mxu0 %v7831_v62  ;;  %1904 = vmatpush1.bf16.msra.mxu1 %v7834_v63  ;;  %v7926_v62 = vld [vmem:[#allocation2 + $0x788] ss:$16 sps:$4 sm:$0xff]   ;;  %v7931_v63 = vld [vmem:[#allocation2 + $0x7a4] ss:$16 sps:$4 sm:$0xff]  }
  0xdd   :  { %1741 = vmatprep.subr.bf16.mxu0 %v7839_v0  ;;  %1905 = vmatprep.subr.bf16.mxu1 %v7842_v1  ;;  %v7934_v0 = vld [vmem:[#allocation2 + $0x7ac] ss:$16 sps:$4 sm:$0xff]   ;;  %v7929_v1 = vld [vmem:[#allocation2 + $0x7a0] ss:$16 sps:$4 sm:$0xff]  }
  0xe0   :  { %1742 = vmatpush1.bf16.msra.mxu0 %v7837_v2  ;;  %1906 = vmatpush1.bf16.msra.mxu1 %v7840_v3  ;;  %v7932_v2 = vld [vmem:[#allocation2 + $0x7a8] ss:$16 sps:$4 sm:$0xff]   ;;  %v7937_v3 = vld [vmem:[#allocation2 + $0x7c4] ss:$16 sps:$4 sm:$0xff]  }
  0xe1   :  { %1743 = vmatprep.subr.bf16.mxu0 %v7845_v4  ;;  %1907 = vmatprep.subr.bf16.mxu1 %v7848_v5  ;;  %v7940_v4 = vld [vmem:[#allocation2 + $0x7cc] ss:$16 sps:$4 sm:$0xff]   ;;  %v7935_v5 = vld [vmem:[#allocation2 + $0x7c0] ss:$16 sps:$4 sm:$0xff]  }
  0xe4   :  { %1744 = vmatpush1.bf16.msra.mxu0 %v7843_v6  ;;  %1908 = vmatpush1.bf16.msra.mxu1 %v7846_v7  ;;  %v7938_v6 = vld [vmem:[#allocation2 + $0x7c8] ss:$16 sps:$4 sm:$0xff]   ;;  %v7943_v7 = vld [vmem:[#allocation2 + $0x7e4] ss:$16 sps:$4 sm:$0xff]  }
  0xe5   :  { %1754 = vmatprep.subr.bf16.mxu0 %v7853_v8  ;;  %1918 = vmatprep.subr.bf16.mxu1 %v7856_v9  ;;  %v7946_v8 = vld [vmem:[#allocation2 + $0x7ec] ss:$16 sps:$4 sm:$0xff]   ;;  %v7941_v9 = vld [vmem:[#allocation2 + $0x7e0] ss:$16 sps:$4 sm:$0xff]  }
  0xe7   :  { %1746 = vmatmul.mubr.bf16.vlgmr.msra.gmra.mrb[0].mxu0 %v6687_v14  ;;  %1910 = vmatmul.mubr.bf16.vlgmr.msra.gmra.mrb[0].mxu1 %v6687_v14  ;;  %v6689_v14 = vcombine.low %v8202_v13, %v8202_v13  ;;  %v7961_v13 = vld [vmem:[#allocation4 + $0x40] ss:$8 sps:$4 sm:$0xff]  }
  0xe8   :  { %1755 = vmatpush1.bf16.msra.mxu0 %v7851_v10  ;;  %1919 = vmatpush1.bf16.msra.mxu1 %v7854_v12  ;;  %v7944_v10 = vld [vmem:[#allocation2 + $0x7e8] ss:$16 sps:$4 sm:$0xff]   ;;  %v7951_v12 = vld [vmem:[#allocation4 + $0x4] ss:$8 sps:$4 sm:$0xff]  }
  0xe9   :  { %1756 = vmatprep.subr.bf16.mxu0 %v7859_v15  ;;  %1920 = vmatprep.subr.bf16.mxu1 %v7862_v16  ;;  %v7949_v15 = vld [vmem:[#allocation4] ss:$8 sps:$4 sm:$0xff]   ;;  %v7954_v16 = vld [vmem:[#allocation4 + $0x14] ss:$8 sps:$4 sm:$0xff]  }
  0xea   :  { %1786 = vmatprep.mubr.bf16.mxu0 %v6690_v19  ;;  %1950 = vmatprep.mubr.bf16.mxu1 %v6690_v19  ;;  %v7955_v19 = vld [vmem:[#allocation4 + $0x20] ss:$8 sps:$4 sm:$0xff]  }
  0xec   :  { %1757 = vmatpush1.bf16.msra.mxu0 %v7857_v17  ;;  %1921 = vmatpush1.bf16.msra.mxu1 %v7860_v18  ;;  %v7952_v17 = vld [vmem:[#allocation4 + $0x10] ss:$8 sps:$4 sm:$0xff]   ;;  %v7957_v18 = vld [vmem:[#allocation4 + $0x24] ss:$8 sps:$4 sm:$0xff]  }
  0xed   :  { %1758 = vmatprep.subr.bf16.mxu0 %v7865_v20  ;;  %1922 = vmatprep.subr.bf16.mxu1 %v7868_v21  ;;  %v7960_v20 = vld [vmem:[#allocation4 + $0x34] ss:$8 sps:$4 sm:$0xff]   ;;  %v7958_v21 = vld [vmem:[#allocation4 + $0x30] ss:$8 sps:$4 sm:$0xff]  }
  0xf0   :  { %1759 = vmatpush1.bf16.msra.mxu0 %v7863_v11  ;;  %1923 = vmatpush1.bf16.msra.mxu1 %v7866_v22  ;;  %v7963_v11 = vld [vmem:[#allocation4 + $0x44] ss:$8 sps:$4 sm:$0xff]   ;;  %v7966_v22 = vld [vmem:[#allocation4 + $0x54] ss:$8 sps:$4 sm:$0xff]  }
  0xf1   :  { %1760 = vmatprep.subr.bf16.mxu0 %v7871_v23  ;;  %1924 = vmatprep.subr.bf16.mxu1 %v7874_v24  ;;  %v7964_v23 = vld [vmem:[#allocation4 + $0x50] ss:$8 sps:$4 sm:$0xff]   ;;  %v7969_v24 = vld [vmem:[#allocation4 + $0x64] ss:$8 sps:$4 sm:$0xff]  }
  0xf4   :  { %1761 = vmatpush1.bf16.msra.mxu0 %v7869_v25  ;;  %1925 = vmatpush1.bf16.msra.mxu1 %v7872_v26  ;;  %v7967_v25 = vld [vmem:[#allocation4 + $0x60] ss:$8 sps:$4 sm:$0xff]   ;;  %v7972_v26 = vld [vmem:[#allocation4 + $0x74] ss:$8 sps:$4 sm:$0xff]  }
  0xf5   :  { %1762 = vmatprep.subr.bf16.mxu0 %v7877_v27  ;;  %1926 = vmatprep.subr.bf16.mxu1 %v7880_v28  ;;  %v7970_v27 = vld [vmem:[#allocation4 + $0x70] ss:$8 sps:$4 sm:$0xff]   ;;  %v7975_v28 = vld [vmem:[#allocation4 + $0x84] ss:$8 sps:$4 sm:$0xff]  }
  0xf8   :  { %1763 = vmatpush1.bf16.msra.mxu0 %v7875_v29  ;;  %1927 = vmatpush1.bf16.msra.mxu1 %v7878_v30  ;;  %v7973_v29 = vld [vmem:[#allocation4 + $0x80] ss:$8 sps:$4 sm:$0xff]   ;;  %v7978_v30 = vld [vmem:[#allocation4 + $0x94] ss:$8 sps:$4 sm:$0xff]  }
  0xf9   :  { %1764 = vmatprep.subr.bf16.mxu0 %v7883_v31  ;;  %1928 = vmatprep.subr.bf16.mxu1 %v7886_v32  ;;  %v7976_v31 = vld [vmem:[#allocation4 + $0x90] ss:$8 sps:$4 sm:$0xff]   ;;  %v7981_v32 = vld [vmem:[#allocation4 + $0xa4] ss:$8 sps:$4 sm:$0xff]  }
  0xfc   :  { %1765 = vmatpush1.bf16.msra.mxu0 %v7881_v33  ;;  %1929 = vmatpush1.bf16.msra.mxu1 %v7884_v34  ;;  %v7979_v33 = vld [vmem:[#allocation4 + $0xa0] ss:$8 sps:$4 sm:$0xff]   ;;  %v7984_v34 = vld [vmem:[#allocation4 + $0xb4] ss:$8 sps:$4 sm:$0xff]  }
  0xfd   :  { %1766 = vmatprep.subr.bf16.mxu0 %v7889_v35  ;;  %1930 = vmatprep.subr.bf16.mxu1 %v7892_v36  ;;  %v7982_v35 = vld [vmem:[#allocation4 + $0xb0] ss:$8 sps:$4 sm:$0xff]   ;;  %v7987_v36 = vld [vmem:[#allocation4 + $0xc4] ss:$8 sps:$4 sm:$0xff]  }
 0x100   :  { %1767 = vmatpush1.bf16.msra.mxu0 %v7887_v37  ;;  %1931 = vmatpush1.bf16.msra.mxu1 %v7890_v38  ;;  %v7985_v37 = vld [vmem:[#allocation4 + $0xc0] ss:$8 sps:$4 sm:$0xff]   ;;  %v7990_v38 = vld [vmem:[#allocation4 + $0xd4] ss:$8 sps:$4 sm:$0xff]  }
 0x101   :  { %1768 = vmatprep.subr.bf16.mxu0 %v7895_v39  ;;  %1932 = vmatprep.subr.bf16.mxu1 %v7898_v40  ;;  %v7988_v39 = vld [vmem:[#allocation4 + $0xd0] ss:$8 sps:$4 sm:$0xff]   ;;  %v7993_v40 = vld [vmem:[#allocation4 + $0xe4] ss:$8 sps:$4 sm:$0xff]  }
 0x104   :  { %1769 = vmatpush1.bf16.msra.mxu0 %v7893_v41  ;;  %1933 = vmatpush1.bf16.msra.mxu1 %v7896_v42  ;;  %v7991_v41 = vld [vmem:[#allocation4 + $0xe0] ss:$8 sps:$4 sm:$0xff]   ;;  %v7996_v42 = vld [vmem:[#allocation4 + $0xf4] ss:$8 sps:$4 sm:$0xff]  }
 0x105   :  { %1770 = vmatprep.subr.bf16.mxu0 %v7901_v43  ;;  %1934 = vmatprep.subr.bf16.mxu1 %v7904_v44  ;;  %v7994_v43 = vld [vmem:[#allocation4 + $0xf0] ss:$8 sps:$4 sm:$0xff]   ;;  %v7999_v44 = vld [vmem:[#allocation4 + $0x104] ss:$8 sps:$4 sm:$0xff]  }
 0x108   :  { %1771 = vmatpush1.bf16.msra.mxu0 %v7899_v45  ;;  %1935 = vmatpush1.bf16.msra.mxu1 %v7902_v46  ;;  %v2517_v45 = vld [vmem:[%s10108_s7] sm:$0xff] }
 0x109   :  { %1772 = vmatprep.subr.bf16.mxu0 %v7907_v47  ;;  %1936 = vmatprep.subr.bf16.mxu1 %v7910_v48  ;;  %v2533_v46 = vld [vmem:[%s10108_s7 + $0x80] sm:$0xff] }
 0x10a   :  { %v7011_v47 = vcombine.low %v2517_v45, %v2533_v46  ;;  %v7012_v48 = vcombine.high %v2517_v45, %v2533_v46 }
 0x10c   :  { %1773 = vmatpush1.bf16.msra.mxu0 %v7905_v49  ;;  %1937 = vmatpush1.bf16.msra.mxu1 %v7908_v50  ;;  %v2549_v49 = vld [vmem:[%s10108_s7 + $0x100] sm:$0xff] }
 0x10d   :  { %1774 = vmatprep.subr.bf16.mxu0 %v7913_v51  ;;  %1938 = vmatprep.subr.bf16.mxu1 %v7916_v52  ;;  %v2565_v50 = vld [vmem:[%s10108_s7 + $0x180] sm:$0xff] }
 0x10e   :  { %v7044_v51 = vcombine.high %v2549_v49, %v2565_v50  ;;  %v7043_v52 = vcombine.low %v2549_v49, %v2565_v50 }
 0x110   :  { %1775 = vmatpush1.bf16.msra.mxu0 %v7911_v53  ;;  %1939 = vmatpush1.bf16.msra.mxu1 %v7914_v54  ;;  %v2581_v53 = vld [vmem:[%s10108_s7 + $0x200] sm:$0xff] }
 0x111   :  { %1776 = vmatprep.subr.bf16.mxu0 %v7919_v55  ;;  %1940 = vmatprep.subr.bf16.mxu1 %v7922_v56  ;;  %v2597_v54 = vld [vmem:[%s10108_s7 + $0x280] sm:$0xff] }
 0x112   :  { %v7076_v55 = vcombine.high %v2581_v53, %v2597_v54  ;;  %v7075_v56 = vcombine.low %v2581_v53, %v2597_v54 }
 0x114   :  { %1777 = vmatpush1.bf16.msra.mxu0 %v7917_v57  ;;  %1941 = vmatpush1.bf16.msra.mxu1 %v7920_v58  ;;  %v2613_v57 = vld [vmem:[%s10108_s7 + $0x300] sm:$0xff] }
 0x115   :  { %1778 = vmatprep.subr.bf16.mxu0 %v7925_v59  ;;  %1942 = vmatprep.subr.bf16.mxu1 %v7928_v60  ;;  %v2629_v58 = vld [vmem:[%s10108_s7 + $0x380] sm:$0xff] }
 0x116   :  { %v7108_v59 = vcombine.high %v2613_v57, %v2629_v58  ;;  %v7107_v60 = vcombine.low %v2613_v57, %v2629_v58 }
 0x118   :  { %1779 = vmatpush1.bf16.msra.mxu0 %v7923_v61  ;;  %1943 = vmatpush1.bf16.msra.mxu1 %v7926_v62  ;;  %v2645_v61 = vld [vmem:[%s10108_s7 + $0x400] sm:$0xff] }
 0x119   :  { %1780 = vmatprep.subr.bf16.mxu0 %v7931_v63  ;;  %1944 = vmatprep.subr.bf16.mxu1 %v7934_v0  ;;  %v2661_v62 = vld [vmem:[%s10108_s7 + $0x480] sm:$0xff] }
 0x11a   :  { %v7140_v63 = vcombine.high %v2645_v61, %v2661_v62  ;;  %v7139_v0 = vcombine.low %v2645_v61, %v2661_v62 }
 0x11c   :  { %1781 = vmatpush1.bf16.msra.mxu0 %v7929_v1  ;;  %1945 = vmatpush1.bf16.msra.mxu1 %v7932_v2  ;;  %v2677_v1 = vld [vmem:[%s10108_s7 + $0x500] sm:$0xff] }
 0x11d   :  { %1782 = vmatprep.subr.bf16.mxu0 %v7937_v3  ;;  %1946 = vmatprep.subr.bf16.mxu1 %v7940_v4  ;;  %v2693_v2 = vld [vmem:[%s10108_s7 + $0x580] sm:$0xff] }
 0x11e   :  { %v7172_v3 = vcombine.high %v2677_v1, %v2693_v2  ;;  %v7171_v4 = vcombine.low %v2677_v1, %v2693_v2 }
 0x120   :  { %1783 = vmatpush1.bf16.msra.mxu0 %v7935_v5  ;;  %1947 = vmatpush1.bf16.msra.mxu1 %v7938_v6  ;;  %v2709_v5 = vld [vmem:[%s10108_s7 + $0x600] sm:$0xff] }
 0x121   :  { %1784 = vmatprep.subr.bf16.mxu0 %v7943_v7  ;;  %1948 = vmatprep.subr.bf16.mxu1 %v7946_v8  ;;  %v2725_v6 = vld [vmem:[%s10108_s7 + $0x680] sm:$0xff] }
 0x122   :  { %v7204_v7 = vcombine.high %v2709_v5, %v2725_v6  ;;  %v7203_v8 = vcombine.low %v2709_v5, %v2725_v6 }
 0x124   :  { %1785 = vmatpush1.bf16.msra.mxu0 %v7941_v9  ;;  %1949 = vmatpush1.bf16.msra.mxu1 %v7944_v10  ;;  %v2741_v9 = vld [vmem:[%s10108_s7 + $0x700] sm:$0xff] }
 0x125   :  { %2403 = vmatprep.subr.bf16.mxu0 %v7951_v12  ;;  %5589 = vmatprep.subr.bf16.mxu1 %v7012_v48  ;;  %v2757_v10 = vld [vmem:[%s10108_s7 + $0x780] sm:$0xff] }
 0x126   :  { %v7236_v12 = vcombine.high %v2741_v9, %v2757_v10 }
 0x127   :  { %1787 = vmatmul.mubr.bf16.vlgmr.msra.gmra.mrb[0].mxu0 %v6689_v14  ;;  %1951 = vmatmul.mubr.bf16.vlgmr.msra.gmra.mrb[0].mxu1 %v6689_v14  ;;  %v7235_v14 = vcombine.low %v2741_v9, %v2757_v10  ;;  %v7997_v9 = vld [vmem:[#allocation4 + $0x100] ss:$8 sps:$4 sm:$0xff]  }
 0x128   :  { %2404 = vmatpush1.bf16.msra.mxu0 %v7949_v15  ;;  %5590 = vmatpush1.bf16.msra.mxu1 %v7011_v47  ;;  %v2773_v15 = vld [vmem:[%s10108_s7 + $0x800] sm:$0xff] }
 0x129   :  { %2405 = vmatprep.subr.bf16.mxu0 %v7954_v16  ;;  %5591 = vmatprep.subr.bf16.mxu1 %v7044_v51  ;;  %v2789_v16 = vld [vmem:[%s10108_s7 + $0x880] sm:$0xff] }
 0x12c   :  { %2406 = vmatpush1.bf16.msra.mxu0 %v7952_v17  ;;  %5592 = vmatpush1.bf16.msra.mxu1 %v7043_v52  ;;  %v7268_v17 = vcombine.high %v2773_v15, %v2789_v16 }
 0x12d   :  { %2407 = vmatprep.subr.bf16.mxu0 %v7957_v18  ;;  %5593 = vmatprep.subr.bf16.mxu1 %v7076_v55  ;;  %v7267_v18 = vcombine.low %v2773_v15, %v2789_v16  ;;  %v8000_v15 = vld [vmem:[#allocation4 + $0x110] ss:$8 sps:$4 sm:$0xff]   ;;  %v8005_v16 = vld [vmem:[#allocation4 + $0x124] ss:$8 sps:$4 sm:$0xff]  }
 0x130   :  { %2408 = vmatpush1.bf16.msra.mxu0 %v7955_v19  ;;  %5594 = vmatpush1.bf16.msra.mxu1 %v7075_v56  ;;  %v2805_v19 = vld [vmem:[%s10108_s7 + $0x900] sm:$0xff] }
 0x131   :  { %2409 = vmatprep.subr.bf16.mxu0 %v7960_v20  ;;  %5595 = vmatprep.subr.bf16.mxu1 %v7108_v59  ;;  %v2821_v20 = vld [vmem:[%s10108_s7 + $0x980] sm:$0xff] }
 0x134   :  { %2410 = vmatpush1.bf16.msra.mxu0 %v7958_v21  ;;  %5596 = vmatpush1.bf16.msra.mxu1 %v7107_v60  ;;  %v7300_v21 = vcombine.high %v2805_v19, %v2821_v20 }
 0x135   :  { %2411 = vmatprep.subr.bf16.mxu0 %v7963_v11  ;;  %5597 = vmatprep.subr.bf16.mxu1 %v7140_v63  ;;  %v7299_v11 = vcombine.low %v2805_v19, %v2821_v20  ;;  %v8006_v19 = vld [vmem:[#allocation4 + $0x130] ss:$8 sps:$4 sm:$0xff]   ;;  %v8011_v20 = vld [vmem:[#allocation4 + $0x144] ss:$8 sps:$4 sm:$0xff]  }
 0x138   :  { %2412 = vmatpush1.bf16.msra.mxu0 %v7961_v13  ;;  %5598 = vmatpush1.bf16.msra.mxu1 %v7139_v0  ;;  %v2837_v13 = vld [vmem:[%s10108_s7 + $0xa00] sm:$0xff] }
 0x139   :  { %2413 = vmatprep.subr.bf16.mxu0 %v7966_v22  ;;  %5599 = vmatprep.subr.bf16.mxu1 %v7172_v3  ;;  %v2853_v22 = vld [vmem:[%s10108_s7 + $0xa80] sm:$0xff] }
 0x13c   :  { %2414 = vmatpush1.bf16.msra.mxu0 %v7964_v23  ;;  %5600 = vmatpush1.bf16.msra.mxu1 %v7171_v4  ;;  %v1961_v23 = vlaneseq }
 0x13d   :  { %2415 = vmatprep.subr.bf16.mxu0 %v7969_v24  ;;  %5601 = vmatprep.subr.bf16.mxu1 %v7204_v7  ;;  %v7332_v24 = vcombine.high %v2837_v13, %v2853_v22 }
 0x140   :  { %2416 = vmatpush1.bf16.msra.mxu0 %v7967_v25  ;;  %5602 = vmatpush1.bf16.msra.mxu1 %v7203_v8  ;;  %v7331_v25 = vcombine.low %v2837_v13, %v2853_v22  ;;  %v8012_v13 = vld [vmem:[#allocation4 + $0x150] ss:$8 sps:$4 sm:$0xff]   ;;  %v8017_v22 = vld [vmem:[#allocation4 + $0x164] ss:$8 sps:$4 sm:$0xff]  }
 0x141   :  { %2417 = vmatprep.subr.bf16.mxu0 %v7972_v26  ;;  %5603 = vmatprep.subr.bf16.mxu1 %v7236_v12  ;;  %v2869_v26 = vld [vmem:[%s10108_s7 + $0xb00] sm:$0xff]  ;;  %v8002_v12 = vld [vmem:[#allocation4 + $0x114] ss:$8 sps:$4 sm:$0xff]  }
 0x144   :  { %2418 = vmatpush1.bf16.msra.mxu0 %v7970_v27  ;;  %5604 = vmatpush1.bf16.msra.mxu1 %v7235_v14  ;;  %v2885_v27 = vld [vmem:[%s10108_s7 + $0xb80] sm:$0xff] }
 0x145   :  { %2419 = vmatprep.subr.bf16.mxu0 %v7975_v28  ;;  %5605 = vmatprep.subr.bf16.mxu1 %v7268_v17  ;;  %v8282_v28 = vshrl.u32 %v1961_v23, 7  ;;  %v8003_v17 = vld [vmem:[#allocation4 + $0x120] ss:$8 sps:$4 sm:$0xff]  }
 0x146   :  { %v8015_v23 = vld [vmem:[#allocation4 + $0x160] ss:$8 sps:$4 sm:$0xff]  }
 0x148   :  { %2420 = vmatpush1.bf16.msra.mxu0 %v7973_v29  ;;  %5606 = vmatpush1.bf16.msra.mxu1 %v7267_v18  ;;  %v7364_v29 = vcombine.high %v2869_v26, %v2885_v27  ;;  %v8008_v18 = vld [vmem:[#allocation4 + $0x134] ss:$8 sps:$4 sm:$0xff]  }
 0x149   :  { %2421 = vmatprep.subr.bf16.mxu0 %v7978_v30  ;;  %5607 = vmatprep.subr.bf16.mxu1 %v7300_v21  ;;  %v7363_v30 = vcombine.low %v2869_v26, %v2885_v27  ;;  %v8009_v21 = vld [vmem:[#allocation4 + $0x140] ss:$8 sps:$4 sm:$0xff]   ;;  %v8023_v26 = vld [vmem:[#allocation4 + $0x184] ss:$8 sps:$4 sm:$0xff]  }
 0x14a   :  { %v8021_v27 = vld [vmem:[#allocation4 + $0x180] ss:$8 sps:$4 sm:$0xff]  }
 0x14c   :  { %2422 = vmatpush1.bf16.msra.mxu0 %v7976_v31  ;;  %5608 = vmatpush1.bf16.msra.mxu1 %v7299_v11  ;;  %v2901_v31 = vld [vmem:[%s10108_s7 + $0xc00] sm:$0xff]  ;;  %v8014_v11 = vld [vmem:[#allocation4 + $0x154] ss:$8 sps:$4 sm:$0xff]  }
 0x14d   :  { %2423 = vmatprep.subr.bf16.mxu0 %v7981_v32  ;;  %5609 = vmatprep.subr.bf16.mxu1 %v7332_v24  ;;  %v2917_v32 = vld [vmem:[%s10108_s7 + $0xc80] sm:$0xff]  ;;  %v8020_v24 = vld [vmem:[#allocation4 + $0x174] ss:$8 sps:$4 sm:$0xff]  }
 0x150   :  { %2424 = vmatpush1.bf16.msra.mxu0 %v7979_v33  ;;  %5610 = vmatpush1.bf16.msra.mxu1 %v7331_v25  ;;  %v8291_v33 = vsub.s32 0, %v8282_v28  ;;  %v8018_v25 = vld [vmem:[#allocation4 + $0x170] ss:$8 sps:$4 sm:$0xff]  }
 0x151   :  { %2425 = vmatprep.subr.bf16.mxu0 %v7984_v34  ;;  %5611 = vmatprep.subr.bf16.mxu1 %v7364_v29  ;;  %v8294_v34 = vsub.s32 2, %v8282_v28  ;;  %v8026_v29 = vld [vmem:[#allocation4 + $0x194] ss:$8 sps:$4 sm:$0xff]  }
 0x154   :  { %2426 = vmatpush1.bf16.msra.mxu0 %v7982_v35  ;;  %v7396_v35 = vcombine.high %v2901_v31, %v2917_v32  ;;  %5612 = vmatpush1.bf16.msra.mxu1 %v7363_v30  ;;  %v8024_v30 = vld [vmem:[#allocation4 + $0x190] ss:$8 sps:$4 sm:$0xff]  }
 0x155   :  { %2427 = vmatprep.subr.bf16.mxu0 %v7987_v36  ;;  %v1959_v36 = vld [vmem:[%s10103_s2] sm:$0xf] }
 0x156   :  { %5613 = vmatprep.subr.bf16.mxu1 %v7396_v35  ;;  %v8032_v35 = vld [vmem:[#allocation4 + $0x1b4] ss:$8 sps:$4 sm:$0xff]  }
 0x158   :  { %2428 = vmatpush1.bf16.msra.mxu0 %v7985_v37  ;;  %v8300_v37 = vsub.s32 1, %v8282_v28 }
 0x159   :  { %2429 = vmatprep.subr.bf16.mxu0 %v7990_v38  ;;  %v8303_v38 = vsub.s32 3, %v8282_v28 }
 0x15a   :  { %v1968_v46 = vrot.slane %v1959_v36, %v8300_v37 }
 0x15b   :  { %v1976_v47 = vrot.slane %v1959_v36, %v8303_v38 }
 0x15c   :  { %2430 = vmatpush1.bf16.msra.mxu0 %v7988_v39  ;;  %v7395_v39 = vcombine.low %v2901_v31, %v2917_v32  ;;  %v8029_v31 = vld [vmem:[#allocation4 + $0x1a4] ss:$8 sps:$4 sm:$0xff]   ;;  %v8027_v32 = vld [vmem:[#allocation4 + $0x1a0] ss:$8 sps:$4 sm:$0xff]  }
 0x15d   :  { %2431 = vmatprep.subr.bf16.mxu0 %v7993_v40  ;;  %v1985_v40 = vld [vmem:[%s10104_s3] sm:$0xf] }
 0x15e   :  { %v1990_v48 = vrot.slane %v1985_v40, %v8291_v33  ;;  %v1998_v49 = vrot.slane %v1985_v40, %v8294_v34  ;;  %5614 = vmatpush1.bf16.msra.mxu1 %v7395_v39  ;;  %v1994_v53 = vrot.slane %v1985_v40, %v8300_v37  ;;  %v2002_v54 = vrot.slane %v1985_v40, %v8303_v38  ;;  %v8035_v39 = vld [vmem:[#allocation4 + $0x1c4] ss:$8 sps:$4 sm:$0xff]   ;;  %v8033_v40 = vld [vmem:[#allocation4 + $0x1c0] ss:$8 sps:$4 sm:$0xff]  }
 0x160   :  { %2432 = vmatpush1.bf16.msra.mxu0 %v7991_v41  ;;  %v2933_v41 = vld [vmem:[%s10108_s7 + $0xd00] sm:$0xff] }
 0x161   :  { %2433 = vmatprep.subr.bf16.mxu0 %v7996_v42  ;;  %v2949_v42 = vld [vmem:[%s10108_s7 + $0xd80] sm:$0xff] }
 0x162   :  { %v7428_v45 = vcombine.high %v2933_v41, %v2949_v42  ;;  %v7427_v50 = vcombine.low %v2933_v41, %v2949_v42  ;;  %v8038_v41 = vld [vmem:[#allocation4 + $0x1d4] ss:$8 sps:$4 sm:$0xff]   ;;  %v8036_v42 = vld [vmem:[#allocation4 + $0x1d0] ss:$8 sps:$4 sm:$0xff]  }
 0x164   :  { %2434 = vmatpush1.bf16.msra.mxu0 %v7994_v43  ;;  %v1964_v43 = vrot.slane %v1959_v36, %v8291_v33  ;;  %5615 = vmatprep.subr.bf16.mxu1 %v7428_v45  ;;  %v8044_v45 = vld [vmem:[#allocation4 + $0x1f4] ss:$8 sps:$4 sm:$0xff]  }
 0x165   :  { %2444 = vmatprep.subr.bf16.mxu0 %v7999_v44  ;;  %v1972_v44 = vrot.slane %v1959_v36, %v8294_v34  ;;  %5616 = vmatpush1.bf16.msra.mxu1 %v7427_v50  ;;  %v8030_v36 = vld [vmem:[#allocation4 + $0x1b0] ss:$8 sps:$4 sm:$0xff]  }
 0x1fa   :  { %v1788_v51 = vpop.f32.mrb[0].mxu0  ;;  %v1952_v52 = vpop.f32.mrb[0].mxu1 }
 0x1fb   :  { %v1981_v55 = vmul.f32 %v1964_v43, %v1788_v51  ;;  %v1983_v56 = vmul.f32 %v1972_v44, %v1952_v52  ;;  %v1790_v57 = vpop.f32.mrb[1].mxu0  ;;  %v1954_v58 = vpop.f32.mrb[1].mxu1  ;;  %v8041_v43 = vld [vmem:[#allocation4 + $0x1e4] ss:$8 sps:$4 sm:$0xff]   ;;  %v8039_v44 = vld [vmem:[#allocation4 + $0x1e0] ss:$8 sps:$4 sm:$0xff]  }
 0x1fc   :  { %v1982_v59 = vmul.f32 %v1968_v46, %v1790_v57  ;;  %v1984_v60 = vmul.f32 %v1976_v47, %v1954_v58  ;;  %v1792_v61 = vpop.f32.mrb[2].mxu0  ;;  %v1956_v62 = vpop.f32.mrb[2].mxu1  ;;  %v2519_v46 = vld [vmem:[%s10108_s7 + $0x10] sm:$0xff] }
 0x1fd   :  { %v2007_v63 = vadd.f32 %v1990_v48, %v1981_v55  ;;  %v8322_v0 = vadd.f32 %v1998_v49, %v1983_v56  ;;  %v1793_v1 = vpop.f32.mrb[3].mxu0  ;;  %v1957_v2 = vpop.f32.mrb[3].mxu1  ;;  %v2535_v47 = vld [vmem:[%s10108_s7 + $0x90] sm:$0xff] }
 0x1fe   :  { %v2008_v3 = vadd.f32 %v1994_v53, %v1982_v59  ;;  %v2010_v4 = vadd.f32 %v2002_v54, %v1984_v60  ;;  %v8042_v48 = vld [vmem:[#allocation4 + $0x1f0] ss:$8 sps:$4 sm:$0xff]   ;;  %v7016_v50 = vcombine.high %v2519_v46, %v2535_v47  ;;  %v7015_v53 = vcombine.low %v2519_v46, %v2535_v47  ;;  %v2965_v46 = vld [vmem:[%s10108_s7 + $0xe00] sm:$0xff] }
 0x1ff   :  { %v2011_v5 = vmax.f32 %v2007_v63, 0.0  ;;  %v2013_v49 = vmax.f32 %v8322_v0, 0.0  ;;  %v2551_v51 = vld [vmem:[%s10108_s7 + $0x110] sm:$0xff]  ;;  %v2981_v47 = vld [vmem:[%s10108_s7 + $0xe80] sm:$0xff] }
 0x200   :  { %v2012_v6 = vmax.f32 %v2008_v3, 0.0  ;;  %v2014_v7 = vmax.f32 %v2010_v4, 0.0  ;;  %v2567_v52 = vld [vmem:[%s10108_s7 + $0x190] sm:$0xff] }
 0x201   :  { %v2015_v10 = vpack.c.bf16 %v2011_v5, %v2011_v5  ;;  %v2017_v54 = vpack.c.bf16 %v2013_v49, %v2013_v49  ;;  %v7048_v55 = vcombine.high %v2551_v51, %v2567_v52  ;;  %v2583_v56 = vld [vmem:[%s10108_s7 + $0x210] sm:$0xff]  ;;  %v7047_v58 = vcombine.low %v2551_v51, %v2567_v52 }
 0x202   :  { %v2016_v8 = vpack.c.bf16 %v2012_v6, %v2012_v6  ;;  %v2018_v14 = vpack.c.bf16 %v2014_v7, %v2014_v7  ;;  %v2599_v57 = vld [vmem:[%s10108_s7 + $0x290] sm:$0xff]  ;;  %v7460_v49 = vcombine.high %v2965_v46, %v2981_v47  ;;  %v7459_v51 = vcombine.low %v2965_v46, %v2981_v47  ;;  %v2633_v46 = vld [vmem:[%s10108_s7 + $0x3a0] sm:$0xff] }
 0x203   :  { %v7080_v59 = vcombine.high %v2583_v56, %v2599_v57  ;;  %v2615_v60 = vld [vmem:[%s10108_s7 + $0x310] sm:$0xff]  ;;  %v7079_v62 = vcombine.low %v2583_v56, %v2599_v57 }
 0x204   :  { %2435 = vmatprep.mubr.bf16.mxu0 %v2016_v8  ;;  %v2631_v61 = vld [vmem:[%s10108_s7 + $0x390] sm:$0xff]  ;;  %5617 = vmatprep.subr.bf16.mxu1 %v7460_v49 }
 0x205   :  { %2436 = vmatmul.mubr.bf16.vlgmr.msra.gmra.mrb[4].mxu0 %v2015_v10  ;;  %v7112_v63 = vcombine.high %v2615_v60, %v2631_v61  ;;  %v2647_v0 = vld [vmem:[%s10108_s7 + $0x410] sm:$0xff]  ;;  %v7111_v2 = vcombine.low %v2615_v60, %v2631_v61  ;;  %5618 = vmatpush1.bf16.msra.mxu1 %v7459_v51  ;;  %v2646_v51 = vld [vmem:[%s10108_s7 + $0x408] sm:$0xff] }
 0x206   :  { %2445 = vmatpush1.bf16.msra.mxu0 %v7997_v9  ;;  %2476 = vmatprep.mubr.bf16.mxu0 %v2018_v14  ;;  %v2663_v1 = vld [vmem:[%s10108_s7 + $0x490] sm:$0xff] }
 0x207   :  { %2446 = vmatprep.subr.bf16.mxu0 %v8002_v12  ;;  %v7144_v3 = vcombine.high %v2647_v0, %v2663_v1  ;;  %v2679_v4 = vld [vmem:[%s10108_s7 + $0x510] sm:$0xff]  ;;  %v7143_v6 = vcombine.low %v2647_v0, %v2663_v1  ;;  %v2521_v0 = vld [vmem:[%s10108_s7 + $0x20] sm:$0xff] }
 0x208   :  { %v2695_v5 = vld [vmem:[%s10108_s7 + $0x590] sm:$0xff] }
 0x209   :  { %v7176_v7 = vcombine.high %v2679_v4, %v2695_v5  ;;  %v2711_v8 = vld [vmem:[%s10108_s7 + $0x610] sm:$0xff]  ;;  %v7175_v10 = vcombine.low %v2679_v4, %v2695_v5 }
 0x20a   :  { %2447 = vmatpush1.bf16.msra.mxu0 %v8000_v15  ;;  %v2727_v9 = vld [vmem:[%s10108_s7 + $0x690] sm:$0xff] }
 0x20b   :  { %2448 = vmatprep.subr.bf16.mxu0 %v8005_v16  ;;  %v7208_v12 = vcombine.high %v2711_v8, %v2727_v9  ;;  %v2743_v14 = vld [vmem:[%s10108_s7 + $0x710] sm:$0xff]  ;;  %v7207_v16 = vcombine.low %v2711_v8, %v2727_v9 }
 0x20c   :  { %v2759_v15 = vld [vmem:[%s10108_s7 + $0x790] sm:$0xff] }
 0x20d   :  { %v2999_v56 = vld [vmem:[%s10108_s7 + $0xf10] sm:$0xff] }
 0x20e   :  { %2449 = vmatpush1.bf16.msra.mxu0 %v8003_v17  ;;  %v7240_v17 = vcombine.high %v2743_v14, %v2759_v15 }
 0x20f   :  { %2450 = vmatprep.subr.bf16.mxu0 %v8008_v18  ;;  %v2775_v18 = vld [vmem:[%s10108_s7 + $0x810] sm:$0xff] }
 0x212   :  { %2451 = vmatpush1.bf16.msra.mxu0 %v8006_v19  ;;  %v2791_v19 = vld [vmem:[%s10108_s7 + $0x890] sm:$0xff] }
 0x213   :  { %2452 = vmatprep.subr.bf16.mxu0 %v8011_v20  ;;  %v7239_v20 = vcombine.low %v2743_v14, %v2759_v15 }
 0x216   :  { %2453 = vmatpush1.bf16.msra.mxu0 %v8009_v21  ;;  %v7272_v21 = vcombine.high %v2775_v18, %v2791_v19 }
 0x217   :  { %2454 = vmatprep.subr.bf16.mxu0 %v8014_v11  ;;  %v2807_v11 = vld [vmem:[%s10108_s7 + $0x910] sm:$0xff] }
 0x21a   :  { %2455 = vmatpush1.bf16.msra.mxu0 %v8012_v13  ;;  %v2823_v13 = vld [vmem:[%s10108_s7 + $0x990] sm:$0xff] }
 0x21b   :  { %2456 = vmatprep.subr.bf16.mxu0 %v8017_v22  ;;  %v7271_v22 = vcombine.low %v2775_v18, %v2791_v19 }
 0x21e   :  { %2457 = vmatpush1.bf16.msra.mxu0 %v8015_v23  ;;  %v7304_v23 = vcombine.high %v2807_v11, %v2823_v13 }
 0x21f   :  { %2458 = vmatprep.subr.bf16.mxu0 %v8020_v24  ;;  %v2839_v24 = vld [vmem:[%s10108_s7 + $0xa10] sm:$0xff] }
 0x222   :  { %2459 = vmatpush1.bf16.msra.mxu0 %v8018_v25  ;;  %v2855_v25 = vld [vmem:[%s10108_s7 + $0xa90] sm:$0xff] }
 0x223   :  { %2460 = vmatprep.subr.bf16.mxu0 %v8023_v26  ;;  %v7303_v26 = vcombine.low %v2807_v11, %v2823_v13 }
 0x226   :  { %2461 = vmatpush1.bf16.msra.mxu0 %v8021_v27  ;;  %v7336_v27 = vcombine.high %v2839_v24, %v2855_v25 }
 0x227   :  { %2462 = vmatprep.subr.bf16.mxu0 %v8026_v29  ;;  %v2871_v29 = vld [vmem:[%s10108_s7 + $0xb10] sm:$0xff] }
 0x22a   :  { %2463 = vmatpush1.bf16.msra.mxu0 %v8024_v30  ;;  %v2887_v30 = vld [vmem:[%s10108_s7 + $0xb90] sm:$0xff] }
 0x22b   :  { %2464 = vmatprep.subr.bf16.mxu0 %v8029_v31  ;;  %v7335_v31 = vcombine.low %v2839_v24, %v2855_v25  ;;  %v2553_v24 = vld [vmem:[%s10108_s7 + $0x120] sm:$0xff] }
 0x22c   :  { %v2569_v25 = vld [vmem:[%s10108_s7 + $0x1a0] sm:$0xff] }
 0x22e   :  { %2465 = vmatpush1.bf16.msra.mxu0 %v8027_v32  ;;  %v7368_v32 = vcombine.high %v2871_v29, %v2887_v30 }
 0x22f   :  { %2466 = vmatprep.subr.bf16.mxu0 %v8032_v35  ;;  %v2903_v35 = vld [vmem:[%s10108_s7 + $0xc10] sm:$0xff] }
 0x232   :  { %2467 = vmatpush1.bf16.msra.mxu0 %v8030_v36  ;;  %v2919_v36 = vld [vmem:[%s10108_s7 + $0xc90] sm:$0xff] }
 0x233   :  { %2468 = vmatprep.subr.bf16.mxu0 %v8035_v39  ;;  %v7367_v39 = vcombine.low %v2871_v29, %v2887_v30  ;;  %v2582_v29 = vld [vmem:[%s10108_s7 + $0x208] sm:$0xff] }
 0x236   :  { %2469 = vmatpush1.bf16.msra.mxu0 %v8033_v40  ;;  %v7400_v40 = vcombine.high %v2903_v35, %v2919_v36 }
 0x237   :  { %2470 = vmatprep.subr.bf16.mxu0 %v8038_v41  ;;  %v2935_v41 = vld [vmem:[%s10108_s7 + $0xd10] sm:$0xff] }
 0x23a   :  { %2471 = vmatpush1.bf16.msra.mxu0 %v8036_v42  ;;  %v2951_v42 = vld [vmem:[%s10108_s7 + $0xd90] sm:$0xff] }
 0x23b   :  { %2472 = vmatprep.subr.bf16.mxu0 %v8041_v43  ;;  %v7399_v43 = vcombine.low %v2903_v35, %v2919_v36  ;;  %v2585_v35 = vld [vmem:[%s10108_s7 + $0x220] sm:$0xff] }
 0x23c   :  { %v2601_v36 = vld [vmem:[%s10108_s7 + $0x2a0] sm:$0xff] }
 0x23e   :  { %2473 = vmatpush1.bf16.msra.mxu0 %v8039_v44  ;;  %v7432_v44 = vcombine.high %v2935_v41, %v2951_v42 }
 0x23f   :  { %2474 = vmatprep.subr.bf16.mxu0 %v8044_v45  ;;  %v7431_v45 = vcombine.low %v2935_v41, %v2951_v42  ;;  %v7084_v42 = vcombine.high %v2585_v35, %v2601_v36 }
 0x242   :  { %2475 = vmatpush1.bf16.msra.mxu0 %v8042_v48  ;;  %v2967_v48 = vld [vmem:[%s10108_s7 + $0xe10] sm:$0xff] }
 0x243   :  { %5671 = vmatprep.subr.bf16.mxu0 %v7016_v50  ;;  %v2983_v50 = vld [vmem:[%s10108_s7 + $0xe90] sm:$0xff] }
 0x244   :  { %v7463_v52 = vcombine.low %v2967_v48, %v2983_v50 }
 0x245   :  { %2477 = vmatmul.mubr.bf16.vlgmr.msra.gmra.mrb[4].mxu0 %v2017_v54  ;;  %v2997_v54 = vld [vmem:[%s10108_s7 + $0xf00] sm:$0xff] }
 0x246   :  { %5672 = vmatpush1.bf16.msra.mxu0 %v7015_v53  ;;  %v7464_v53 = vcombine.high %v2967_v48, %v2983_v50  ;;  %v7083_v48 = vcombine.low %v2585_v35, %v2601_v36  ;;  %v2825_v35 = vld [vmem:[%s10108_s7 + $0x9a0] sm:$0xff] }
 0x247   :  { %5673 = vmatprep.subr.bf16.mxu0 %v7048_v55  ;;  %v3013_v55 = vld [vmem:[%s10108_s7 + $0xf80] sm:$0xff] }
 0x248   :  { %v7492_v57 = vcombine.high %v2997_v54, %v3013_v55 }
 0x24a   :  { %5674 = vmatpush1.bf16.msra.mxu0 %v7047_v58  ;;  %v3015_v58 = vld [vmem:[%s10108_s7 + $0xf90] sm:$0xff]  ;;  %5619 = vmatprep.subr.bf16.mxu1 %v7492_v57 }
 0x24b   :  { %5675 = vmatprep.subr.bf16.mxu0 %v7080_v59  ;;  %v7491_v59 = vcombine.low %v2997_v54, %v3013_v55  ;;  %v7495_v60 = vcombine.low %v2999_v56, %v3015_v58  ;;  %v7496_v61 = vcombine.high %v2999_v56, %v3015_v58  ;;  %v2665_v54 = vld [vmem:[%s10108_s7 + $0x4a0] sm:$0xff] }
 0x24d   :  { %5620 = vmatpush1.bf16.msra.mxu1 %v7491_v59  ;;  %v2678_v59 = vld [vmem:[%s10108_s7 + $0x508] sm:$0xff] }
 0x24e   :  { %5676 = vmatpush1.bf16.msra.mxu0 %v7079_v62  ;;  %v2518_v62 = vld [vmem:[%s10108_s7 + $0x8] sm:$0xff] }
 0x24f   :  { %5677 = vmatprep.subr.bf16.mxu0 %v7112_v63  ;;  %v2534_v63 = vld [vmem:[%s10108_s7 + $0x88] sm:$0xff] }
 0x250   :  { %v7014_v1 = vcombine.high %v2518_v62, %v2534_v63 }
 0x252   :  { %5678 = vmatpush1.bf16.msra.mxu0 %v7111_v2  ;;  %v2537_v2 = vld [vmem:[%s10108_s7 + $0xa0] sm:$0xff]  ;;  %5630 = vmatprep.subr.bf16.mxu1 %v7014_v1 }
 0x253   :  { %5679 = vmatprep.subr.bf16.mxu0 %v7144_v3  ;;  %v7013_v3 = vcombine.low %v2518_v62, %v2534_v63  ;;  %v7019_v4 = vcombine.low %v2521_v0, %v2537_v2  ;;  %v7020_v5 = vcombine.high %v2521_v0, %v2537_v2  ;;  %v2697_v62 = vld [vmem:[%s10108_s7 + $0x5a0] sm:$0xff] }
 0x256   :  { %5680 = vmatpush1.bf16.msra.mxu0 %v7143_v6  ;;  %v2485_v6 = vld [vmem:[%s10106_s5] sm:$0x3] }
 0x257   :  { %5681 = vmatprep.subr.bf16.mxu0 %v7176_v7  ;;  %v2499_v7 = vld [vmem:[%s10107_s6] sm:$0x3]  ;;  %v2490_v8 = vrot.slane %v2485_v6, %v8291_v33  ;;  %v2494_v9 = vrot.slane %v2485_v6, %v8300_v37 }
 0x258   :  { %v2508_v14 = vrot.slane %v2499_v7, %v8300_v37  ;;  %v2729_v6 = vld [vmem:[%s10108_s7 + $0x6a0] sm:$0xff] }
 0x25a   :  { %5682 = vmatpush1.bf16.msra.mxu0 %v7175_v10  ;;  %v2504_v10 = vrot.slane %v2499_v7, %v8291_v33 }
 0x25b   :  { %5683 = vmatprep.subr.bf16.mxu0 %v7208_v12 }
 0x25e   :  { %5684 = vmatpush1.bf16.msra.mxu0 %v7207_v16 }
 0x25f   :  { %5685 = vmatprep.subr.bf16.mxu0 %v7240_v17 }
 0x262   :  { %5686 = vmatpush1.bf16.msra.mxu0 %v7239_v20 }
 0x263   :  { %5687 = vmatprep.subr.bf16.mxu0 %v7272_v21 }
 0x266   :  { %5688 = vmatpush1.bf16.msra.mxu0 %v7271_v22  ;;  %v2550_v22 = vld [vmem:[%s10108_s7 + $0x108] sm:$0xff] }
 0x267   :  { %5689 = vmatprep.subr.bf16.mxu0 %v7304_v23  ;;  %v2566_v23 = vld [vmem:[%s10108_s7 + $0x188] sm:$0xff] }
 0x268   :  { %v7046_v30 = vcombine.high %v2550_v22, %v2566_v23 }
 0x26a   :  { %5690 = vmatpush1.bf16.msra.mxu0 %v7303_v26 }
 0x26b   :  { %5691 = vmatprep.subr.bf16.mxu0 %v7336_v27 }
 0x26e   :  { %5692 = vmatpush1.bf16.msra.mxu0 %v7335_v31  ;;  %v7052_v31 = vcombine.high %v2553_v24, %v2569_v25 }
 0x26f   :  { %5693 = vmatprep.subr.bf16.mxu0 %v7368_v32  ;;  %v2598_v32 = vld [vmem:[%s10108_s7 + $0x288] sm:$0xff] }
 0x270   :  { %v7078_v41 = vcombine.high %v2582_v29, %v2598_v32  ;;  %v7077_v47 = vcombine.low %v2582_v29, %v2598_v32  ;;  %v2809_v32 = vld [vmem:[%s10108_s7 + $0x920] sm:$0xff] }
 0x272   :  { %5694 = vmatpush1.bf16.msra.mxu0 %v7367_v39  ;;  %v7045_v39 = vcombine.low %v2550_v22, %v2566_v23  ;;  %v2793_v22 = vld [vmem:[%s10108_s7 + $0x8a0] sm:$0xff] }
 0x273   :  { %5695 = vmatprep.subr.bf16.mxu0 %v7400_v40  ;;  %v7051_v40 = vcombine.low %v2553_v24, %v2569_v25 }
 0x276   :  { %5696 = vmatpush1.bf16.msra.mxu0 %v7399_v43  ;;  %v2614_v43 = vld [vmem:[%s10108_s7 + $0x308] sm:$0xff] }
 0x277   :  { %5697 = vmatprep.subr.bf16.mxu0 %v7432_v44  ;;  %v2630_v44 = vld [vmem:[%s10108_s7 + $0x388] sm:$0xff] }
 0x278   :  { %v7110_v49 = vcombine.high %v2614_v43, %v2630_v44  ;;  %v7109_v55 = vcombine.low %v2614_v43, %v2630_v44  ;;  %v2854_v43 = vld [vmem:[%s10108_s7 + $0xa88] sm:$0xff]  ;;  %v2841_v44 = vld [vmem:[%s10108_s7 + $0xa20] sm:$0xff] }
 0x27a   :  { %5698 = vmatpush1.bf16.msra.mxu0 %v7431_v45  ;;  %v2617_v45 = vld [vmem:[%s10108_s7 + $0x320] sm:$0xff] }
 0x27b   :  { %5699 = vmatprep.subr.bf16.mxu0 %v7464_v53  ;;  %v7116_v50 = vcombine.high %v2617_v45, %v2633_v46  ;;  %v2649_v53 = vld [vmem:[%s10108_s7 + $0x420] sm:$0xff]  ;;  %v7115_v56 = vcombine.low %v2617_v45, %v2633_v46 }
 0x27c   :  { %v7148_v58 = vcombine.high %v2649_v53, %v2665_v54  ;;  %v7147_v0 = vcombine.low %v2649_v53, %v2665_v54  ;;  %v2857_v45 = vld [vmem:[%s10108_s7 + $0xaa0] sm:$0xff] }
 0x27d   :  { %v2889_v53 = vld [vmem:[%s10108_s7 + $0xba0] sm:$0xff] }
 0x27e   :  { %5700 = vmatpush1.bf16.msra.mxu0 %v7463_v52  ;;  %v2662_v52 = vld [vmem:[%s10108_s7 + $0x488] sm:$0xff] }
 0x27f   :  { %5701 = vmatprep.subr.bf16.mxu0 %v7496_v61  ;;  %v7142_v57 = vcombine.high %v2646_v51, %v2662_v52  ;;  %v2681_v61 = vld [vmem:[%s10108_s7 + $0x520] sm:$0xff]  ;;  %v7141_v63 = vcombine.low %v2646_v51, %v2662_v52  ;;  %v2886_v51 = vld [vmem:[%s10108_s7 + $0xb88] sm:$0xff] }
 0x280   :  { %v7180_v2 = vcombine.high %v2681_v61, %v2697_v62  ;;  %v2873_v52 = vld [vmem:[%s10108_s7 + $0xb20] sm:$0xff] }
 0x282   :  { %5702 = vmatpush1.bf16.msra.mxu0 %v7495_v60  ;;  %v2694_v60 = vld [vmem:[%s10108_s7 + $0x588] sm:$0xff] }
 0x283   :  { %5753 = vmatprep.subr.bf16.mxu0 %v7020_v5  ;;  %v7174_v1 = vcombine.high %v2678_v59, %v2694_v60  ;;  %v2713_v5 = vld [vmem:[%s10108_s7 + $0x620] sm:$0xff]  ;;  %v7173_v7 = vcombine.low %v2678_v59, %v2694_v60  ;;  %v2918_v59 = vld [vmem:[%s10108_s7 + $0xc88] sm:$0xff] }
 0x284   :  { %v2905_v60 = vld [vmem:[%s10108_s7 + $0xc20] sm:$0xff] }
 0x318   :  { %v2478_v12 = vpop.f32.mrb[4].mxu0 }
 0x319   :  { %v2497_v15 = vmul.f32 %v2490_v8, %v2478_v12  ;;  %v2480_v16 = vpop.f32.mrb[5].mxu0  ;;  %v7179_v8 = vcombine.low %v2681_v61, %v2697_v62  ;;  %v2742_v12 = vld [vmem:[%s10108_s7 + $0x708] sm:$0xff]  ;;  %v2921_v61 = vld [vmem:[%s10108_s7 + $0xca0] sm:$0xff] }
 0x31a   :  { %v2498_v17 = vmul.f32 %v2494_v9, %v2480_v16  ;;  %v2482_v18 = vpop.f32.mrb[6].mxu0  ;;  %v2761_v16 = vld [vmem:[%s10108_s7 + $0x7a0] sm:$0xff] }
 0x31b   :  { %v2511_v19 = vadd.f32 %v2504_v10, %v2497_v15  ;;  %v2483_v20 = vpop.f32.mrb[7].mxu0  ;;  %v7212_v10 = vcombine.high %v2713_v5, %v2729_v6  ;;  %v2745_v15 = vld [vmem:[%s10108_s7 + $0x720] sm:$0xff]  ;;  %v7211_v18 = vcombine.low %v2713_v5, %v2729_v6 }
 0x31c   :  { %v2512_v21 = vadd.f32 %v2508_v14, %v2498_v17  ;;  %v2758_v14 = vld [vmem:[%s10108_s7 + $0x788] sm:$0xff]  ;;  %v7244_v20 = vcombine.high %v2745_v15, %v2761_v16  ;;  %v7243_v24 = vcombine.low %v2745_v15, %v2761_v16  ;;  %v2953_v5 = vld [vmem:[%s10108_s7 + $0xda0] sm:$0xff] }
 0x31d   :  { %v2513_v11 = vmax.f32 %v2511_v19, 0.0  ;;  %v7238_v19 = vcombine.high %v2742_v12, %v2758_v14  ;;  %v7237_v23 = vcombine.low %v2742_v12, %v2758_v14  ;;  %v2982_v12 = vld [vmem:[%s10108_s7 + $0xe88] sm:$0xff]  ;;  %v2969_v14 = vld [vmem:[%s10108_s7 + $0xe20] sm:$0xff] }
 0x31e   :  { %v2514_v13 = vmax.f32 %v2512_v21, 0.0  ;;  %v2774_v21 = vld [vmem:[%s10108_s7 + $0x808] sm:$0xff]  ;;  %v2985_v15 = vld [vmem:[%s10108_s7 + $0xea0] sm:$0xff] }
 0x31f   :  { %v8469_v27 = vpack.c.bf16 %v2513_v11, %v2513_v11  ;;  %v2790_v11 = vld [vmem:[%s10108_s7 + $0x888] sm:$0xff] }
 0x320   :  { %v8467_v26 = vpack.c.bf16 %v2514_v13, %v2514_v13  ;;  %v2777_v13 = vld [vmem:[%s10108_s7 + $0x820] sm:$0xff]  ;;  %v7270_v25 = vcombine.high %v2774_v21, %v2790_v11  ;;  %v7269_v36 = vcombine.low %v2774_v21, %v2790_v11  ;;  %v3014_v21 = vld [vmem:[%s10108_s7 + $0xf88] sm:$0xff] }
 0x321   :  { %v7276_v29 = vcombine.high %v2777_v13, %v2793_v22  ;;  %v3001_v11 = vld [vmem:[%s10108_s7 + $0xf20] sm:$0xff] }
 0x322   :  { %5621 = vmatprep.mubr.bf16.mxu1 %v8467_v26  ;;  %5703 = vmatprep.mubr.bf16.mxu0 %v8467_v26 }
 0x323   :  { %5622 = vmatmul.mubr.bf16.vlgmr.msra.gmra.mrb[4].mxu1 %v8469_v27  ;;  %5704 = vmatmul.mubr.bf16.vlgmr.msra.gmra.mrb[8].mxu0 %v8469_v27 }
 0x324   :  { %5631 = vmatpush1.bf16.msra.mxu1 %v7013_v3  ;;  %5754 = vmatpush1.bf16.msra.mxu0 %v7019_v4  ;;  %v2710_v3 = vld [vmem:[%s10108_s7 + $0x608] sm:$0xff] }
 0x325   :  { %5662 = vmatprep.mubr.bf16.mxu1 %v8467_v26  ;;  %5785 = vmatprep.mubr.bf16.mxu0 %v8467_v26  ;;  %v2726_v4 = vld [vmem:[%s10108_s7 + $0x688] sm:$0xff] }
 0x326   :  { %5632 = vmatprep.subr.bf16.mxu1 %v7046_v30  ;;  %5755 = vmatprep.subr.bf16.mxu0 %v7052_v31  ;;  %v7206_v9 = vcombine.high %v2710_v3, %v2726_v4  ;;  %v7205_v17 = vcombine.low %v2710_v3, %v2726_v4  ;;  %v2806_v30 = vld [vmem:[%s10108_s7 + $0x908] sm:$0xff]  ;;  %v2937_v4 = vld [vmem:[%s10108_s7 + $0xd20] sm:$0xff] }
 0x327   :  { %v2822_v31 = vld [vmem:[%s10108_s7 + $0x988] sm:$0xff] }
 0x328   :  { %5633 = vmatpush1.bf16.msra.mxu1 %v7045_v39  ;;  %5756 = vmatpush1.bf16.msra.mxu0 %v7051_v40  ;;  %v7275_v39 = vcombine.low %v2777_v13, %v2793_v22  ;;  %v7302_v40 = vcombine.high %v2806_v30, %v2822_v31  ;;  %v7301_v46 = vcombine.low %v2806_v30, %v2822_v31  ;;  %v2950_v3 = vld [vmem:[%s10108_s7 + $0xd88] sm:$0xff]  ;;  %v3017_v13 = vld [vmem:[%s10108_s7 + $0xfa0] sm:$0xff]  ;;  %v2536_v30 = vld [vmem:[%s10108_s7 + $0x98] sm:$0xff] }
 0x329   :  { %5634 = vmatprep.subr.bf16.mxu1 %v7078_v41  ;;  %5757 = vmatprep.subr.bf16.mxu0 %v7084_v42  ;;  %v7308_v41 = vcombine.high %v2809_v32, %v2825_v35  ;;  %v2838_v42 = vld [vmem:[%s10108_s7 + $0xa08] sm:$0xff]  ;;  %v2523_v31 = vld [vmem:[%s10108_s7 + $0x30] sm:$0xff] }
 0x32a   :  { %v7333_v54 = vcombine.low %v2838_v42, %v2854_v43 }
 0x32c   :  { %5635 = vmatpush1.bf16.msra.mxu1 %v7077_v47  ;;  %5758 = vmatpush1.bf16.msra.mxu0 %v7083_v48  ;;  %v7307_v47 = vcombine.low %v2809_v32, %v2825_v35  ;;  %v7334_v48 = vcombine.high %v2838_v42, %v2854_v43  ;;  %v2539_v32 = vld [vmem:[%s10108_s7 + $0xb0] sm:$0xff]  ;;  %v2568_v42 = vld [vmem:[%s10108_s7 + $0x198] sm:$0xff] }
 0x32d   :  { %5636 = vmatprep.subr.bf16.mxu1 %v7110_v49  ;;  %5759 = vmatprep.subr.bf16.mxu0 %v7116_v50  ;;  %v7340_v49 = vcombine.high %v2841_v44, %v2857_v45  ;;  %v2870_v50 = vld [vmem:[%s10108_s7 + $0xb08] sm:$0xff]  ;;  %v2555_v43 = vld [vmem:[%s10108_s7 + $0x130] sm:$0xff] }
 0x32e   :  { %v7365_v62 = vcombine.low %v2870_v50, %v2886_v51 }
 0x330   :  { %5637 = vmatpush1.bf16.msra.mxu1 %v7109_v55  ;;  %5760 = vmatpush1.bf16.msra.mxu0 %v7115_v56  ;;  %v7339_v55 = vcombine.low %v2841_v44, %v2857_v45  ;;  %v7366_v56 = vcombine.high %v2870_v50, %v2886_v51  ;;  %v2571_v44 = vld [vmem:[%s10108_s7 + $0x1b0] sm:$0xff]  ;;  %v2600_v50 = vld [vmem:[%s10108_s7 + $0x298] sm:$0xff] }
 0x331   :  { %5638 = vmatprep.subr.bf16.mxu1 %v7142_v57  ;;  %5761 = vmatprep.subr.bf16.mxu0 %v7148_v58  ;;  %v7372_v57 = vcombine.high %v2873_v52, %v2889_v53  ;;  %v2902_v58 = vld [vmem:[%s10108_s7 + $0xc08] sm:$0xff]  ;;  %v2587_v51 = vld [vmem:[%s10108_s7 + $0x230] sm:$0xff] }
 0x332   :  { %v7397_v6 = vcombine.low %v2902_v58, %v2918_v59 }
 0x334   :  { %5639 = vmatpush1.bf16.msra.mxu1 %v7141_v63  ;;  %5762 = vmatpush1.bf16.msra.mxu0 %v7147_v0  ;;  %v7371_v63 = vcombine.low %v2873_v52, %v2889_v53  ;;  %v7398_v0 = vcombine.high %v2902_v58, %v2918_v59  ;;  %v2603_v52 = vld [vmem:[%s10108_s7 + $0x2b0] sm:$0xff]  ;;  %v2632_v58 = vld [vmem:[%s10108_s7 + $0x398] sm:$0xff] }
 0x335   :  { %5640 = vmatprep.subr.bf16.mxu1 %v7174_v1  ;;  %5763 = vmatprep.subr.bf16.mxu0 %v7180_v2  ;;  %v7404_v1 = vcombine.high %v2905_v60, %v2921_v61  ;;  %v2934_v2 = vld [vmem:[%s10108_s7 + $0xd08] sm:$0xff]  ;;  %v2619_v59 = vld [vmem:[%s10108_s7 + $0x330] sm:$0xff] }
 0x336   :  { %v7429_v16 = vcombine.low %v2934_v2, %v2950_v3 }
 0x338   :  { %5641 = vmatpush1.bf16.msra.mxu1 %v7173_v7  ;;  %5764 = vmatpush1.bf16.msra.mxu0 %v7179_v8  ;;  %v7403_v7 = vcombine.low %v2905_v60, %v2921_v61  ;;  %v7430_v8 = vcombine.high %v2934_v2, %v2950_v3  ;;  %v2635_v60 = vld [vmem:[%s10108_s7 + $0x3b0] sm:$0xff]  ;;  %v2664_v2 = vld [vmem:[%s10108_s7 + $0x498] sm:$0xff] }
 0x339   :  { %5642 = vmatprep.subr.bf16.mxu1 %v7206_v9  ;;  %5765 = vmatprep.subr.bf16.mxu0 %v7212_v10  ;;  %v7436_v9 = vcombine.high %v2937_v4, %v2953_v5  ;;  %v2966_v10 = vld [vmem:[%s10108_s7 + $0xe08] sm:$0xff]  ;;  %v2651_v3 = vld [vmem:[%s10108_s7 + $0x430] sm:$0xff] }
 0x33a   :  { %v7461_v22 = vcombine.low %v2966_v10, %v2982_v12 }
 0x33c   :  { %5643 = vmatpush1.bf16.msra.mxu1 %v7205_v17  ;;  %5766 = vmatpush1.bf16.msra.mxu0 %v7211_v18  ;;  %v7435_v17 = vcombine.low %v2937_v4, %v2953_v5  ;;  %v7462_v18 = vcombine.high %v2966_v10, %v2982_v12  ;;  %v2667_v4 = vld [vmem:[%s10108_s7 + $0x4b0] sm:$0xff]  ;;  %v2696_v10 = vld [vmem:[%s10108_s7 + $0x598] sm:$0xff] }
 0x33d   :  { %5644 = vmatprep.subr.bf16.mxu1 %v7238_v19  ;;  %5767 = vmatprep.subr.bf16.mxu0 %v7244_v20  ;;  %v7468_v19 = vcombine.high %v2969_v14, %v2985_v15  ;;  %v2998_v20 = vld [vmem:[%s10108_s7 + $0xf08] sm:$0xff]  ;;  %v2683_v12 = vld [vmem:[%s10108_s7 + $0x530] sm:$0xff] }
 0x33e   :  { %v7493_v35 = vcombine.low %v2998_v20, %v3014_v21 }
 0x340   :  { %5645 = vmatpush1.bf16.msra.mxu1 %v7237_v23  ;;  %5768 = vmatpush1.bf16.msra.mxu0 %v7243_v24  ;;  %v7467_v23 = vcombine.low %v2969_v14, %v2985_v15  ;;  %v7494_v24 = vcombine.high %v2998_v20, %v3014_v21  ;;  %v2699_v14 = vld [vmem:[%s10108_s7 + $0x5b0] sm:$0xff]  ;;  %v2728_v20 = vld [vmem:[%s10108_s7 + $0x698] sm:$0xff] }
 0x341   :  { %5646 = vmatprep.subr.bf16.mxu1 %v7270_v25  ;;  %5769 = vmatprep.subr.bf16.mxu0 %v7276_v29  ;;  %v7500_v25 = vcombine.high %v3001_v11, %v3017_v13  ;;  %v2520_v29 = vld [vmem:[%s10108_s7 + $0x18] sm:$0xff]  ;;  %v2715_v21 = vld [vmem:[%s10108_s7 + $0x630] sm:$0xff] }
 0x342   :  { %v7017_v45 = vcombine.low %v2520_v29, %v2536_v30 }
 0x344   :  { %5647 = vmatpush1.bf16.msra.mxu1 %v7269_v36  ;;  %5770 = vmatpush1.bf16.msra.mxu0 %v7275_v39  ;;  %v7499_v36 = vcombine.low %v3001_v11, %v3017_v13  ;;  %v7018_v39 = vcombine.high %v2520_v29, %v2536_v30  ;;  %v2731_v11 = vld [vmem:[%s10108_s7 + $0x6b0] sm:$0xff]  ;;  %v2760_v29 = vld [vmem:[%s10108_s7 + $0x798] sm:$0xff] }
 0x345   :  { %5648 = vmatprep.subr.bf16.mxu1 %v7302_v40  ;;  %5771 = vmatprep.subr.bf16.mxu0 %v7308_v41  ;;  %v7024_v40 = vcombine.high %v2523_v31, %v2539_v32  ;;  %v2552_v41 = vld [vmem:[%s10108_s7 + $0x118] sm:$0xff]  ;;  %v2747_v30 = vld [vmem:[%s10108_s7 + $0x730] sm:$0xff] }
 0x346   :  { %v7049_v53 = vcombine.low %v2552_v41, %v2568_v42 }
 0x348   :  { %5649 = vmatpush1.bf16.msra.mxu1 %v7301_v46  ;;  %5772 = vmatpush1.bf16.msra.mxu0 %v7307_v47  ;;  %v7023_v46 = vcombine.low %v2523_v31, %v2539_v32  ;;  %v7050_v47 = vcombine.high %v2552_v41, %v2568_v42  ;;  %v2763_v31 = vld [vmem:[%s10108_s7 + $0x7b0] sm:$0xff]  ;;  %v2792_v41 = vld [vmem:[%s10108_s7 + $0x898] sm:$0xff] }
 0x349   :  { %5650 = vmatprep.subr.bf16.mxu1 %v7334_v48  ;;  %5773 = vmatprep.subr.bf16.mxu0 %v7340_v49  ;;  %v7056_v48 = vcombine.high %v2555_v43, %v2571_v44  ;;  %v2584_v49 = vld [vmem:[%s10108_s7 + $0x218] sm:$0xff]  ;;  %v2779_v42 = vld [vmem:[%s10108_s7 + $0x830] sm:$0xff] }
 0x34a   :  { %v7081_v61 = vcombine.low %v2584_v49, %v2600_v50 }
 0x34c   :  { %5651 = vmatpush1.bf16.msra.mxu1 %v7333_v54  ;;  %5774 = vmatpush1.bf16.msra.mxu0 %v7339_v55  ;;  %v7055_v54 = vcombine.low %v2555_v43, %v2571_v44  ;;  %v7082_v55 = vcombine.high %v2584_v49, %v2600_v50  ;;  %v2795_v43 = vld [vmem:[%s10108_s7 + $0x8b0] sm:$0xff]  ;;  %v2824_v49 = vld [vmem:[%s10108_s7 + $0x998] sm:$0xff] }
 0x34d   :  { %5652 = vmatprep.subr.bf16.mxu1 %v7366_v56  ;;  %5775 = vmatprep.subr.bf16.mxu0 %v7372_v57  ;;  %v7088_v56 = vcombine.high %v2587_v51, %v2603_v52  ;;  %v2616_v57 = vld [vmem:[%s10108_s7 + $0x318] sm:$0xff]  ;;  %v2811_v50 = vld [vmem:[%s10108_s7 + $0x930] sm:$0xff] }
 0x34e   :  { %v7113_v5 = vcombine.low %v2616_v57, %v2632_v58 }
 0x350   :  { %5653 = vmatpush1.bf16.msra.mxu1 %v7365_v62  ;;  %5776 = vmatpush1.bf16.msra.mxu0 %v7371_v63  ;;  %v7087_v62 = vcombine.low %v2587_v51, %v2603_v52  ;;  %v7114_v63 = vcombine.high %v2616_v57, %v2632_v58  ;;  %v2827_v51 = vld [vmem:[%s10108_s7 + $0x9b0] sm:$0xff]  ;;  %v2856_v57 = vld [vmem:[%s10108_s7 + $0xa98] sm:$0xff] }
 0x351   :  { %5654 = vmatprep.subr.bf16.mxu1 %v7398_v0  ;;  %5777 = vmatprep.subr.bf16.mxu0 %v7404_v1  ;;  %v7120_v0 = vcombine.high %v2619_v59, %v2635_v60  ;;  %v2648_v1 = vld [vmem:[%s10108_s7 + $0x418] sm:$0xff]  ;;  %v2843_v58 = vld [vmem:[%s10108_s7 + $0xa30] sm:$0xff] }
 0x352   :  { %v7145_v15 = vcombine.low %v2648_v1, %v2664_v2 }
 0x354   :  { %5655 = vmatpush1.bf16.msra.mxu1 %v7397_v6  ;;  %5778 = vmatpush1.bf16.msra.mxu0 %v7403_v7  ;;  %v7119_v6 = vcombine.low %v2619_v59, %v2635_v60  ;;  %v7146_v7 = vcombine.high %v2648_v1, %v2664_v2  ;;  %v2859_v59 = vld [vmem:[%s10108_s7 + $0xab0] sm:$0xff]  ;;  %v2888_v1 = vld [vmem:[%s10108_s7 + $0xb98] sm:$0xff] }
 0x355   :  { %5656 = vmatprep.subr.bf16.mxu1 %v7430_v8  ;;  %5779 = vmatprep.subr.bf16.mxu0 %v7436_v9  ;;  %v7152_v8 = vcombine.high %v2651_v3, %v2667_v4  ;;  %v2680_v9 = vld [vmem:[%s10108_s7 + $0x518] sm:$0xff]  ;;  %v2875_v2 = vld [vmem:[%s10108_s7 + $0xb30] sm:$0xff] }
 0x356   :  { %v7177_v13 = vcombine.low %v2680_v9, %v2696_v10 }
 0x358   :  { %5657 = vmatpush1.bf16.msra.mxu1 %v7429_v16  ;;  %5780 = vmatpush1.bf16.msra.mxu0 %v7435_v17  ;;  %v7151_v16 = vcombine.low %v2651_v3, %v2667_v4  ;;  %v7178_v17 = vcombine.high %v2680_v9, %v2696_v10  ;;  %v2891_v3 = vld [vmem:[%s10108_s7 + $0xbb0] sm:$0xff]  ;;  %v2920_v9 = vld [vmem:[%s10108_s7 + $0xc98] sm:$0xff] }
 0x359   :  { %5658 = vmatprep.subr.bf16.mxu1 %v7462_v18  ;;  %5781 = vmatprep.subr.bf16.mxu0 %v7468_v19  ;;  %v7184_v18 = vcombine.high %v2683_v12, %v2699_v14  ;;  %v2712_v19 = vld [vmem:[%s10108_s7 + $0x618] sm:$0xff]  ;;  %v2907_v10 = vld [vmem:[%s10108_s7 + $0xc30] sm:$0xff] }
 0x35a   :  { %v7209_v32 = vcombine.low %v2712_v19, %v2728_v20 }
 0x35c   :  { %5659 = vmatpush1.bf16.msra.mxu1 %v7461_v22  ;;  %5782 = vmatpush1.bf16.msra.mxu0 %v7467_v23  ;;  %v7183_v22 = vcombine.low %v2683_v12, %v2699_v14  ;;  %v7210_v23 = vcombine.high %v2712_v19, %v2728_v20  ;;  %v2923_v12 = vld [vmem:[%s10108_s7 + $0xcb0] sm:$0xff]  ;;  %v2952_v19 = vld [vmem:[%s10108_s7 + $0xd98] sm:$0xff] }
 0x35d   :  { %5660 = vmatprep.subr.bf16.mxu1 %v7494_v24  ;;  %5783 = vmatprep.subr.bf16.mxu0 %v7500_v25  ;;  %v7216_v24 = vcombine.high %v2715_v21, %v2731_v11  ;;  %v2744_v25 = vld [vmem:[%s10108_s7 + $0x718] sm:$0xff]  ;;  %v2939_v20 = vld [vmem:[%s10108_s7 + $0xd30] sm:$0xff] }
 0x35e   :  { %v7241_v44 = vcombine.low %v2744_v25, %v2760_v29 }
 0x360   :  { %5661 = vmatpush1.bf16.msra.mxu1 %v7493_v35  ;;  %5784 = vmatpush1.bf16.msra.mxu0 %v7499_v36  ;;  %v7215_v35 = vcombine.low %v2715_v21, %v2731_v11  ;;  %v7242_v36 = vcombine.high %v2744_v25, %v2760_v29  ;;  %v2955_v21 = vld [vmem:[%s10108_s7 + $0xdb0] sm:$0xff]  ;;  %v2984_v25 = vld [vmem:[%s10108_s7 + $0xe98] sm:$0xff] }
 0x361   :  { %5712 = vmatprep.subr.bf16.mxu1 %v7018_v39  ;;  %5835 = vmatprep.subr.bf16.mxu0 %v7024_v40  ;;  %v7248_v39 = vcombine.high %v2747_v30, %v2763_v31  ;;  %v2776_v40 = vld [vmem:[%s10108_s7 + $0x818] sm:$0xff]  ;;  %v2971_v29 = vld [vmem:[%s10108_s7 + $0xe30] sm:$0xff] }
 0x362   :  { %v7273_v52 = vcombine.low %v2776_v40, %v2792_v41 }
 0x363   :  { %5663 = vmatmul.mubr.bf16.vlgmr.msra.gmra.mrb[8].mxu1 %v8469_v27  ;;  %5786 = vmatmul.mubr.bf16.vlgmr.msra.gmra.mrb[12].mxu0 %v8469_v27 }
 0x364   :  { %5713 = vmatpush1.bf16.msra.mxu1 %v7017_v45  ;;  %5744 = vmatprep.mubr.bf16.mxu1 %v8467_v26  ;;  %v7247_v45 = vcombine.low %v2747_v30, %v2763_v31  ;;  %v2987_v30 = vld [vmem:[%s10108_s7 + $0xeb0] sm:$0xff] }
 0x365   :  { %5836 = vmatpush1.bf16.msra.mxu0 %v7023_v46  ;;  %5867 = vmatprep.mubr.bf16.mxu0 %v8467_v26  ;;  %v7274_v46 = vcombine.high %v2776_v40, %v2792_v41  ;;  %v3016_v40 = vld [vmem:[%s10108_s7 + $0xf98] sm:$0xff]  ;;  %v3003_v41 = vld [vmem:[%s10108_s7 + $0xf30] sm:$0xff] }
 0x366   :  { %5714 = vmatprep.subr.bf16.mxu1 %v7050_v47  ;;  %5837 = vmatprep.subr.bf16.mxu0 %v7056_v48  ;;  %v7280_v47 = vcombine.high %v2779_v42, %v2795_v43  ;;  %v2808_v48 = vld [vmem:[%s10108_s7 + $0x918] sm:$0xff] }
 0x367   :  { %v7305_v60 = vcombine.low %v2808_v48, %v2824_v49 }
 0x368   :  { %5715 = vmatpush1.bf16.msra.mxu1 %v7049_v53  ;;  %v7279_v53 = vcombine.low %v2779_v42, %v2795_v43  ;;  %v3019_v42 = vld [vmem:[%s10108_s7 + $0xfb0] sm:$0xff] }
 0x369   :  { %5838 = vmatpush1.bf16.msra.mxu0 %v7055_v54  ;;  %5716 = vmatprep.subr.bf16.mxu1 %v7082_v55  ;;  %v7306_v54 = vcombine.high %v2808_v48, %v2824_v49  ;;  %v7312_v55 = vcombine.high %v2811_v50, %v2827_v51  ;;  %v2538_v48 = vld [vmem:[%s10108_s7 + $0xa8] sm:$0xff]  ;;  %v2525_v49 = vld [vmem:[%s10108_s7 + $0x40] sm:$0xff] }
 0x36a   :  { %5839 = vmatprep.subr.bf16.mxu0 %v7088_v56  ;;  %v2840_v56 = vld [vmem:[%s10108_s7 + $0xa18] sm:$0xff] }
 0x36b   :  { %v7337_v4 = vcombine.low %v2840_v56, %v2856_v57 }
 0x36c   :  { %5717 = vmatpush1.bf16.msra.mxu1 %v7081_v61  ;;  %v7311_v61 = vcombine.low %v2811_v50, %v2827_v51  ;;  %v2541_v50 = vld [vmem:[%s10108_s7 + $0xc0] sm:$0xff] }
 0x36d   :  { %5840 = vmatpush1.bf16.msra.mxu0 %v7087_v62  ;;  %5718 = vmatprep.subr.bf16.mxu1 %v7114_v63  ;;  %v7338_v62 = vcombine.high %v2840_v56, %v2856_v57  ;;  %v7344_v63 = vcombine.high %v2843_v58, %v2859_v59  ;;  %v2570_v56 = vld [vmem:[%s10108_s7 + $0x1a8] sm:$0xff] }
 0x36e   :  { %5841 = vmatprep.subr.bf16.mxu0 %v7120_v0  ;;  %v2872_v0 = vld [vmem:[%s10108_s7 + $0xb18] sm:$0xff] }
 0x36f   :  { %v7369_v14 = vcombine.low %v2872_v0, %v2888_v1 }
 0x370   :  { %5719 = vmatpush1.bf16.msra.mxu1 %v7113_v5  ;;  %v7343_v5 = vcombine.low %v2843_v58, %v2859_v59  ;;  %v2557_v58 = vld [vmem:[%s10108_s7 + $0x140] sm:$0xff] }
 0x371   :  { %5842 = vmatpush1.bf16.msra.mxu0 %v7119_v6  ;;  %5720 = vmatprep.subr.bf16.mxu1 %v7146_v7  ;;  %v7370_v6 = vcombine.high %v2872_v0, %v2888_v1  ;;  %v7376_v7 = vcombine.high %v2875_v2, %v2891_v3  ;;  %v2573_v59 = vld [vmem:[%s10108_s7 + $0x1c0] sm:$0xff] }
 0x372   :  { %5843 = vmatprep.subr.bf16.mxu0 %v7152_v8  ;;  %v2904_v8 = vld [vmem:[%s10108_s7 + $0xc18] sm:$0xff]  ;;  %v7060_v0 = vcombine.high %v2557_v58, %v2573_v59  ;;  %v2589_v1 = vld [vmem:[%s10108_s7 + $0x240] sm:$0xff] }
 0x373   :  { %v7401_v11 = vcombine.low %v2904_v8, %v2920_v9 }
 0x374   :  { %5721 = vmatpush1.bf16.msra.mxu1 %v7145_v15  ;;  %v7375_v15 = vcombine.low %v2875_v2, %v2891_v3  ;;  %v2605_v2 = vld [vmem:[%s10108_s7 + $0x2c0] sm:$0xff] }
 0x375   :  { %5844 = vmatpush1.bf16.msra.mxu0 %v7151_v16  ;;  %5722 = vmatprep.subr.bf16.mxu1 %v7178_v17  ;;  %v7402_v16 = vcombine.high %v2904_v8, %v2920_v9  ;;  %v7408_v17 = vcombine.high %v2907_v10, %v2923_v12  ;;  %v2634_v8 = vld [vmem:[%s10108_s7 + $0x3a8] sm:$0xff]  ;;  %v2621_v9 = vld [vmem:[%s10108_s7 + $0x340] sm:$0xff] }
 0x376   :  { %5845 = vmatprep.subr.bf16.mxu0 %v7184_v18  ;;  %v2936_v18 = vld [vmem:[%s10108_s7 + $0xd18] sm:$0xff] }
 0x377   :  { %v7433_v31 = vcombine.low %v2936_v18, %v2952_v19 }
 0x378   :  { %5723 = vmatpush1.bf16.msra.mxu1 %v7177_v13  ;;  %v7407_v13 = vcombine.low %v2907_v10, %v2923_v12  ;;  %v2637_v10 = vld [vmem:[%s10108_s7 + $0x3c0] sm:$0xff] }
 0x379   :  { %5846 = vmatpush1.bf16.msra.mxu0 %v7183_v22  ;;  %5724 = vmatprep.subr.bf16.mxu1 %v7210_v23  ;;  %v7434_v22 = vcombine.high %v2936_v18, %v2952_v19  ;;  %v7440_v23 = vcombine.high %v2939_v20, %v2955_v21  ;;  %v2666_v18 = vld [vmem:[%s10108_s7 + $0x4a8] sm:$0xff]  ;;  %v2653_v19 = vld [vmem:[%s10108_s7 + $0x440] sm:$0xff] }
 0x37a   :  { %5847 = vmatprep.subr.bf16.mxu0 %v7216_v24  ;;  %v2968_v24 = vld [vmem:[%s10108_s7 + $0xe18] sm:$0xff] }
 0x37b   :  { %v7465_v43 = vcombine.low %v2968_v24, %v2984_v25 }
 0x37c   :  { %5725 = vmatpush1.bf16.msra.mxu1 %v7209_v32  ;;  %v7439_v32 = vcombine.low %v2939_v20, %v2955_v21  ;;  %v2669_v20 = vld [vmem:[%s10108_s7 + $0x4c0] sm:$0xff] }
 0x37d   :  { %5848 = vmatpush1.bf16.msra.mxu0 %v7215_v35  ;;  %5726 = vmatprep.subr.bf16.mxu1 %v7242_v36  ;;  %v7466_v35 = vcombine.high %v2968_v24, %v2984_v25  ;;  %v7472_v36 = vcombine.high %v2971_v29, %v2987_v30  ;;  %v2698_v24 = vld [vmem:[%s10108_s7 + $0x5a8] sm:$0xff]  ;;  %v2685_v25 = vld [vmem:[%s10108_s7 + $0x540] sm:$0xff] }
 0x37e   :  { %5849 = vmatprep.subr.bf16.mxu0 %v7248_v39  ;;  %v3000_v39 = vld [vmem:[%s10108_s7 + $0xf18] sm:$0xff] }
 0x37f   :  { %v7497_v51 = vcombine.low %v3000_v39, %v3016_v40 }
 0x380   :  { %5727 = vmatpush1.bf16.msra.mxu1 %v7241_v44  ;;  %v7471_v44 = vcombine.low %v2971_v29, %v2987_v30  ;;  %v2701_v29 = vld [vmem:[%s10108_s7 + $0x5c0] sm:$0xff] }
 0x381   :  { %5850 = vmatpush1.bf16.msra.mxu0 %v7247_v45  ;;  %5728 = vmatprep.subr.bf16.mxu1 %v7274_v46  ;;  %v7498_v45 = vcombine.high %v3000_v39, %v3016_v40  ;;  %v7504_v46 = vcombine.high %v3003_v41, %v3019_v42  ;;  %v2730_v39 = vld [vmem:[%s10108_s7 + $0x6a8] sm:$0xff]  ;;  %v2717_v40 = vld [vmem:[%s10108_s7 + $0x640] sm:$0xff] }
 0x382   :  { %5851 = vmatprep.subr.bf16.mxu0 %v7280_v47  ;;  %v2522_v47 = vld [vmem:[%s10108_s7 + $0x28] sm:$0xff] }
 0x383   :  { %v7021_v57 = vcombine.low %v2522_v47, %v2538_v48 }
 0x384   :  { %5729 = vmatpush1.bf16.msra.mxu1 %v7273_v52  ;;  %v7503_v52 = vcombine.low %v3003_v41, %v3019_v42  ;;  %v2733_v41 = vld [vmem:[%s10108_s7 + $0x6c0] sm:$0xff] }
 0x385   :  { %5852 = vmatpush1.bf16.msra.mxu0 %v7279_v53  ;;  %5730 = vmatprep.subr.bf16.mxu1 %v7306_v54  ;;  %v7022_v53 = vcombine.high %v2522_v47, %v2538_v48  ;;  %v7028_v54 = vcombine.high %v2525_v49, %v2541_v50  ;;  %v2762_v47 = vld [vmem:[%s10108_s7 + $0x7a8] sm:$0xff]  ;;  %v2749_v48 = vld [vmem:[%s10108_s7 + $0x740] sm:$0xff] }
 0x386   :  { %5853 = vmatprep.subr.bf16.mxu0 %v7312_v55  ;;  %v2554_v55 = vld [vmem:[%s10108_s7 + $0x128] sm:$0xff] }
 0x387   :  { %v7053_v3 = vcombine.low %v2554_v55, %v2570_v56 }
 0x388   :  { %5731 = vmatpush1.bf16.msra.mxu1 %v7305_v60  ;;  %v7027_v60 = vcombine.low %v2525_v49, %v2541_v50  ;;  %v2765_v49 = vld [vmem:[%s10108_s7 + $0x7c0] sm:$0xff] }
 0x389   :  { %5854 = vmatpush1.bf16.msra.mxu0 %v7311_v61  ;;  %5732 = vmatprep.subr.bf16.mxu1 %v7338_v62  ;;  %v7054_v61 = vcombine.high %v2554_v55, %v2570_v56  ;;  %v2586_v62 = vld [vmem:[%s10108_s7 + $0x228] sm:$0xff]  ;;  %v2781_v56 = vld [vmem:[%s10108_s7 + $0x840] sm:$0xff] }
 0x38a   :  { %5855 = vmatprep.subr.bf16.mxu0 %v7344_v63  ;;  %v2602_v63 = vld [vmem:[%s10108_s7 + $0x2a8] sm:$0xff] }
 0x38b   :  { %v7085_v12 = vcombine.low %v2586_v62, %v2602_v63  ;;  %v2794_v55 = vld [vmem:[%s10108_s7 + $0x8a8] sm:$0xff] }
 0x38c   :  { %5733 = vmatpush1.bf16.msra.mxu1 %v7337_v4  ;;  %v7059_v4 = vcombine.low %v2557_v58, %v2573_v59  ;;  %v7251_v59 = vcombine.low %v2749_v48, %v2765_v49 }
 0x38d   :  { %5856 = vmatpush1.bf16.msra.mxu0 %v7343_v5  ;;  %5734 = vmatprep.subr.bf16.mxu1 %v7370_v6  ;;  %v7086_v5 = vcombine.high %v2586_v62, %v2602_v63  ;;  %v7092_v6 = vcombine.high %v2589_v1, %v2605_v2  ;;  %v2810_v62 = vld [vmem:[%s10108_s7 + $0x928] sm:$0xff] }
 0x38e   :  { %5857 = vmatprep.subr.bf16.mxu0 %v7376_v7  ;;  %v2618_v7 = vld [vmem:[%s10108_s7 + $0x328] sm:$0xff] }
 0x38f   :  { %v7117_v21 = vcombine.low %v2618_v7, %v2634_v8  ;;  %v2826_v63 = vld [vmem:[%s10108_s7 + $0x9a8] sm:$0xff] }
 0x390   :  { %5735 = vmatpush1.bf16.msra.mxu1 %v7369_v14  ;;  %v7091_v14 = vcombine.low %v2589_v1, %v2605_v2  ;;  %v2829_v1 = vld [vmem:[%s10108_s7 + $0x9c0] sm:$0xff] }
 0x391   :  { %5858 = vmatpush1.bf16.msra.mxu0 %v7375_v15  ;;  %5736 = vmatprep.subr.bf16.mxu1 %v7402_v16  ;;  %v7118_v15 = vcombine.high %v2618_v7, %v2634_v8  ;;  %v7124_v16 = vcombine.high %v2621_v9, %v2637_v10  ;;  %v2858_v7 = vld [vmem:[%s10108_s7 + $0xaa8] sm:$0xff]  ;;  %v2845_v8 = vld [vmem:[%s10108_s7 + $0xa40] sm:$0xff] }
 0x392   :  { %5859 = vmatprep.subr.bf16.mxu0 %v7408_v17  ;;  %v2650_v17 = vld [vmem:[%s10108_s7 + $0x428] sm:$0xff] }
 0x393   :  { %v7149_v30 = vcombine.low %v2650_v17, %v2666_v18 }
 0x394   :  { %5737 = vmatpush1.bf16.msra.mxu1 %v7401_v11  ;;  %v7123_v11 = vcombine.low %v2621_v9, %v2637_v10  ;;  %v2861_v9 = vld [vmem:[%s10108_s7 + $0xac0] sm:$0xff]  ;;  %v7309_v10 = vcombine.low %v2810_v62, %v2826_v63 }
 0x395   :  { %5860 = vmatpush1.bf16.msra.mxu0 %v7407_v13  ;;  %5738 = vmatprep.subr.bf16.mxu1 %v7434_v22  ;;  %v7150_v13 = vcombine.high %v2650_v17, %v2666_v18  ;;  %v7156_v22 = vcombine.high %v2653_v19, %v2669_v20  ;;  %v2890_v17 = vld [vmem:[%s10108_s7 + $0xba8] sm:$0xff]  ;;  %v2877_v18 = vld [vmem:[%s10108_s7 + $0xb40] sm:$0xff] }
 0x396   :  { %5861 = vmatprep.subr.bf16.mxu0 %v7440_v23  ;;  %v2682_v23 = vld [vmem:[%s10108_s7 + $0x528] sm:$0xff] }
 0x397   :  { %v7181_v42 = vcombine.low %v2682_v23, %v2698_v24 }
 0x398   :  { %5739 = vmatpush1.bf16.msra.mxu1 %v7433_v31  ;;  %v7155_v31 = vcombine.low %v2653_v19, %v2669_v20  ;;  %v2893_v19 = vld [vmem:[%s10108_s7 + $0xbc0] sm:$0xff] }
 0x399   :  { %5862 = vmatpush1.bf16.msra.mxu0 %v7439_v32  ;;  %5740 = vmatprep.subr.bf16.mxu1 %v7466_v35  ;;  %v7182_v32 = vcombine.high %v2682_v23, %v2698_v24  ;;  %v7188_v35 = vcombine.high %v2685_v25, %v2701_v29  ;;  %v2922_v23 = vld [vmem:[%s10108_s7 + $0xca8] sm:$0xff]  ;;  %v2909_v24 = vld [vmem:[%s10108_s7 + $0xc40] sm:$0xff] }
 0x39a   :  { %5863 = vmatprep.subr.bf16.mxu0 %v7472_v36  ;;  %v2714_v36 = vld [vmem:[%s10108_s7 + $0x628] sm:$0xff] }
 0x39b   :  { %v7213_v50 = vcombine.low %v2714_v36, %v2730_v39 }
 0x39c   :  { %5741 = vmatpush1.bf16.msra.mxu1 %v7465_v43  ;;  %v7187_v43 = vcombine.low %v2685_v25, %v2701_v29  ;;  %v2925_v25 = vld [vmem:[%s10108_s7 + $0xcc0] sm:$0xff] }
 0x39d   :  { %5864 = vmatpush1.bf16.msra.mxu0 %v7471_v44  ;;  %5742 = vmatprep.subr.bf16.mxu1 %v7498_v45  ;;  %v7214_v44 = vcombine.high %v2714_v36, %v2730_v39  ;;  %v7220_v45 = vcombine.high %v2717_v40, %v2733_v41  ;;  %v2954_v36 = vld [vmem:[%s10108_s7 + $0xda8] sm:$0xff]  ;;  %v2941_v39 = vld [vmem:[%s10108_s7 + $0xd40] sm:$0xff] }
 0x39e   :  { %5865 = vmatprep.subr.bf16.mxu0 %v7504_v46  ;;  %v2746_v46 = vld [vmem:[%s10108_s7 + $0x728] sm:$0xff] }
 0x39f   :  { %v7245_v58 = vcombine.low %v2746_v46, %v2762_v47 }
 0x3a0   :  { %5743 = vmatpush1.bf16.msra.mxu1 %v7497_v51  ;;  %v7219_v51 = vcombine.low %v2717_v40, %v2733_v41  ;;  %v2957_v40 = vld [vmem:[%s10108_s7 + $0xdc0] sm:$0xff] }
 0x3a1   :  { %5866 = vmatpush1.bf16.msra.mxu0 %v7503_v52  ;;  %5794 = vmatprep.subr.bf16.mxu1 %v7022_v53  ;;  %v7246_v52 = vcombine.high %v2746_v46, %v2762_v47  ;;  %v7252_v53 = vcombine.high %v2749_v48, %v2765_v49  ;;  %v2986_v46 = vld [vmem:[%s10108_s7 + $0xea8] sm:$0xff]  ;;  %v2973_v47 = vld [vmem:[%s10108_s7 + $0xe40] sm:$0xff] }
 0x3a2   :  { %5917 = vmatprep.subr.bf16.mxu0 %v7028_v54  ;;  %v2778_v54 = vld [vmem:[%s10108_s7 + $0x828] sm:$0xff]  ;;  %v2989_v48 = vld [vmem:[%s10108_s7 + $0xec0] sm:$0xff] }
 0x3a3   :  { %5745 = vmatmul.mubr.bf16.vlgmr.msra.gmra.mrb[12].mxu1 %v8469_v27  ;;  %v7277_v2 = vcombine.low %v2778_v54, %v2794_v55 }
 0x3a4   :  { %5868 = vmatmul.mubr.bf16.vlgmr.msra.gmra.mrb[16].mxu0 %v8469_v27  ;;  %5795 = vmatpush1.bf16.msra.mxu1 %v7021_v57  ;;  %v2797_v57 = vld [vmem:[%s10108_s7 + $0x8c0] sm:$0xff] }
 0x3a5   :  { %5826 = vmatprep.mubr.bf16.mxu1 %v8467_v26  ;;  %5918 = vmatpush1.bf16.msra.mxu0 %v7027_v60  ;;  %v7278_v60 = vcombine.high %v2778_v54, %v2794_v55  ;;  %v3018_v54 = vld [vmem:[%s10108_s7 + $0xfa8] sm:$0xff]  ;;  %v3005_v55 = vld [vmem:[%s10108_s7 + $0xf40] sm:$0xff] }
 0x3a6   :  { %5949 = vmatprep.mubr.bf16.mxu0 %v8467_v26  ;;  %5796 = vmatprep.subr.bf16.mxu1 %v7054_v61  ;;  %v7284_v61 = vcombine.high %v2781_v56, %v2797_v57 }
 0x3a7   :  { %5919 = vmatprep.subr.bf16.mxu0 %v7060_v0  ;;  %v2813_v0 = vld [vmem:[%s10108_s7 + $0x940] sm:$0xff] }
 0x3a8   :  { %5797 = vmatpush1.bf16.msra.mxu1 %v7053_v3  ;;  %v7283_v3 = vcombine.low %v2781_v56, %v2797_v57  ;;  %v3021_v56 = vld [vmem:[%s10108_s7 + $0xfc0] sm:$0xff] }
 0x3a9   :  { %5920 = vmatpush1.bf16.msra.mxu0 %v7059_v4  ;;  %5798 = vmatprep.subr.bf16.mxu1 %v7086_v5  ;;  %v7310_v4 = vcombine.high %v2810_v62, %v2826_v63  ;;  %v7316_v5 = vcombine.high %v2813_v0, %v2829_v1  ;;  %v2540_v62 = vld [vmem:[%s10108_s7 + $0xb8] sm:$0xff]  ;;  %v2527_v63 = vld [vmem:[%s10108_s7 + $0x50] sm:$0xff] }
 0x3aa   :  { %5921 = vmatprep.subr.bf16.mxu0 %v7092_v6  ;;  %v2842_v6 = vld [vmem:[%s10108_s7 + $0xa28] sm:$0xff] }
 0x3ab   :  { %v7341_v20 = vcombine.low %v2842_v6, %v2858_v7 }
 0x3ac   :  { %5799 = vmatpush1.bf16.msra.mxu1 %v7085_v12  ;;  %v7315_v12 = vcombine.low %v2813_v0, %v2829_v1  ;;  %v2543_v0 = vld [vmem:[%s10108_s7 + $0xd0] sm:$0xff] }
 0x3ad   :  { %5922 = vmatpush1.bf16.msra.mxu0 %v7091_v14  ;;  %5800 = vmatprep.subr.bf16.mxu1 %v7118_v15  ;;  %v7342_v14 = vcombine.high %v2842_v6, %v2858_v7  ;;  %v7348_v15 = vcombine.high %v2845_v8, %v2861_v9  ;;  %v2572_v6 = vld [vmem:[%s10108_s7 + $0x1b8] sm:$0xff] }
 0x3ae   :  { %5923 = vmatprep.subr.bf16.mxu0 %v7124_v16  ;;  %v2874_v16 = vld [vmem:[%s10108_s7 + $0xb28] sm:$0xff] }
 0x3af   :  { %v7373_v29 = vcombine.low %v2874_v16, %v2890_v17 }
 0x3b0   :  { %5801 = vmatpush1.bf16.msra.mxu1 %v7117_v21  ;;  %v7347_v21 = vcombine.low %v2845_v8, %v2861_v9  ;;  %v2559_v8 = vld [vmem:[%s10108_s7 + $0x150] sm:$0xff] }
 0x3b1   :  { %5924 = vmatpush1.bf16.msra.mxu0 %v7123_v11  ;;  %5802 = vmatprep.subr.bf16.mxu1 %v7150_v13  ;;  %v7374_v11 = vcombine.high %v2874_v16, %v2890_v17  ;;  %v7380_v13 = vcombine.high %v2877_v18, %v2893_v19  ;;  %v2575_v9 = vld [vmem:[%s10108_s7 + $0x1d0] sm:$0xff] }
 0x3b2   :  { %5925 = vmatprep.subr.bf16.mxu0 %v7156_v22  ;;  %v2906_v22 = vld [vmem:[%s10108_s7 + $0xc28] sm:$0xff]  ;;  %v7064_v16 = vcombine.high %v2559_v8, %v2575_v9  ;;  %v2591_v17 = vld [vmem:[%s10108_s7 + $0x250] sm:$0xff] }
 0x3b3   :  { %v7405_v41 = vcombine.low %v2906_v22, %v2922_v23 }
 0x3b4   :  { %5803 = vmatpush1.bf16.msra.mxu1 %v7149_v30  ;;  %v7379_v30 = vcombine.low %v2877_v18, %v2893_v19  ;;  %v2607_v18 = vld [vmem:[%s10108_s7 + $0x2d0] sm:$0xff] }
 0x3b5   :  { %5926 = vmatpush1.bf16.msra.mxu0 %v7155_v31  ;;  %5804 = vmatprep.subr.bf16.mxu1 %v7182_v32  ;;  %v7406_v31 = vcombine.high %v2906_v22, %v2922_v23  ;;  %v7412_v32 = vcombine.high %v2909_v24, %v2925_v25  ;;  %v2636_v22 = vld [vmem:[%s10108_s7 + $0x3b8] sm:$0xff]  ;;  %v2623_v23 = vld [vmem:[%s10108_s7 + $0x350] sm:$0xff] }
 0x3b6   :  { %5927 = vmatprep.subr.bf16.mxu0 %v7188_v35  ;;  %v2938_v35 = vld [vmem:[%s10108_s7 + $0xd28] sm:$0xff] }
 0x3b7   :  { %v7437_v49 = vcombine.low %v2938_v35, %v2954_v36 }
 0x3b8   :  { %5805 = vmatpush1.bf16.msra.mxu1 %v7181_v42  ;;  %v7411_v42 = vcombine.low %v2909_v24, %v2925_v25  ;;  %v2639_v24 = vld [vmem:[%s10108_s7 + $0x3d0] sm:$0xff] }
 0x3b9   :  { %5928 = vmatpush1.bf16.msra.mxu0 %v7187_v43  ;;  %5806 = vmatprep.subr.bf16.mxu1 %v7214_v44  ;;  %v7438_v43 = vcombine.high %v2938_v35, %v2954_v36  ;;  %v7444_v44 = vcombine.high %v2941_v39, %v2957_v40  ;;  %v2668_v35 = vld [vmem:[%s10108_s7 + $0x4b8] sm:$0xff]  ;;  %v2655_v36 = vld [vmem:[%s10108_s7 + $0x450] sm:$0xff] }
 0x3ba   :  { %5929 = vmatprep.subr.bf16.mxu0 %v7220_v45  ;;  %v2970_v45 = vld [vmem:[%s10108_s7 + $0xe28] sm:$0xff] }
 0x3bb   :  { %v7469_v57 = vcombine.low %v2970_v45, %v2986_v46 }
 0x3bc   :  { %5807 = vmatpush1.bf16.msra.mxu1 %v7213_v50  ;;  %v7443_v50 = vcombine.low %v2941_v39, %v2957_v40  ;;  %v2671_v39 = vld [vmem:[%s10108_s7 + $0x4d0] sm:$0xff] }
 0x3bd   :  { %5930 = vmatpush1.bf16.msra.mxu0 %v7219_v51  ;;  %5808 = vmatprep.subr.bf16.mxu1 %v7246_v52  ;;  %v7470_v51 = vcombine.high %v2970_v45, %v2986_v46  ;;  %v7476_v52 = vcombine.high %v2973_v47, %v2989_v48  ;;  %v2700_v45 = vld [vmem:[%s10108_s7 + $0x5b8] sm:$0xff]  ;;  %v9108_v46 = vsub.s32 4, %v8282_v28 }
 0x3be   :  { %5931 = vmatprep.subr.bf16.mxu0 %v7252_v53  ;;  %v3002_v53 = vld [vmem:[%s10108_s7 + $0xf28] sm:$0xff] }
 0x3bf   :  { %v7501_v1 = vcombine.low %v3002_v53, %v3018_v54 }
 0x3c0   :  { %5809 = vmatpush1.bf16.msra.mxu1 %v7245_v58  ;;  %v7475_v58 = vcombine.low %v2973_v47, %v2989_v48  ;;  %v2687_v47 = vld [vmem:[%s10108_s7 + $0x550] sm:$0xff] }
 0x3c1   :  { %5932 = vmatpush1.bf16.msra.mxu0 %v7251_v59  ;;  %5810 = vmatprep.subr.bf16.mxu1 %v7278_v60  ;;  %v7502_v59 = vcombine.high %v3002_v53, %v3018_v54  ;;  %v7508_v60 = vcombine.high %v3005_v55, %v3021_v56  ;;  %v2703_v48 = vld [vmem:[%s10108_s7 + $0x5d0] sm:$0xff]  ;;  %v9127_v53 = vld [vmem:[%s10110_s9] sm:$0xff] }
 0x3c2   :  { %5933 = vmatprep.subr.bf16.mxu0 %v7284_v61  ;;  %v2524_v61 = vld [vmem:[%s10108_s7 + $0x38] sm:$0xff] }
 0x3c3   :  { %v7025_v7 = vcombine.low %v2524_v61, %v2540_v62 }
 0x3c4   :  { %5811 = vmatpush1.bf16.msra.mxu1 %v7277_v2  ;;  %v7507_v2 = vcombine.low %v3005_v55, %v3021_v56  ;;  %v7192_v55 = vcombine.high %v2687_v47, %v2703_v48  ;;  %v2716_v56 = vld [vmem:[%s10108_s7 + $0x638] sm:$0xff] }
 0x3c5   :  { %5934 = vmatpush1.bf16.msra.mxu0 %v7283_v3  ;;  %5812 = vmatprep.subr.bf16.mxu1 %v7310_v4  ;;  %v7026_v3 = vcombine.high %v2524_v61, %v2540_v62  ;;  %v7032_v4 = vcombine.high %v2527_v63, %v2543_v0  ;;  %v2735_v61 = vld [vmem:[%s10108_s7 + $0x6d0] sm:$0xff]  ;;  %v6456_v62 = vrot.slane %v9127_v53, %v8291_v33 }
 0x3c6   :  { %5935 = vmatprep.subr.bf16.mxu0 %v7316_v5  ;;  %v2556_v5 = vld [vmem:[%s10108_s7 + $0x138] sm:$0xff] }
 0x3c7   :  { %v7057_v19 = vcombine.low %v2556_v5, %v2572_v6 }
 0x3c8   :  { %5813 = vmatpush1.bf16.msra.mxu1 %v7309_v10  ;;  %v7031_v10 = vcombine.low %v2527_v63, %v2543_v0 }
 0x3c9   :  { %5936 = vmatpush1.bf16.msra.mxu0 %v7315_v12  ;;  %5814 = vmatprep.subr.bf16.mxu1 %v7342_v14  ;;  %v7058_v12 = vcombine.high %v2556_v5, %v2572_v6  ;;  %v2588_v14 = vld [vmem:[%s10108_s7 + $0x238] sm:$0xff] }
 0x3ca   :  { %5937 = vmatprep.subr.bf16.mxu0 %v7348_v15  ;;  %v2604_v15 = vld [vmem:[%s10108_s7 + $0x2b8] sm:$0xff] }
 0x3cb   :  { %v7089_v25 = vcombine.low %v2588_v14, %v2604_v15 }
 0x3cc   :  { %5815 = vmatpush1.bf16.msra.mxu1 %v7341_v20  ;;  %v7063_v20 = vcombine.low %v2559_v8, %v2575_v9 }
 0x3cd   :  { %5938 = vmatpush1.bf16.msra.mxu0 %v7347_v21  ;;  %5816 = vmatprep.subr.bf16.mxu1 %v7374_v11  ;;  %v7090_v21 = vcombine.high %v2588_v14, %v2604_v15  ;;  %v7096_v11 = vcombine.high %v2591_v17, %v2607_v18 }
 0x3ce   :  { %5939 = vmatprep.subr.bf16.mxu0 %v7380_v13  ;;  %v2620_v13 = vld [vmem:[%s10108_s7 + $0x338] sm:$0xff] }
 0x3cf   :  { %v7121_v40 = vcombine.low %v2620_v13, %v2636_v22 }
 0x3d0   :  { %5817 = vmatpush1.bf16.msra.mxu1 %v7373_v29  ;;  %v7095_v29 = vcombine.low %v2591_v17, %v2607_v18  ;;  %v2751_v18 = vld [vmem:[%s10108_s7 + $0x750] sm:$0xff] }
 0x3d1   :  { %5940 = vmatpush1.bf16.msra.mxu0 %v7379_v30  ;;  %5818 = vmatprep.subr.bf16.mxu1 %v7406_v31  ;;  %v7122_v30 = vcombine.high %v2620_v13, %v2636_v22  ;;  %v7128_v31 = vcombine.high %v2623_v23, %v2639_v24 }
 0x3d2   :  { %5941 = vmatprep.subr.bf16.mxu0 %v7412_v32  ;;  %v2652_v32 = vld [vmem:[%s10108_s7 + $0x438] sm:$0xff] }
 0x3d4   :  { %5819 = vmatpush1.bf16.msra.mxu1 %v7405_v41  ;;  %v7127_v41 = vcombine.low %v2623_v23, %v2639_v24 }
 0x3d5   :  { %5942 = vmatpush1.bf16.msra.mxu0 %v7411_v42  ;;  %5820 = vmatprep.subr.bf16.mxu1 %v7438_v43  ;;  %v7154_v42 = vcombine.high %v2652_v32, %v2668_v35  ;;  %v7160_v43 = vcombine.high %v2655_v36, %v2671_v39 }
 0x3d6   :  { %5943 = vmatprep.subr.bf16.mxu0 %v7444_v44  ;;  %v2684_v44 = vld [vmem:[%s10108_s7 + $0x538] sm:$0xff] }
 0x3d7   :  { %v7186_v54 = vcombine.high %v2684_v44, %v2700_v45  ;;  %v7185_v63 = vcombine.low %v2684_v44, %v2700_v45 }
 0x3d8   :  { %5821 = vmatpush1.bf16.msra.mxu1 %v7437_v49  ;;  %v7153_v49 = vcombine.low %v2652_v32, %v2668_v35 }
 0x3d9   :  { %5944 = vmatpush1.bf16.msra.mxu0 %v7443_v50  ;;  %5822 = vmatprep.subr.bf16.mxu1 %v7470_v51  ;;  %v9119_v50 = vld [vmem:[%s10109_s8] sm:$0xff]  ;;  %v9122_v51 = vsub.s32 5, %v8282_v28 }
 0x3da   :  { %5945 = vmatprep.subr.bf16.mxu0 %v7476_v52  ;;  %v7159_v52 = vcombine.low %v2655_v36, %v2671_v39  ;;  %v6260_v0 = vrot.slane %v9119_v50, %v8300_v37  ;;  %v2780_v39 = vld [vmem:[%s10108_s7 + $0x838] sm:$0xff] }
 0x3db   :  { %v6476_v8 = vrot.slane %v9127_v53, %v9122_v51 }
 0x3dc   :  { %5823 = vmatpush1.bf16.msra.mxu1 %v7469_v57  ;;  %v2732_v57 = vld [vmem:[%s10108_s7 + $0x6b8] sm:$0xff] }
 0x3dd   :  { %5946 = vmatpush1.bf16.msra.mxu0 %v7475_v58  ;;  %5824 = vmatprep.subr.bf16.mxu1 %v7502_v59  ;;  %v6256_v58 = vrot.slane %v9119_v50, %v8291_v33  ;;  %v6272_v59 = vrot.slane %v9119_v50, %v9108_v46  ;;  %v7217_v22 = vcombine.low %v2716_v56, %v2732_v57 }
 0x3de   :  { %5947 = vmatprep.subr.bf16.mxu0 %v7508_v60  ;;  %v2719_v60 = vld [vmem:[%s10108_s7 + $0x650] sm:$0xff] }
 0x3df   :  { %v7224_v9 = vcombine.high %v2719_v60, %v2735_v61  ;;  %v7223_v23 = vcombine.low %v2719_v60, %v2735_v61  ;;  %v2860_v60 = vld [vmem:[%s10108_s7 + $0xab8] sm:$0xff]  ;;  %v2847_v61 = vld [vmem:[%s10108_s7 + $0xa50] sm:$0xff] }
 0x3e0   :  { %5825 = vmatpush1.bf16.msra.mxu1 %v7501_v1  ;;  %v6276_v1 = vrot.slane %v9119_v50, %v9122_v51 }
 0x3e1   :  { %5948 = vmatpush1.bf16.msra.mxu0 %v7507_v2  ;;  %5876 = vmatprep.subr.bf16.mxu1 %v7026_v3  ;;  %v6472_v2 = vrot.slane %v9127_v53, %v9108_v46  ;;  %v7191_v3 = vcombine.low %v2687_v47, %v2703_v48  ;;  %v2812_v48 = vld [vmem:[%s10108_s7 + $0x938] sm:$0xff] }
 0x3e2   :  { %5999 = vmatprep.subr.bf16.mxu0 %v7032_v4  ;;  %v7218_v4 = vcombine.high %v2716_v56, %v2732_v57 }
 0x3e3   :  { %5827 = vmatmul.mubr.bf16.vlgmr.msra.gmra.mrb[16].mxu1 %v8469_v27 }
 0x3e4   :  { %5950 = vmatmul.mubr.bf16.vlgmr.msra.gmra.mrb[20].mxu0 %v8469_v27  ;;  %5877 = vmatpush1.bf16.msra.mxu1 %v7025_v7  ;;  %v6460_v7 = vrot.slane %v9127_v53, %v8300_v37 }
 0x3e5   :  { %5908 = vmatprep.mubr.bf16.mxu1 %v8467_v26  ;;  %6000 = vmatpush1.bf16.msra.mxu0 %v7031_v10  ;;  %v2748_v10 = vld [vmem:[%s10108_s7 + $0x738] sm:$0xff] }
 0x3e6   :  { %6031 = vmatprep.mubr.bf16.mxu0 %v8467_v26  ;;  %5878 = vmatprep.subr.bf16.mxu1 %v7058_v12  ;;  %v2764_v12 = vld [vmem:[%s10108_s7 + $0x7b8] sm:$0xff] }
 0x3e7   :  { %6001 = vmatprep.subr.bf16.mxu0 %v7064_v16 }
 0x3e8   :  { %5879 = vmatpush1.bf16.msra.mxu1 %v7057_v19  ;;  %v2767_v19 = vld [vmem:[%s10108_s7 + $0x7d0] sm:$0xff] }
 0x3e9   :  { %6002 = vmatpush1.bf16.msra.mxu0 %v7063_v20  ;;  %5880 = vmatprep.subr.bf16.mxu1 %v7090_v21  ;;  %v7256_v36 = vcombine.high %v2751_v18, %v2767_v19  ;;  %v7255_v44 = vcombine.low %v2751_v18, %v2767_v19 }
 0x3ea   :  { %6003 = vmatprep.subr.bf16.mxu0 %v7096_v11 }
 0x3ec   :  { %5881 = vmatpush1.bf16.msra.mxu1 %v7089_v25 }
 0x3ed   :  { %6004 = vmatpush1.bf16.msra.mxu0 %v7095_v29  ;;  %5882 = vmatprep.subr.bf16.mxu1 %v7122_v30 }
 0x3ee   :  { %6005 = vmatprep.subr.bf16.mxu0 %v7128_v31  ;;  %v7250_v31 = vcombine.high %v2748_v10, %v2764_v12 }
 0x3f0   :  { %5883 = vmatpush1.bf16.msra.mxu1 %v7121_v40  ;;  %v2796_v40 = vld [vmem:[%s10108_s7 + $0x8b8] sm:$0xff] }
 0x3f1   :  { %6006 = vmatpush1.bf16.msra.mxu0 %v7127_v41  ;;  %5884 = vmatprep.subr.bf16.mxu1 %v7154_v42  ;;  %v2783_v41 = vld [vmem:[%s10108_s7 + $0x850] sm:$0xff]  ;;  %v7282_v45 = vcombine.high %v2780_v39, %v2796_v40 }
 0x3f2   :  { %6007 = vmatprep.subr.bf16.mxu0 %v7160_v43  ;;  %v2799_v42 = vld [vmem:[%s10108_s7 + $0x8d0] sm:$0xff]  ;;  %v7249_v43 = vcombine.low %v2748_v10, %v2764_v12  ;;  %v2908_v12 = vld [vmem:[%s10108_s7 + $0xc38] sm:$0xff] }
 0x3f3   :  { %v7288_v47 = vcombine.high %v2783_v41, %v2799_v42  ;;  %v7287_v56 = vcombine.low %v2783_v41, %v2799_v42  ;;  %v3004_v42 = vld [vmem:[%s10108_s7 + $0xf38] sm:$0xff] }
 0x3f4   :  { %5885 = vmatpush1.bf16.msra.mxu1 %v7153_v49  ;;  %v2828_v49 = vld [vmem:[%s10108_s7 + $0x9b8] sm:$0xff] }
 0x3f5   :  { %6008 = vmatpush1.bf16.msra.mxu0 %v7159_v52  ;;  %5886 = vmatprep.subr.bf16.mxu1 %v7186_v54  ;;  %v2815_v52 = vld [vmem:[%s10108_s7 + $0x950] sm:$0xff]  ;;  %v7314_v57 = vcombine.high %v2812_v48, %v2828_v49 }
 0x3f6   :  { %v5623_v5 = vpop.f32.mrb[4].mxu1  ;;  %v5705_v6 = vpop.f32.mrb[8].mxu0  ;;  %6009 = vmatprep.subr.bf16.mxu0 %v7192_v55  ;;  %v2831_v54 = vld [vmem:[%s10108_s7 + $0x9d0] sm:$0xff]  ;;  %v7281_v55 = vcombine.low %v2780_v39, %v2796_v40 }
 0x3f7   :  { %v6413_v14 = vmul.f32 %v6256_v58, %v5623_v5  ;;  %v6417_v15 = vmul.f32 %v6272_v59, %v5705_v6  ;;  %v5625_v16 = vpop.f32.mrb[5].mxu1  ;;  %v5707_v17 = vpop.f32.mrb[9].mxu0  ;;  %v7320_v58 = vcombine.high %v2815_v52, %v2831_v54  ;;  %v2844_v59 = vld [vmem:[%s10108_s7 + $0xa38] sm:$0xff]  ;;  %v2879_v5 = vld [vmem:[%s10108_s7 + $0xb50] sm:$0xff] }
 0x3f8   :  { %v6414_v20 = vmul.f32 %v6260_v0, %v5625_v16  ;;  %v6418_v21 = vmul.f32 %v6276_v1, %v5707_v17  ;;  %5887 = vmatpush1.bf16.msra.mxu1 %v7185_v63  ;;  %v5627_v11 = vpop.f32.mrb[6].mxu1  ;;  %v5709_v13 = vpop.f32.mrb[10].mxu0  ;;  %v7313_v63 = vcombine.low %v2812_v48, %v2828_v49  ;;  %v7319_v0 = vcombine.low %v2815_v52, %v2831_v54  ;;  %v2895_v6 = vld [vmem:[%s10108_s7 + $0xbd0] sm:$0xff]  ;;  %v2526_v54 = vld [vmem:[%s10108_s7 + $0x48] sm:$0xff] }
 0x3f9   :  { %v6613_v24 = vadd.f32 %v6456_v62, %v6413_v14  ;;  %v6617_v25 = vadd.f32 %v6472_v2, %v6417_v15  ;;  %6010 = vmatpush1.bf16.msra.mxu0 %v7191_v3  ;;  %v5628_v29 = vpop.f32.mrb[7].mxu1  ;;  %v5710_v30 = vpop.f32.mrb[11].mxu0  ;;  %5888 = vmatprep.subr.bf16.mxu1 %v7218_v4  ;;  %v2863_v62 = vld [vmem:[%s10108_s7 + $0xad0] sm:$0xff]  ;;  %v7346_v1 = vcombine.high %v2844_v59, %v2860_v60  ;;  %v2876_v3 = vld [vmem:[%s10108_s7 + $0xb38] sm:$0xff] }
 0x3fa   :  { %v6614_v32 = vadd.f32 %v6460_v7, %v6414_v20  ;;  %v6618_v35 = vadd.f32 %v6476_v8, %v6418_v21  ;;  %6011 = vmatprep.subr.bf16.mxu0 %v7224_v9  ;;  %v7352_v2 = vcombine.high %v2847_v61, %v2863_v62  ;;  %v2892_v4 = vld [vmem:[%s10108_s7 + $0xbb8] sm:$0xff]  ;;  %v7345_v7 = vcombine.low %v2844_v59, %v2860_v60  ;;  %v2911_v15 = vld [vmem:[%s10108_s7 + $0xc50] sm:$0xff] }
 0x3fb   :  { %6645 = vst [vmem:[%s10111_s10] sm:$0xff] %v6613_v24  ;;  %6649 = vst [vmem:[%s10111_s10 + $0x20] sm:$0xff] %v6617_v25  ;;  %v7351_v8 = vcombine.low %v2847_v61, %v2863_v62  ;;  %v7378_v9 = vcombine.high %v2876_v3, %v2892_v4  ;;  %v7384_v10 = vcombine.high %v2879_v5, %v2895_v6  ;;  %v2924_v14 = vld [vmem:[%s10108_s7 + $0xcb8] sm:$0xff]  ;;  %v2927_v16 = vld [vmem:[%s10108_s7 + $0xcd0] sm:$0xff] }
 0x3fc   :  { %6646 = vst [vmem:[%s10111_s10 + $0x8] sm:$0xff] %v6614_v32  ;;  %6650 = vst [vmem:[%s10111_s10 + $0x28] sm:$0xff] %v6618_v35  ;;  %5889 = vmatpush1.bf16.msra.mxu1 %v7217_v22  ;;  %v7377_v17 = vcombine.low %v2876_v3, %v2892_v4  ;;  %v7383_v18 = vcombine.low %v2879_v5, %v2895_v6  ;;  %v7410_v19 = vcombine.high %v2908_v12, %v2924_v14  ;;  %v2940_v21 = vld [vmem:[%s10108_s7 + $0xd38] sm:$0xff]  ;;  %v2943_v13 = vld [vmem:[%s10108_s7 + $0xd50] sm:$0xff] }
 0x3fd   :  { %6012 = vmatpush1.bf16.msra.mxu0 %v7223_v23  ;;  %5890 = vmatprep.subr.bf16.mxu1 %v7250_v31  ;;  %v7416_v20 = vcombine.high %v2911_v15, %v2927_v16  ;;  %v2956_v11 = vld [vmem:[%s10108_s7 + $0xdb8] sm:$0xff]  ;;  %v2959_v22 = vld [vmem:[%s10108_s7 + $0xdd0] sm:$0xff]  ;;  %v7409_v23 = vcombine.low %v2908_v12, %v2924_v14  ;;  %v7415_v24 = vcombine.low %v2911_v15, %v2927_v16  ;;  %v2558_v62 = vld [vmem:[%s10108_s7 + $0x148] sm:$0xff] }
 0x3fe   :  { %6013 = vmatprep.subr.bf16.mxu0 %v7256_v36  ;;  %v7442_v25 = vcombine.high %v2940_v21, %v2956_v11  ;;  %v7448_v29 = vcombine.high %v2943_v13, %v2959_v22  ;;  %v2972_v30 = vld [vmem:[%s10108_s7 + $0xe38] sm:$0xff]  ;;  %v2975_v32 = vld [vmem:[%s10108_s7 + $0xe50] sm:$0xff]  ;;  %v7441_v36 = vcombine.low %v2940_v21, %v2956_v11  ;;  %v7447_v39 = vcombine.low %v2943_v13, %v2959_v22  ;;  %v2590_v5 = vld [vmem:[%s10108_s7 + $0x248] sm:$0xff] }
 0x3ff   :  { %v2988_v31 = vld [vmem:[%s10108_s7 + $0xeb8] sm:$0xff]  ;;  %v2991_v35 = vld [vmem:[%s10108_s7 + $0xed0] sm:$0xff]  ;;  %v2606_v6 = vld [vmem:[%s10108_s7 + $0x2c8] sm:$0xff] }
 0x400   :  { %5891 = vmatpush1.bf16.msra.mxu1 %v7249_v43  ;;  %v7474_v40 = vcombine.high %v2972_v30, %v2988_v31  ;;  %v7480_v41 = vcombine.high %v2975_v32, %v2991_v35  ;;  %v3020_v43 = vld [vmem:[%s10108_s7 + $0xfb8] sm:$0xff]  ;;  %v7479_v48 = vcombine.low %v2975_v32, %v2991_v35  ;;  %v7094_v14 = vcombine.high %v2590_v5, %v2606_v6  ;;  %v2622_v16 = vld [vmem:[%s10108_s7 + $0x348] sm:$0xff] }
 0x401   :  { %6014 = vmatpush1.bf16.msra.mxu0 %v7255_v44  ;;  %5892 = vmatprep.subr.bf16.mxu1 %v7282_v45  ;;  %v3007_v44 = vld [vmem:[%s10108_s7 + $0xf50] sm:$0xff]  ;;  %v7506_v49 = vcombine.high %v3004_v42, %v3020_v43  ;;  %v2654_v22 = vld [vmem:[%s10108_s7 + $0x448] sm:$0xff] }
 0x402   :  { %6015 = vmatprep.subr.bf16.mxu0 %v7288_v47  ;;  %v3023_v45 = vld [vmem:[%s10108_s7 + $0xfd0] sm:$0xff]  ;;  %v7473_v47 = vcombine.low %v2972_v30, %v2988_v31  ;;  %v2686_v35 = vld [vmem:[%s10108_s7 + $0x548] sm:$0xff] }
 0x403   :  { %v7512_v52 = vcombine.high %v3007_v44, %v3023_v45  ;;  %v7511_v59 = vcombine.low %v3007_v44, %v3023_v45  ;;  %v9361_v45 = vld [vmem:[%s10110_s9 + $0x8] sm:$0xff] }
 0x404   :  { %5893 = vmatpush1.bf16.msra.mxu1 %v7281_v55  ;;  %v2542_v55 = vld [vmem:[%s10108_s7 + $0xc8] sm:$0xff] }
 0x405   :  { %6016 = vmatpush1.bf16.msra.mxu0 %v7287_v56  ;;  %5894 = vmatprep.subr.bf16.mxu1 %v7314_v57  ;;  %v2529_v56 = vld [vmem:[%s10108_s7 + $0x60] sm:$0xff]  ;;  %v7030_v60 = vcombine.high %v2526_v54, %v2542_v55 }
 0x406   :  { %6017 = vmatprep.subr.bf16.mxu0 %v7320_v58  ;;  %v2545_v57 = vld [vmem:[%s10108_s7 + $0xe0] sm:$0xff]  ;;  %v7505_v58 = vcombine.low %v3004_v42, %v3020_v43  ;;  %v9356_v42 = vld [vmem:[%s10109_s8 + $0x8] sm:$0xff] }
 0x407   :  { %v7036_v61 = vcombine.high %v2529_v56, %v2545_v57  ;;  %v7035_v3 = vcombine.low %v2529_v56, %v2545_v57  ;;  %v2737_v56 = vld [vmem:[%s10108_s7 + $0x6e0] sm:$0xff]  ;;  %v6464_v57 = vrot.slane %v9127_v53, %v8294_v34 }
 0x408   :  { %5895 = vmatpush1.bf16.msra.mxu1 %v7313_v63  ;;  %v2574_v63 = vld [vmem:[%s10108_s7 + $0x1c8] sm:$0xff] }
 0x409   :  { %6018 = vmatpush1.bf16.msra.mxu0 %v7319_v0  ;;  %5896 = vmatprep.subr.bf16.mxu1 %v7346_v1  ;;  %v7029_v0 = vcombine.low %v2526_v54, %v2542_v55  ;;  %v2561_v1 = vld [vmem:[%s10108_s7 + $0x160] sm:$0xff]  ;;  %v7062_v4 = vcombine.high %v2558_v62, %v2574_v63  ;;  %v6288_v54 = vrot.slane %v9356_v42, %v8291_v33 }
 0x40a   :  { %6019 = vmatprep.subr.bf16.mxu0 %v7352_v2  ;;  %v2577_v2 = vld [vmem:[%s10108_s7 + $0x1e0] sm:$0xff] }
 0x40b   :  { %v7067_v12 = vcombine.low %v2561_v1, %v2577_v2  ;;  %v2721_v55 = vld [vmem:[%s10108_s7 + $0x660] sm:$0xff] }
 0x40c   :  { %5897 = vmatpush1.bf16.msra.mxu1 %v7345_v7  ;;  %v7068_v7 = vcombine.high %v2561_v1, %v2577_v2  ;;  %v6468_v2 = vrot.slane %v9127_v53, %v8303_v38 }
 0x40d   :  { %6020 = vmatpush1.bf16.msra.mxu0 %v7351_v8  ;;  %5898 = vmatprep.subr.bf16.mxu1 %v7378_v9  ;;  %v2593_v8 = vld [vmem:[%s10108_s7 + $0x260] sm:$0xff] }
 0x40e   :  { %6021 = vmatprep.subr.bf16.mxu0 %v7384_v10  ;;  %v2609_v9 = vld [vmem:[%s10108_s7 + $0x2e0] sm:$0xff]  ;;  %v7061_v10 = vcombine.low %v2558_v62, %v2574_v63 }
 0x40f   :  { %v7100_v15 = vcombine.high %v2593_v8, %v2609_v9  ;;  %v7099_v21 = vcombine.low %v2593_v8, %v2609_v9 }
 0x410   :  { %5899 = vmatpush1.bf16.msra.mxu1 %v7377_v17  ;;  %v2638_v17 = vld [vmem:[%s10108_s7 + $0x3c8] sm:$0xff] }
 0x411   :  { %6022 = vmatpush1.bf16.msra.mxu0 %v7383_v18  ;;  %5900 = vmatprep.subr.bf16.mxu1 %v7410_v19  ;;  %v2625_v18 = vld [vmem:[%s10108_s7 + $0x360] sm:$0xff]  ;;  %v7126_v11 = vcombine.high %v2622_v16, %v2638_v17 }
 0x412   :  { %6023 = vmatprep.subr.bf16.mxu0 %v7416_v20  ;;  %v2641_v19 = vld [vmem:[%s10108_s7 + $0x3e0] sm:$0xff]  ;;  %v7093_v20 = vcombine.low %v2590_v5, %v2606_v6  ;;  %v2750_v5 = vld [vmem:[%s10108_s7 + $0x748] sm:$0xff] }
 0x413   :  { %v7132_v13 = vcombine.high %v2625_v18, %v2641_v19  ;;  %v7131_v30 = vcombine.low %v2625_v18, %v2641_v19  ;;  %v2766_v6 = vld [vmem:[%s10108_s7 + $0x7c8] sm:$0xff] }
 0x414   :  { %5901 = vmatpush1.bf16.msra.mxu1 %v7409_v23  ;;  %v2670_v23 = vld [vmem:[%s10108_s7 + $0x4c8] sm:$0xff] }
 0x415   :  { %6024 = vmatpush1.bf16.msra.mxu0 %v7415_v24  ;;  %5902 = vmatprep.subr.bf16.mxu1 %v7442_v25  ;;  %v2657_v24 = vld [vmem:[%s10108_s7 + $0x460] sm:$0xff]  ;;  %v7158_v31 = vcombine.high %v2654_v22, %v2670_v23 }
 0x416   :  { %6025 = vmatprep.subr.bf16.mxu0 %v7448_v29  ;;  %v2673_v25 = vld [vmem:[%s10108_s7 + $0x4e0] sm:$0xff]  ;;  %v7125_v29 = vcombine.low %v2622_v16, %v2638_v17 }
 0x417   :  { %v7164_v32 = vcombine.high %v2657_v24, %v2673_v25  ;;  %v7163_v43 = vcombine.low %v2657_v24, %v2673_v25 }
 0x418   :  { %5903 = vmatpush1.bf16.msra.mxu1 %v7441_v36  ;;  %v2702_v36 = vld [vmem:[%s10108_s7 + $0x5c8] sm:$0xff] }
 0x419   :  { %6026 = vmatpush1.bf16.msra.mxu0 %v7447_v39  ;;  %5904 = vmatprep.subr.bf16.mxu1 %v7474_v40  ;;  %v2689_v39 = vld [vmem:[%s10108_s7 + $0x560] sm:$0xff]  ;;  %v7190_v44 = vcombine.high %v2686_v35, %v2702_v36 }
 0x41a   :  { %6027 = vmatprep.subr.bf16.mxu0 %v7480_v41  ;;  %v2705_v40 = vld [vmem:[%s10108_s7 + $0x5e0] sm:$0xff]  ;;  %v7157_v41 = vcombine.low %v2654_v22, %v2670_v23  ;;  %v7254_v23 = vcombine.high %v2750_v5, %v2766_v6 }
 0x41b   :  { %v7195_v62 = vcombine.low %v2689_v39, %v2705_v40 }
 0x41c   :  { %5905 = vmatpush1.bf16.msra.mxu1 %v7473_v47  ;;  %v7196_v47 = vcombine.high %v2689_v39, %v2705_v40 }
 0x41d   :  { %6028 = vmatpush1.bf16.msra.mxu0 %v7479_v48  ;;  %5906 = vmatprep.subr.bf16.mxu1 %v7506_v49  ;;  %v2718_v48 = vld [vmem:[%s10108_s7 + $0x648] sm:$0xff] }
 0x41e   :  { %6029 = vmatprep.subr.bf16.mxu0 %v7512_v52  ;;  %v2734_v49 = vld [vmem:[%s10108_s7 + $0x6c8] sm:$0xff]  ;;  %v6264_v52 = vrot.slane %v9119_v50, %v8294_v34 }
 0x41f   :  { %v7222_v63 = vcombine.high %v2718_v48, %v2734_v49  ;;  %v7221_v19 = vcombine.low %v2718_v48, %v2734_v49  ;;  %v2833_v48 = vld [vmem:[%s10108_s7 + $0x9e0] sm:$0xff] }
 0x420   :  { %5907 = vmatpush1.bf16.msra.mxu1 %v7505_v58  ;;  %v6268_v58 = vrot.slane %v9119_v50, %v8303_v38 }
 0x421   :  { %6030 = vmatpush1.bf16.msra.mxu0 %v7511_v59  ;;  %5958 = vmatprep.subr.bf16.mxu1 %v7030_v60  ;;  %v6292_v59 = vrot.slane %v9356_v42, %v8300_v37  ;;  %v7189_v60 = vcombine.low %v2686_v35, %v2702_v36  ;;  %v2801_v35 = vld [vmem:[%s10108_s7 + $0x8e0] sm:$0xff]  ;;  %v7253_v36 = vcombine.low %v2750_v5, %v2766_v6 }
 0x422   :  { %6081 = vmatprep.subr.bf16.mxu0 %v7036_v61  ;;  %v6488_v61 = vrot.slane %v9361_v45, %v8291_v33 }
 0x423   :  { %5909 = vmatmul.mubr.bf16.vlgmr.msra.gmra.mrb[20].mxu1 %v8469_v27 }
 0x424   :  { %6032 = vmatmul.mubr.bf16.vlgmr.msra.gmra.mrb[24].mxu0 %v8469_v27  ;;  %5959 = vmatpush1.bf16.msra.mxu1 %v7029_v0 }
 0x425   :  { %5990 = vmatprep.mubr.bf16.mxu1 %v8467_v26  ;;  %6082 = vmatpush1.bf16.msra.mxu0 %v7035_v3  ;;  %v6492_v3 = vrot.slane %v9361_v45, %v8300_v37 }
 0x426   :  { %6113 = vmatprep.mubr.bf16.mxu0 %v8467_v26  ;;  %5960 = vmatprep.subr.bf16.mxu1 %v7062_v4  ;;  %v7228_v4 = vcombine.high %v2721_v55, %v2737_v56 }
 0x427   :  { %6083 = vmatprep.subr.bf16.mxu0 %v7068_v7 }
 0x428   :  { %5961 = vmatpush1.bf16.msra.mxu1 %v7061_v10 }
 0x429   :  { %6084 = vmatpush1.bf16.msra.mxu0 %v7067_v12  ;;  %5962 = vmatprep.subr.bf16.mxu1 %v7094_v14  ;;  %v2753_v12 = vld [vmem:[%s10108_s7 + $0x760] sm:$0xff] }
 0x42a   :  { %6085 = vmatprep.subr.bf16.mxu0 %v7100_v15  ;;  %v2769_v14 = vld [vmem:[%s10108_s7 + $0x7e0] sm:$0xff] }
 0x42b   :  { %v7259_v39 = vcombine.low %v2753_v12, %v2769_v14 }
 0x42c   :  { %5963 = vmatpush1.bf16.msra.mxu1 %v7093_v20  ;;  %v7227_v20 = vcombine.low %v2721_v55, %v2737_v56  ;;  %v2846_v56 = vld [vmem:[%s10108_s7 + $0xa48] sm:$0xff] }
 0x42d   :  { %6086 = vmatpush1.bf16.msra.mxu0 %v7099_v21  ;;  %5964 = vmatprep.subr.bf16.mxu1 %v7126_v11 }
 0x42e   :  { %6087 = vmatprep.subr.bf16.mxu0 %v7132_v13 }
 0x430   :  { %5965 = vmatpush1.bf16.msra.mxu1 %v7125_v29  ;;  %v7260_v29 = vcombine.high %v2753_v12, %v2769_v14  ;;  %v2929_v12 = vld [vmem:[%s10108_s7 + $0xce0] sm:$0xff] }
 0x431   :  { %6088 = vmatpush1.bf16.msra.mxu0 %v7131_v30  ;;  %5966 = vmatprep.subr.bf16.mxu1 %v7158_v31  ;;  %v2782_v30 = vld [vmem:[%s10108_s7 + $0x848] sm:$0xff] }
 0x432   :  { %6089 = vmatprep.subr.bf16.mxu0 %v7164_v32  ;;  %v2798_v31 = vld [vmem:[%s10108_s7 + $0x8c8] sm:$0xff]  ;;  %v2785_v32 = vld [vmem:[%s10108_s7 + $0x860] sm:$0xff] }
 0x433   :  { %v7286_v40 = vcombine.high %v2782_v30, %v2798_v31  ;;  %v7285_v49 = vcombine.low %v2782_v30, %v2798_v31  ;;  %v2993_v30 = vld [vmem:[%s10108_s7 + $0xee0] sm:$0xff] }
 0x434   :  { %5967 = vmatpush1.bf16.msra.mxu1 %v7157_v41  ;;  %v7292_v41 = vcombine.high %v2785_v32, %v2801_v35 }
 0x435   :  { %6090 = vmatpush1.bf16.msra.mxu0 %v7163_v43  ;;  %5968 = vmatprep.subr.bf16.mxu1 %v7190_v44  ;;  %v2814_v43 = vld [vmem:[%s10108_s7 + $0x948] sm:$0xff] }
 0x436   :  { %v5664_v0 = vpop.f32.mrb[8].mxu1  ;;  %v5787_v1 = vpop.f32.mrb[12].mxu0  ;;  %6091 = vmatprep.subr.bf16.mxu0 %v7196_v47  ;;  %v2830_v44 = vld [vmem:[%s10108_s7 + $0x9c8] sm:$0xff]  ;;  %v2817_v47 = vld [vmem:[%s10108_s7 + $0x960] sm:$0xff] }
 0x437   :  { %v6415_v7 = vmul.f32 %v6264_v52, %v5664_v0  ;;  %v6421_v8 = vmul.f32 %v6288_v54, %v5787_v1  ;;  %v5666_v9 = vpop.f32.mrb[9].mxu1  ;;  %v5789_v10 = vpop.f32.mrb[13].mxu0  ;;  %v7291_v52 = vcombine.low %v2785_v32, %v2801_v35  ;;  %v7318_v54 = vcombine.high %v2814_v43, %v2830_v44  ;;  %v2878_v0 = vld [vmem:[%s10108_s7 + $0xb48] sm:$0xff] }
 0x438   :  { %v6416_v15 = vmul.f32 %v6268_v58, %v5666_v9  ;;  %v6422_v16 = vmul.f32 %v6292_v59, %v5789_v10  ;;  %v5668_v17 = vpop.f32.mrb[10].mxu1  ;;  %v5791_v18 = vpop.f32.mrb[14].mxu0  ;;  %5969 = vmatpush1.bf16.msra.mxu1 %v7189_v60  ;;  %v7324_v55 = vcombine.high %v2817_v47, %v2833_v48  ;;  %v2849_v58 = vld [vmem:[%s10108_s7 + $0xa60] sm:$0xff]  ;;  %v7317_v60 = vcombine.low %v2814_v43, %v2830_v44  ;;  %v2894_v1 = vld [vmem:[%s10108_s7 + $0xbc8] sm:$0xff] }
 0x439   :  { %v6615_v21 = vadd.f32 %v6464_v57, %v6415_v7  ;;  %v6621_v11 = vadd.f32 %v6488_v61, %v6421_v8  ;;  %6092 = vmatpush1.bf16.msra.mxu0 %v7195_v62  ;;  %v5669_v13 = vpop.f32.mrb[11].mxu1  ;;  %v5792_v22 = vpop.f32.mrb[15].mxu0  ;;  %5970 = vmatprep.subr.bf16.mxu1 %v7222_v63  ;;  %v2862_v57 = vld [vmem:[%s10108_s7 + $0xac8] sm:$0xff]  ;;  %v2865_v59 = vld [vmem:[%s10108_s7 + $0xae0] sm:$0xff]  ;;  %v7323_v61 = vcombine.low %v2817_v47, %v2833_v48 }
 0x43a   :  { %v6616_v24 = vadd.f32 %v6468_v2, %v6416_v15  ;;  %v6622_v25 = vadd.f32 %v6492_v3, %v6422_v16  ;;  %6093 = vmatprep.subr.bf16.mxu0 %v7228_v4  ;;  %v7350_v62 = vcombine.high %v2846_v56, %v2862_v57  ;;  %v7356_v63 = vcombine.high %v2849_v58, %v2865_v59  ;;  %v2881_v2 = vld [vmem:[%s10108_s7 + $0xb60] sm:$0xff]  ;;  %v2910_v8 = vld [vmem:[%s10108_s7 + $0xc48] sm:$0xff] }
 0x43b   :  { %6647 = vst [vmem:[%s10111_s10 + $0x10] sm:$0xff] %v6615_v21  ;;  %6653 = vst [vmem:[%s10111_s10 + $0x40] sm:$0xff] %v6621_v11  ;;  %v2897_v3 = vld [vmem:[%s10108_s7 + $0xbe0] sm:$0xff]  ;;  %v7349_v4 = vcombine.low %v2846_v56, %v2862_v57  ;;  %v7355_v5 = vcombine.low %v2849_v58, %v2865_v59  ;;  %v7382_v6 = vcombine.high %v2878_v0, %v2894_v1  ;;  %v2926_v9 = vld [vmem:[%s10108_s7 + $0xcc8] sm:$0xff] }
 0x43c   :  { %6648 = vst [vmem:[%s10111_s10 + $0x18] sm:$0xff] %v6616_v24  ;;  %6654 = vst [vmem:[%s10111_s10 + $0x48] sm:$0xff] %v6622_v25  ;;  %5971 = vmatpush1.bf16.msra.mxu1 %v7221_v19  ;;  %v7388_v7 = vcombine.high %v2881_v2, %v2897_v3  ;;  %v2913_v10 = vld [vmem:[%s10108_s7 + $0xc60] sm:$0xff]  ;;  %v7381_v14 = vcombine.low %v2878_v0, %v2894_v1  ;;  %v7387_v15 = vcombine.low %v2881_v2, %v2897_v3  ;;  %v2942_v18 = vld [vmem:[%s10108_s7 + $0xd48] sm:$0xff] }
 0x43d   :  { %6094 = vmatpush1.bf16.msra.mxu0 %v7227_v20  ;;  %5972 = vmatprep.subr.bf16.mxu1 %v7254_v23  ;;  %v7414_v16 = vcombine.high %v2910_v8, %v2926_v9  ;;  %v7420_v17 = vcombine.high %v2913_v10, %v2929_v12  ;;  %v2958_v19 = vld [vmem:[%s10108_s7 + $0xdc8] sm:$0xff]  ;;  %v2945_v20 = vld [vmem:[%s10108_s7 + $0xd60] sm:$0xff]  ;;  %v7413_v11 = vcombine.low %v2910_v8, %v2926_v9  ;;  %v2547_v56 = vld [vmem:[%s10108_s7 + $0xf0] sm:$0xff] }
 0x43e   :  { %6095 = vmatprep.subr.bf16.mxu0 %v7260_v29  ;;  %v2961_v21 = vld [vmem:[%s10108_s7 + $0xde0] sm:$0xff]  ;;  %v7419_v13 = vcombine.low %v2913_v10, %v2929_v12  ;;  %v7446_v22 = vcombine.high %v2942_v18, %v2958_v19  ;;  %v2974_v24 = vld [vmem:[%s10108_s7 + $0xe48] sm:$0xff]  ;;  %v7445_v31 = vcombine.low %v2942_v18, %v2958_v19  ;;  %v2563_v0 = vld [vmem:[%s10108_s7 + $0x170] sm:$0xff] }
 0x43f   :  { %v7452_v23 = vcombine.high %v2945_v20, %v2961_v21  ;;  %v2990_v25 = vld [vmem:[%s10108_s7 + $0xec8] sm:$0xff]  ;;  %v2977_v29 = vld [vmem:[%s10108_s7 + $0xe60] sm:$0xff]  ;;  %v7451_v32 = vcombine.low %v2945_v20, %v2961_v21  ;;  %v2579_v1 = vld [vmem:[%s10108_s7 + $0x1f0] sm:$0xff] }
 0x440   :  { %5973 = vmatpush1.bf16.msra.mxu1 %v7253_v36  ;;  %v7478_v35 = vcombine.high %v2974_v24, %v2990_v25  ;;  %v7484_v36 = vcombine.high %v2977_v29, %v2993_v30  ;;  %v3025_v43 = vld [vmem:[%s10108_s7 + $0xfe0] sm:$0xff]  ;;  %v7477_v44 = vcombine.low %v2974_v24, %v2990_v25  ;;  %v7483_v47 = vcombine.low %v2977_v29, %v2993_v30  ;;  %v2611_v8 = vld [vmem:[%s10108_s7 + $0x2f0] sm:$0xff] }
 0x441   :  { %6096 = vmatpush1.bf16.msra.mxu0 %v7259_v39  ;;  %5974 = vmatprep.subr.bf16.mxu1 %v7286_v40  ;;  %v3006_v39 = vld [vmem:[%s10108_s7 + $0xf48] sm:$0xff]  ;;  %v7071_v10 = vcombine.low %v2563_v0, %v2579_v1  ;;  %v2643_v18 = vld [vmem:[%s10108_s7 + $0x3f0] sm:$0xff] }
 0x442   :  { %6097 = vmatprep.subr.bf16.mxu0 %v7292_v41  ;;  %v3022_v40 = vld [vmem:[%s10108_s7 + $0xfc8] sm:$0xff]  ;;  %v3009_v41 = vld [vmem:[%s10108_s7 + $0xf60] sm:$0xff]  ;;  %v2675_v24 = vld [vmem:[%s10108_s7 + $0x4f0] sm:$0xff] }
 0x443   :  { %v7510_v48 = vcombine.high %v3006_v39, %v3022_v40  ;;  %v7509_v57 = vcombine.low %v3006_v39, %v3022_v40  ;;  %v7515_v58 = vcombine.low %v3009_v41, %v3025_v43  ;;  %v2691_v39 = vld [vmem:[%s10108_s7 + $0x570] sm:$0xff] }
 0x444   :  { %5975 = vmatpush1.bf16.msra.mxu1 %v7285_v49  ;;  %v7516_v49 = vcombine.high %v3009_v41, %v3025_v43  ;;  %v2707_v40 = vld [vmem:[%s10108_s7 + $0x5f0] sm:$0xff]  ;;  %v9591_v43 = vsub.s32 7, %v8282_v28 }
 0x445   :  { %6098 = vmatpush1.bf16.msra.mxu0 %v7291_v52  ;;  %5976 = vmatprep.subr.bf16.mxu1 %v7318_v54  ;;  %v2528_v52 = vld [vmem:[%s10108_s7 + $0x58] sm:$0xff] }
 0x446   :  { %6099 = vmatprep.subr.bf16.mxu0 %v7324_v55  ;;  %v2544_v54 = vld [vmem:[%s10108_s7 + $0xd8] sm:$0xff]  ;;  %v2531_v55 = vld [vmem:[%s10108_s7 + $0x70] sm:$0xff] }
 0x447   :  { %v7034_v59 = vcombine.high %v2528_v52, %v2544_v54  ;;  %v7039_v2 = vcombine.low %v2531_v55, %v2547_v56 }
 0x448   :  { %5977 = vmatpush1.bf16.msra.mxu1 %v7317_v60  ;;  %v7040_v60 = vcombine.high %v2531_v55, %v2547_v56  ;;  %v2739_v55 = vld [vmem:[%s10108_s7 + $0x6f0] sm:$0xff] }
 0x449   :  { %6100 = vmatpush1.bf16.msra.mxu0 %v7323_v61  ;;  %5978 = vmatprep.subr.bf16.mxu1 %v7350_v62  ;;  %v2560_v61 = vld [vmem:[%s10108_s7 + $0x158] sm:$0xff] }
 0x44a   :  { %6101 = vmatprep.subr.bf16.mxu0 %v7356_v63  ;;  %v2576_v62 = vld [vmem:[%s10108_s7 + $0x1d8] sm:$0xff]  ;;  %v7033_v63 = vcombine.low %v2528_v52, %v2544_v54 }
 0x44b   :  { %v7066_v3 = vcombine.high %v2560_v61, %v2576_v62  ;;  %v7065_v9 = vcombine.low %v2560_v61, %v2576_v62  ;;  %v2736_v52 = vld [vmem:[%s10108_s7 + $0x6d8] sm:$0xff]  ;;  %v7199_v61 = vcombine.low %v2691_v39, %v2707_v40 }
 0x44c   :  { %5979 = vmatpush1.bf16.msra.mxu1 %v7349_v4  ;;  %v2592_v4 = vld [vmem:[%s10108_s7 + $0x258] sm:$0xff] }
 0x44d   :  { %6102 = vmatpush1.bf16.msra.mxu0 %v7355_v5  ;;  %5980 = vmatprep.subr.bf16.mxu1 %v7382_v6  ;;  %v2608_v5 = vld [vmem:[%s10108_s7 + $0x2d8] sm:$0xff]  ;;  %v7072_v6 = vcombine.high %v2563_v0, %v2579_v1  ;;  %v6504_v0 = vrot.slane %v9361_v45, %v9108_v46  ;;  %v6484_v1 = vrot.slane %v9127_v53, %v9591_v43 }
 0x44e   :  { %6103 = vmatprep.subr.bf16.mxu0 %v7388_v7  ;;  %v2595_v7 = vld [vmem:[%s10108_s7 + $0x270] sm:$0xff]  ;;  %v7098_v12 = vcombine.high %v2592_v4, %v2608_v5  ;;  %v7097_v19 = vcombine.low %v2592_v4, %v2608_v5 }
 0x44f   :  { %v7103_v20 = vcombine.low %v2595_v7, %v2611_v8 }
 0x450   :  { %5981 = vmatpush1.bf16.msra.mxu1 %v7381_v14  ;;  %v7104_v14 = vcombine.high %v2595_v7, %v2611_v8  ;;  %v6508_v7 = vrot.slane %v9361_v45, %v9122_v51  ;;  %v2771_v8 = vld [vmem:[%s10108_s7 + $0x7f0] sm:$0xff] }
 0x451   :  { %6104 = vmatpush1.bf16.msra.mxu0 %v7387_v15  ;;  %5982 = vmatprep.subr.bf16.mxu1 %v7414_v16  ;;  %v2624_v15 = vld [vmem:[%s10108_s7 + $0x358] sm:$0xff] }
 0x452   :  { %6105 = vmatprep.subr.bf16.mxu0 %v7420_v17  ;;  %v2640_v16 = vld [vmem:[%s10108_s7 + $0x3d8] sm:$0xff]  ;;  %v2627_v17 = vld [vmem:[%s10108_s7 + $0x370] sm:$0xff] }
 0x453   :  { %v7130_v21 = vcombine.high %v2624_v15, %v2640_v16  ;;  %v7129_v25 = vcombine.low %v2624_v15, %v2640_v16  ;;  %v7135_v29 = vcombine.low %v2627_v17, %v2643_v18 }
 0x454   :  { %5983 = vmatpush1.bf16.msra.mxu1 %v7413_v11  ;;  %v7136_v11 = vcombine.high %v2627_v17, %v2643_v18 }
 0x455   :  { %6106 = vmatpush1.bf16.msra.mxu0 %v7419_v13  ;;  %5984 = vmatprep.subr.bf16.mxu1 %v7446_v22  ;;  %v2656_v13 = vld [vmem:[%s10108_s7 + $0x458] sm:$0xff] }
 0x456   :  { %6107 = vmatprep.subr.bf16.mxu0 %v7452_v23  ;;  %v2672_v22 = vld [vmem:[%s10108_s7 + $0x4d8] sm:$0xff]  ;;  %v2659_v23 = vld [vmem:[%s10108_s7 + $0x470] sm:$0xff] }
 0x457   :  { %v7162_v30 = vcombine.high %v2656_v13, %v2672_v22  ;;  %v7161_v41 = vcombine.low %v2656_v13, %v2672_v22 }
 0x458   :  { %5985 = vmatpush1.bf16.msra.mxu1 %v7445_v31  ;;  %v7168_v31 = vcombine.high %v2659_v23, %v2675_v24 }
 0x459   :  { %6108 = vmatpush1.bf16.msra.mxu0 %v7451_v32  ;;  %5986 = vmatprep.subr.bf16.mxu1 %v7478_v35  ;;  %v2688_v32 = vld [vmem:[%s10108_s7 + $0x558] sm:$0xff] }
 0x45a   :  { %6109 = vmatprep.subr.bf16.mxu0 %v7484_v36  ;;  %v2704_v35 = vld [vmem:[%s10108_s7 + $0x5d8] sm:$0xff]  ;;  %v9582_v36 = vsub.s32 6, %v8282_v28  ;;  %v2723_v28 = vld [vmem:[%s10108_s7 + $0x670] sm:$0xff] }
 0x45b   :  { %v7231_v16 = vcombine.low %v2723_v28, %v2739_v55 }
 0x45c   :  { %5987 = vmatpush1.bf16.msra.mxu1 %v7477_v44  ;;  %v7167_v44 = vcombine.low %v2659_v23, %v2675_v24  ;;  %v6280_v54 = vrot.slane %v9119_v50, %v9582_v36  ;;  %v6480_v56 = vrot.slane %v9127_v53, %v9582_v36  ;;  %v2755_v53 = vld [vmem:[%s10108_s7 + $0x770] sm:$0xff]  ;;  %v2784_v24 = vld [vmem:[%s10108_s7 + $0x858] sm:$0xff] }
 0x45d   :  { %6110 = vmatpush1.bf16.msra.mxu0 %v7483_v47  ;;  %5988 = vmatprep.subr.bf16.mxu1 %v7510_v48  ;;  %v7194_v47 = vcombine.high %v2688_v32, %v2704_v35  ;;  %v7200_v48 = vcombine.high %v2691_v39, %v2707_v40  ;;  %v7264_v23 = vcombine.high %v2755_v53, %v2771_v8 }
 0x45e   :  { %6111 = vmatprep.subr.bf16.mxu0 %v7516_v49  ;;  %v2720_v49 = vld [vmem:[%s10108_s7 + $0x658] sm:$0xff] }
 0x45f   :  { %v7226_v62 = vcombine.high %v2720_v49, %v2736_v52  ;;  %v7225_v15 = vcombine.low %v2720_v49, %v2736_v52 }
 0x460   :  { %5989 = vmatpush1.bf16.msra.mxu1 %v7509_v57  ;;  %v6304_v57 = vrot.slane %v9356_v42, %v9108_v46 }
 0x461   :  { %6112 = vmatpush1.bf16.msra.mxu0 %v7515_v58  ;;  %6040 = vmatprep.subr.bf16.mxu1 %v7034_v59  ;;  %v6284_v58 = vrot.slane %v9119_v50, %v9591_v43  ;;  %v7193_v59 = vcombine.low %v2688_v32, %v2704_v35  ;;  %v2752_v50 = vld [vmem:[%s10108_s7 + $0x758] sm:$0xff]  ;;  %v7263_v35 = vcombine.low %v2755_v53, %v2771_v8  ;;  %v2915_v53 = vld [vmem:[%s10108_s7 + $0xc70] sm:$0xff] }
 0x462   :  { %6163 = vmatprep.subr.bf16.mxu0 %v7040_v60  ;;  %v6308_v60 = vrot.slane %v9356_v42, %v9122_v51  ;;  %v2931_v8 = vld [vmem:[%s10108_s7 + $0xcf0] sm:$0xff] }
 0x463   :  { %5991 = vmatmul.mubr.bf16.vlgmr.msra.gmra.mrb[24].mxu1 %v8469_v27 }
 0x464   :  { %6114 = vmatmul.mubr.bf16.vlgmr.msra.gmra.mrb[28].mxu0 %v8469_v27  ;;  %6041 = vmatpush1.bf16.msra.mxu1 %v7033_v63 }
 0x465   :  { %6072 = vmatprep.mubr.bf16.mxu1 %v8467_v26  ;;  %6164 = vmatpush1.bf16.msra.mxu0 %v7039_v2  ;;  %v7232_v2 = vcombine.high %v2723_v28, %v2739_v55  ;;  %v2848_v55 = vld [vmem:[%s10108_s7 + $0xa58] sm:$0xff] }
 0x466   :  { %6195 = vmatprep.mubr.bf16.mxu0 %v8467_v26  ;;  %6042 = vmatprep.subr.bf16.mxu1 %v7066_v3  ;;  %v2768_v3 = vld [vmem:[%s10108_s7 + $0x7d8] sm:$0xff] }
 0x467   :  { %6165 = vmatprep.subr.bf16.mxu0 %v7072_v6  ;;  %v7257_v32 = vcombine.low %v2752_v50, %v2768_v3 }
 0x468   :  { %6043 = vmatpush1.bf16.msra.mxu1 %v7065_v9 }
 0x469   :  { %6166 = vmatpush1.bf16.msra.mxu0 %v7071_v10  ;;  %6044 = vmatprep.subr.bf16.mxu1 %v7098_v12 }
 0x46a   :  { %6167 = vmatprep.subr.bf16.mxu0 %v7104_v14 }
 0x46c   :  { %6045 = vmatpush1.bf16.msra.mxu1 %v7097_v19 }
 0x46d   :  { %6168 = vmatpush1.bf16.msra.mxu0 %v7103_v20  ;;  %6046 = vmatprep.subr.bf16.mxu1 %v7130_v21  ;;  %v7258_v21 = vcombine.high %v2752_v50, %v2768_v3 }
 0x46e   :  { %6169 = vmatprep.subr.bf16.mxu0 %v7136_v11 }
 0x470   :  { %6047 = vmatpush1.bf16.msra.mxu1 %v7129_v25  ;;  %v2800_v25 = vld [vmem:[%s10108_s7 + $0x8d8] sm:$0xff] }
 0x471   :  { %6170 = vmatpush1.bf16.msra.mxu0 %v7135_v29  ;;  %6048 = vmatprep.subr.bf16.mxu1 %v7162_v30  ;;  %v2787_v30 = vld [vmem:[%s10108_s7 + $0x870] sm:$0xff]  ;;  %v7290_v39 = vcombine.high %v2784_v24, %v2800_v25  ;;  %v7289_v49 = vcombine.low %v2784_v24, %v2800_v25 }
 0x472   :  { %6171 = vmatprep.subr.bf16.mxu0 %v7168_v31  ;;  %v2803_v31 = vld [vmem:[%s10108_s7 + $0x8f0] sm:$0xff] }
 0x473   :  { %v7296_v40 = vcombine.high %v2787_v30, %v2803_v31  ;;  %v7295_v52 = vcombine.low %v2787_v30, %v2803_v31  ;;  %v2995_v24 = vld [vmem:[%s10108_s7 + $0xef0] sm:$0xff] }
 0x474   :  { %6049 = vmatpush1.bf16.msra.mxu1 %v7161_v41  ;;  %v2816_v41 = vld [vmem:[%s10108_s7 + $0x958] sm:$0xff] }
 0x475   :  { %6172 = vmatpush1.bf16.msra.mxu0 %v7167_v44  ;;  %6050 = vmatprep.subr.bf16.mxu1 %v7194_v47  ;;  %v2832_v44 = vld [vmem:[%s10108_s7 + $0x9d8] sm:$0xff]  ;;  %v2819_v47 = vld [vmem:[%s10108_s7 + $0x970] sm:$0xff] }
 0x476   :  { %v5746_v63 = vpop.f32.mrb[12].mxu1  ;;  %6173 = vmatprep.subr.bf16.mxu0 %v7200_v48  ;;  %v2835_v48 = vld [vmem:[%s10108_s7 + $0x9f0] sm:$0xff] }
 0x477   :  { %v6419_v4 = vmul.f32 %v6280_v54, %v5746_v63  ;;  %v5869_v5 = vpop.f32.mrb[16].mxu0  ;;  %v5748_v6 = vpop.f32.mrb[13].mxu1  ;;  %v7322_v54 = vcombine.high %v2816_v41, %v2832_v44  ;;  %v7328_v28 = vcombine.high %v2819_v47, %v2835_v48  ;;  %v2880_v63 = vld [vmem:[%s10108_s7 + $0xb58] sm:$0xff] }
 0x478   :  { %v6425_v9 = vmul.f32 %v6304_v57, %v5869_v5  ;;  %v6420_v10 = vmul.f32 %v6284_v58, %v5748_v6  ;;  %v5871_v12 = vpop.f32.mrb[17].mxu0  ;;  %v5750_v14 = vpop.f32.mrb[14].mxu1  ;;  %6051 = vmatpush1.bf16.msra.mxu1 %v7193_v59  ;;  %v2851_v57 = vld [vmem:[%s10108_s7 + $0xa70] sm:$0xff]  ;;  %v7321_v59 = vcombine.low %v2816_v41, %v2832_v44  ;;  %v2912_v6 = vld [vmem:[%s10108_s7 + $0xc58] sm:$0xff] }
 0x479   :  { %v6619_v17 = vadd.f32 %v6480_v56, %v6419_v4  ;;  %v6426_v18 = vmul.f32 %v6308_v60, %v5871_v12  ;;  %v5873_v19 = vpop.f32.mrb[18].mxu0  ;;  %6174 = vmatpush1.bf16.msra.mxu0 %v7199_v61  ;;  %v5751_v20 = vpop.f32.mrb[15].mxu1  ;;  %6052 = vmatprep.subr.bf16.mxu1 %v7226_v62  ;;  %v2864_v56 = vld [vmem:[%s10108_s7 + $0xad8] sm:$0xff]  ;;  %v2867_v58 = vld [vmem:[%s10108_s7 + $0xaf0] sm:$0xff]  ;;  %v7327_v60 = vcombine.low %v2819_v47, %v2835_v48 }
 0x47a   :  { %v6625_v11 = vadd.f32 %v6504_v0, %v6425_v9  ;;  %v6620_v13 = vadd.f32 %v6484_v1, %v6420_v10  ;;  %v5874_v22 = vpop.f32.mrb[19].mxu0  ;;  %6175 = vmatprep.subr.bf16.mxu0 %v7232_v2  ;;  %v7354_v61 = vcombine.high %v2848_v55, %v2864_v56  ;;  %v7360_v62 = vcombine.high %v2851_v57, %v2867_v58  ;;  %v2896_v0 = vld [vmem:[%s10108_s7 + $0xbd8] sm:$0xff]  ;;  %v2883_v1 = vld [vmem:[%s10108_s7 + $0xb70] sm:$0xff] }
 0x47b   :  { %6651 = vst [vmem:[%s10111_s10 + $0x30] sm:$0xff] %v6619_v17  ;;  %v6626_v29 = vadd.f32 %v6508_v7, %v6426_v18  ;;  %v2899_v2 = vld [vmem:[%s10108_s7 + $0xbf0] sm:$0xff]  ;;  %v7353_v50 = vcombine.low %v2848_v55, %v2864_v56  ;;  %v7359_v3 = vcombine.low %v2851_v57, %v2867_v58  ;;  %v7386_v4 = vcombine.high %v2880_v63, %v2896_v0  ;;  %v2928_v7 = vld [vmem:[%s10108_s7 + $0xcd8] sm:$0xff]  ;;  %v2562_v56 = vld [vmem:[%s10108_s7 + $0x168] sm:$0xff] }
 0x47c   :  { %6657 = vst [vmem:[%s10111_s10 + $0x60] sm:$0xff] %v6625_v11  ;;  %6652 = vst [vmem:[%s10111_s10 + $0x38] sm:$0xff] %v6620_v13  ;;  %6053 = vmatpush1.bf16.msra.mxu1 %v7225_v15  ;;  %v7392_v5 = vcombine.high %v2883_v1, %v2899_v2  ;;  %v7385_v9 = vcombine.low %v2880_v63, %v2896_v0  ;;  %v7391_v10 = vcombine.low %v2883_v1, %v2899_v2  ;;  %v2944_v15 = vld [vmem:[%s10108_s7 + $0xd58] sm:$0xff]  ;;  %v2947_v17 = vld [vmem:[%s10108_s7 + $0xd70] sm:$0xff] }
 0x47d   :  { %6658 = vst [vmem:[%s10111_s10 + $0x68] sm:$0xff] %v6626_v29  ;;  %6176 = vmatpush1.bf16.msra.mxu0 %v7231_v16  ;;  %6054 = vmatprep.subr.bf16.mxu1 %v7258_v21  ;;  %v7418_v12 = vcombine.high %v2912_v6, %v2928_v7  ;;  %v7424_v14 = vcombine.high %v2915_v53, %v2931_v8  ;;  %v2960_v16 = vld [vmem:[%s10108_s7 + $0xdd8] sm:$0xff]  ;;  %v2963_v18 = vld [vmem:[%s10108_s7 + $0xdf0] sm:$0xff]  ;;  %v2578_v57 = vld [vmem:[%s10108_s7 + $0x1e8] sm:$0xff] }
 0x47e   :  { %6177 = vmatprep.subr.bf16.mxu0 %v7264_v23  ;;  %v7417_v19 = vcombine.low %v2912_v6, %v2928_v7  ;;  %v7423_v20 = vcombine.low %v2915_v53, %v2931_v8  ;;  %v7450_v21 = vcombine.high %v2944_v15, %v2960_v16  ;;  %v7456_v11 = vcombine.high %v2947_v17, %v2963_v18  ;;  %v2976_v13 = vld [vmem:[%s10108_s7 + $0xe58] sm:$0xff]  ;;  %v2979_v23 = vld [vmem:[%s10108_s7 + $0xe70] sm:$0xff]  ;;  %v2626_v0 = vld [vmem:[%s10108_s7 + $0x368] sm:$0xff] }
 0x47f   :  { %v2992_v22 = vld [vmem:[%s10108_s7 + $0xed8] sm:$0xff]  ;;  %v7449_v25 = vcombine.low %v2944_v15, %v2960_v16  ;;  %v7455_v29 = vcombine.low %v2947_v17, %v2963_v18  ;;  %v7488_v31 = vcombine.high %v2979_v23, %v2995_v24  ;;  %v7487_v44 = vcombine.low %v2979_v23, %v2995_v24  ;;  %v2642_v1 = vld [vmem:[%s10108_s7 + $0x3e8] sm:$0xff]  ;;  %v9796_v16 = vld [vmem:[%s10110_s9 + $0x10] sm:$0xff] }
 0x480   :  { %6055 = vmatpush1.bf16.msra.mxu1 %v7257_v32  ;;  %v7482_v30 = vcombine.high %v2976_v13, %v2992_v22  ;;  %v3008_v32 = vld [vmem:[%s10108_s7 + $0xf58] sm:$0xff]  ;;  %v7481_v41 = vcombine.low %v2976_v13, %v2992_v22  ;;  %v2690_v7 = vld [vmem:[%s10108_s7 + $0x568] sm:$0xff]  ;;  %v6296_v15 = vrot.slane %v9356_v42, %v8294_v34  ;;  %v6300_v18 = vrot.slane %v9356_v42, %v8303_v38 }
 0x481   :  { %6178 = vmatpush1.bf16.msra.mxu0 %v7263_v35  ;;  %6056 = vmatprep.subr.bf16.mxu1 %v7290_v39  ;;  %v3024_v35 = vld [vmem:[%s10108_s7 + $0xfd8] sm:$0xff]  ;;  %v3011_v39 = vld [vmem:[%s10108_s7 + $0xf70] sm:$0xff]  ;;  %v2706_v53 = vld [vmem:[%s10108_s7 + $0x5e8] sm:$0xff]  ;;  %v6520_v22 = vrot.slane %v9796_v16, %v8291_v33  ;;  %v6500_v23 = vrot.slane %v9361_v45, %v8303_v38 }
 0x482   :  { %6179 = vmatprep.subr.bf16.mxu0 %v7296_v40  ;;  %v3027_v40 = vld [vmem:[%s10108_s7 + $0xff0] sm:$0xff]  ;;  %v7514_v47 = vcombine.high %v3008_v32, %v3024_v35  ;;  %v2754_v42 = vld [vmem:[%s10108_s7 + $0x768] sm:$0xff] }
 0x483   :  { %v7520_v48 = vcombine.high %v3011_v39, %v3027_v40  ;;  %v2770_v24 = vld [vmem:[%s10108_s7 + $0x7e8] sm:$0xff] }
 0x484   :  { %6057 = vmatpush1.bf16.msra.mxu1 %v7289_v49  ;;  %v2530_v49 = vld [vmem:[%s10108_s7 + $0x68] sm:$0xff] }
 0x485   :  { %6180 = vmatpush1.bf16.msra.mxu0 %v7295_v52  ;;  %6058 = vmatprep.subr.bf16.mxu1 %v7322_v54  ;;  %v2546_v52 = vld [vmem:[%s10108_s7 + $0xe8] sm:$0xff]  ;;  %v7513_v54 = vcombine.low %v3008_v32, %v3024_v35 }
 0x486   :  { %6181 = vmatprep.subr.bf16.mxu0 %v7328_v28  ;;  %v7519_v28 = vcombine.low %v3011_v39, %v3027_v40  ;;  %v7038_v55 = vcombine.high %v2530_v49, %v2546_v52  ;;  %v7037_v58 = vcombine.low %v2530_v49, %v2546_v52  ;;  %v7262_v49 = vcombine.high %v2754_v42, %v2770_v24 }
 0x488   :  { %6059 = vmatpush1.bf16.msra.mxu1 %v7321_v59  ;;  %v7070_v59 = vcombine.high %v2562_v56, %v2578_v57 }
 0x489   :  { %6182 = vmatpush1.bf16.msra.mxu0 %v7327_v60  ;;  %6060 = vmatprep.subr.bf16.mxu1 %v7354_v61  ;;  %v2594_v60 = vld [vmem:[%s10108_s7 + $0x268] sm:$0xff] }
 0x48a   :  { %6183 = vmatprep.subr.bf16.mxu0 %v7360_v62  ;;  %v2610_v61 = vld [vmem:[%s10108_s7 + $0x2e8] sm:$0xff]  ;;  %v7069_v62 = vcombine.low %v2562_v56, %v2578_v57 }
 0x48b   :  { %v7102_v63 = vcombine.high %v2594_v60, %v2610_v61  ;;  %v7101_v2 = vcombine.low %v2594_v60, %v2610_v61  ;;  %v2802_v56 = vld [vmem:[%s10108_s7 + $0x8e8] sm:$0xff] }
 0x48c   :  { %6061 = vmatpush1.bf16.msra.mxu1 %v7353_v50  ;;  %v7134_v50 = vcombine.high %v2626_v0, %v2642_v1  ;;  %v2818_v60 = vld [vmem:[%s10108_s7 + $0x968] sm:$0xff] }
 0x48d   :  { %6184 = vmatpush1.bf16.msra.mxu0 %v7359_v3  ;;  %6062 = vmatprep.subr.bf16.mxu1 %v7386_v4  ;;  %v2658_v3 = vld [vmem:[%s10108_s7 + $0x468] sm:$0xff] }
 0x48e   :  { %6185 = vmatprep.subr.bf16.mxu0 %v7392_v5  ;;  %v2674_v4 = vld [vmem:[%s10108_s7 + $0x4e8] sm:$0xff]  ;;  %v7133_v5 = vcombine.low %v2626_v0, %v2642_v1 }
 0x48f   :  { %v7166_v6 = vcombine.high %v2658_v3, %v2674_v4  ;;  %v7165_v8 = vcombine.low %v2658_v3, %v2674_v4  ;;  %v2834_v61 = vld [vmem:[%s10108_s7 + $0x9e8] sm:$0xff] }
 0x490   :  { %6063 = vmatpush1.bf16.msra.mxu1 %v7385_v9  ;;  %v9783_v9 = vld [vmem:[%s10109_s8 + $0x10] sm:$0xff]  ;;  %v2850_v0 = vld [vmem:[%s10108_s7 + $0xa68] sm:$0xff] }
 0x491   :  { %6186 = vmatpush1.bf16.msra.mxu0 %v7391_v10  ;;  %6064 = vmatprep.subr.bf16.mxu1 %v7418_v12  ;;  %v7198_v10 = vcombine.high %v2690_v7, %v2706_v53  ;;  %v2722_v12 = vld [vmem:[%s10108_s7 + $0x668] sm:$0xff]  ;;  %v6320_v17 = vrot.slane %v9783_v9, %v8291_v33 }
 0x492   :  { %6187 = vmatprep.subr.bf16.mxu0 %v7424_v14  ;;  %v2738_v14 = vld [vmem:[%s10108_s7 + $0x6e8] sm:$0xff] }
 0x493   :  { %v2866_v1 = vld [vmem:[%s10108_s7 + $0xae8] sm:$0xff] }
 0x494   :  { %6065 = vmatpush1.bf16.msra.mxu1 %v7417_v19  ;;  %v7197_v19 = vcombine.low %v2690_v7, %v2706_v53  ;;  %v2882_v3 = vld [vmem:[%s10108_s7 + $0xb68] sm:$0xff] }
 0x495   :  { %6188 = vmatpush1.bf16.msra.mxu0 %v7423_v20  ;;  %6066 = vmatprep.subr.bf16.mxu1 %v7450_v21  ;;  %v6496_v20 = vrot.slane %v9361_v45, %v8294_v34  ;;  %v6324_v21 = vrot.slane %v9783_v9, %v8300_v37  ;;  %v7229_v45 = vcombine.low %v2722_v12, %v2738_v14  ;;  %v2898_v4 = vld [vmem:[%s10108_s7 + $0xbe8] sm:$0xff] }
 0x496   :  { %6189 = vmatprep.subr.bf16.mxu0 %v7456_v11  ;;  %v7230_v11 = vcombine.high %v2722_v12, %v2738_v14  ;;  %v2914_v7 = vld [vmem:[%s10108_s7 + $0xc68] sm:$0xff] }
 0x497   :  { %v2930_v53 = vld [vmem:[%s10108_s7 + $0xce8] sm:$0xff] }
 0x498   :  { %6067 = vmatpush1.bf16.msra.mxu1 %v7449_v25  ;;  %v2946_v12 = vld [vmem:[%s10108_s7 + $0xd68] sm:$0xff] }
 0x499   :  { %6190 = vmatpush1.bf16.msra.mxu0 %v7455_v29  ;;  %6068 = vmatprep.subr.bf16.mxu1 %v7482_v30  ;;  %v2962_v14 = vld [vmem:[%s10108_s7 + $0xde8] sm:$0xff] }
 0x49a   :  { %6191 = vmatprep.subr.bf16.mxu0 %v7488_v31  ;;  %v6524_v31 = vrot.slane %v9796_v16, %v8300_v37 }
 0x49c   :  { %6069 = vmatpush1.bf16.msra.mxu1 %v7481_v41 }
 0x49d   :  { %6192 = vmatpush1.bf16.msra.mxu0 %v7487_v44  ;;  %6070 = vmatprep.subr.bf16.mxu1 %v7514_v47 }
 0x49e   :  { %6193 = vmatprep.subr.bf16.mxu0 %v7520_v48 }
 0x4a0   :  { %6071 = vmatpush1.bf16.msra.mxu1 %v7513_v54 }
 0x4a1   :  { %6194 = vmatpush1.bf16.msra.mxu0 %v7519_v28  ;;  %6122 = vmatprep.subr.bf16.mxu1 %v7038_v55  ;;  %v2786_v55 = vld [vmem:[%s10108_s7 + $0x868] sm:$0xff] }
 0x4a3   :  { %6073 = vmatmul.mubr.bf16.vlgmr.msra.gmra.mrb[28].mxu1 %v8469_v27 }
 0x4a4   :  { %6196 = vmatmul.mubr.bf16.vlgmr.msra.gmra.mrb[32].mxu0 %v8469_v27  ;;  %6123 = vmatpush1.bf16.msra.mxu1 %v7037_v58  ;;  %v7261_v58 = vcombine.low %v2754_v42, %v2770_v24  ;;  %v2532_v42 = vld [vmem:[%s10108_s7 + $0x78] sm:$0xff] }
 0x4a5   :  { %6154 = vmatprep.mubr.bf16.mxu1 %v8467_v26  ;;  %6124 = vmatprep.subr.bf16.mxu1 %v7070_v59  ;;  %v7294_v59 = vcombine.high %v2786_v55, %v2802_v56  ;;  %v2548_v24 = vld [vmem:[%s10108_s7 + $0xf8] sm:$0xff] }
 0x4a8   :  { %6125 = vmatpush1.bf16.msra.mxu1 %v7069_v62  ;;  %v7293_v62 = vcombine.low %v2786_v55, %v2802_v56  ;;  %v2692_v55 = vld [vmem:[%s10108_s7 + $0x578] sm:$0xff] }
 0x4a9   :  { %6126 = vmatprep.subr.bf16.mxu1 %v7102_v63  ;;  %v7326_v63 = vcombine.high %v2818_v60, %v2834_v61  ;;  %v2708_v56 = vld [vmem:[%s10108_s7 + $0x5f8] sm:$0xff] }
 0x4ac   :  { %6127 = vmatpush1.bf16.msra.mxu1 %v7101_v2  ;;  %v7325_v2 = vcombine.low %v2818_v60, %v2834_v61  ;;  %v2740_v60 = vld [vmem:[%s10108_s7 + $0x6f8] sm:$0xff]  ;;  %v8045_v61 = vld [vmem:[%s10109_s8 + $0x8] sm:$0xff] }
 0x4ad   :  { %6128 = vmatprep.subr.bf16.mxu1 %v7134_v50  ;;  %v7358_v50 = vcombine.high %v2850_v0, %v2866_v1 }
 0x4b0   :  { %6129 = vmatpush1.bf16.msra.mxu1 %v7133_v5  ;;  %v7357_v5 = vcombine.low %v2850_v0, %v2866_v1  ;;  %v6316_v0 = vrot.slane %v8045_v61, %v9591_v43  ;;  %v7201_v1 = vcombine.low %v2692_v55, %v2708_v56 }
 0x4b1   :  { %6130 = vmatprep.subr.bf16.mxu1 %v7166_v6  ;;  %v7390_v6 = vcombine.high %v2882_v3, %v2898_v4 }
 0x4b4   :  { %6131 = vmatpush1.bf16.msra.mxu1 %v7165_v8  ;;  %v7389_v8 = vcombine.low %v2882_v3, %v2898_v4  ;;  %v6340_v3 = vrot.slane %v9783_v9, %v9122_v51 }
 0x4b5   :  { %6132 = vmatprep.subr.bf16.mxu1 %v7198_v10  ;;  %v7422_v10 = vcombine.high %v2914_v7, %v2930_v53 }
 0x4b6   :  { %v5828_v13 = vpop.f32.mrb[16].mxu1 }
 0x4b7   :  { %v6423_v25 = vmul.f32 %v6296_v15, %v5828_v13  ;;  %v5951_v29 = vpop.f32.mrb[20].mxu0  ;;  %v5830_v30 = vpop.f32.mrb[17].mxu1  ;;  %v7421_v15 = vcombine.low %v2914_v7, %v2930_v53  ;;  %v3026_v13 = vld [vmem:[%s10108_s7 + $0xfe8] sm:$0xff]  ;;  %v2756_v53 = vld [vmem:[%s10108_s7 + $0x778] sm:$0xff] }
 0x4b8   :  { %v6429_v32 = vmul.f32 %v6320_v17, %v5951_v29  ;;  %v6424_v35 = vmul.f32 %v6300_v18, %v5830_v30  ;;  %v5953_v39 = vpop.f32.mrb[21].mxu0  ;;  %v5832_v40 = vpop.f32.mrb[18].mxu1  ;;  %6133 = vmatpush1.bf16.msra.mxu1 %v7197_v19  ;;  %v7454_v17 = vcombine.high %v2946_v12, %v2962_v14  ;;  %v2978_v18 = vld [vmem:[%s10108_s7 + $0xe68] sm:$0xff]  ;;  %v7042_v29 = vcombine.high %v2532_v42, %v2548_v24  ;;  %v2564_v30 = vld [vmem:[%s10108_s7 + $0x178] sm:$0xff] }
 0x4b9   :  { %v6623_v41 = vadd.f32 %v6496_v20, %v6423_v25  ;;  %v6430_v44 = vmul.f32 %v6324_v21, %v5953_v39  ;;  %v5955_v47 = vpop.f32.mrb[22].mxu0  ;;  %v5833_v48 = vpop.f32.mrb[19].mxu1  ;;  %6134 = vmatprep.subr.bf16.mxu1 %v7230_v11  ;;  %v2994_v19 = vld [vmem:[%s10108_s7 + $0xee8] sm:$0xff]  ;;  %v7453_v20 = vcombine.low %v2946_v12, %v2962_v14  ;;  %v2596_v39 = vld [vmem:[%s10108_s7 + $0x278] sm:$0xff] }
 0x4ba   :  { %v6629_v52 = vadd.f32 %v6520_v22, %v6429_v32  ;;  %v6624_v54 = vadd.f32 %v6500_v23, %v6424_v35  ;;  %v5956_v28 = vpop.f32.mrb[23].mxu0  ;;  %v7486_v21 = vcombine.high %v2978_v18, %v2994_v19  ;;  %v3010_v11 = vld [vmem:[%s10108_s7 + $0xf68] sm:$0xff]  ;;  %v7485_v22 = vcombine.low %v2978_v18, %v2994_v19  ;;  %v2612_v40 = vld [vmem:[%s10108_s7 + $0x2f8] sm:$0xff] }
 0x4bb   :  { %6655 = vst [vmem:[%s10111_s10 + $0x50] sm:$0xff] %v6623_v41  ;;  %v6630_v57 = vadd.f32 %v6524_v31, %v6430_v44  ;;  %v7518_v23 = vcombine.high %v3010_v11, %v3026_v13  ;;  %v7517_v25 = vcombine.low %v3010_v11, %v3026_v13  ;;  %v2580_v31 = vld [vmem:[%s10108_s7 + $0x1f8] sm:$0xff]  ;;  %v7041_v32 = vcombine.low %v2532_v42, %v2548_v24 }
 0x4bc   :  { %6661 = vst [vmem:[%s10111_s10 + $0x80] sm:$0xff] %v6629_v52  ;;  %6656 = vst [vmem:[%s10111_s10 + $0x58] sm:$0xff] %v6624_v54  ;;  %6135 = vmatpush1.bf16.msra.mxu1 %v7229_v45  ;;  %v7074_v35 = vcombine.high %v2564_v30, %v2580_v31  ;;  %v7073_v45 = vcombine.low %v2564_v30, %v2580_v31  ;;  %v7106_v41 = vcombine.high %v2596_v39, %v2612_v40  ;;  %v2628_v44 = vld [vmem:[%s10108_s7 + $0x378] sm:$0xff] }
 0x4bd   :  { %6662 = vst [vmem:[%s10111_s10 + $0x88] sm:$0xff] %v6630_v57  ;;  %6136 = vmatprep.subr.bf16.mxu1 %v7262_v49  ;;  %v2644_v47 = vld [vmem:[%s10108_s7 + $0x3f8] sm:$0xff]  ;;  %v7105_v48 = vcombine.low %v2596_v39, %v2612_v40 }
 0x4be   :  { %v7138_v49 = vcombine.high %v2628_v44, %v2644_v47  ;;  %v2660_v52 = vld [vmem:[%s10108_s7 + $0x478] sm:$0xff]  ;;  %v7137_v54 = vcombine.low %v2628_v44, %v2644_v47 }
 0x4bf   :  { %v2788_v30 = vld [vmem:[%s10108_s7 + $0x878] sm:$0xff] }
 0x4c0   :  { %6137 = vmatpush1.bf16.msra.mxu1 %v7261_v58  ;;  %v7202_v58 = vcombine.high %v2692_v55, %v2708_v56  ;;  %v2804_v31 = vld [vmem:[%s10108_s7 + $0x8f8] sm:$0xff] }
 0x4c1   :  { %6138 = vmatprep.subr.bf16.mxu1 %v7294_v59  ;;  %v2724_v59 = vld [vmem:[%s10108_s7 + $0x678] sm:$0xff]  ;;  %v7298_v39 = vcombine.high %v2788_v30, %v2804_v31 }
 0x4c2   :  { %v7234_v4 = vcombine.high %v2724_v59, %v2740_v60  ;;  %v2820_v40 = vld [vmem:[%s10108_s7 + $0x978] sm:$0xff] }
 0x4c3   :  { %v2852_v47 = vld [vmem:[%s10108_s7 + $0xa78] sm:$0xff] }
 0x4c4   :  { %6139 = vmatpush1.bf16.msra.mxu1 %v7293_v62  ;;  %v6312_v62 = vrot.slane %v8045_v61, %v9582_v36  ;;  %v2916_v56 = vld [vmem:[%s10108_s7 + $0xc78] sm:$0xff] }
 0x4c5   :  { %6140 = vmatprep.subr.bf16.mxu1 %v7326_v63  ;;  %v6336_v63 = vrot.slane %v9783_v9, %v9108_v46  ;;  %v2964_v61 = vld [vmem:[%s10108_s7 + $0xdf8] sm:$0xff] }
 0x4c8   :  { %6141 = vmatpush1.bf16.msra.mxu1 %v7325_v2  ;;  %v8046_v2 = vld [vmem:[%s10110_s9 + $0x8] sm:$0xff] }
 0x4c9   :  { %6142 = vmatprep.subr.bf16.mxu1 %v7358_v50  ;;  %v6512_v50 = vrot.slane %v8046_v2, %v9582_v36  ;;  %v6516_v7 = vrot.slane %v8046_v2, %v9591_v43 }
 0x4cc   :  { %6143 = vmatpush1.bf16.msra.mxu1 %v7357_v5 }
 0x4cd   :  { %6144 = vmatprep.subr.bf16.mxu1 %v7390_v6  ;;  %v6536_v6 = vrot.slane %v9796_v16, %v9108_v46 }
 0x4d0   :  { %6145 = vmatpush1.bf16.msra.mxu1 %v7389_v8  ;;  %v2772_v8 = vld [vmem:[%s10108_s7 + $0x7f8] sm:$0xff] }
 0x4d1   :  { %6146 = vmatprep.subr.bf16.mxu1 %v7422_v10  ;;  %v7266_v42 = vcombine.high %v2756_v53, %v2772_v8 }
 0x4d4   :  { %6147 = vmatpush1.bf16.msra.mxu1 %v7421_v15  ;;  %v6540_v15 = vrot.slane %v9796_v16, %v9122_v51 }
 0x4d5   :  { %6148 = vmatprep.subr.bf16.mxu1 %v7454_v17 }
 0x4d8   :  { %6149 = vmatpush1.bf16.msra.mxu1 %v7453_v20 }
 0x4d9   :  { %6150 = vmatprep.subr.bf16.mxu1 %v7486_v21  ;;  %v7233_v21 = vcombine.low %v2724_v59, %v2740_v60  ;;  %v2948_v60 = vld [vmem:[%s10108_s7 + $0xd78] sm:$0xff] }
 0x4da   :  { %v7457_v2 = vcombine.low %v2948_v60, %v2964_v61 }
 0x4dc   :  { %6151 = vmatpush1.bf16.msra.mxu1 %v7485_v22 }
 0x4dd   :  { %6152 = vmatprep.subr.bf16.mxu1 %v7518_v23 }
 0x4e0   :  { %6153 = vmatpush1.bf16.msra.mxu1 %v7517_v25 }
 0x4e1   :  { %6204 = vmatprep.subr.bf16.mxu1 %v7042_v29 }
 0x4e3   :  { %6155 = vmatmul.mubr.bf16.vlgmr.msra.gmra.mrb[32].mxu1 %v8469_v27 }
 0x4e4   :  { %6205 = vmatpush1.bf16.msra.mxu1 %v7041_v32  ;;  %6236 = vmatprep.mubr.bf16.mxu1 %v8467_v26  ;;  %v2676_v26 = vld [vmem:[%s10108_s7 + $0x4f8] sm:$0xff] }
 0x4e5   :  { %6206 = vmatprep.subr.bf16.mxu1 %v7074_v35  ;;  %v7170_v28 = vcombine.high %v2660_v52, %v2676_v26  ;;  %v7169_v57 = vcombine.low %v2660_v52, %v2676_v26  ;;  %v7265_v35 = vcombine.low %v2756_v53, %v2772_v8  ;;  %v2884_v26 = vld [vmem:[%s10108_s7 + $0xb78] sm:$0xff]  ;;  %v6328_v8 = vrot.slane %v9783_v9, %v8294_v34 }
 0x4e6   :  { %v10010_v53 = vld [vmem:[%s10109_s8 + $0x18] sm:$0xff] }
 0x4e8   :  { %6207 = vmatpush1.bf16.msra.mxu1 %v7073_v45  ;;  %v2836_v45 = vld [vmem:[%s10108_s7 + $0x9f8] sm:$0xff] }
 0x4e9   :  { %6208 = vmatprep.subr.bf16.mxu1 %v7106_v41  ;;  %v7297_v41 = vcombine.low %v2788_v30, %v2804_v31  ;;  %v7330_v44 = vcombine.high %v2820_v40, %v2836_v45 }
 0x4ec   :  { %6209 = vmatpush1.bf16.msra.mxu1 %v7105_v48  ;;  %v2868_v48 = vld [vmem:[%s10108_s7 + $0xaf8] sm:$0xff] }
 0x4ed   :  { %6210 = vmatprep.subr.bf16.mxu1 %v7138_v49  ;;  %v7329_v49 = vcombine.low %v2820_v40, %v2836_v45  ;;  %v7362_v52 = vcombine.high %v2852_v47, %v2868_v48  ;;  %v6368_v40 = vrot.slane %v10010_v53, %v9108_v46  ;;  %v6348_v45 = vrot.slane %v9783_v9, %v9591_v43 }
 0x4f0   :  { %6211 = vmatpush1.bf16.msra.mxu1 %v7137_v54  ;;  %v2900_v54 = vld [vmem:[%s10108_s7 + $0xbf8] sm:$0xff] }
 0x4f1   :  { %6212 = vmatprep.subr.bf16.mxu1 %v7170_v28  ;;  %v7361_v28 = vcombine.low %v2852_v47, %v2868_v48  ;;  %v7394_v55 = vcombine.high %v2884_v26, %v2900_v54 }
 0x4f4   :  { %6213 = vmatpush1.bf16.msra.mxu1 %v7169_v57  ;;  %v2932_v57 = vld [vmem:[%s10108_s7 + $0xcf8] sm:$0xff] }
 0x4f5   :  { %6214 = vmatprep.subr.bf16.mxu1 %v7202_v58  ;;  %v7393_v58 = vcombine.low %v2884_v26, %v2900_v54  ;;  %v7426_v59 = vcombine.high %v2916_v56, %v2932_v57 }
 0x4f6   :  { %v5910_v5 = vpop.f32.mrb[20].mxu1 }
 0x4f7   :  { %v6427_v10 = vmul.f32 %v6312_v62, %v5910_v5  ;;  %v6033_v12 = vpop.f32.mrb[24].mxu0  ;;  %v5912_v14 = vpop.f32.mrb[21].mxu1  ;;  %v7425_v62 = vcombine.low %v2916_v56, %v2932_v57 }
 0x4f8   :  { %v6433_v17 = vmul.f32 %v6336_v63, %v6033_v12  ;;  %v6428_v18 = vmul.f32 %v6316_v0, %v5912_v14  ;;  %v6035_v19 = vpop.f32.mrb[25].mxu0  ;;  %v5914_v20 = vpop.f32.mrb[22].mxu1  ;;  %6215 = vmatpush1.bf16.msra.mxu1 %v7201_v1  ;;  %v7458_v63 = vcombine.high %v2948_v60, %v2964_v61  ;;  %v2980_v0 = vld [vmem:[%s10108_s7 + $0xe78] sm:$0xff]  ;;  %v6352_v12 = vrot.slane %v10010_v53, %v8291_v33 }
 0x4f9   :  { %v6627_v11 = vadd.f32 %v6512_v50, %v6427_v10  ;;  %v6434_v13 = vmul.f32 %v6340_v3, %v6035_v19  ;;  %v6037_v22 = vpop.f32.mrb[26].mxu0  ;;  %v5915_v23 = vpop.f32.mrb[23].mxu1  ;;  %6216 = vmatprep.subr.bf16.mxu1 %v7234_v4  ;;  %v2996_v1 = vld [vmem:[%s10108_s7 + $0xef8] sm:$0xff]  ;;  %v6332_v14 = vrot.slane %v9783_v9, %v8303_v38  ;;  %v6532_v19 = vrot.slane %v9796_v16, %v8303_v38 }
 0x4fa   :  { %v6633_v24 = vadd.f32 %v6536_v6, %v6433_v17  ;;  %v6628_v25 = vadd.f32 %v6516_v7, %v6428_v18  ;;  %v6038_v29 = vpop.f32.mrb[27].mxu0  ;;  %v7490_v50 = vcombine.high %v2980_v0, %v2996_v1  ;;  %v3012_v3 = vld [vmem:[%s10108_s7 + $0xf78] sm:$0xff]  ;;  %v7489_v5 = vcombine.low %v2980_v0, %v2996_v1 }
 0x4fb   :  { %6659 = vst [vmem:[%s10111_s10 + $0x70] sm:$0xff] %v6627_v11  ;;  %v6634_v32 = vadd.f32 %v6540_v15, %v6434_v13  ;;  %v3028_v4 = vld [vmem:[%s10108_s7 + $0xff8] sm:$0xff]  ;;  %v6356_v15 = vrot.slane %v10010_v53, %v8300_v37  ;;  %v6364_v0 = vrot.slane %v10010_v53, %v8303_v38 }
 0x4fc   :  { %6665 = vst [vmem:[%s10111_s10 + $0xa0] sm:$0xff] %v6633_v24  ;;  %6660 = vst [vmem:[%s10111_s10 + $0x78] sm:$0xff] %v6628_v25  ;;  %6217 = vmatpush1.bf16.msra.mxu1 %v7233_v21  ;;  %v7522_v6 = vcombine.high %v3012_v3, %v3028_v4  ;;  %v7521_v7 = vcombine.low %v3012_v3, %v3028_v4  ;;  %v10017_v10 = vld [vmem:[%s10110_s9 + $0x18] sm:$0xff] }
 0x4fd   :  { %6666 = vst [vmem:[%s10111_s10 + $0xa8] sm:$0xff] %v6634_v32  ;;  %6218 = vmatprep.subr.bf16.mxu1 %v7266_v42  ;;  %v6552_v18 = vrot.slane %v10017_v10, %v8291_v33  ;;  %v6556_v13 = vrot.slane %v10017_v10, %v8300_v37  ;;  %v6344_v37 = vrot.slane %v9783_v9, %v9582_v36 }
 0x4fe   :  { %v6568_v48 = vrot.slane %v10017_v10, %v9108_v46  ;;  %v6560_v1 = vrot.slane %v10017_v10, %v8294_v34 }
 0x500   :  { %6219 = vmatpush1.bf16.msra.mxu1 %v7265_v35 }
 0x501   :  { %6220 = vmatprep.subr.bf16.mxu1 %v7298_v39 }
 0x504   :  { %6221 = vmatpush1.bf16.msra.mxu1 %v7297_v41  ;;  %v6544_v41 = vrot.slane %v9796_v16, %v9582_v36 }
 0x505   :  { %6222 = vmatprep.subr.bf16.mxu1 %v7330_v44  ;;  %v6372_v44 = vrot.slane %v10010_v53, %v9122_v51 }
 0x508   :  { %6223 = vmatpush1.bf16.msra.mxu1 %v7329_v49  ;;  %v6548_v49 = vrot.slane %v9796_v16, %v9591_v43 }
 0x509   :  { %6224 = vmatprep.subr.bf16.mxu1 %v7362_v52 }
 0x50c   :  { %6225 = vmatpush1.bf16.msra.mxu1 %v7361_v28  ;;  %v6572_v28 = vrot.slane %v10017_v10, %v9122_v51  ;;  %v6360_v51 = vrot.slane %v10010_v53, %v8294_v34 }
 0x50d   :  { %6226 = vmatprep.subr.bf16.mxu1 %v7394_v55 }
 0x510   :  { %6227 = vmatpush1.bf16.msra.mxu1 %v7393_v58 }
 0x511   :  { %6228 = vmatprep.subr.bf16.mxu1 %v7426_v59 }
 0x514   :  { %6229 = vmatpush1.bf16.msra.mxu1 %v7425_v62 }
 0x515   :  { %6230 = vmatprep.subr.bf16.mxu1 %v7458_v63 }
 0x518   :  { %6231 = vmatpush1.bf16.msra.mxu1 %v7457_v2 }
 0x519   :  { %6232 = vmatprep.subr.bf16.mxu1 %v7490_v50  ;;  %v6564_v50 = vrot.slane %v10017_v10, %v8303_v38  ;;  %v6380_v38 = vrot.slane %v10010_v53, %v9591_v43 }
 0x51c   :  { %6233 = vmatpush1.bf16.msra.mxu1 %v7489_v5 }
 0x51d   :  { %6234 = vmatprep.subr.bf16.mxu1 %v7522_v6 }
 0x520   :  { %6235 = vmatpush1.bf16.msra.mxu1 %v7521_v7 }
 0x523   :  { %6237 = vmatmul.mubr.bf16.vlgmr.msra.gmra.mrb[36].mxu1 %v8469_v27  ;;  %v6528_v27 = vrot.slane %v9796_v16, %v8294_v34  ;;  %v6376_v34 = vrot.slane %v10010_v53, %v9582_v36 }
 0x536   :  { %v5992_v17 = vpop.f32.mrb[24].mxu1 }
 0x537   :  { %v6431_v20 = vmul.f32 %v6328_v8, %v5992_v17  ;;  %v6115_v21 = vpop.f32.mrb[28].mxu0  ;;  %v5994_v11 = vpop.f32.mrb[25].mxu1 }
 0x538   :  { %v6437_v22 = vmul.f32 %v6352_v12, %v6115_v21  ;;  %v6432_v23 = vmul.f32 %v6332_v14, %v5994_v11  ;;  %v6117_v42 = vpop.f32.mrb[29].mxu0  ;;  %v5996_v24 = vpop.f32.mrb[26].mxu1  ;;  %v6576_v14 = vrot.slane %v10017_v10, %v9582_v36 }
 0x539   :  { %v6631_v25 = vadd.f32 %v6528_v27, %v6431_v20  ;;  %v6438_v29 = vmul.f32 %v6356_v15, %v6117_v42  ;;  %v6119_v30 = vpop.f32.mrb[30].mxu0  ;;  %v5997_v31 = vpop.f32.mrb[27].mxu1  ;;  %v6580_v15 = vrot.slane %v10017_v10, %v9591_v43 }
 0x53a   :  { %v6637_v32 = vadd.f32 %v6552_v18, %v6437_v22  ;;  %v6632_v35 = vadd.f32 %v6532_v19, %v6432_v23  ;;  %v6120_v33 = vpop.f32.mrb[31].mxu0 }
 0x53b   :  { %6663 = vst [vmem:[%s10111_s10 + $0x90] sm:$0xff] %v6631_v25  ;;  %v6638_v39 = vadd.f32 %v6556_v13, %v6438_v29 }
 0x53c   :  { %6669 = vst [vmem:[%s10111_s10 + $0xc0] sm:$0xff] %v6637_v32  ;;  %6664 = vst [vmem:[%s10111_s10 + $0x98] sm:$0xff] %v6632_v35 }
 0x53d   :  { %6670 = vst [vmem:[%s10111_s10 + $0xc8] sm:$0xff] %v6638_v39 }
 0x576   :  { %v6074_v47 = vpop.f32.mrb[28].mxu1 }
 0x577   :  { %v6435_v52 = vmul.f32 %v6344_v37, %v6074_v47  ;;  %v6197_v26 = vpop.f32.mrb[32].mxu0  ;;  %v6076_v54 = vpop.f32.mrb[29].mxu1 }
 0x578   :  { %v6441_v9 = vmul.f32 %v6368_v40, %v6197_v26  ;;  %v6436_v55 = vmul.f32 %v6348_v45, %v6076_v54  ;;  %v6199_v56 = vpop.f32.mrb[33].mxu0  ;;  %v6078_v57 = vpop.f32.mrb[30].mxu1 }
 0x579   :  { %v6635_v58 = vadd.f32 %v6544_v41, %v6435_v52  ;;  %v6442_v59 = vmul.f32 %v6372_v44, %v6199_v56  ;;  %v6201_v60 = vpop.f32.mrb[34].mxu0  ;;  %v6079_v61 = vpop.f32.mrb[31].mxu1 }
 0x57a   :  { %v6641_v62 = vadd.f32 %v6568_v48, %v6441_v9  ;;  %v6636_v63 = vadd.f32 %v6548_v49, %v6436_v55  ;;  %v6202_v46 = vpop.f32.mrb[35].mxu0 }
 0x57b   :  { %6667 = vst [vmem:[%s10111_s10 + $0xb0] sm:$0xff] %v6635_v58  ;;  %v6642_v16 = vadd.f32 %v6572_v28, %v6442_v59 }
 0x57c   :  { %6673 = vst [vmem:[%s10111_s10 + $0xe0] sm:$0xff] %v6641_v62  ;;  %6668 = vst [vmem:[%s10111_s10 + $0xb8] sm:$0xff] %v6636_v63 }
 0x57d   :  { %6674 = vst [vmem:[%s10111_s10 + $0xe8] sm:$0xff] %v6642_v16 }
 0x5b6   :  { %v6156_v2 = vpop.f32.mrb[32].mxu1 }
 0x5b7   :  { %v6439_v3 = vmul.f32 %v6360_v51, %v6156_v2  ;;  %v6158_v4 = vpop.f32.mrb[33].mxu1 }
 0x5b8   :  { %v6440_v5 = vmul.f32 %v6364_v0, %v6158_v4  ;;  %v6160_v6 = vpop.f32.mrb[34].mxu1 }
 0x5b9   :  { %v6639_v7 = vadd.f32 %v6560_v1, %v6439_v3  ;;  %v6161_v8 = vpop.f32.mrb[35].mxu1 }
 0x5ba   :  { %v6640_v12 = vadd.f32 %v6564_v50, %v6440_v5 }
 0x5bb   :  { %6671 = vst [vmem:[%s10111_s10 + $0xd0] sm:$0xff] %v6639_v7 }
 0x5bc   :  { %6672 = vst [vmem:[%s10111_s10 + $0xd8] sm:$0xff] %v6640_v12 }
 0x5f6   :  { %v6238_v27 = vpop.f32.mrb[36].mxu1 }
 0x5f7   :  { %v6443_v17 = vmul.f32 %v6376_v34, %v6238_v27  ;;  %v6240_v18 = vpop.f32.mrb[37].mxu1 }
 0x5f8   :  { %v6444_v19 = vmul.f32 %v6380_v38, %v6240_v18  ;;  %v6242_v20 = vpop.f32.mrb[38].mxu1 }
 0x5f9   :  { %v6643_v21 = vadd.f32 %v6576_v14, %v6443_v17  ;;  %v6243_v11 = vpop.f32.mrb[39].mxu1 }
 0x5fa   :  { %v6644_v13 = vadd.f32 %v6580_v15, %v6444_v19 }
 0x5fb   :  { %6675 = vst [vmem:[%s10111_s10 + $0xf0] sm:$0xff] %v6643_v21 }
 0x5fc   :  { %6676 = vst [vmem:[%s10111_s10 + $0xf8] sm:$0xff] %v6644_v13 }
 0x5fd   :  { %6681 = vsyncpa [#allocation3], 1 }
 0x5fe   :  { %6682 = vsyncpa [#allocation5], 1 }

</bundles_post_ra>
